<compile_context>
chip_gen: v6e
topology: v6e:2x2x1
jax: 0.10.0
libtpu: 0.0.40
codegen_flags: <defaults>
</compile_context>

<pallas_src>
import numpy as np
import jax
import jax.numpy as jnp
from jax import lax
from jax.experimental import pallas as pl
from jax.experimental.pallas import tpu as pltpu

EPS = 1e-5


# --------------------------------------------------------------------------
# Pallas kernel: full forward for a block of B samples (slab-batched).
# --------------------------------------------------------------------------
def _model_kernel(x_ref,
                  w0_ref, t0_ref, w1_ref, t1_ref, w2_ref, t2_ref,
                  wf0_ref, bf0_ref, wf1_ref, bf1_ref,
                  out_ref,
                  y0_s, y1_s, y2_s):
    f32 = jnp.float32
    bf16 = jnp.bfloat16

    B = x_ref.shape[0]
    L = x_ref.shape[1]                 # 144
    S0 = B * L                         # input slab rows
    L0 = S0 - 3                        # conv0 output rows
    Q0 = (L0 - 4) // 4 + 1             # pooled0 rows (36B - 1)
    L1 = Q0 - 3                        # conv1 output rows
    Q1 = (L1 - 4) // 4 + 1             # pooled1 rows (9B - 1)
    L2 = Q1 - 2                        # conv2 output rows (9B - 3)

    # ---- conv0 (packed 4 taps, BN scale pre-folded) + shift + ReLU -----------
    slab = x_ref[...].reshape(S0, 128)                         # bf16, free merge
    z = jnp.dot(slab, w0_ref[...], preferred_element_type=f32)  # (S0, 128)
    y0 = (z[0:L0, 0:32] + z[1:L0 + 1, 32:64]
          + z[2:L0 + 2, 64:96] + z[3:L0 + 3, 96:128])
    y0 = jnp.maximum(y0 + t0_ref[...], 0.0)                    # (L0, 32) f32
    y0_s[...] = y0

    # ---- MaxPool1d(4, 4): strided sublane loads + elementwise max (VPU) ------
    p0 = jnp.maximum(
        jnp.maximum(y0_s[pl.ds(0, Q0, stride=4)], y0_s[pl.ds(1, Q0, stride=4)]),
        jnp.maximum(y0_s[pl.ds(2, Q0, stride=4)], y0_s[pl.ds(3, Q0, stride=4)]))
    p0 = p0.astype(bf16)                                       # (Q0, 32)

    # ---- conv1 (packed 4 taps) + shift + ReLU --------------------------------
    z = jnp.dot(p0, w1_ref[...], preferred_element_type=f32)    # (Q0, 128)
    y1 = (z[0:L1, 0:32] + z[1:L1 + 1, 32:64]
          + z[2:L1 + 2, 64:96] + z[3:L1 + 3, 96:128])
    y1 = jnp.maximum(y1 + t1_ref[...], 0.0)                    # (L1, 32) f32
    y1_s[...] = y1

    # ---- MaxPool1d(4, 4) -----------------------------------------------------
    p1 = jnp.maximum(
        jnp.maximum(y1_s[pl.ds(0, Q1, stride=4)], y1_s[pl.ds(1, Q1, stride=4)]),
        jnp.maximum(y1_s[pl.ds(2, Q1, stride=4)], y1_s[pl.ds(3, Q1, stride=4)]))
    p1 = p1.astype(bf16)                                       # (Q1, 32)

    # ---- conv2 (packed 3 taps) + shift + ReLU --------------------------------
    z = jnp.dot(p1, w2_ref[...], preferred_element_type=f32)    # (Q1, 192)
    y2 = z[0:L2, 0:64] + z[1:L2 + 1, 64:128] + z[2:L2 + 2, 128:192]
    y2 = jnp.maximum(y2 + t2_ref[...], 0.0)                    # (L2, 64) f32
    y2_s[...] = y2

    # ---- AvgPool(3,3) / MaxPool(3,3) + feature slots (strided loads) ---------
    # Per sample b the 6 valid conv2 rows sit at 9b..9b+5 in the slab.
    r0 = y2_s[pl.ds(0, B, stride=9)]
    r1 = y2_s[pl.ds(1, B, stride=9)]
    r2 = y2_s[pl.ds(2, B, stride=9)]
    r3 = y2_s[pl.ds(3, B, stride=9)]
    r4 = y2_s[pl.ds(4, B, stride=9)]
    r5 = y2_s[pl.ds(5, B, stride=9)]
    a0 = (r0 + r1 + r2).astype(bf16)     # avg slot 0 (1/3 folded into wf0[0])
    a1 = (r3 + r4 + r5).astype(bf16)     # avg slot 1 (1/3 folded into wf0[1])
    m0 = jnp.maximum(jnp.maximum(r0, r1), r2).astype(bf16)     # max slot 0
    m1 = jnp.maximum(jnp.maximum(r3, r4), r5).astype(bf16)     # max slot 1

    # ---- fc0 as four partial matmuls (no feature scratch), fc1, log_softmax --
    h = (jnp.dot(a0, wf0_ref[0], preferred_element_type=f32)
         + jnp.dot(a1, wf0_ref[1], preferred_element_type=f32)
         + jnp.dot(m0, wf0_ref[2], preferred_element_type=f32)
         + jnp.dot(m1, wf0_ref[3], preferred_element_type=f32)
         + bf0_ref[...])                                        # (B, 64) f32
    logits = jnp.dot(h.astype(bf16), wf1_ref[...],
                     preferred_element_type=f32) + bf1_ref[...]  # (B, 128) f32
    mx = jnp.max(logits, axis=-1, keepdims=True)
    zc = logits - mx
    lse = jnp.log(jnp.sum(jnp.exp(zc), axis=-1, keepdims=True))
    out_ref[...] = (zc - lse).astype(out_ref.dtype)


# --------------------------------------------------------------------------
# Wrapper: pallas_call with batch-blocked grid (block_b multiple of 8).
# --------------------------------------------------------------------------
def pallas_forward(x_nlc, kparams, block_b=8):
    N, L, C = x_nlc.shape
    assert L == 144 and C == 128, "model expects (N, 144, 128) channels-last"
    assert block_b % 8 == 0, "output block needs >=8 sublanes"

    n_blocks = pl.cdiv(N, block_b)
    n_pad = n_blocks * block_b
    if n_pad != N:
        x_nlc = jnp.pad(x_nlc, ((0, n_pad - N), (0, 0), (0, 0)))
    x_bf = x_nlc.astype(jnp.bfloat16)

    B = block_b
    L0 = B * L - 3
    Q0 = (L0 - 4) // 4 + 1
    L1 = Q0 - 3
    Q1 = (L1 - 4) // 4 + 1
    L2 = Q1 - 2

    def const_spec(arr):
        nd = arr.ndim
        return pl.BlockSpec(arr.shape, lambda i, nd=nd: (0,) * nd)

    in_specs = [pl.BlockSpec((B, L, C), lambda i: (i, 0, 0))]
    in_specs += [const_spec(p) for p in kparams]

    out = pl.pallas_call(
        _model_kernel,
        out_shape=jax.ShapeDtypeStruct((n_pad, 128), jnp.float32),
        grid_spec=pltpu.PrefetchScalarGridSpec(
            num_scalar_prefetch=0,
            grid=(n_blocks,),
            in_specs=in_specs,
            out_specs=pl.BlockSpec((B, 128), lambda i: (i, 0)),
            scratch_shapes=[
                pltpu.VMEM((L0, 32), jnp.float32),   # conv0 activations
                pltpu.VMEM((L1, 32), jnp.float32),   # conv1 activations
                pltpu.VMEM((L2, 64), jnp.float32),   # conv2 activations
            ],
        ),
        compiler_params=pltpu.CompilerParams(
            dimension_semantics=("parallel",)),
    )(x_bf, *kparams)
    return out[:N, :10]


# --------------------------------------------------------------------------
# Deterministic parameter initialization (shapes from model_1DCNN_3.__init__).
# --------------------------------------------------------------------------
def init_params(key):
    ks = jax.random.split(key, 22)

    def u(k, shape, bound):
        return jax.random.uniform(k, shape, jnp.float32, -bound, bound)

    P = {}
    b = 1.0 / np.sqrt(128 * 4)
    P['w0'] = u(ks[0], (32, 128, 4), b); P['b0'] = u(ks[1], (32,), b)
    P['g0'] = jax.random.uniform(ks[2], (32,), jnp.float32, 0.8, 1.2)
    P['be0'] = u(ks[3], (32,), 0.1)
    P['m0'] = 0.1 * jax.random.normal(ks[4], (32,), jnp.float32)
    P['v0'] = jax.random.uniform(ks[5], (32,), jnp.float32, 0.5, 1.5)
    b = 1.0 / np.sqrt(32 * 4)
    P['w1'] = u(ks[6], (32, 32, 4), b); P['b1'] = u(ks[7], (32,), b)
    P['g1'] = jax.random.uniform(ks[8], (32,), jnp.float32, 0.8, 1.2)
    P['be1'] = u(ks[9], (32,), 0.1)
    P['m1'] = 0.1 * jax.random.normal(ks[10], (32,), jnp.float32)
    P['v1'] = jax.random.uniform(ks[11], (32,), jnp.float32, 0.5, 1.5)
    b = 1.0 / np.sqrt(32 * 3)
    P['w2'] = u(ks[12], (64, 32, 3), b); P['b2'] = u(ks[13], (64,), b)
    P['g2'] = jax.random.uniform(ks[14], (64,), jnp.float32, 0.8, 1.2)
    P['be2'] = u(ks[15], (64,), 0.1)
    P['m2'] = 0.1 * jax.random.normal(ks[16], (64,), jnp.float32)
    P['v2'] = jax.random.uniform(ks[17], (64,), jnp.float32, 0.5, 1.5)
    b = 1.0 / np.sqrt(256)
    P['wfc0'] = u(ks[18], (64, 256), b); P['bfc0'] = u(ks[19], (64,), b)
    b = 1.0 / np.sqrt(64)
    P['wfc1'] = u(ks[20], (10, 64), b); P['bfc1'] = u(ks[21], (10,), b)
    return P


def make_kernel_params(P):
    bf16 = jnp.bfloat16

    def fold(bias, g, be, m, v):
        scale = g / jnp.sqrt(v + EPS)
        shift = (bias - m) * scale + be
        return scale, shift.reshape(1, -1).astype(jnp.float32)

    s0, t0 = fold(P['b0'], P['g0'], P['be0'], P['m0'], P['v0'])
    s1, t1 = fold(P['b1'], P['g1'], P['be1'], P['m1'], P['v1'])
    s2, t2 = fold(P['b2'], P['g2'], P['be2'], P['m2'], P['v2'])

    def pack_conv(w, scale):
        # w: (C_out, C_in, K) torch layout; BN scale folded per out-channel.
        # Packed: (C_in, K*C_out) with columns [k*C_out:(k+1)*C_out] = W_k^T.
        wk = jnp.transpose(w * scale[:, None, None], (2, 1, 0))   # (K, Ci, Co)
        return jnp.concatenate([wk[k] for k in range(wk.shape[0])],
                               axis=1).astype(bf16)

    w0p = pack_conv(P['w0'], s0)          # (128, 128)
    w1p = pack_conv(P['w1'], s1)          # (32, 128)
    w2p = pack_conv(P['w2'], s2)          # (32, 192)

    # fc0 split into the 4 concat slots (avg0, avg1, max0, max1); flattened
    # PyTorch index = channel*4 + slot.  1/3 avg factor folded into slots 0,1.
    wfc0 = P['wfc0']                      # (64, 256)
    slots = []
    for s in range(4):
        ws = wfc0[:, s::4].T              # (64_chan, 64_out)
        if s < 2:
            ws = ws / 3.0
        slots.append(ws)
    wf0 = jnp.stack(slots, axis=0).astype(bf16)      # (4, 64, 64)
    bf0 = P['bfc0'].reshape(1, 64).astype(jnp.float32)

    # fc1 padded to 128 output lanes; pad bias = -1e9 masks the fake classes
    # (kept in f32 on purpose).
    wf1p = jnp.zeros((64, 128), jnp.float32).at[:, :10].set(P['wfc1'].T).astype(bf16)
    bf1p = jnp.full((1, 128), -1e9, jnp.float32).at[0, :10].set(P['bfc1'])

    return [w0p, t0, w1p, t1, w2p, t2, wf0, bf0, wf1p, bf1p]


# --------------------------------------------------------------------------
# Pure-JAX reference (NCL, mirrors PyTorch eval-mode semantics, f32).
# --------------------------------------------------------------------------
def ref_forward(x, P):
    def conv1d(x, w, b):
        y = lax.conv_general_dilated(x, w, (1,), 'VALID',
                                     dimension_numbers=('NCH', 'OIH', 'NCH'))
        return y + b[None, :, None]

    def bn(x, g, be, m, v):
        return (x - m[None, :, None]) / jnp.sqrt(v[None, :, None] + EPS) \
            * g[None, :, None] + be[None, :, None]

    def maxpool(x, k):
        N, C, L = x.shape
        Lo = (L - k) // k + 1
        return jnp.max(x[:, :, :Lo * k].reshape(N, C, Lo, k), axis=-1)

    def avgpool(x, k):
        N, C, L = x.shape
        Lo = (L - k) // k + 1
        return jnp.mean(x[:, :, :Lo * k].reshape(N, C, Lo, k), axis=-1)

    out = jax.nn.relu(bn(conv1d(x, P['w0'], P['b0']),
                         P['g0'], P['be0'], P['m0'], P['v0']))
    out = maxpool(out, 4)
    out = jax.nn.relu(bn(conv1d(out, P['w1'], P['b1']),
                         P['g1'], P['be1'], P['m1'], P['v1']))
    out = maxpool(out, 4)
    out = jax.nn.relu(bn(conv1d(out, P['w2'], P['b2']),
                         P['g2'], P['be2'], P['m2'], P['v2']))
    o1 = avgpool(out, 3)
    o2 = maxpool(out, 3)
    out = jnp.concatenate([o1, o2], axis=2)           # (N, 64, 4)
    out = out.reshape(x.shape[0], -1)                 # (N, 256)
    out = out @ P['wfc0'].T + P['bfc0']
    out = out @ P['wfc1'].T + P['bfc1']
    return jax.nn.log_softmax(out, axis=1)


if __name__ == "__main__":
    key = jax.random.PRNGKey(0)
    kx, kp = jax.random.split(key)

    # Input: (N, C, L) = (8, 128, 144) — L=144 makes the flattened feature dim 256
    x = jax.random.normal(kx, (8, 128, 144), jnp.float32)
    P = init_params(kp)
    kparams = make_kernel_params(P)

    x_nlc = jnp.transpose(x, (0, 2, 1))               # kernel layout (N, L, C)
    out = pallas_forward(x_nlc, kparams, block_b=8)   # grid = (1,)
    out = jax.block_until_ready(out)

    ref = ref_forward(x, P)
    np.testing.assert_allclose(np.asarray(out), np.asarray(ref),
                               atol=2.5e-2, rtol=2.5e-2)
    assert out.shape == (8, 10)
    print("KERNEL_OK")
</pallas_src>

<mosaic_0001>
module attributes {stable_mosaic.version = 11 : i64} {
  func.func @_model_kernel(%arg0: i32, %arg1: memref<8x144x128xbf16, #tpu.memory_space<vmem>>, %arg2: memref<128x128xbf16, #tpu.memory_space<vmem>>, %arg3: memref<1x32xf32, #tpu.memory_space<vmem>>, %arg4: memref<32x128xbf16, #tpu.memory_space<vmem>>, %arg5: memref<1x32xf32, #tpu.memory_space<vmem>>, %arg6: memref<32x192xbf16, #tpu.memory_space<vmem>>, %arg7: memref<1x64xf32, #tpu.memory_space<vmem>>, %arg8: memref<4x64x64xbf16, #tpu.memory_space<vmem>>, %arg9: memref<1x64xf32, #tpu.memory_space<vmem>>, %arg10: memref<64x128xbf16, #tpu.memory_space<vmem>>, %arg11: memref<1x128xf32, #tpu.memory_space<vmem>>, %arg12: memref<8x128xf32, #tpu.memory_space<vmem>>, %arg13: memref<1149x32xf32, #tpu.memory_space<vmem>>, %arg14: memref<284x32xf32, #tpu.memory_space<vmem>>, %arg15: memref<69x64xf32, #tpu.memory_space<vmem>>) attributes {dimension_semantics = [#tpu.dimension_semantics<parallel>], iteration_bounds = array<i64: 1>, scalar_prefetch = 0 : i64, scratch_operands = 3 : i64, tpu.core_type = #tpu.core_type<tc>, window_params = [{transform_indices = @transform_0, window_bounds = array<i64: 8, 144, 128>}, {pipeline_mode = #tpu.pipeline_mode<synchronous>, transform_indices = @transform_1, window_bounds = array<i64: 128, 128>}, {pipeline_mode = #tpu.pipeline_mode<synchronous>, transform_indices = @transform_2, window_bounds = array<i64: 1, 32>}, {pipeline_mode = #tpu.pipeline_mode<synchronous>, transform_indices = @transform_3, window_bounds = array<i64: 32, 128>}, {pipeline_mode = #tpu.pipeline_mode<synchronous>, transform_indices = @transform_4, window_bounds = array<i64: 1, 32>}, {pipeline_mode = #tpu.pipeline_mode<synchronous>, transform_indices = @transform_5, window_bounds = array<i64: 32, 192>}, {pipeline_mode = #tpu.pipeline_mode<synchronous>, transform_indices = @transform_6, window_bounds = array<i64: 1, 64>}, {pipeline_mode = #tpu.pipeline_mode<synchronous>, transform_indices = @transform_7, window_bounds = array<i64: 4, 64, 64>}, {pipeline_mode = #tpu.pipeline_mode<synchronous>, transform_indices = @transform_8, window_bounds = array<i64: 1, 64>}, {pipeline_mode = #tpu.pipeline_mode<synchronous>, transform_indices = @transform_9, window_bounds = array<i64: 64, 128>}, {pipeline_mode = #tpu.pipeline_mode<synchronous>, transform_indices = @transform_10, window_bounds = array<i64: 1, 128>}, {transform_indices = @transform_11, window_bounds = array<i64: 8, 128>}]} {
    %c0 = arith.constant 0 : index
    %c0_0 = arith.constant 0 : index
    %c0_1 = arith.constant 0 : index
    %0 = vector.load %arg1[%c0, %c0_0, %c0_1] : memref<8x144x128xbf16, #tpu.memory_space<vmem>>, vector<8x144x128xbf16>
    %1 = vector.shape_cast %0 : vector<8x144x128xbf16> to vector<1152x128xbf16>
    %c0_2 = arith.constant 0 : index
    %c0_3 = arith.constant 0 : index
    %2 = vector.load %arg2[%c0_2, %c0_3] : memref<128x128xbf16, #tpu.memory_space<vmem>>, vector<128x128xbf16>
    %cst = arith.constant dense<0.000000e+00> : vector<1152x128xf32>
    %3 = tpu.matmul %1, %2, %cst {dimension_numbers = #tpu.dot_dimension_numbers<[1], [0], [0], [1], [0, 0, 1, 1], [], []>} : vector<1152x128xbf16>, vector<128x128xbf16>, vector<1152x128xf32> -> vector<1152x128xf32>
    %4 = vector.extract_strided_slice %3 {offsets = [0, 0], sizes = [1149, 32], strides = [1, 1]} : vector<1152x128xf32> to vector<1149x32xf32>
    %5 = vector.extract_strided_slice %3 {offsets = [1, 32], sizes = [1149, 32], strides = [1, 1]} : vector<1152x128xf32> to vector<1149x32xf32>
    %6 = arith.addf %4, %5 : vector<1149x32xf32>
    %7 = vector.extract_strided_slice %3 {offsets = [2, 64], sizes = [1149, 32], strides = [1, 1]} : vector<1152x128xf32> to vector<1149x32xf32>
    %8 = arith.addf %6, %7 : vector<1149x32xf32>
    %9 = vector.extract_strided_slice %3 {offsets = [3, 96], sizes = [1149, 32], strides = [1, 1]} : vector<1152x128xf32> to vector<1149x32xf32>
    %10 = arith.addf %8, %9 : vector<1149x32xf32>
    %c0_4 = arith.constant 0 : index
    %c0_5 = arith.constant 0 : index
    %11 = vector.load %arg3[%c0_4, %c0_5] : memref<1x32xf32, #tpu.memory_space<vmem>>, vector<1x32xf32>
    %12 = vector.broadcast %11 : vector<1x32xf32> to vector<1149x32xf32>
    %13 = arith.addf %10, %12 : vector<1149x32xf32>
    %cst_6 = arith.constant 0.000000e+00 : f32
    %14 = vector.broadcast %cst_6 : f32 to vector<1149x32xf32>
    %15 = arith.maximumf %13, %14 : vector<1149x32xf32>
    %c0_7 = arith.constant 0 : index
    %c0_8 = arith.constant 0 : index
    %16 = vector.load %arg13[%c0_7, %c0_8] : memref<1149x32xf32, #tpu.memory_space<vmem>>, vector<1149x32xf32>
    tpu.vector_store %arg13[%c0_7, %c0_8], %15 {strides = array<i32>} : memref<1149x32xf32, #tpu.memory_space<vmem>>, vector<1149x32xf32>,
    %c0_9 = arith.constant 0 : index
    %c0_10 = arith.constant 0 : index
    %17 = tpu.strided_load %arg13[%c0_9, %c0_10] {strides = array<i32: 4, 1>} : memref<1149x32xf32, #tpu.memory_space<vmem>>, vector<287x32xf32>
    %c1 = arith.constant 1 : index
    %c0_11 = arith.constant 0 : index
    %18 = tpu.strided_load %arg13[%c1, %c0_11] {strides = array<i32: 4, 1>} : memref<1149x32xf32, #tpu.memory_space<vmem>>, vector<287x32xf32>
    %19 = arith.maximumf %17, %18 : vector<287x32xf32>
    %c2 = arith.constant 2 : index
    %c0_12 = arith.constant 0 : index
    %20 = tpu.strided_load %arg13[%c2, %c0_12] {strides = array<i32: 4, 1>} : memref<1149x32xf32, #tpu.memory_space<vmem>>, vector<287x32xf32>
    %c3 = arith.constant 3 : index
    %c0_13 = arith.constant 0 : index
    %21 = tpu.strided_load %arg13[%c3, %c0_13] {strides = array<i32: 4, 1>} : memref<1149x32xf32, #tpu.memory_space<vmem>>, vector<287x32xf32>
    %22 = arith.maximumf %20, %21 : vector<287x32xf32>
    %23 = arith.maximumf %19, %22 : vector<287x32xf32>
    %24 = arith.truncf %23 : vector<287x32xf32> to vector<287x32xbf16>
    %c0_14 = arith.constant 0 : index
    %c0_15 = arith.constant 0 : index
    %25 = vector.load %arg4[%c0_14, %c0_15] : memref<32x128xbf16, #tpu.memory_space<vmem>>, vector<32x128xbf16>
    %cst_16 = arith.constant dense<0.000000e+00> : vector<287x128xf32>
    %26 = tpu.matmul %24, %25, %cst_16 {dimension_numbers = #tpu.dot_dimension_numbers<[1], [0], [0], [1], [0, 0, 1, 1], [], []>} : vector<287x32xbf16>, vector<32x128xbf16>, vector<287x128xf32> -> vector<287x128xf32>
    %27 = vector.extract_strided_slice %26 {offsets = [0, 0], sizes = [284, 32], strides = [1, 1]} : vector<287x128xf32> to vector<284x32xf32>
    %28 = vector.extract_strided_slice %26 {offsets = [1, 32], sizes = [284, 32], strides = [1, 1]} : vector<287x128xf32> to vector<284x32xf32>
    %29 = arith.addf %27, %28 : vector<284x32xf32>
    %30 = vector.extract_strided_slice %26 {offsets = [2, 64], sizes = [284, 32], strides = [1, 1]} : vector<287x128xf32> to vector<284x32xf32>
    %31 = arith.addf %29, %30 : vector<284x32xf32>
    %32 = vector.extract_strided_slice %26 {offsets = [3, 96], sizes = [284, 32], strides = [1, 1]} : vector<287x128xf32> to vector<284x32xf32>
    %33 = arith.addf %31, %32 : vector<284x32xf32>
    %c0_17 = arith.constant 0 : index
    %c0_18 = arith.constant 0 : index
    %34 = vector.load %arg5[%c0_17, %c0_18] : memref<1x32xf32, #tpu.memory_space<vmem>>, vector<1x32xf32>
    %35 = vector.broadcast %34 : vector<1x32xf32> to vector<284x32xf32>
    %36 = arith.addf %33, %35 : vector<284x32xf32>
    %cst_19 = arith.constant 0.000000e+00 : f32
    %37 = vector.broadcast %cst_19 : f32 to vector<284x32xf32>
    %38 = arith.maximumf %36, %37 : vector<284x32xf32>
    %c0_20 = arith.constant 0 : index
    %c0_21 = arith.constant 0 : index
    %39 = vector.load %arg14[%c0_20, %c0_21] : memref<284x32xf32, #tpu.memory_space<vmem>>, vector<284x32xf32>
    tpu.vector_store %arg14[%c0_20, %c0_21], %38 {strides = array<i32>} : memref<284x32xf32, #tpu.memory_space<vmem>>, vector<284x32xf32>,
    %c0_22 = arith.constant 0 : index
    %c0_23 = arith.constant 0 : index
    %40 = tpu.strided_load %arg14[%c0_22, %c0_23] {strides = array<i32: 4, 1>} : memref<284x32xf32, #tpu.memory_space<vmem>>, vector<71x32xf32>
    %c1_24 = arith.constant 1 : index
    %c0_25 = arith.constant 0 : index
    %41 = tpu.strided_load %arg14[%c1_24, %c0_25] {strides = array<i32: 4, 1>} : memref<284x32xf32, #tpu.memory_space<vmem>>, vector<71x32xf32>
    %42 = arith.maximumf %40, %41 : vector<71x32xf32>
    %c2_26 = arith.constant 2 : index
    %c0_27 = arith.constant 0 : index
    %43 = tpu.strided_load %arg14[%c2_26, %c0_27] {strides = array<i32: 4, 1>} : memref<284x32xf32, #tpu.memory_space<vmem>>, vector<71x32xf32>
    %c3_28 = arith.constant 3 : index
    %c0_29 = arith.constant 0 : index
    %44 = tpu.strided_load %arg14[%c3_28, %c0_29] {strides = array<i32: 4, 1>} : memref<284x32xf32, #tpu.memory_space<vmem>>, vector<71x32xf32>
    %45 = arith.maximumf %43, %44 : vector<71x32xf32>
    %46 = arith.maximumf %42, %45 : vector<71x32xf32>
    %47 = arith.truncf %46 : vector<71x32xf32> to vector<71x32xbf16>
    %c0_30 = arith.constant 0 : index
    %c0_31 = arith.constant 0 : index
    %48 = vector.load %arg6[%c0_30, %c0_31] : memref<32x192xbf16, #tpu.memory_space<vmem>>, vector<32x192xbf16>
    %cst_32 = arith.constant dense<0.000000e+00> : vector<71x192xf32>
    %49 = tpu.matmul %47, %48, %cst_32 {dimension_numbers = #tpu.dot_dimension_numbers<[1], [0], [0], [1], [0, 0, 1, 1], [], []>} : vector<71x32xbf16>, vector<32x192xbf16>, vector<71x192xf32> -> vector<71x192xf32>
    %50 = vector.extract_strided_slice %49 {offsets = [0, 0], sizes = [69, 64], strides = [1, 1]} : vector<71x192xf32> to vector<69x64xf32>
    %51 = vector.extract_strided_slice %49 {offsets = [1, 64], sizes = [69, 64], strides = [1, 1]} : vector<71x192xf32> to vector<69x64xf32>
    %52 = arith.addf %50, %51 : vector<69x64xf32>
    %53 = vector.extract_strided_slice %49 {offsets = [2, 128], sizes = [69, 64], strides = [1, 1]} : vector<71x192xf32> to vector<69x64xf32>
    %54 = arith.addf %52, %53 : vector<69x64xf32>
    %c0_33 = arith.constant 0 : index
    %c0_34 = arith.constant 0 : index
    %55 = vector.load %arg7[%c0_33, %c0_34] : memref<1x64xf32, #tpu.memory_space<vmem>>, vector<1x64xf32>
    %56 = vector.broadcast %55 : vector<1x64xf32> to vector<69x64xf32>
    %57 = arith.addf %54, %56 : vector<69x64xf32>
    %cst_35 = arith.constant 0.000000e+00 : f32
    %58 = vector.broadcast %cst_35 : f32 to vector<69x64xf32>
    %59 = arith.maximumf %57, %58 : vector<69x64xf32>
    %c0_36 = arith.constant 0 : index
    %c0_37 = arith.constant 0 : index
    %60 = vector.load %arg15[%c0_36, %c0_37] : memref<69x64xf32, #tpu.memory_space<vmem>>, vector<69x64xf32>
    tpu.vector_store %arg15[%c0_36, %c0_37], %59 {strides = array<i32>} : memref<69x64xf32, #tpu.memory_space<vmem>>, vector<69x64xf32>,
    %c0_38 = arith.constant 0 : index
    %c0_39 = arith.constant 0 : index
    %61 = tpu.strided_load %arg15[%c0_38, %c0_39] {strides = array<i32: 9, 1>} : memref<69x64xf32, #tpu.memory_space<vmem>>, vector<8x64xf32>
    %c1_40 = arith.constant 1 : index
    %c0_41 = arith.constant 0 : index
    %62 = tpu.strided_load %arg15[%c1_40, %c0_41] {strides = array<i32: 9, 1>} : memref<69x64xf32, #tpu.memory_space<vmem>>, vector<8x64xf32>
    %c2_42 = arith.constant 2 : index
    %c0_43 = arith.constant 0 : index
    %63 = tpu.strided_load %arg15[%c2_42, %c0_43] {strides = array<i32: 9, 1>} : memref<69x64xf32, #tpu.memory_space<vmem>>, vector<8x64xf32>
    %c3_44 = arith.constant 3 : index
    %c0_45 = arith.constant 0 : index
    %64 = tpu.strided_load %arg15[%c3_44, %c0_45] {strides = array<i32: 9, 1>} : memref<69x64xf32, #tpu.memory_space<vmem>>, vector<8x64xf32>
    %c4 = arith.constant 4 : index
    %c0_46 = arith.constant 0 : index
    %65 = tpu.strided_load %arg15[%c4, %c0_46] {strides = array<i32: 9, 1>} : memref<69x64xf32, #tpu.memory_space<vmem>>, vector<8x64xf32>
    %c5 = arith.constant 5 : index
    %c0_47 = arith.constant 0 : index
    %66 = tpu.strided_load %arg15[%c5, %c0_47] {strides = array<i32: 9, 1>} : memref<69x64xf32, #tpu.memory_space<vmem>>, vector<8x64xf32>
    %67 = arith.addf %61, %62 : vector<8x64xf32>
    %68 = arith.addf %67, %63 : vector<8x64xf32>
    %69 = arith.truncf %68 : vector<8x64xf32> to vector<8x64xbf16>
    %70 = arith.addf %64, %65 : vector<8x64xf32>
    %71 = arith.addf %70, %66 : vector<8x64xf32>
    %72 = arith.truncf %71 : vector<8x64xf32> to vector<8x64xbf16>
    %73 = arith.maximumf %61, %62 : vector<8x64xf32>
    %74 = arith.maximumf %73, %63 : vector<8x64xf32>
    %75 = arith.truncf %74 : vector<8x64xf32> to vector<8x64xbf16>
    %76 = arith.maximumf %64, %65 : vector<8x64xf32>
    %77 = arith.maximumf %76, %66 : vector<8x64xf32>
    %78 = arith.truncf %77 : vector<8x64xf32> to vector<8x64xbf16>
    %c0_48 = arith.constant 0 : index
    %c0_49 = arith.constant 0 : index
    %c0_50 = arith.constant 0 : index
    %79 = vector.load %arg8[%c0_48, %c0_49, %c0_50] : memref<4x64x64xbf16, #tpu.memory_space<vmem>>, vector<1x64x64xbf16>
    %80 = vector.shape_cast %79 : vector<1x64x64xbf16> to vector<64x64xbf16>
    %cst_51 = arith.constant dense<0.000000e+00> : vector<8x64xf32>
    %81 = tpu.matmul %69, %80, %cst_51 {dimension_numbers = #tpu.dot_dimension_numbers<[1], [0], [0], [1], [0, 0, 1, 1], [], []>} : vector<8x64xbf16>, vector<64x64xbf16>, vector<8x64xf32> -> vector<8x64xf32>
    %c1_52 = arith.constant 1 : index
    %c0_53 = arith.constant 0 : index
    %c0_54 = arith.constant 0 : index
    %82 = vector.load %arg8[%c1_52, %c0_53, %c0_54] : memref<4x64x64xbf16, #tpu.memory_space<vmem>>, vector<1x64x64xbf16>
    %83 = vector.shape_cast %82 : vector<1x64x64xbf16> to vector<64x64xbf16>
    %cst_55 = arith.constant dense<0.000000e+00> : vector<8x64xf32>
    %84 = tpu.matmul %72, %83, %cst_55 {dimension_numbers = #tpu.dot_dimension_numbers<[1], [0], [0], [1], [0, 0, 1, 1], [], []>} : vector<8x64xbf16>, vector<64x64xbf16>, vector<8x64xf32> -> vector<8x64xf32>
    %85 = arith.addf %81, %84 : vector<8x64xf32>
    %c2_56 = arith.constant 2 : index
    %c0_57 = arith.constant 0 : index
    %c0_58 = arith.constant 0 : index
    %86 = vector.load %arg8[%c2_56, %c0_57, %c0_58] : memref<4x64x64xbf16, #tpu.memory_space<vmem>>, vector<1x64x64xbf16>
    %87 = vector.shape_cast %86 : vector<1x64x64xbf16> to vector<64x64xbf16>
    %cst_59 = arith.constant dense<0.000000e+00> : vector<8x64xf32>
    %88 = tpu.matmul %75, %87, %cst_59 {dimension_numbers = #tpu.dot_dimension_numbers<[1], [0], [0], [1], [0, 0, 1, 1], [], []>} : vector<8x64xbf16>, vector<64x64xbf16>, vector<8x64xf32> -> vector<8x64xf32>
    %89 = arith.addf %85, %88 : vector<8x64xf32>
    %c3_60 = arith.constant 3 : index
    %c0_61 = arith.constant 0 : index
    %c0_62 = arith.constant 0 : index
    %90 = vector.load %arg8[%c3_60, %c0_61, %c0_62] : memref<4x64x64xbf16, #tpu.memory_space<vmem>>, vector<1x64x64xbf16>
    %91 = vector.shape_cast %90 : vector<1x64x64xbf16> to vector<64x64xbf16>
    %cst_63 = arith.constant dense<0.000000e+00> : vector<8x64xf32>
    %92 = tpu.matmul %78, %91, %cst_63 {dimension_numbers = #tpu.dot_dimension_numbers<[1], [0], [0], [1], [0, 0, 1, 1], [], []>} : vector<8x64xbf16>, vector<64x64xbf16>, vector<8x64xf32> -> vector<8x64xf32>
    %93 = arith.addf %89, %92 : vector<8x64xf32>
    %c0_64 = arith.constant 0 : index
    %c0_65 = arith.constant 0 : index
    %94 = vector.load %arg9[%c0_64, %c0_65] : memref<1x64xf32, #tpu.memory_space<vmem>>, vector<1x64xf32>
    %95 = vector.broadcast %94 : vector<1x64xf32> to vector<8x64xf32>
    %96 = arith.addf %93, %95 : vector<8x64xf32>
    %97 = arith.truncf %96 : vector<8x64xf32> to vector<8x64xbf16>
    %c0_66 = arith.constant 0 : index
    %c0_67 = arith.constant 0 : index
    %98 = vector.load %arg10[%c0_66, %c0_67] : memref<64x128xbf16, #tpu.memory_space<vmem>>, vector<64x128xbf16>
    %cst_68 = arith.constant dense<0.000000e+00> : vector<8x128xf32>
    %99 = tpu.matmul %97, %98, %cst_68 {dimension_numbers = #tpu.dot_dimension_numbers<[1], [0], [0], [1], [0, 0, 1, 1], [], []>} : vector<8x64xbf16>, vector<64x128xbf16>, vector<8x128xf32> -> vector<8x128xf32>
    %c0_69 = arith.constant 0 : index
    %c0_70 = arith.constant 0 : index
    %100 = vector.load %arg11[%c0_69, %c0_70] : memref<1x128xf32, #tpu.memory_space<vmem>>, vector<1x128xf32>
    %101 = vector.broadcast %100 : vector<1x128xf32> to vector<8x128xf32>
    %102 = arith.addf %99, %101 : vector<8x128xf32>
    %cst_71 = arith.constant dense<0xFF800000> : vector<8xf32>
    %103 = vector.multi_reduction <maximumf>, %102, %cst_71 [1] : vector<8x128xf32> to vector<8xf32>
    %104 = vector.shape_cast %103 : vector<8xf32> to vector<8x1xf32>
    %105 = vector.broadcast %104 : vector<8x1xf32> to vector<8x128xf32>
    %106 = arith.subf %102, %105 : vector<8x128xf32>
    %107 = math.exp %106 : vector<8x128xf32>
    %cst_72 = arith.constant dense<0.000000e+00> : vector<8xf32>
    %108 = vector.multi_reduction <add>, %107, %cst_72 [1] : vector<8x128xf32> to vector<8xf32>
    %109 = vector.shape_cast %108 : vector<8xf32> to vector<8x1xf32>
    %110 = math.log %109 : vector<8x1xf32>
    %111 = vector.broadcast %110 : vector<8x1xf32> to vector<8x128xf32>
    %112 = arith.subf %106, %111 : vector<8x128xf32>
    %c0_73 = arith.constant 0 : index
    %c0_74 = arith.constant 0 : index
    %113 = vector.load %arg12[%c0_73, %c0_74] : memref<8x128xf32, #tpu.memory_space<vmem>>, vector<8x128xf32>
    tpu.vector_store %arg12[%c0_73, %c0_74], %112 {strides = array<i32>} : memref<8x128xf32, #tpu.memory_space<vmem>>, vector<8x128xf32>,
    return
  }
  func.func @transform_0(%arg0: i32) -> (i32, i32, i32) {
    %c0_i32 = arith.constant 0 : i32
    %c0_i32_0 = arith.constant 0 : i32
    %c0_i32_1 = arith.constant 0 : i32
    return %arg0, %c0_i32, %c0_i32_0 : i32, i32, i32
  }
  func.func @transform_1(%arg0: i32) -> (i32, i32) {
    %c0_i32 = arith.constant 0 : i32
    %c0_i32_0 = arith.constant 0 : i32
    %c0_i32_1 = arith.constant 0 : i32
    return %c0_i32, %c0_i32_0 : i32, i32
  }
  func.func @transform_2(%arg0: i32) -> (i32, i32) {
    %c0_i32 = arith.constant 0 : i32
    %c0_i32_0 = arith.constant 0 : i32
    %c0_i32_1 = arith.constant 0 : i32
    return %c0_i32, %c0_i32_0 : i32, i32
  }
  func.func @transform_3(%arg0: i32) -> (i32, i32) {
    %c0_i32 = arith.constant 0 : i32
    %c0_i32_0 = arith.constant 0 : i32
    %c0_i32_1 = arith.constant 0 : i32
    return %c0_i32, %c0_i32_0 : i32, i32
  }
  func.func @transform_4(%arg0: i32) -> (i32, i32) {
    %c0_i32 = arith.constant 0 : i32
    %c0_i32_0 = arith.constant 0 : i32
    %c0_i32_1 = arith.constant 0 : i32
    return %c0_i32, %c0_i32_0 : i32, i32
  }
  func.func @transform_5(%arg0: i32) -> (i32, i32) {
    %c0_i32 = arith.constant 0 : i32
    %c0_i32_0 = arith.constant 0 : i32
    %c0_i32_1 = arith.constant 0 : i32
    return %c0_i32, %c0_i32_0 : i32, i32
  }
  func.func @transform_6(%arg0: i32) -> (i32, i32) {
    %c0_i32 = arith.constant 0 : i32
    %c0_i32_0 = arith.constant 0 : i32
    %c0_i32_1 = arith.constant 0 : i32
    return %c0_i32, %c0_i32_0 : i32, i32
  }
  func.func @transform_7(%arg0: i32) -> (i32, i32, i32) {
    %c0_i32 = arith.constant 0 : i32
    %c0_i32_0 = arith.constant 0 : i32
    %c0_i32_1 = arith.constant 0 : i32
    %c0_i32_2 = arith.constant 0 : i32
    return %c0_i32, %c0_i32_0, %c0_i32_1 : i32, i32, i32
  }
  func.func @transform_8(%arg0: i32) -> (i32, i32) {
    %c0_i32 = arith.constant 0 : i32
    %c0_i32_0 = arith.constant 0 : i32
    %c0_i32_1 = arith.constant 0 : i32
    return %c0_i32, %c0_i32_0 : i32, i32
  }
  func.func @transform_9(%arg0: i32) -> (i32, i32) {
    %c0_i32 = arith.constant 0 : i32
    %c0_i32_0 = arith.constant 0 : i32
    %c0_i32_1 = arith.constant 0 : i32
    return %c0_i32, %c0_i32_0 : i32, i32
  }
  func.func @transform_10(%arg0: i32) -> (i32, i32) {
    %c0_i32 = arith.constant 0 : i32
    %c0_i32_0 = arith.constant 0 : i32
    %c0_i32_1 = arith.constant 0 : i32
    return %c0_i32, %c0_i32_0 : i32, i32
  }
  func.func @transform_11(%arg0: i32) -> (i32, i32) {
    %c0_i32 = arith.constant 0 : i32
    %c0_i32_0 = arith.constant 0 : i32
    return %arg0, %c0_i32 : i32, i32
  }
}

</mosaic_0001>

<bundles_post_ra>
// kernel: tpu_custom_call.1
= control target key start
LH: loop header
LB: loop body
LE: loop exit
PB: predicated region body
PF: predicated region fallthrough
CT: control target
= control target key end

     0   :  { %16 = vsyncpa [#allocation6], 0  ;;  %s11498_s0 = inlined_call_operand.hbm [shape: bf16[8,144,128], index: 0, kind: input, shape index: {}]   ;;  %s11499_s1 = inlined_call_operand.hbm [shape: bf16[128,128], index: 1, kind: input, shape index: {}]   ;;  %s11500_s2 = inlined_call_operand.vmem [shape: f32[1,32], index: 2, kind: input, shape index: {}]   ;;  %s11501_s3 = inlined_call_operand.hbm [shape: bf16[32,128], index: 3, kind: input, shape index: {}]   ;;  %s11502_s4 = inlined_call_operand.vmem [shape: f32[1,32], index: 4, kind: input, shape index: {}]   ;;  %s11503_s5 = inlined_call_operand.hbm [shape: bf16[32,192], index: 5, kind: input, shape index: {}]   ;;  %s11504_s6 = inlined_call_operand.vmem [shape: f32[1,64], index: 6, kind: input, shape index: {}]   ;;  %s11505_s7 = inlined_call_operand.hbm [shape: bf16[4,64,64], index: 7, kind: input, shape index: {}]   ;;  %s11506_s8 = inlined_call_operand.vmem [shape: f32[1,64], index: 8, kind: input, shape index: {}]   ;;  %s11507_s9 = inlined_call_operand.hbm [shape: bf16[64,128], index: 9, kind: input, shape index: {}]   ;;  %s11508_s10 = inlined_call_operand.vmem [shape: f32[1,128], index: 10, kind: input, shape index: {}]   ;;  %s11509_s11 = inlined_call_operand.hbm [shape: f32[8,128], index: 11, kind: output, shape index: {}]  }
   0x1   :  { %17 = vsyncpa [#allocation9], 0 }
   0x2   :  { %18 = vsyncpa [#allocation12], 0 }
   0x3   :  { %19 = vsyncpa [#allocation15], 0 }
   0x4   :  { %20 = vsyncpa [#allocation7], 0  ;;  %s7642_s17 = smov [#allocation8]   ;;  %s7643_s19 = smov [#allocation11]  }
   0x5   :  { %s38_s18 = sshll.u32 %s7642_s17, 4  ;;  %s66_s20 = sshll.u32 %s7643_s19, 4  ;;  %s39_s18 = int_to_ptr.vmem [resolvable:$true] %s38_s18  ;;  %s67_s20 = int_to_ptr.vmem [resolvable:$true] %s66_s20 }
   0x6   :  { %s7500_s21 = scalar_lea.vmem %s39_s18, 1024  ;;  %p7505_p1 = scmp.lt.s32.totalorder %s39_s18, %s39_s18 }
   0x7   :  { %p7501_p0 = scmp.ne.s32.totalorder %s39_s18, %s7500_s21  ;;  %p7506_p2 = scmp.lt.s32.totalorder %s7500_s21, %s7500_s21 }
   0x9   :  { %p7507_p3 = por %p7506_p2, %p7505_p1 }
   0xb   :  { %p7508_p4 = pnand %p7507_p3, %p7501_p0 }
   0xd   :  { %7511 = shalt.err (!%p7508_p4)
}
   0xe   :  { %s7644_s22 = smov 64   ;;  %s7645_s23 = smov 4  }
   0xf   :  { %44 = dma.hbm_to_vmem [thread:$0]  %s11499_s1, 1024, %s39_s18, [#allocation9], %s7644_s22, %s7644_s22, %s7645_s23  }
  0x10   :  { %s7520_s26 = scalar_lea.vmem %s67_s20, 512  ;;  %p7525_p6 = scmp.lt.s32.totalorder %s67_s20, %s67_s20 }
  0x11   :  { %p7521_p5 = scmp.ne.s32.totalorder %s67_s20, %s7520_s26  ;;  %p7526_p7 = scmp.lt.s32.totalorder %s7520_s26, %s7520_s26 }
  0x13   :  { %p7527_p8 = por %p7526_p7, %p7525_p6 }
  0x15   :  { %p7528_p9 = pnand %p7527_p8, %p7521_p5 }
  0x17   :  { %7531 = shalt.err (!%p7528_p9)
}
  0x18   :  { %s7646_s27 = smov 128   ;;  %s7647_s28 = smov 8  }
  0x19   :  { %72 = dma.hbm_to_vmem [thread:$0]  %s11503_s5, 512, %s67_s20, [#allocation12], %s7646_s27, %s7646_s27, %s7647_s28  }
  0x1a   :  { %s7648_s12 = smov [#allocation5]   ;;  %s7649_s14 = smov [#allocation10]  }
  0x1b   :  { %s26_s13 = sshll.u32 %s7648_s12, 4  ;;  %s52_s15 = sshll.u32 %s7649_s14, 4  ;;  %s27_s13 = int_to_ptr.vmem [resolvable:$true] %s26_s13  ;;  %s53_s15 = int_to_ptr.vmem [resolvable:$true] %s52_s15 }
  0x1c   :  { %s7540_s1 = scalar_lea.vmem %s27_s13, 9216  ;;  %p7545_p11 = scmp.lt.s32.totalorder %s27_s13, %s27_s13 }
  0x1d   :  { %p7541_p10 = scmp.ne.s32.totalorder %s27_s13, %s7540_s1  ;;  %p7546_p12 = scmp.lt.s32.totalorder %s7540_s1, %s7540_s1 }
  0x1f   :  { %p7547_p13 = por %p7546_p12, %p7545_p11 }
  0x21   :  { %p7548_p0 = pnand %p7547_p13, %p7541_p10 }
  0x23   :  { %7551 = shalt.err (!%p7548_p0)
}
  0x24   :  { %32 = dma.hbm_to_vmem [thread:$0]  %s11498_s0, 9216, %s27_s13, [#allocation6], %s7644_s22, %s7644_s22, %s7645_s23  }
  0x25   :  { %s7560_s5 = scalar_lea.vmem %s53_s15, 256  ;;  %p7565_p2 = scmp.lt.s32.totalorder %s53_s15, %s53_s15 }
  0x26   :  { %p7561_p1 = scmp.ne.s32.totalorder %s53_s15, %s7560_s5  ;;  %p7566_p3 = scmp.lt.s32.totalorder %s7560_s5, %s7560_s5 }
  0x28   :  { %p7567_p4 = por %p7566_p3, %p7565_p2 }
  0x2a   :  { %p7568_p5 = pnand %p7567_p4, %p7561_p1 }
  0x2c   :  { %7571 = shalt.err (!%p7568_p5)
}
  0x2d   :  { %58 = dma.hbm_to_vmem [thread:$0]  %s11501_s3, 256, %s53_s15, [#allocation9], %s7644_s22, %s7644_s22, %s7645_s23  }
  0x2e   :  { %s7650_s20 = smov [#allocation13]   ;;  %s7651_s24 = smov [#allocation14]  }
  0x2f   :  { %s80_s21 = sshll.u32 %s7650_s20, 4  ;;  %s94_s25 = sshll.u32 %s7651_s24, 4  ;;  %s81_s21 = int_to_ptr.vmem [resolvable:$true] %s80_s21  ;;  %s95_s25 = int_to_ptr.vmem [resolvable:$true] %s94_s25 }
  0x30   :  { %s7580_s0 = scalar_lea.vmem %s81_s21, 2048  ;;  %p7585_p7 = scmp.lt.s32.totalorder %s81_s21, %s81_s21 }
  0x31   :  { %p7581_p6 = scmp.ne.s32.totalorder %s81_s21, %s7580_s0  ;;  %p7586_p8 = scmp.lt.s32.totalorder %s7580_s0, %s7580_s0 }
  0x33   :  { %p7587_p9 = por %p7586_p8, %p7585_p7 }
  0x35   :  { %p7588_p10 = pnand %p7587_p9, %p7581_p6 }
  0x37   :  { %7591 = shalt.err (!%p7588_p10)
}
  0x38   :  { %86 = dma.hbm_to_vmem [thread:$0]  %s11505_s7, 2048, %s81_s21, [#allocation12], %s7644_s22, %s7644_s22, %s7645_s23  }
  0x39   :  { %s7600_s3 = scalar_lea.vmem %s95_s25, 512  ;;  %p7605_p12 = scmp.lt.s32.totalorder %s95_s25, %s95_s25 }
  0x3a   :  { %p7601_p11 = scmp.ne.s32.totalorder %s95_s25, %s7600_s3  ;;  %p7606_p13 = scmp.lt.s32.totalorder %s7600_s3, %s7600_s3 }
  0x3c   :  { %p7607_p0 = por %p7606_p13, %p7605_p12 }
  0x3e   :  { %p7608_p1 = pnand %p7607_p0, %p7601_p11 }
  0x40   :  { %7611 = shalt.err (!%p7608_p1)
}
  0x41   :  { %100 = dma.hbm_to_vmem [thread:$0]  %s11507_s9, 512, %s95_s25, [#allocation15], %s7644_s22, %s7644_s22, %s7645_s23  }
  0x42   :  { %7632 = dma.done.wait [#allocation6], 9216  }
  0x43   :  { %7633 = vsyncadd [#allocation6], 4294958080 }
  0x44   :  { %7634 = dma.done.wait [#allocation9], 1280  }
  0x45   :  { %7635 = vsyncadd [#allocation9], 4294966016 }
  0x46   :  { %7636 = dma.done.wait [#allocation12], 2560  }
  0x47   :  { %7637 = vsyncadd [#allocation12], 4294964736 }
  0x48   :  { %7638 = dma.done.wait [#allocation15], 512  }
  0x49   :  { %7639 = vsyncadd [#allocation15], 4294966784  ;;  %v7374_v0 = vld [vmem:[#allocation8 + $0x38] sm:$0xff]   ;;  %v7375_v1 = vld [vmem:[#allocation8 + $0x30] sm:$0xff]   ;;  %vm2379_vm0 = vcmask 1045504   ;;  %vm1515_vm1 = vcmask 1046528  }
  0x4a   :  { %7082 = vmatprep.subr.bf16.mxu0 %v7374_v0  ;;  %7342 = vmatprep.subr.bf16.mxu1 %v7374_v0  ;;  %v7376_v2 = vld [vmem:[#allocation8 + $0x28] sm:$0xff]   ;;  %v7377_v3 = vld [vmem:[#allocation8 + $0x20] sm:$0xff]   ;;  %v7378_v5 = vld [vmem:[#allocation8 + $0x18] sm:$0xff]   ;;  %s7652_s7 = smov 96   ;;  %vm3243_vm2 = vcmask 1044480   ;;  %s7653_s9 = smov 32  }
  0x4b   :  { %7083 = vmatpush3.bf16.msra.mxu0 %v7374_v0  ;;  %7350 = vmatpush3.bf16.msra.mxu1 %v7374_v0  ;;  %v7382_v4 = vld [vmem:[#allocation5] sm:$0xff]   ;;  %v7379_v6 = vld [vmem:[#allocation8 + $0x10] sm:$0xff]   ;;  %v7380_v7 = vld [vmem:[#allocation8 + $0x8] sm:$0xff]   ;;  %vm4402_vm3 = vcmask 261120   ;;  %vm4546_vm4 = vcmask 258048   ;;  %vm6359_vm5 = vcmask 523264  }
  0x4c   :  { %7084 = vmatprep.subr.bf16.mxu0 %v7375_v1  ;;  %7343 = vmatprep.subr.bf16.mxu1 %v7375_v1  ;;  %v7381_v8 = vld [vmem:[#allocation8] sm:$0xff]   ;;  %v7383_v9 = vld [vmem:[#allocation5 + $0x8] sm:$0xff]   ;;  %v7384_v10 = vld [vmem:[#allocation5 + $0x10] sm:$0xff]   ;;  %vm6003_vm6 = vcmask 257024   ;;  %vm7656_vm7 = vmmov 0   ;;  %vm6368_vm8 = vcmask 520192  }
  0x4d   :  { %7098 = vmatprep.mubr.bf16.mxu0 %v7382_v4  ;;  %v7385_v11 = vld [vmem:[#allocation5 + $0x18] sm:$0xff]   ;;  %v7386_v12 = vld [vmem:[#allocation5 + $0x20] sm:$0xff]   ;;  %v7387_v13 = vld [vmem:[#allocation5 + $0x28] sm:$0xff]  }
  0x4e   :  { %v7388_v14 = vld [vmem:[#allocation5 + $0x30] sm:$0xff]   ;;  %v7389_v15 = vld [vmem:[#allocation5 + $0x38] sm:$0xff]   ;;  %v7390_v16 = vld [vmem:[#allocation5 + $0x40] sm:$0xff]  }
  0x4f   :  { %7085 = vmatpush3.bf16.msra.mxu0 %v7375_v1  ;;  %7351 = vmatpush3.bf16.msra.mxu1 %v7375_v1  ;;  %v7391_v17 = vld [vmem:[#allocation5 + $0x48] sm:$0xff]   ;;  %v7392_v18 = vld [vmem:[#allocation5 + $0x50] sm:$0xff]   ;;  %v7393_v19 = vld [vmem:[#allocation5 + $0x58] sm:$0xff]  }
  0x50   :  { %7086 = vmatprep.subr.bf16.mxu0 %v7376_v2  ;;  %7344 = vmatprep.subr.bf16.mxu1 %v7376_v2  ;;  %v7394_v20 = vld [vmem:[#allocation5 + $0x60] sm:$0xff]   ;;  %v7395_v21 = vld [vmem:[#allocation5 + $0x68] sm:$0xff]   ;;  %v7396_v22 = vld [vmem:[#allocation5 + $0x70] sm:$0xff]  }
  0x51   :  { %v7397_v23 = vld [vmem:[#allocation5 + $0x78] sm:$0xff]   ;;  %v7398_v24 = vld [vmem:[#allocation5 + $0x80] sm:$0xff]   ;;  %v7399_v25 = vld [vmem:[#allocation5 + $0x88] sm:$0xff]  }
  0x52   :  { %v7400_v26 = vld [vmem:[#allocation5 + $0x90] sm:$0xff]   ;;  %v7401_v27 = vld [vmem:[#allocation5 + $0x98] sm:$0xff]   ;;  %v7402_v28 = vld [vmem:[#allocation5 + $0xa0] sm:$0xff]  }
  0x53   :  { %7087 = vmatpush3.bf16.msra.mxu0 %v7376_v2  ;;  %7352 = vmatpush3.bf16.msra.mxu1 %v7376_v2  ;;  %v7403_v29 = vld [vmem:[#allocation5 + $0xa8] sm:$0xff]   ;;  %v7404_v30 = vld [vmem:[#allocation5 + $0xb0] sm:$0xff]   ;;  %v7405_v31 = vld [vmem:[#allocation5 + $0xb8] sm:$0xff]  }
  0x54   :  { %7088 = vmatprep.subr.bf16.mxu0 %v7377_v3  ;;  %7345 = vmatprep.subr.bf16.mxu1 %v7377_v3  ;;  %v7406_v32 = vld [vmem:[#allocation5 + $0xc0] sm:$0xff]   ;;  %v7407_v33 = vld [vmem:[#allocation5 + $0xc8] sm:$0xff]   ;;  %v7408_v34 = vld [vmem:[#allocation5 + $0xd0] sm:$0xff]  }
  0x55   :  { %v7409_v35 = vld [vmem:[#allocation5 + $0xd8] sm:$0xff]   ;;  %v7410_v36 = vld [vmem:[#allocation5 + $0xe0] sm:$0xff]   ;;  %v7411_v37 = vld [vmem:[#allocation5 + $0xe8] sm:$0xff]  }
  0x56   :  { %v7412_v40 = vld [vmem:[#allocation5 + $0xf0] sm:$0xff]   ;;  %v7413_v41 = vld [vmem:[#allocation5 + $0xf8] sm:$0xff]   ;;  %v7414_v63 = vld [vmem:[#allocation5 + $0x1e0] sm:$0xff]  }
  0x57   :  { %7089 = vmatpush3.bf16.msra.mxu0 %v7377_v3  ;;  %7353 = vmatpush3.bf16.msra.mxu1 %v7377_v3  ;;  %v7415_v0 = vld [vmem:[#allocation5 + $0x1e8] sm:$0xff]  }
  0x58   :  { %7090 = vmatprep.subr.bf16.mxu0 %v7378_v5  ;;  %7346 = vmatprep.subr.bf16.mxu1 %v7378_v5 }
  0x59   :  { %7218 = vmatprep.mubr.bf16.mxu1 %v7414_v63 }
  0x5b   :  { %7091 = vmatpush3.bf16.msra.mxu0 %v7378_v5  ;;  %7354 = vmatpush3.bf16.msra.mxu1 %v7378_v5 }
  0x5c   :  { %7092 = vmatprep.subr.bf16.mxu0 %v7379_v6  ;;  %7347 = vmatprep.subr.bf16.mxu1 %v7379_v6 }
  0x5f   :  { %7093 = vmatpush3.bf16.msra.mxu0 %v7379_v6  ;;  %7355 = vmatpush3.bf16.msra.mxu1 %v7379_v6  ;;  %v7416_v6 = vld [vmem:[#allocation5 + $0x100] sm:$0xff]  }
  0x60   :  { %7094 = vmatprep.subr.bf16.mxu0 %v7380_v7  ;;  %7348 = vmatprep.subr.bf16.mxu1 %v7380_v7 }
  0x63   :  { %7095 = vmatpush3.bf16.msra.mxu0 %v7380_v7  ;;  %7356 = vmatpush3.bf16.msra.mxu1 %v7380_v7 }
  0x64   :  { %7096 = vmatprep.subr.bf16.mxu0 %v7381_v8  ;;  %7349 = vmatprep.subr.bf16.mxu1 %v7381_v8 }
  0x67   :  { %7097 = vmatpush3.bf16.msra.mxu0 %v7381_v8  ;;  %7357 = vmatpush3.bf16.msra.mxu1 %v7381_v8 }
  0x6a   :  { %7099 = vmatmul.mubr.bf16.vlgmr.msra.gmra.mxu0 %v7383_v9  ;;  %7219 = vmatmul.mubr.bf16.vlgmr.msra.gmra.mxu1 %v7415_v0 }
  0x6b   :  { %7102 = vmatprep.mubr.bf16.mxu0 %v7384_v10  ;;  %v7417_v10 = vld [vmem:[#allocation5 + $0x108] sm:$0xff]  }
  0x72   :  { %7103 = vmatmul.mubr.bf16.gmra.mxu0 %v7385_v11 }
  0x73   :  { %7106 = vmatprep.mubr.bf16.mxu0 %v7386_v12  ;;  %v7418_v12 = vld [vmem:[#allocation5 + $0x1f0] sm:$0xff]  }
  0x74   :  { %7222 = vmatprep.mubr.bf16.mxu1 %v7418_v12 }
  0x7a   :  { %7107 = vmatmul.mubr.bf16.gmra.mxu0 %v7387_v13 }
  0x7b   :  { %7110 = vmatprep.mubr.bf16.mxu0 %v7388_v14  ;;  %v7419_v14 = vld [vmem:[#allocation5 + $0x1f8] sm:$0xff]  }
  0x7c   :  { %7223 = vmatmul.mubr.bf16.gmra.mxu1 %v7419_v14 }
  0x82   :  { %7111 = vmatmul.mubr.bf16.gmra.mxu0 %v7389_v15 }
  0x83   :  { %7114 = vmatprep.mubr.bf16.mxu0 %v7390_v16 }
  0x8a   :  { %7115 = vmatmul.mubr.bf16.gmra.mxu0 %v7391_v17 }
  0x8b   :  { %7118 = vmatprep.mubr.bf16.mxu0 %v7392_v18 }
  0x92   :  { %7119 = vmatmul.mubr.bf16.gmra.mxu0 %v7393_v19 }
  0x93   :  { %7122 = vmatprep.mubr.bf16.mxu0 %v7394_v20 }
  0x9a   :  { %7123 = vmatmul.mubr.bf16.gmra.mxu0 %v7395_v21 }
  0x9b   :  { %7126 = vmatprep.mubr.bf16.mxu0 %v7396_v22 }
  0xa2   :  { %7127 = vmatmul.mubr.bf16.gmra.mxu0 %v7397_v23 }
  0xa3   :  { %7130 = vmatprep.mubr.bf16.mxu0 %v7398_v24 }
  0xaa   :  { %7131 = vmatmul.mubr.bf16.gmra.mxu0 %v7399_v25 }
  0xab   :  { %7134 = vmatprep.mubr.bf16.mxu0 %v7400_v26  ;;  %v7420_v26 = vld [vmem:[#allocation5 + $0x200] sm:$0xff]  }
  0xac   :  { %7226 = vmatprep.mubr.bf16.mxu1 %v7420_v26 }
  0xb2   :  { %7135 = vmatmul.mubr.bf16.gmra.mxu0 %v7401_v27  ;;  %v7421_v27 = vld [vmem:[#allocation5 + $0x208] sm:$0xff]  }
  0xb3   :  { %7138 = vmatprep.mubr.bf16.mxu0 %v7402_v28  ;;  %7227 = vmatmul.mubr.bf16.gmra.mxu1 %v7421_v27 }
  0xba   :  { %7139 = vmatmul.mubr.bf16.gmra.mxu0 %v7403_v29 }
  0xbb   :  { %7142 = vmatprep.mubr.bf16.mxu0 %v7404_v30 }
  0xc2   :  { %7143 = vmatmul.mubr.bf16.gmra.mxu0 %v7405_v31 }
  0xc3   :  { %7146 = vmatprep.mubr.bf16.mxu0 %v7406_v32 }
  0xca   :  { %7147 = vmatmul.mubr.bf16.gmra.mxu0 %v7407_v33 }
  0xcb   :  { %7150 = vmatprep.mubr.bf16.mxu0 %v7408_v34 }
  0xd2   :  { %7151 = vmatmul.mubr.bf16.gmra.mxu0 %v7409_v35 }
  0xd3   :  { %7154 = vmatprep.mubr.bf16.mxu0 %v7410_v36 }
  0xda   :  { %7155 = vmatmul.mubr.bf16.gmra.mxu0 %v7411_v37  ;;  %v7422_v37 = vld [vmem:[#allocation5 + $0x210] sm:$0xff]  }
  0xdb   :  { %7158 = vmatprep.mubr.bf16.mxu0 %v7412_v40  ;;  %v7423_v40 = vld [vmem:[#allocation5 + $0x218] sm:$0xff]   ;;  %7230 = vmatprep.mubr.bf16.mxu1 %v7422_v37 }
  0xdc   :  { %7231 = vmatmul.mubr.bf16.gmra.mxu1 %v7423_v40 }
  0xe2   :  { %7159 = vmatmul.mubr.bf16.gmra.mxu0 %v7413_v41  ;;  %v7424_v41 = vld [vmem:[#allocation5 + $0x110] sm:$0xff]  }
  0xe3   :  { %7162 = vmatprep.mubr.bf16.mxu0 %v7416_v6  ;;  %v7429_v6 = vld [vmem:[#allocation5 + $0x238] sm:$0xff]  }
  0xea   :  { %7163 = vmatmul.mubr.bf16.gmra.mxu0 %v7417_v10 }
  0xeb   :  { %7166 = vmatprep.mubr.bf16.mxu0 %v7424_v41 }
 0x12a   :  { %v7751_v38 = vpop.f32.mrf.mxu0 }
 0x12b   :  { %v2383_v43 = vrot.slane %v7751_v38, 2  ;;  %v1519_v45 = vrot.slane %v7751_v38, 1  ;;  %v3247_v53 = vrot.slane %v7751_v38, 3 }
 0x12c   :  { %v7753_v39 = vpop.f32.mrf.mxu0 }
 0x12d   :  { %v1516_v59 = vrot.slane %v7753_v39, 1  ;;  %v2380_v5 = vrot.slane %v7753_v39, 2  ;;  %v3244_v13 = vrot.slane %v7753_v39, 3 }
 0x12e   :  { %v7755_v42 = vpop.f32.mrf.mxu0 }
 0x12f   :  { %v2385_v44 = vrot.slane %v7755_v42, 2  ;;  %v1521_v46 = vrot.slane %v7755_v42, 1  ;;  %v3249_v48 = vrot.slane %v7755_v42, 3 }
 0x130   :  { %v7761_v47 = vpop.f32.mrf.mxu0 }
 0x131   :  { %v2386_v49 = vsel %vm2379_vm0, %v2383_v43, %v2385_v44  ;;  %v1522_v50 = vsel %vm1515_vm1, %v1519_v45, %v1521_v46  ;;  %v2381_v51 = vrot.slane %v7761_v47, 2  ;;  %v3250_v54 = vsel %vm3243_vm2, %v3247_v53, %v3249_v48 }
 0x132   :  { %2671 = vrot.lane.b32.xlu0 %v2386_v49, %s7644_s22  ;;  %1807 = vrot.lane.b32.xlu1 %v1522_v50, %s7652_s7  ;;  %v7769_v52 = vpop.f32.mrf.mxu0  ;;  %v3245_v56 = vrot.slane %v7761_v47, 3  ;;  %v1517_v57 = vrot.slane %v7761_v47, 1 }
 0x133   :  { %v2384_v55 = vsel %vm2379_vm0, %v2381_v51, %v2383_v43  ;;  %v2382_v8 = vsel %vm2379_vm0, %v2380_v5, %v2381_v51  ;;  %v1527_v15 = vrot.slane %v7769_v52, 1  ;;  %v2391_v20 = vrot.slane %v7769_v52, 2  ;;  %v7428_v5 = vld [vmem:[#allocation5 + $0x230] sm:$0xff]  }
 0x134   :  { %v7776_v58 = vpop.f32.mrf.mxu0  ;;  %v3248_v61 = vsel %vm3243_vm2, %v3245_v56, %v3247_v53  ;;  %v1518_v62 = vsel %vm1515_vm1, %v1516_v59, %v1517_v57  ;;  %v1520_v1 = vsel %vm1515_vm1, %v1517_v57, %v1519_v45  ;;  %v3246_v17 = vsel %vm3243_vm2, %v3244_v13, %v3245_v56  ;;  %v7426_v53 = vld [vmem:[#allocation5 + $0x220] sm:$0xff]  }
 0x135   :  { %v1523_v60 = vrot.slane %v7776_v58, 1  ;;  %v2387_v3 = vrot.slane %v7776_v58, 2  ;;  %v3251_v7 = vrot.slane %v7776_v58, 3  ;;  %v3255_v28 = vrot.slane %v7769_v52, 3  ;;  %7234 = vmatprep.mubr.bf16.mxu1 %v7426_v53 }
 0x136   :  { %3535 = vrot.lane.b32.xlu0 %v3250_v54, %s7653_s9  ;;  %2669 = vrot.lane.b32.xlu1 %v2384_v55, %s7644_s22  ;;  %v7791_v4 = vpop.f32.mrf.mxu0  ;;  %v7427_v54 = vld [vmem:[#allocation5 + $0x228] sm:$0xff]  }
 0x137   :  { %v1524_v2 = vsel %vm1515_vm1, %v1521_v46, %v1523_v60  ;;  %v2388_v9 = vsel %vm2379_vm0, %v2385_v44, %v2387_v3  ;;  %v1529_v16 = vrot.slane %v7791_v4, 1  ;;  %v3252_v18 = vsel %vm3243_vm2, %v3249_v48, %v3251_v7  ;;  %v7425_v46 = vld [vmem:[#allocation5 + $0x118] sm:$0xff]   ;;  %7235 = vmatmul.mubr.bf16.gmra.mxu1 %v7427_v54  ;;  %v7435_v54 = vld [vmem:[#allocation5 + $0x148] sm:$0xff]  }
 0x138   :  { %v7801_v11 = vpop.f32.mrf.mxu0  ;;  %v2393_v23 = vrot.slane %v7791_v4, 2  ;;  %v3257_v29 = vrot.slane %v7791_v4, 3  ;;  %7167 = vmatmul.mubr.bf16.gmra.mxu0 %v7425_v46  ;;  %7238 = vmatprep.mubr.bf16.mxu1 %v7428_v5  ;;  %v7434_v46 = vld [vmem:[#allocation5 + $0x140] sm:$0xff]  }
 0x139   :  { %v1525_v19 = vrot.slane %v7801_v11, 1  ;;  %v1530_v21 = vsel %vm1515_vm1, %v1527_v15, %v1529_v16  ;;  %v2389_v24 = vrot.slane %v7801_v11, 2  ;;  %v3253_v32 = vrot.slane %v7801_v11, 3 }
 0x13a   :  { %3533 = vrot.lane.b32.xlu1 %v3248_v61, %s7653_s9  ;;  %1803 = vrot.lane.b32.xlu0 %v1518_v62, %s7652_s7  ;;  %v7820_v25 = vpop.f32.mrf.mxu0  ;;  %v2394_v30 = vsel %vm2379_vm0, %v2391_v20, %v2393_v23  ;;  %v3258_v35 = vsel %vm3243_vm2, %v3255_v28, %v3257_v29 }
 0x13b   :  { %v1528_v22 = vsel %vm1515_vm1, %v1525_v19, %v1527_v15  ;;  %v2392_v31 = vsel %vm2379_vm0, %v2389_v24, %v2391_v20  ;;  %v3256_v36 = vsel %vm3243_vm2, %v3253_v32, %v3255_v28  ;;  %v1526_v43 = vsel %vm1515_vm1, %v1523_v60, %v1525_v19 }
 0x13c   :  { %v7829_v33 = vpop.f32.mrf.mxu0  ;;  %v2390_v50 = vsel %vm2379_vm0, %v2387_v3, %v2389_v24  ;;  %v1535_v55 = vrot.slane %v7820_v25, 1  ;;  %v3254_v60 = vsel %vm3243_vm2, %v3251_v7, %v3253_v32  ;;  %v2399_v62 = vrot.slane %v7820_v25, 2 }
 0x13d   :  { %v1531_v34 = vrot.slane %v7829_v33, 1  ;;  %v2395_v45 = vrot.slane %v7829_v33, 2  ;;  %v3259_v49 = vrot.slane %v7829_v33, 3  ;;  %v3263_v7 = vrot.slane %v7820_v25, 3 }
 0x13e   :  { %1805 = vrot.lane.b32.xlu0 %v1520_v1, %s7652_s7  ;;  %1809 = vrot.lane.b32.xlu1 %v1524_v2, %s7652_s7  ;;  %v7847_v48 = vpop.f32.mrf.mxu0 }
 0x13f   :  { %v1532_v44 = vsel %vm1515_vm1, %v1529_v16, %v1531_v34  ;;  %v2396_v51 = vsel %vm2379_vm0, %v2393_v23, %v2395_v45  ;;  %v1537_v57 = vrot.slane %v7847_v48, 1  ;;  %v3260_v61 = vsel %vm3243_vm2, %v3257_v29, %v3259_v49  ;;  %7239 = vmatmul.mubr.bf16.gmra.mxu1 %v7429_v6  ;;  %v7432_v29 = vld [vmem:[#allocation5 + $0x130] sm:$0xff]  }
 0x140   :  { %v7857_v56 = vpop.f32.mrf.mxu0  ;;  %v2401_v1 = vrot.slane %v7847_v48, 2 }
 0x141   :  { %v1533_v59 = vrot.slane %v7857_v56, 1  ;;  %v1538_v63 = vsel %vm1515_vm1, %v1535_v55, %v1537_v57  ;;  %v2397_v2 = vrot.slane %v7857_v56, 2 }
 0x142   :  { %2667 = vrot.lane.b32.xlu0 %v2382_v8, %s7644_s22  ;;  %2673 = vrot.lane.b32.xlu1 %v2388_v9, %s7644_s22  ;;  %v7874_v3 = vpop.f32.mrf.mxu0  ;;  %v3265_v8 = vrot.slane %v7847_v48, 3  ;;  %v3261_v9 = vrot.slane %v7857_v56, 3  ;;  %v2402_v10 = vsel %vm2379_vm0, %v2399_v62, %v2401_v1 }
 0x143   :  { %v1536_v0 = vsel %vm1515_vm1, %v1533_v59, %v1535_v55  ;;  %v2400_v12 = vsel %vm2379_vm0, %v2397_v2, %v2399_v62  ;;  %v2398_v24 = vsel %vm2379_vm0, %v2395_v45, %v2397_v2  ;;  %v1543_v27 = vrot.slane %v7874_v3, 1 }
 0x144   :  { %v7883_v13 = vpop.f32.mrf.mxu0  ;;  %v3266_v15 = vsel %vm3243_vm2, %v3263_v7, %v3265_v8  ;;  %v3264_v16 = vsel %vm3243_vm2, %v3261_v9, %v3263_v7  ;;  %v3262_v32 = vsel %vm3243_vm2, %v3259_v49, %v3261_v9  ;;  %v3271_v45 = vrot.slane %v7874_v3, 3 }
 0x145   :  { %v1539_v14 = vrot.slane %v7883_v13, 1  ;;  %v2403_v20 = vrot.slane %v7883_v13, 2  ;;  %v3267_v23 = vrot.slane %v7883_v13, 3 }
 0x146   :  { %3531 = vrot.lane.b32.xlu0 %v3246_v17, %s7653_s9  ;;  %3537 = vrot.lane.b32.xlu1 %v3252_v18, %s7653_s9  ;;  %v7430_v17 = vld [vmem:[#allocation5 + $0x120] sm:$0xff]   ;;  %v1534_v18 = vsel %vm1515_vm1, %v1531_v34, %v1533_v59 }
 0x147   :  { %v1540_v19 = vsel %vm1515_vm1, %v1537_v57, %v1539_v14  ;;  %7170 = vmatprep.mubr.bf16.mxu0 %v7430_v17  ;;  %v2404_v26 = vsel %vm2379_vm0, %v2401_v1, %v2403_v20  ;;  %v3268_v34 = vsel %vm3243_vm2, %v3265_v8, %v3267_v23  ;;  %v7437_v1 = vld [vmem:[#allocation5 + $0x158] sm:$0xff]  }
 0x14a   :  { %1815 = vrot.lane.b32.xlu0 %v1530_v21, %s7652_s7  ;;  %1813 = vrot.lane.b32.xlu1 %v1528_v22, %s7652_s7  ;;  %v7431_v21 = vld [vmem:[#allocation5 + $0x128] sm:$0xff]   ;;  %v7899_v22 = vpop.f32.mrf.mxu0 }
 0x14b   :  { %7171 = vmatmul.mubr.bf16.gmra.mxu0 %v7431_v21  ;;  %v2409_v41 = vrot.slane %v7899_v22, 2  ;;  %v3273_v49 = vrot.slane %v7899_v22, 3 }
 0x14c   :  { %v7907_v28 = vpop.f32.mrf.mxu0  ;;  %7174 = vmatprep.mubr.bf16.mxu0 %v7432_v29 }
 0x14d   :  { %v3274_v59 = vsel %vm3243_vm2, %v3271_v45, %v3273_v49 }
 0x14e   :  { %2679 = vrot.lane.b32.xlu0 %v2394_v30, %s7644_s22  ;;  %2677 = vrot.lane.b32.xlu1 %v2392_v31, %s7644_s22  ;;  %v1545_v30 = vrot.slane %v7899_v22, 1  ;;  %v1541_v31 = vrot.slane %v7907_v28, 1 }
 0x150   :  { %v1546_v37 = vsel %vm1515_vm1, %v1543_v27, %v1545_v30  ;;  %v1544_v40 = vsel %vm1515_vm1, %v1541_v31, %v1543_v27  ;;  %v1542_v62 = vsel %vm1515_vm1, %v1539_v14, %v1541_v31 }
 0x152   :  { %3543 = vrot.lane.b32.xlu0 %v3258_v35, %s7653_s9  ;;  %3541 = vrot.lane.b32.xlu1 %v3256_v36, %s7653_s9  ;;  %v7433_v35 = vld [vmem:[#allocation5 + $0x138] sm:$0xff]   ;;  %v2407_v36 = vrot.slane %v7874_v3, 2 }
 0x153   :  { %7175 = vmatmul.mubr.bf16.gmra.mxu0 %v7433_v35 }
 0x154   :  { %7178 = vmatprep.mubr.bf16.mxu0 %v7434_v46 }
 0x156   :  { %1811 = vrot.lane.b32.xlu0 %v1526_v43, %s7652_s7  ;;  %1817 = vrot.lane.b32.xlu1 %v1532_v44, %s7652_s7  ;;  %v2405_v43 = vrot.slane %v7907_v28, 2  ;;  %v7924_v44 = vpop.f32.mrf.mxu0 }
 0x157   :  { %v1551_v8 = vrot.slane %v7924_v44, 1  ;;  %v2415_v17 = vrot.slane %v7924_v44, 2 }
 0x158   :  { %v2408_v53 = vsel %vm2379_vm0, %v2405_v43, %v2407_v36  ;;  %v7933_v55 = vpop.f32.mrf.mxu0  ;;  %v2406_v6 = vsel %vm2379_vm0, %v2403_v20, %v2405_v43 }
 0x159   :  { %v1547_v57 = vrot.slane %v7933_v55, 1  ;;  %v3275_v5 = vrot.slane %v7933_v55, 3 }
 0x15a   :  { %2675 = vrot.lane.b32.xlu0 %v2390_v50, %s7644_s22  ;;  %2681 = vrot.lane.b32.xlu1 %v2396_v51, %s7644_s22  ;;  %v3269_v50 = vrot.slane %v7907_v28, 3  ;;  %v2410_v51 = vsel %vm2379_vm0, %v2407_v36, %v2409_v41  ;;  %v7947_v2 = vpop.f32.mrf.mxu0 }
 0x15b   :  { %7179 = vmatmul.mubr.bf16.gmra.mxu0 %v7435_v54  ;;  %v2417_v21 = vrot.slane %v7947_v2, 2  ;;  %v3281_v27 = vrot.slane %v7947_v2, 3 }
 0x15c   :  { %v7955_v9 = vpop.f32.mrf.mxu0 }
 0x15d   :  { %v1549_v14 = vrot.slane %v7955_v9, 1  ;;  %v3277_v29 = vrot.slane %v7955_v9, 3 }
 0x15e   :  { %3539 = vrot.lane.b32.xlu0 %v3254_v60, %s7653_s9  ;;  %3545 = vrot.lane.b32.xlu1 %v3260_v61, %s7653_s9  ;;  %v3272_v60 = vsel %vm3243_vm2, %v3269_v50, %v3271_v45  ;;  %v7436_v61 = vld [vmem:[#allocation5 + $0x150] sm:$0xff]  }
 0x15f   :  { %7182 = vmatprep.mubr.bf16.mxu0 %v7436_v61  ;;  %v1552_v20 = vsel %vm1515_vm1, %v1549_v14, %v1551_v8 }
 0x162   :  { %1823 = vrot.lane.b32.xlu0 %v1538_v63, %s7652_s7  ;;  %1821 = vrot.lane.b32.xlu1 %v1536_v0, %s7652_s7  ;;  %v1548_v63 = vsel %vm1515_vm1, %v1545_v30, %v1547_v57  ;;  %v2411_v0 = vrot.slane %v7933_v55, 2  ;;  %v2418_v30 = vsel %vm2379_vm0, %v2415_v17, %v2417_v21 }
 0x163   :  { %7183 = vmatmul.mubr.bf16.gmra.mxu0 %v7437_v1 }
 0x164   :  { %v2412_v7 = vsel %vm2379_vm0, %v2409_v41, %v2411_v0 }
 0x166   :  { %2687 = vrot.lane.b32.xlu0 %v2402_v10, %s7644_s22  ;;  %2685 = vrot.lane.b32.xlu1 %v2400_v12, %s7644_s22  ;;  %v7438_v10 = vld [vmem:[#allocation10 + $0x8] sm:$0xff]   ;;  %v1553_v12 = vrot.slane %v7947_v2, 1 }
 0x167   :  { %7242 = vmatprep.subr.bf16.mxu1 %v7438_v10 }
 0x168   :  { %7243 = vmatpush3.bf16.msra.mxu1 %v7438_v10 }
 0x16a   :  { %3551 = vrot.lane.b32.xlu0 %v3266_v15, %s7653_s9  ;;  %3549 = vrot.lane.b32.xlu1 %v3264_v16, %s7653_s9  ;;  %v3270_v15 = vsel %vm3243_vm2, %v3267_v23, %v3269_v50  ;;  %v3276_v16 = vsel %vm3243_vm2, %v3273_v49, %v3275_v5  ;;  %v7970_v23 = vpop.f32.mrf.mxu0 }
 0x16e   :  { %1819 = vrot.lane.b32.xlu0 %v1534_v18, %s7652_s7  ;;  %1825 = vrot.lane.b32.xlu1 %v1540_v19, %s7652_s7  ;;  %v7439_v18 = vld [vmem:[#allocation10] sm:$0xff]   ;;  %v1554_v19 = vsel %vm1515_vm1, %v1551_v8, %v1553_v12 }
 0x16f   :  { %7244 = vmatprep.subr.bf16.mxu1 %v7439_v18 }
 0x170   :  { %7245 = vmatpush3.bf16.msra.mxu1 %v7439_v18 }
 0x172   :  { %2683 = vrot.lane.b32.xlu0 %v2398_v24, %s7644_s22  ;;  %2689 = vrot.lane.b32.xlu1 %v2404_v26, %s7644_s22  ;;  %v2413_v24 = vrot.slane %v7955_v9, 2  ;;  %v3279_v26 = vrot.slane %v7924_v44, 3 }
 0x174   :  { %v2416_v31 = vsel %vm2379_vm0, %v2413_v24, %v2415_v17  ;;  %v3282_v35 = vsel %vm3243_vm2, %v3279_v26, %v3281_v27  ;;  %v3280_v36 = vsel %vm3243_vm2, %v3277_v29, %v3279_v26  ;;  %v2414_v46 = vsel %vm2379_vm0, %v2411_v0, %v2413_v24  ;;  %v8019_v0 = vld [vmem:[%s11500_s2] ss:$0 sm:$0xff] }
 0x176   :  { %3547 = vrot.lane.b32.xlu0 %v3262_v32, %s7653_s9  ;;  %3553 = vrot.lane.b32.xlu1 %v3268_v34, %s7653_s9  ;;  %v7979_v32 = vpop.f32.mrf.mxu0 }
 0x177   :  { %v1555_v34 = vrot.slane %v7979_v32, 1  ;;  %v2419_v41 = vrot.slane %v7979_v32, 2  ;;  %v3283_v45 = vrot.slane %v7979_v32, 3 }
 0x178   :  { %v7995_v43 = vpop.f32.mrf.mxu0 }
 0x179   :  { %v2420_v49 = vsel %vm2379_vm0, %v2417_v21, %v2419_v41  ;;  %v3289_v17 = vrot.slane %v7995_v43, 3 }
 0x17a   :  { %1831 = vrot.lane.b32.xlu0 %v1546_v37, %s7652_s7  ;;  %1829 = vrot.lane.b32.xlu1 %v1544_v40, %s7652_s7  ;;  %v1550_v37 = vsel %vm1515_vm1, %v1547_v57, %v1549_v14  ;;  %v1556_v40 = vsel %vm1515_vm1, %v1553_v12, %v1555_v34  ;;  %v8004_v50 = vpop.f32.mrf.mxu0  ;;  %v3278_v57 = vsel %vm3243_vm2, %v3275_v5, %v3277_v29 }
 0x17b   :  { %v2421_v12 = vrot.slane %v8004_v50, 2 }
 0x17c   :  { %v8026_v14 = vpop.f32.mrf.mxu0 }
 0x17e   :  { %2695 = vrot.lane.b32.xlu0 %v2410_v51, %s7644_s22  ;;  %2693 = vrot.lane.b32.xlu1 %v2408_v53, %s7644_s22  ;;  %v1559_v51 = vrot.slane %v7970_v23, 1 }
 0x182   :  { %3559 = vrot.lane.b32.xlu0 %v3274_v59, %s7653_s9  ;;  %3557 = vrot.lane.b32.xlu1 %v3272_v60, %s7653_s9  ;;  %v1561_v59 = vrot.slane %v7995_v43, 1  ;;  %v1557_v60 = vrot.slane %v8004_v50, 1 }
 0x184   :  { %v1562_v8 = vsel %vm1515_vm1, %v1559_v51, %v1561_v59  ;;  %v1560_v10 = vsel %vm1515_vm1, %v1557_v60, %v1559_v51  ;;  %v1558_v51 = vsel %vm1515_vm1, %v1555_v34, %v1557_v60 }
 0x186   :  { %1827 = vrot.lane.b32.xlu0 %v1542_v62, %s7652_s7  ;;  %1833 = vrot.lane.b32.xlu1 %v1548_v63, %s7652_s7  ;;  %v3284_v62 = vsel %vm3243_vm2, %v3281_v27, %v3283_v45  ;;  %v8036_v27 = vpop.f32.mrf.mxu0 }
 0x18a   :  { %2691 = vrot.lane.b32.xlu0 %v2406_v6, %s7644_s22  ;;  %2697 = vrot.lane.b32.xlu1 %v2412_v7, %s7644_s22  ;;  %v2423_v6 = vrot.slane %v7970_v23, 2 }
 0x18c   :  { %v2424_v26 = vsel %vm2379_vm0, %v2421_v12, %v2423_v6 }
 0x18e   :  { %3555 = vrot.lane.b32.xlu0 %v3270_v15, %s7653_s9  ;;  %3561 = vrot.lane.b32.xlu1 %v3276_v16, %s7653_s9  ;;  %v3287_v16 = vrot.slane %v7970_v23, 3 }
 0x192   :  { %1839 = vrot.lane.b32.xlu0 %v1554_v19, %s7652_s7  ;;  %1837 = vrot.lane.b32.xlu1 %v1552_v20, %s7652_s7  ;;  %v3285_v20 = vrot.slane %v8004_v50, 3 }
 0x196   :  { %2703 = vrot.lane.b32.xlu0 %v2418_v30, %s7644_s22  ;;  %2701 = vrot.lane.b32.xlu1 %v2416_v31, %s7644_s22  ;;  %v1563_v31 = vrot.slane %v8036_v27, 1 }
 0x19a   :  { %3567 = vrot.lane.b32.xlu0 %v3282_v35, %s7653_s9  ;;  %3565 = vrot.lane.b32.xlu1 %v3280_v36, %s7653_s9  ;;  %v3290_v36 = vsel %vm3243_vm2, %v3287_v16, %v3289_v17 }
 0x19e   :  { %1835 = vrot.lane.b32.xlu0 %v1550_v37, %s7652_s7  ;;  %1841 = vrot.lane.b32.xlu1 %v1556_v40, %s7652_s7  ;;  %v3288_v37 = vsel %vm3243_vm2, %v3285_v20, %v3287_v16 }
 0x1a2   :  { %2699 = vrot.lane.b32.xlu0 %v2414_v46, %s7644_s22  ;;  %2705 = vrot.lane.b32.xlu1 %v2420_v49, %s7644_s22 }
 0x1a4   :  { %v2672_v53 = vpop.permute.xlu0 %2671  ;;  %v1808_v54 = vpop.permute.xlu1 %1807 }
 0x1a5   :  { %v2237_v61 = vadd.f32 %v7751_v38, %v1808_v54  ;;  %v2425_v38 = vrot.slane %v7995_v43, 2 }
 0x1a6   :  { %3563 = vrot.lane.b32.xlu0 %v3278_v57, %s7653_s9  ;;  %3569 = vrot.lane.b32.xlu1 %v3284_v62, %s7653_s9  ;;  %v8058_v62 = vpop.f32.mrf.mxu0 }
 0x1a7   :  { %v3101_v63 = vadd.f32 %v2672_v53, %v2237_v61  ;;  %v2426_v24 = vsel %vm2379_vm0, %v2423_v6, %v2425_v38  ;;  %v2427_v53 = vrot.slane %v8036_v27, 2  ;;  %v1564_v61 = vsel %vm1515_vm1, %v1561_v59, %v1563_v31 }
 0x1a8   :  { %v3536_v1 = vpop.permute.xlu0 %3535  ;;  %v2670_v5 = vpop.permute.xlu1 %2669 }
 0x1a9   :  { %v3965_v7 = vadd.f32 %v3536_v1, %v3101_v63  ;;  %v3291_v1 = vrot.slane %v8036_v27, 3 }
 0x1aa   :  { %1847 = vrot.lane.b32.xlu0 %v1562_v8, %s7652_s7  ;;  %1845 = vrot.lane.b32.xlu1 %v1560_v10, %s7652_s7  ;;  %v2428_v8 = vsel %vm2379_vm0, %v2425_v38, %v2427_v53  ;;  %v8070_v10 = vpop.f32.mrf.mxu0  ;;  %v3286_v38 = vsel %vm3243_vm2, %v3283_v45, %v3285_v20  ;;  %v2431_v20 = vrot.slane %v8026_v14, 2 }
 0x1ab   :  { %v4116_v15 = vadd.f32 %v8019_v0, %v3965_v7 }
 0x1ac   :  { %v3534_v18 = vpop.permute.xlu1 %3533  ;;  %v1804_v19 = vpop.permute.xlu0 %1803 }
 0x1ad   :  { %v4260_v21 = vmax.f32 %v4116_v15, 0.0  ;;  %v2235_v54 = vadd.f32 %v1804_v19, %v7753_v39 }
 0x1ae   :  { %2711 = vrot.lane.b32.xlu0 %v2426_v24, %s7644_s22  ;;  %2709 = vrot.lane.b32.xlu1 %v2424_v26, %s7644_s22 }
 0x1af   :  { %4405 = vst.msk [vmem:[#allocation2 + $0x10] sm:$0xff] %vm4402_vm3, %v4260_v21  ;;  %v1565_v21 = vrot.slane %v8070_v10, 1 }
 0x1b0   :  { %v1806_v29 = vpop.permute.xlu0 %1805  ;;  %v1810_v30 = vpop.permute.xlu1 %1809 }
 0x1b1   :  { %v2236_v35 = vadd.f32 %v1806_v29, %v7761_v47  ;;  %v2238_v57 = vadd.f32 %v7755_v42, %v1810_v30  ;;  %v2422_v42 = vsel %vm2379_vm0, %v2419_v41, %v2421_v12  ;;  %v1567_v41 = vrot.slane %v8026_v14, 1 }
 0x1b2   :  { %3575 = vrot.lane.b32.xlu0 %v3290_v36, %s7653_s9  ;;  %3573 = vrot.lane.b32.xlu1 %v3288_v37, %s7653_s9  ;;  %v1569_v12 = vrot.slane %v8058_v62, 1  ;;  %v3292_v29 = vsel %vm3243_vm2, %v3289_v17, %v3291_v1  ;;  %v2433_v36 = vrot.slane %v8058_v62, 2 }
 0x1b3   :  { %v3100_v40 = vadd.f32 %v2670_v5, %v2236_v35 }
 0x1b4   :  { %v2668_v46 = vpop.permute.xlu0 %2667  ;;  %v2674_v49 = vpop.permute.xlu1 %2673  ;;  %v1570_v45 = vsel %vm1515_vm1, %v1567_v41, %v1569_v12 }
 0x1b5   :  { %v3964_v47 = vadd.f32 %v3534_v18, %v3100_v40  ;;  %v3099_v34 = vadd.f32 %v2668_v46, %v2235_v54  ;;  %v3102_v60 = vadd.f32 %v2674_v49, %v2238_v57  ;;  %v1568_v40 = vsel %vm1515_vm1, %v1565_v21, %v1567_v41  ;;  %v8095_v49 = vpop.f32.mrf.mxu0 }
 0x1b6   :  { %1843 = vrot.lane.b32.xlu0 %v1558_v51, %s7652_s7  ;;  %1849 = vrot.lane.b32.xlu1 %v1564_v61, %s7652_s7  ;;  %v2429_v46 = vrot.slane %v8070_v10, 2  ;;  %v3297_v57 = vrot.slane %v8058_v62, 3 }
 0x1b7   :  { %v4115_v63 = vadd.f32 %v8019_v0, %v3964_v47  ;;  %v3295_v47 = vrot.slane %v8026_v14, 3 }
 0x1b8   :  { %v3532_v39 = vpop.permute.xlu0 %3531  ;;  %v3538_v5 = vpop.permute.xlu1 %3537 }
 0x1b9   :  { %v4259_v6 = vmax.f32 %v4115_v63, 0.0  ;;  %v3963_v59 = vadd.f32 %v3532_v39, %v3099_v34  ;;  %v3966_v7 = vadd.f32 %v3538_v5, %v3102_v60  ;;  %v2434_v60 = vsel %vm2379_vm0, %v2431_v20, %v2433_v36  ;;  %v8104_v5 = vpop.f32.mrf.mxu0 }
 0x1ba   :  { %2707 = vrot.lane.b32.xlu0 %v2422_v42, %s7644_s22  ;;  %2713 = vrot.lane.b32.xlu1 %v2428_v8, %s7644_s22  ;;  %v2432_v39 = vsel %vm2379_vm0, %v2429_v46, %v2431_v20  ;;  %v3298_v8 = vsel %vm3243_vm2, %v3295_v47, %v3297_v57  ;;  %v7441_v20 = vld [vmem:[#allocation5 + $0x168] sm:$0xff]  }
 0x1bb   :  { %4404 = vst.msk [vmem:[#allocation2 + $0x8] sm:$0xff] %vm4402_vm3, %v4259_v6  ;;  %v4114_v15 = vadd.f32 %v8019_v0, %v3963_v59  ;;  %v4117_v16 = vadd.f32 %v8019_v0, %v3966_v7 }
 0x1bc   :  { %v1816_v18 = vpop.permute.xlu0 %1815  ;;  %v1814_v19 = vpop.permute.xlu1 %1813 }
 0x1bd   :  { %v4258_v24 = vmax.f32 %v4114_v15, 0.0  ;;  %v4261_v26 = vmax.f32 %v4117_v16, 0.0  ;;  %v2241_v37 = vadd.f32 %v7769_v52, %v1816_v18  ;;  %v2240_v17 = vadd.f32 %v1814_v19, %v7801_v11 }
 0x1be   :  { %3571 = vrot.lane.b32.xlu0 %v3286_v38, %s7653_s9  ;;  %3577 = vrot.lane.b32.xlu1 %v3292_v29, %s7653_s9  ;;  %v3293_v52 = vrot.slane %v8070_v10, 3  ;;  %v1571_v15 = vrot.slane %v8104_v5, 1 }
 0x1bf   :  { %4403 = vst.msk [vmem:[#allocation2] sm:$0xff] %vm4402_vm3, %v4258_v24  ;;  %4406 = vst.msk [vmem:[#allocation2 + $0x18] sm:$0xff] %vm4402_vm3, %v4261_v26  ;;  %v1566_v24 = vsel %vm1515_vm1, %v1563_v31, %v1565_v21  ;;  %v7440_v26 = vld [vmem:[#allocation5 + $0x160] sm:$0xff]  }
 0x1c0   :  { %v2680_v30 = vpop.permute.xlu0 %2679  ;;  %v2678_v35 = vpop.permute.xlu1 %2677  ;;  %v3296_v18 = vsel %vm3243_vm2, %v3293_v52, %v3295_v47  ;;  %7186 = vmatprep.mubr.bf16.mxu0 %v7440_v26 }
 0x1c1   :  { %v3105_v51 = vadd.f32 %v2680_v30, %v2241_v37  ;;  %v3104_v54 = vadd.f32 %v2678_v35, %v2240_v17  ;;  %v1572_v35 = vsel %vm1515_vm1, %v1569_v12, %v1571_v15  ;;  %v8128_v37 = vpop.f32.mrf.mxu0  ;;  %7187 = vmatmul.mubr.bf16.gmra.mxu0 %v7441_v20  ;;  %v3299_v12 = vrot.slane %v8104_v5, 3 }
 0x1c2   :  { %1855 = vrot.lane.b32.xlu0 %v1570_v45, %s7652_s7  ;;  %1853 = vrot.lane.b32.xlu1 %v1568_v40, %s7652_s7  ;;  %v2435_v45 = vrot.slane %v8104_v5, 2 }
 0x1c3   :  { %v8139_v47 = vpop.f32.mrf.mxu0 }
 0x1c4   :  { %v3544_v61 = vpop.permute.xlu0 %3543  ;;  %v3542_v11 = vpop.permute.xlu1 %3541 }
 0x1c5   :  { %v3969_v63 = vadd.f32 %v3544_v61, %v3105_v51  ;;  %v3968_v34 = vadd.f32 %v3542_v11, %v3104_v54  ;;  %v2436_v54 = vsel %vm2379_vm0, %v2433_v36, %v2435_v45  ;;  %v3294_v36 = vsel %vm3243_vm2, %v3291_v1, %v3293_v52  ;;  %v8169_v26 = vpop.f32.mrf.mxu0 }
 0x1c6   :  { %2719 = vrot.lane.b32.xlu0 %v2434_v60, %s7644_s22  ;;  %2717 = vrot.lane.b32.xlu1 %v2432_v39, %s7644_s22  ;;  %v7442_v60 = vld [vmem:[#allocation5 + $0x170] sm:$0xff]   ;;  %v1573_v39 = vrot.slane %v8139_v47, 1 }
 0x1c7   :  { %v4120_v42 = vadd.f32 %v8019_v0, %v3969_v63  ;;  %v4119_v6 = vadd.f32 %v8019_v0, %v3968_v34  ;;  %7190 = vmatprep.mubr.bf16.mxu0 %v7442_v60  ;;  %v4728_v20 = vld [vmem:[#allocation2 + $0x2] ss:$4 sm:$0xff] }
 0x1c8   :  { %v1812_v59 = vpop.permute.xlu0 %1811  ;;  %v1818_v7 = vpop.permute.xlu1 %1817 }
 0x1c9   :  { %v4264_v16 = vmax.f32 %v4120_v42, 0.0  ;;  %v4263_v41 = vmax.f32 %v4119_v6, 0.0  ;;  %v2239_v29 = vadd.f32 %v1812_v59, %v7776_v58  ;;  %v2242_v30 = vadd.f32 %v7791_v4, %v1818_v7  ;;  %v7443_v7 = vld [vmem:[#allocation5 + $0x178] sm:$0xff]  }
 0x1ca   :  { %3583 = vrot.lane.b32.xlu0 %v3298_v8, %s7653_s9  ;;  %3581 = vrot.lane.b32.xlu1 %v3296_v18, %s7653_s9  ;;  %v2430_v4 = vsel %vm2379_vm0, %v2427_v53, %v2429_v46  ;;  %v1575_v53 = vrot.slane %v8095_v49, 1  ;;  %v1577_v46 = vrot.slane %v8128_v37, 1  ;;  %v3300_v59 = vsel %vm3243_vm2, %v3297_v57, %v3299_v12 }
 0x1cb   :  { %4409 = vst.msk [vmem:[#allocation2 + $0x30] sm:$0xff] %vm4402_vm3, %v4264_v16  ;;  %4408 = vst.msk [vmem:[#allocation2 + $0x28] sm:$0xff] %vm4402_vm3, %v4263_v41  ;;  %v2439_v16 = vrot.slane %v8095_v49, 2  ;;  %v2441_v57 = vrot.slane %v8128_v37, 2  ;;  %7191 = vmatmul.mubr.bf16.gmra.mxu0 %v7443_v7 }
 0x1cc   :  { %v2676_v19 = vpop.permute.xlu0 %2675  ;;  %v2682_v38 = vpop.permute.xlu1 %2681  ;;  %v1578_v8 = vsel %vm1515_vm1, %v1575_v53, %v1577_v46 }
 0x1cd   :  { %v3103_v17 = vadd.f32 %v2676_v19, %v2239_v29  ;;  %v3106_v31 = vadd.f32 %v2682_v38, %v2242_v30  ;;  %v1576_v19 = vsel %vm1515_vm1, %v1573_v39, %v1575_v53  ;;  %v2437_v38 = vrot.slane %v8139_v47, 2 }
 0x1ce   :  { %1851 = vrot.lane.b32.xlu0 %v1566_v24, %s7652_s7  ;;  %1857 = vrot.lane.b32.xlu1 %v1572_v35, %s7652_s7  ;;  %v4548_v24 = vld [vmem:[#allocation2] ss:$4 sm:$0xff]  ;;  %v4620_v35 = vld [vmem:[#allocation2 + $0x1] ss:$4 sm:$0xff] }
 0x1d0   :  { %v3540_v21 = vpop.permute.xlu0 %3539  ;;  %v3546_v58 = vpop.permute.xlu1 %3545 }
 0x1d1   :  { %v3967_v40 = vadd.f32 %v3540_v21, %v3103_v17  ;;  %v3970_v51 = vadd.f32 %v3546_v58, %v3106_v31  ;;  %v3305_v17 = vrot.slane %v8128_v37, 3  ;;  %v3301_v31 = vrot.slane %v8139_v47, 3 }
 0x1d2   :  { %2715 = vrot.lane.b32.xlu0 %v2430_v4, %s7644_s22  ;;  %2721 = vrot.lane.b32.xlu1 %v2436_v54, %s7644_s22  ;;  %v7444_v4 = vld [vmem:[#allocation5 + $0x180] sm:$0xff]   ;;  %v2442_v54 = vsel %vm2379_vm0, %v2439_v16, %v2441_v57 }
 0x1d3   :  { %v4118_v61 = vadd.f32 %v8019_v0, %v3967_v40  ;;  %v4121_v11 = vadd.f32 %v8019_v0, %v3970_v51  ;;  %7194 = vmatprep.mubr.bf16.mxu0 %v7444_v4 }
 0x1d4   :  { %v1824_v63 = vpop.permute.xlu0 %1823  ;;  %v1822_v34 = vpop.permute.xlu1 %1821 }
 0x1d5   :  { %v4262_v42 = vmax.f32 %v4118_v61, 0.0  ;;  %v4265_v6 = vmax.f32 %v4121_v11, 0.0  ;;  %v2245_v41 = vadd.f32 %v7820_v25, %v1824_v63  ;;  %v2244_v18 = vadd.f32 %v1822_v34, %v7857_v56  ;;  %v4800_v25 = vld [vmem:[#allocation2 + $0x3] ss:$4 sm:$0xff] }
 0x1d6   :  { %3579 = vrot.lane.b32.xlu0 %v3294_v36, %s7653_s9  ;;  %3585 = vrot.lane.b32.xlu1 %v3300_v59, %s7653_s9  ;;  %v3303_v56 = vrot.slane %v8095_v49, 3  ;;  %v2440_v61 = vsel %vm2379_vm0, %v2437_v38, %v2439_v16  ;;  %v7445_v11 = vld [vmem:[#allocation5 + $0x188] sm:$0xff]   ;;  %v4691_v34 = vmax.f32 %v4548_v24, %v4620_v35  ;;  %v4871_v60 = vmax.f32 %v4728_v20, %v4800_v25 }
 0x1d7   :  { %4407 = vst.msk [vmem:[#allocation2 + $0x20] sm:$0xff] %vm4402_vm3, %v4262_v42  ;;  %4410 = vst.msk [vmem:[#allocation2 + $0x38] sm:$0xff] %vm4402_vm3, %v4265_v6  ;;  %v8182_v42 = vpop.f32.mrf.mxu0  ;;  %7195 = vmatmul.mubr.bf16.gmra.mxu0 %v7445_v11 }
 0x1d8   :  { %v2688_v1 = vpop.permute.xlu0 %2687  ;;  %v2686_v52 = vpop.permute.xlu1 %2685  ;;  %v3304_v24 = vsel %vm3243_vm2, %v3301_v31, %v3303_v56 }
 0x1d9   :  { %v3109_v29 = vadd.f32 %v2688_v1, %v2245_v41  ;;  %v3108_v30 = vadd.f32 %v2686_v52, %v2244_v18 }
 0x1da   :  { %1863 = vrot.lane.b32.xlu0 %v1578_v8, %s7652_s7  ;;  %1861 = vrot.lane.b32.xlu1 %v1576_v19, %s7652_s7  ;;  %v3306_v19 = vsel %vm3243_vm2, %v3303_v56, %v3305_v17 }
 0x1dc   :  { %v3552_v21 = vpop.permute.xlu0 %3551  ;;  %v3550_v58 = vpop.permute.xlu1 %3549 }
 0x1dd   :  { %v3973_v40 = vadd.f32 %v3552_v21, %v3109_v29  ;;  %v3972_v51 = vadd.f32 %v3550_v58, %v3108_v30  ;;  %v1579_v29 = vrot.slane %v8182_v42, 1  ;;  %v4907_v30 = vmax.f32 %v4691_v34, %v4871_v60  ;;  %v7446_v58 = vld [vmem:[#allocation5 + $0x190] sm:$0xff]  }
 0x1de   :  { %2727 = vrot.lane.b32.xlu0 %v2442_v54, %s7644_s22  ;;  %2725 = vrot.lane.b32.xlu1 %v2440_v61, %s7644_s22  ;;  %v4550_v53 = vld [vmem:[#allocation2 + $0x20] ss:$4 sm:$0xff]  ;;  %v4622_v63 = vld [vmem:[#allocation2 + $0x21] ss:$4 sm:$0xff]  ;;  %v4730_v36 = vld [vmem:[#allocation2 + $0x22] ss:$4 sm:$0xff] }
 0x1df   :  { %v4124_v6 = vadd.f32 %v8019_v0, %v3973_v40  ;;  %v4123_v59 = vadd.f32 %v8019_v0, %v3972_v51  ;;  %v4692_v7 = vmax.f32 %v4550_v53, %v4622_v63  ;;  %v4802_v1 = vld [vmem:[#allocation2 + $0x23] ss:$4 sm:$0xff]  ;;  %v1574_v40 = vsel %vm1515_vm1, %v1571_v15, %v1573_v39  ;;  %7198 = vmatprep.mubr.bf16.mxu0 %v7446_v58  ;;  %v8213_v39 = vpop.f32.mrf.mxu0 }
 0x1e0   :  { %v1820_v52 = vpop.permute.xlu0 %1819  ;;  %v1826_v8 = vpop.permute.xlu1 %1825  ;;  %v4872_v16 = vmax.f32 %v4730_v36, %v4802_v1  ;;  %v7447_v51 = vld [vmem:[#allocation5 + $0x198] sm:$0xff]   ;;  %v1580_v54 = vsel %vm1515_vm1, %v1577_v46, %v1579_v29  ;;  %v2438_v46 = vsel %vm2379_vm0, %v2435_v45, %v2437_v38  ;;  %v3307_v34 = vrot.slane %v8182_v42, 3 }
 0x1e1   :  { %v4268_v41 = vmax.f32 %v4124_v6, 0.0  ;;  %v4267_v18 = vmax.f32 %v4123_v59, 0.0  ;;  %v2243_v4 = vadd.f32 %v1820_v52, %v7829_v33  ;;  %v2246_v56 = vadd.f32 %v7847_v48, %v1826_v8  ;;  %7199 = vmatmul.mubr.bf16.gmra.mxu0 %v7447_v51  ;;  %v8232_v1 = vpop.f32.mrf.mxu0 }
 0x1e2   :  { %3591 = vrot.lane.b32.xlu0 %v3306_v19, %s7653_s9  ;;  %3589 = vrot.lane.b32.xlu1 %v3304_v24, %s7653_s9  ;;  %v4908_v35 = vmax.f32 %v4692_v7, %v4872_v16  ;;  %v2443_v33 = vrot.slane %v8182_v42, 2  ;;  %v1583_v59 = vrot.slane %v8169_v26, 1  ;;  %v1585_v38 = vrot.slane %v8213_v39, 1 }
 0x1e3   :  { %4413 = vst.msk [vmem:[#allocation2 + $0x50] sm:$0xff] %vm4402_vm3, %v4268_v41  ;;  %4412 = vst.msk [vmem:[#allocation2 + $0x48] sm:$0xff] %vm4402_vm3, %v4267_v18  ;;  %v1581_v16 = vrot.slane %v8232_v1, 1  ;;  %v3308_v41 = vsel %vm3243_vm2, %v3305_v17, %v3307_v34  ;;  %v2447_v18 = vrot.slane %v8169_v26, 2  ;;  %v2445_v17 = vrot.slane %v8232_v1, 2 }
 0x1e4   :  { %v2684_v20 = vpop.permute.xlu0 %2683  ;;  %v2690_v25 = vpop.permute.xlu1 %2689  ;;  %v4943_v21 = vpack.c.bf16 %v4908_v35, %v4907_v30  ;;  %v2444_v36 = vsel %vm2379_vm0, %v2441_v57, %v2443_v33  ;;  %v3302_v57 = vsel %vm3243_vm2, %v3299_v12, %v3301_v31  ;;  %v2449_v31 = vrot.slane %v8213_v39, 2 }
 0x1e5   :  { %v3107_v48 = vadd.f32 %v2684_v20, %v2243_v4  ;;  %v3110_v61 = vadd.f32 %v2690_v25, %v2246_v56  ;;  %v1586_v35 = vsel %vm1515_vm1, %v1583_v59, %v1585_v38  ;;  %v1584_v20 = vsel %vm1515_vm1, %v1581_v16, %v1583_v59  ;;  %v8257_v25 = vpop.f32.mrf.mxu0 }
 0x1e6   :  { %7246 = vmatprep.mubr.msk.bf16.mxu1 %vm4402_vm3, %v4943_v21  ;;  %1859 = vrot.lane.b32.xlu0 %v1574_v40, %s7652_s7  ;;  %v3311_v4 = vrot.slane %v8169_v26, 3 }
 0x1e7   :  { %1865 = vrot.lane.b32.xlu1 %v1580_v54, %s7652_s7  ;;  %v2450_v54 = vsel %vm2379_vm0, %v2447_v18, %v2449_v31 }
 0x1e8   :  { %v3548_v11 = vpop.permute.xlu0 %3547  ;;  %v3554_v15 = vpop.permute.xlu1 %3553 }
 0x1e9   :  { %v3971_v53 = vadd.f32 %v3548_v11, %v3107_v48  ;;  %v3974_v63 = vadd.f32 %v3554_v15, %v3110_v61  ;;  %v3309_v48 = vrot.slane %v8232_v1, 3  ;;  %v2448_v61 = vsel %vm2379_vm0, %v2445_v17, %v2447_v18  ;;  %v8266_v11 = vpop.f32.mrf.mxu0 }
 0x1ea   :  { %2723 = vrot.lane.b32.xlu0 %v2438_v46, %s7644_s22  ;;  %v1587_v59 = vrot.slane %v8266_v11, 1  ;;  %v2451_v18 = vrot.slane %v8266_v11, 2 }
 0x1eb   :  { %v4122_v60 = vadd.f32 %v8019_v0, %v3971_v53  ;;  %v4125_v6 = vadd.f32 %v8019_v0, %v3974_v63  ;;  %2729 = vrot.lane.b32.xlu1 %v2444_v36, %s7644_s22 }
 0x1ec   :  { %v1832_v7 = vpop.permute.xlu0 %1831  ;;  %v1830_v45 = vpop.permute.xlu1 %1829 }
 0x1ed   :  { %v4266_v52 = vmax.f32 %v4122_v60, 0.0  ;;  %v4269_v8 = vmax.f32 %v4125_v6, 0.0  ;;  %v2249_v24 = vadd.f32 %v7874_v3, %v1832_v7  ;;  %v2248_v30 = vadd.f32 %v1830_v45, %v7907_v28 }
 0x1ee   :  { %3587 = vrot.lane.b32.xlu0 %v3302_v57, %s7653_s9  ;;  %v3313_v28 = vrot.slane %v8213_v39, 3  ;;  %v3312_v7 = vsel %vm3243_vm2, %v3309_v48, %v3311_v4 }
 0x1ef   :  { %4411 = vst.msk [vmem:[#allocation2 + $0x40] sm:$0xff] %vm4402_vm3, %v4266_v52  ;;  %4414 = vst.msk [vmem:[#allocation2 + $0x58] sm:$0xff] %vm4402_vm3, %v4269_v8  ;;  %3593 = vrot.lane.b32.xlu1 %v3308_v41, %s7653_s9  ;;  %v1582_v41 = vsel %vm1515_vm1, %v1579_v29, %v1581_v16  ;;  %v2446_v29 = vsel %vm2379_vm0, %v2443_v33, %v2445_v17  ;;  %v3315_v16 = vrot.slane %v8266_v11, 3 }
 0x1f0   :  { %v2696_v19 = vpop.permute.xlu0 %2695  ;;  %v2694_v12 = vpop.permute.xlu1 %2693  ;;  %v3314_v6 = vsel %vm3243_vm2, %v3311_v4, %v3313_v28  ;;  %v1591_v4 = vrot.slane %v8257_v25, 1 }
 0x1f1   :  { %v3113_v21 = vadd.f32 %v2696_v19, %v2249_v24  ;;  %v3112_v58 = vadd.f32 %v2694_v12, %v2248_v30  ;;  %v1588_v19 = vsel %vm1515_vm1, %v1585_v38, %v1587_v59  ;;  %v2452_v38 = vsel %vm2379_vm0, %v2449_v31, %v2451_v18 }
 0x1f2   :  { %1871 = vrot.lane.b32.xlu0 %v1586_v35, %s7652_s7  ;;  %v8289_v35 = vpop.f32.mrf.mxu0  ;;  %v3310_v31 = vsel %vm3243_vm2, %v3307_v34, %v3309_v48 }
 0x1f3   :  { %1869 = vrot.lane.b32.xlu1 %v1584_v20, %s7652_s7  ;;  %v1593_v33 = vrot.slane %v8289_v35, 1  ;;  %v2457_v34 = vrot.slane %v8289_v35, 2 }
 0x1f4   :  { %v3560_v56 = vpop.permute.xlu0 %3559  ;;  %v3558_v3 = vpop.permute.xlu1 %3557 }
 0x1f5   :  { %v3977_v40 = vadd.f32 %v3560_v56, %v3113_v21  ;;  %v3976_v51 = vadd.f32 %v3558_v3, %v3112_v58  ;;  %v8304_v17 = vpop.f32.mrf.mxu0 }
 0x1f6   :  { %2735 = vrot.lane.b32.xlu0 %v2450_v54, %s7644_s22  ;;  %v1589_v54 = vrot.slane %v8304_v17, 1 }
 0x1f7   :  { %v4128_v15 = vadd.f32 %v8019_v0, %v3977_v40  ;;  %v4127_v53 = vadd.f32 %v8019_v0, %v3976_v51  ;;  %2733 = vrot.lane.b32.xlu1 %v2448_v61, %s7644_s22  ;;  %v3316_v61 = vsel %vm3243_vm2, %v3313_v28, %v3315_v16  ;;  %v1594_v28 = vsel %vm1515_vm1, %v1591_v4, %v1593_v33 }
 0x1f8   :  { %v1828_v63 = vpop.permute.xlu0 %1827  ;;  %v1834_v46 = vpop.permute.xlu1 %1833 }
 0x1f9   :  { %v4272_v36 = vmax.f32 %v4128_v15, 0.0  ;;  %v4271_v60 = vmax.f32 %v4127_v53, 0.0  ;;  %v2247_v8 = vadd.f32 %v1828_v63, %v7883_v13  ;;  %v2250_v57 = vadd.f32 %v7899_v22, %v1834_v46 }
 0x1fa   :  { %3599 = vrot.lane.b32.xlu0 %v3314_v6, %s7653_s9  ;;  %v2455_v15 = vrot.slane %v8257_v25, 2  ;;  %v4552_v6 = vld [vmem:[#allocation2 + $0x40] ss:$4 sm:$0xff] }
 0x1fb   :  { %4417 = vst.msk [vmem:[#allocation2 + $0x70] sm:$0xff] %vm4402_vm3, %v4272_v36  ;;  %4416 = vst.msk [vmem:[#allocation2 + $0x68] sm:$0xff] %vm4402_vm3, %v4271_v60  ;;  %3597 = vrot.lane.b32.xlu1 %v3312_v7, %s7653_s9  ;;  %v2453_v36 = vrot.slane %v8304_v17, 2  ;;  %v1592_v60 = vsel %vm1515_vm1, %v1589_v54, %v1591_v4  ;;  %v8329_v7 = vpop.f32.mrf.mxu0 }
 0x1fc   :  { %v2692_v45 = vpop.permute.xlu0 %2691  ;;  %v2698_v52 = vpop.permute.xlu1 %2697 }
 0x1fd   :  { %v3111_v12 = vadd.f32 %v2692_v45, %v2247_v8  ;;  %v3114_v24 = vadd.f32 %v2698_v52, %v2250_v57  ;;  %v4804_v8 = vld [vmem:[#allocation2 + $0x43] ss:$4 sm:$0xff]  ;;  %v3319_v57 = vrot.slane %v8257_v25, 3 }
 0x1fe   :  { %1867 = vrot.lane.b32.xlu0 %v1582_v41, %s7652_s7  ;;  %v3321_v41 = vrot.slane %v8289_v35, 3 }
 0x1ff   :  { %1873 = vrot.lane.b32.xlu1 %v1588_v19, %s7652_s7 }
 0x200   :  { %v3556_v30 = vpop.permute.xlu0 %3555  ;;  %v3562_v13 = vpop.permute.xlu1 %3561 }
 0x201   :  { %v3975_v22 = vadd.f32 %v3556_v30, %v3111_v12  ;;  %v3978_v20 = vadd.f32 %v3562_v13, %v3114_v24  ;;  %v3317_v24 = vrot.slane %v8304_v17, 3 }
 0x202   :  { %2731 = vrot.lane.b32.xlu0 %v2446_v29, %s7644_s22 }
 0x203   :  { %v4126_v21 = vadd.f32 %v8019_v0, %v3975_v22  ;;  %v4129_v58 = vadd.f32 %v8019_v0, %v3978_v20  ;;  %2737 = vrot.lane.b32.xlu1 %v2452_v38, %s7644_s22  ;;  %v2458_v22 = vsel %vm2379_vm0, %v2455_v15, %v2457_v34  ;;  %v2456_v20 = vsel %vm2379_vm0, %v2453_v36, %v2455_v15 }
 0x204   :  { %v1840_v56 = vpop.permute.xlu0 %1839  ;;  %v1838_v3 = vpop.permute.xlu1 %1837 }
 0x205   :  { %v4270_v40 = vmax.f32 %v4126_v21, 0.0  ;;  %v4273_v51 = vmax.f32 %v4129_v58, 0.0  ;;  %v2253_v48 = vadd.f32 %v7924_v44, %v1840_v56  ;;  %v2252_v46 = vadd.f32 %v1838_v3, %v7955_v9  ;;  %v4624_v44 = vld [vmem:[#allocation2 + $0x41] ss:$4 sm:$0xff]  ;;  %v4732_v9 = vld [vmem:[#allocation2 + $0x42] ss:$4 sm:$0xff]  ;;  %v8342_v56 = vpop.f32.mrf.mxu0 }
 0x206   :  { %3595 = vrot.lane.b32.xlu0 %v3310_v31, %s7653_s9  ;;  %v4693_v21 = vmax.f32 %v4552_v6, %v4624_v44  ;;  %v4873_v4 = vmax.f32 %v4732_v9, %v4804_v8 }
 0x207   :  { %4415 = vst.msk [vmem:[#allocation2 + $0x60] sm:$0xff] %vm4402_vm3, %v4270_v40  ;;  %4418 = vst.msk [vmem:[#allocation2 + $0x78] sm:$0xff] %vm4402_vm3, %v4273_v51  ;;  %3601 = vrot.lane.b32.xlu1 %v3316_v61, %s7653_s9 }
 0x208   :  { %v2704_v53 = vpop.permute.xlu0 %2703  ;;  %v2702_v63 = vpop.permute.xlu1 %2701  ;;  %v4909_v6 = vmax.f32 %v4693_v21, %v4873_v4  ;;  %v1599_v4 = vrot.slane %v8329_v7, 1 }
 0x209   :  { %v3117_v45 = vadd.f32 %v2704_v53, %v2253_v48  ;;  %v3116_v52 = vadd.f32 %v2702_v63, %v2252_v46  ;;  %v3322_v46 = vsel %vm3243_vm2, %v3319_v57, %v3321_v41 }
 0x20a   :  { %1879 = vrot.lane.b32.xlu0 %v1594_v28, %s7652_s7  ;;  %v1595_v28 = vrot.slane %v8342_v56, 1 }
 0x20b   :  { %1877 = vrot.lane.b32.xlu1 %v1592_v60, %s7652_s7  ;;  %v3320_v60 = vsel %vm3243_vm2, %v3317_v24, %v3319_v57  ;;  %v1590_v57 = vsel %vm1515_vm1, %v1587_v59, %v1589_v54 }
 0x20c   :  { %v3568_v19 = vpop.permute.xlu0 %3567  ;;  %v3566_v12 = vpop.permute.xlu1 %3565 }
 0x20d   :  { %v3981_v30 = vadd.f32 %v3568_v19, %v3117_v45  ;;  %v3980_v13 = vadd.f32 %v3566_v12, %v3116_v52  ;;  %v2459_v12 = vrot.slane %v8342_v56, 2 }
 0x20e   :  { %2743 = vrot.lane.b32.xlu0 %v2458_v22, %s7644_s22  ;;  %v4554_v29 = vld [vmem:[#allocation2 + $0x60] ss:$4 sm:$0xff]  ;;  %v4626_v38 = vld [vmem:[#allocation2 + $0x61] ss:$4 sm:$0xff]  ;;  %v4734_v58 = vld [vmem:[#allocation2 + $0x62] ss:$4 sm:$0xff] }
 0x20f   :  { %v4132_v3 = vadd.f32 %v8019_v0, %v3981_v30  ;;  %v4131_v40 = vadd.f32 %v8019_v0, %v3980_v13  ;;  %2741 = vrot.lane.b32.xlu1 %v2456_v20, %s7644_s22  ;;  %v4694_v51 = vmax.f32 %v4554_v29, %v4626_v38  ;;  %v4806_v31 = vld [vmem:[#allocation2 + $0x63] ss:$4 sm:$0xff]  ;;  %v8374_v20 = vpop.f32.mrf.mxu0  ;;  %v2454_v29 = vsel %vm2379_vm0, %v2451_v18, %v2453_v36 }
 0x210   :  { %v1836_v61 = vpop.permute.xlu0 %1835  ;;  %v1842_v53 = vpop.permute.xlu1 %1841  ;;  %v4874_v63 = vmax.f32 %v4734_v58, %v4806_v31  ;;  %v3323_v38 = vrot.slane %v8342_v56, 3  ;;  %v1601_v36 = vrot.slane %v8374_v20, 1 }
 0x211   :  { %v4276_v48 = vmax.f32 %v4132_v3, 0.0  ;;  %v4275_v15 = vmax.f32 %v4131_v40, 0.0  ;;  %v2251_v8 = vadd.f32 %v1836_v61, %v7933_v55  ;;  %v2254_v19 = vadd.f32 %v7947_v2, %v1842_v53  ;;  %v8393_v40 = vpop.f32.mrf.mxu0 }
 0x212   :  { %3607 = vrot.lane.b32.xlu0 %v3322_v46, %s7653_s9  ;;  %v4910_v45 = vmax.f32 %v4694_v51, %v4874_v63  ;;  %v1596_v55 = vsel %vm1515_vm1, %v1593_v33, %v1595_v28  ;;  %v2460_v33 = vsel %vm2379_vm0, %v2457_v34, %v2459_v12  ;;  %v3318_v34 = vsel %vm3243_vm2, %v3315_v16, %v3317_v24 }
 0x213   :  { %4421 = vst.msk [vmem:[#allocation2 + $0x90] sm:$0xff] %vm4402_vm3, %v4276_v48  ;;  %4420 = vst.msk [vmem:[#allocation2 + $0x88] sm:$0xff] %vm4402_vm3, %v4275_v15  ;;  %3605 = vrot.lane.b32.xlu1 %v3320_v60, %s7653_s9  ;;  %v1597_v61 = vrot.slane %v8393_v40, 1  ;;  %v3324_v53 = vsel %vm3243_vm2, %v3321_v41, %v3323_v38  ;;  %v2463_v63 = vrot.slane %v8329_v7, 2  ;;  %v2465_v24 = vrot.slane %v8374_v20, 2 }
 0x214   :  { %v2700_v52 = vpop.permute.xlu0 %2699  ;;  %v2706_v44 = vpop.permute.xlu1 %2705  ;;  %v4944_v9 = vpack.c.bf16 %v4910_v45, %v4909_v6  ;;  %v1602_v60 = vsel %vm1515_vm1, %v1599_v4, %v1601_v36  ;;  %v2461_v41 = vrot.slane %v8393_v40, 2 }
 0x215   :  { %v3115_v30 = vadd.f32 %v2700_v52, %v2251_v8  ;;  %v3118_v2 = vadd.f32 %v2706_v44, %v2254_v19  ;;  %v1600_v6 = vsel %vm1515_vm1, %v1597_v61, %v1599_v4  ;;  %v8418_v45 = vpop.f32.mrf.mxu0 }
 0x216   :  { %7247 = vmatmul.mubr.msk.bf16.vlgmr.msra.gmra.mxu1 %vm4402_vm3, %v4944_v9  ;;  %1875 = vrot.lane.b32.xlu0 %v1590_v57, %s7652_s7  ;;  %v3327_v9 = vrot.slane %v8329_v7, 3 }
 0x217   :  { %1881 = vrot.lane.b32.xlu1 %v1596_v55, %s7652_s7  ;;  %v2466_v55 = vsel %vm2379_vm0, %v2463_v63, %v2465_v24 }
 0x218   :  { %v3564_v13 = vpop.permute.xlu0 %3563  ;;  %v3570_v22 = vpop.permute.xlu1 %3569 }
 0x219   :  { %v3979_v59 = vadd.f32 %v3564_v13, %v3115_v30  ;;  %v3982_v54 = vadd.f32 %v3570_v22, %v3118_v2  ;;  %v3325_v30 = vrot.slane %v8393_v40, 3  ;;  %v2464_v2 = vsel %vm2379_vm0, %v2461_v41, %v2463_v63  ;;  %v8427_v13 = vpop.f32.mrf.mxu0  ;;  %v7448_v63 = vld [vmem:[#allocation5 + $0x1a0] sm:$0xff]  }
 0x21a   :  { %2739 = vrot.lane.b32.xlu0 %v2454_v29, %s7644_s22  ;;  %v1603_v4 = vrot.slane %v8427_v13, 1  ;;  %7202 = vmatprep.mubr.bf16.mxu0 %v7448_v63 }
 0x21b   :  { %v4130_v21 = vadd.f32 %v8019_v0, %v3979_v59  ;;  %v4133_v58 = vadd.f32 %v8019_v0, %v3982_v54  ;;  %2745 = vrot.lane.b32.xlu1 %v2460_v33, %s7644_s22 }
 0x21c   :  { %v1848_v3 = vpop.permute.xlu0 %1847  ;;  %v1846_v18 = vpop.permute.xlu1 %1845 }
 0x21d   :  { %v4274_v51 = vmax.f32 %v4130_v21, 0.0  ;;  %v4277_v31 = vmax.f32 %v4133_v58, 0.0  ;;  %v2257_v15 = vadd.f32 %v7970_v23, %v1848_v3  ;;  %v2256_v46 = vadd.f32 %v1846_v18, %v8004_v50 }
 0x21e   :  { %3603 = vrot.lane.b32.xlu0 %v3318_v34, %s7653_s9  ;;  %v3329_v50 = vrot.slane %v8374_v20, 3  ;;  %v3328_v3 = vsel %vm3243_vm2, %v3325_v30, %v3327_v9 }
 0x21f   :  { %4419 = vst.msk [vmem:[#allocation2 + $0x80] sm:$0xff] %vm4402_vm3, %v4274_v51  ;;  %4422 = vst.msk [vmem:[#allocation2 + $0x98] sm:$0xff] %vm4402_vm3, %v4277_v31  ;;  %3609 = vrot.lane.b32.xlu1 %v3324_v53, %s7653_s9  ;;  %v1598_v53 = vsel %vm1515_vm1, %v1595_v28, %v1597_v61 }
 0x220   :  { %v2712_v48 = vpop.permute.xlu0 %2711  ;;  %v2710_v16 = vpop.permute.xlu1 %2709  ;;  %v3330_v58 = vsel %vm3243_vm2, %v3327_v9, %v3329_v50 }
 0x221   :  { %v3121_v52 = vadd.f32 %v2712_v48, %v2257_v15  ;;  %v3120_v44 = vadd.f32 %v2710_v16, %v2256_v46  ;;  %v2467_v48 = vrot.slane %v8427_v13, 2  ;;  %v1604_v16 = vsel %vm1515_vm1, %v1601_v36, %v1603_v4  ;;  %v7449_v15 = vld [vmem:[#allocation5 + $0x1a8] sm:$0xff]  }
 0x222   :  { %1887 = vrot.lane.b32.xlu0 %v1602_v60, %s7652_s7  ;;  %7203 = vmatmul.mubr.bf16.gmra.mxu0 %v7449_v15 }
 0x223   :  { %1885 = vrot.lane.b32.xlu1 %v1600_v6, %s7652_s7  ;;  %v8450_v6 = vpop.f32.mrf.mxu0  ;;  %v2468_v36 = vsel %vm2379_vm0, %v2465_v24, %v2467_v48  ;;  %v3326_v24 = vsel %vm3243_vm2, %v3323_v38, %v3325_v30 }
 0x224   :  { %v3576_v8 = vpop.permute.xlu0 %3575  ;;  %v3574_v23 = vpop.permute.xlu1 %3573  ;;  %v3337_v15 = vrot.slane %v8450_v6, 3 }
 0x225   :  { %v3985_v19 = vadd.f32 %v3576_v8, %v3121_v52  ;;  %v3984_v57 = vadd.f32 %v3574_v23, %v3120_v44  ;;  %v2462_v52 = vsel %vm2379_vm0, %v2459_v12, %v2461_v41  ;;  %v3331_v44 = vrot.slane %v8427_v13, 3  ;;  %v8465_v41 = vpop.f32.mrf.mxu0 }
 0x226   :  { %2751 = vrot.lane.b32.xlu0 %v2466_v55, %s7644_s22  ;;  %v1607_v23 = vrot.slane %v8418_v45, 1  ;;  %v1609_v12 = vrot.slane %v8450_v6, 1  ;;  %v4808_v63 = vld [vmem:[#allocation2 + $0x83] ss:$4 sm:$0xff] }
 0x227   :  { %v4136_v22 = vadd.f32 %v8019_v0, %v3985_v19  ;;  %v4135_v59 = vadd.f32 %v8019_v0, %v3984_v57  ;;  %2749 = vrot.lane.b32.xlu1 %v2464_v2, %s7644_s22 }
 0x228   :  { %v1844_v54 = vpop.permute.xlu0 %1843  ;;  %v1850_v29 = vpop.permute.xlu1 %1849 }
 0x229   :  { %v4280_v33 = vmax.f32 %v4136_v22, 0.0  ;;  %v4279_v21 = vmax.f32 %v4135_v59, 0.0  ;;  %v2255_v31 = vadd.f32 %v1844_v54, %v7979_v32  ;;  %v2258_v34 = vadd.f32 %v7995_v43, %v1850_v29  ;;  %v7450_v22 = vld [vmem:[#allocation5 + $0x1b0] sm:$0xff]   ;;  %v7451_v54 = vld [vmem:[#allocation5 + $0x1b8] sm:$0xff]  }
 0x22a   :  { %3615 = vrot.lane.b32.xlu0 %v3330_v58, %s7653_s9  ;;  %v1605_v59 = vrot.slane %v8465_v41, 1  ;;  %7206 = vmatprep.mubr.bf16.mxu0 %v7450_v22  ;;  %v2471_v29 = vrot.slane %v8418_v45, 2 }
 0x22b   :  { %4425 = vst.msk [vmem:[#allocation2 + $0xb0] sm:$0xff] %vm4402_vm3, %v4280_v33  ;;  %4424 = vst.msk [vmem:[#allocation2 + $0xa8] sm:$0xff] %vm4402_vm3, %v4279_v21  ;;  %3613 = vrot.lane.b32.xlu1 %v3328_v3, %s7653_s9  ;;  %7207 = vmatmul.mubr.bf16.gmra.mxu0 %v7451_v54  ;;  %v2473_v33 = vrot.slane %v8450_v6, 2  ;;  %v2469_v3 = vrot.slane %v8465_v41, 2 }
 0x22c   :  { %v2708_v18 = vpop.permute.xlu0 %2707  ;;  %v2714_v51 = vpop.permute.xlu1 %2713 }
 0x22d   :  { %v3119_v46 = vadd.f32 %v2708_v18, %v2255_v31  ;;  %v3122_v60 = vadd.f32 %v2714_v51, %v2258_v34  ;;  %v1608_v18 = vsel %vm1515_vm1, %v1605_v59, %v1607_v23  ;;  %v4556_v51 = vld [vmem:[#allocation2 + $0x80] ss:$4 sm:$0xff]  ;;  %v8490_v31 = vpop.f32.mrf.mxu0 }
 0x22e   :  { %1883 = vrot.lane.b32.xlu0 %v1598_v53, %s7652_s7 }
 0x22f   :  { %1889 = vrot.lane.b32.xlu1 %v1604_v16, %s7652_s7  ;;  %v3335_v16 = vrot.slane %v8418_v45, 3 }
 0x230   :  { %v3572_v32 = vpop.permute.xlu0 %3571  ;;  %v3578_v43 = vpop.permute.xlu1 %3577 }
 0x231   :  { %v3983_v28 = vadd.f32 %v3572_v32, %v3119_v46  ;;  %v3986_v61 = vadd.f32 %v3578_v43, %v3122_v60  ;;  %v3333_v32 = vrot.slane %v8465_v41, 3 }
 0x232   :  { %2747 = vrot.lane.b32.xlu0 %v2462_v52, %s7644_s22  ;;  %v7452_v52 = vld [vmem:[#allocation5 + $0x1c0] sm:$0xff]  }
 0x233   :  { %v4134_v9 = vadd.f32 %v8019_v0, %v3983_v28  ;;  %v4137_v8 = vadd.f32 %v8019_v0, %v3986_v61  ;;  %2753 = vrot.lane.b32.xlu1 %v2468_v36, %s7644_s22  ;;  %v3332_v0 = vsel %vm3243_vm2, %v3329_v50, %v3331_v44  ;;  %v1610_v50 = vsel %vm1515_vm1, %v1607_v23, %v1609_v12 }
 0x234   :  { %v1856_v19 = vpop.permute.xlu0 %1855  ;;  %v1854_v57 = vpop.permute.xlu1 %1853  ;;  %v2474_v61 = vsel %vm2379_vm0, %v2471_v29, %v2473_v33  ;;  %v2472_v36 = vsel %vm2379_vm0, %v2469_v3, %v2471_v29  ;;  %7210 = vmatprep.mubr.bf16.mxu0 %v7452_v52  ;;  %v7453_v29 = vld [vmem:[#allocation5 + $0x1c8] sm:$0xff]  }
 0x235   :  { %v4278_v55 = vmax.f32 %v4134_v9, 0.0  ;;  %v4281_v2 = vmax.f32 %v4137_v8, 0.0  ;;  %v2261_v21 = vadd.f32 %v8026_v14, %v1856_v19  ;;  %v2260_v58 = vadd.f32 %v1854_v57, %v8070_v10  ;;  %v4628_v14 = vld [vmem:[#allocation2 + $0x81] ss:$4 sm:$0xff]  ;;  %v4736_v10 = vld [vmem:[#allocation2 + $0x82] ss:$4 sm:$0xff]  ;;  %7211 = vmatmul.mubr.bf16.gmra.mxu0 %v7453_v29 }
 0x236   :  { %3611 = vrot.lane.b32.xlu0 %v3326_v24, %s7653_s9  ;;  %v4695_v23 = vmax.f32 %v4556_v51, %v4628_v14  ;;  %v4875_v57 = vmax.f32 %v4736_v10, %v4808_v63 }
 0x237   :  { %4423 = vst.msk [vmem:[#allocation2 + $0xa0] sm:$0xff] %vm4402_vm3, %v4278_v55  ;;  %4426 = vst.msk [vmem:[#allocation2 + $0xb8] sm:$0xff] %vm4402_vm3, %v4281_v2  ;;  %3617 = vrot.lane.b32.xlu1 %v3332_v0, %s7653_s9  ;;  %v8503_v55 = vpop.f32.mrf.mxu0  ;;  %v8508_v2 = vld [vmem:[%s11500_s2] ss:$0 sm:$0xff] }
 0x238   :  { %v2720_v38 = vpop.permute.xlu0 %2719  ;;  %v2718_v30 = vpop.permute.xlu1 %2717  ;;  %v1611_v51 = vrot.slane %v8503_v55, 1 }
 0x239   :  { %v3125_v34 = vadd.f32 %v2720_v38, %v2261_v21  ;;  %v3124_v53 = vadd.f32 %v2718_v30, %v2260_v58 }
 0x23a   :  { %1895 = vrot.lane.b32.xlu0 %v1610_v50, %s7652_s7 }
 0x23b   :  { %1893 = vrot.lane.b32.xlu1 %v1608_v18, %s7652_s7  ;;  %v3338_v18 = vsel %vm3243_vm2, %v3335_v16, %v3337_v15 }
 0x23c   :  { %v3584_v46 = vpop.permute.xlu0 %3583  ;;  %v3582_v60 = vpop.permute.xlu1 %3581 }
 0x23d   :  { %v3989_v43 = vadd.f32 %v3584_v46, %v3125_v34  ;;  %v3988_v28 = vadd.f32 %v3582_v60, %v3124_v53  ;;  %v3336_v34 = vsel %vm3243_vm2, %v3333_v32, %v3335_v16  ;;  %v4911_v53 = vmax.f32 %v4695_v23, %v4875_v57 }
 0x23e   :  { %2759 = vrot.lane.b32.xlu0 %v2474_v61, %s7644_s22  ;;  %v4558_v9 = vld [vmem:[#allocation2 + $0xa0] ss:$4 sm:$0xff]  ;;  %v4630_v8 = vld [vmem:[#allocation2 + $0xa1] ss:$4 sm:$0xff]  ;;  %v4738_v19 = vld [vmem:[#allocation2 + $0xa2] ss:$4 sm:$0xff]  ;;  %v1606_v16 = vsel %vm1515_vm1, %v1603_v4, %v1605_v59 }
 0x23f   :  { %v4140_v24 = vadd.f32 %v8508_v2, %v3989_v43  ;;  %v4139_v22 = vadd.f32 %v8508_v2, %v3988_v28  ;;  %2757 = vrot.lane.b32.xlu1 %v2472_v36, %s7644_s22  ;;  %v4696_v0 = vmax.f32 %v4558_v9, %v4630_v8  ;;  %v4810_v54 = vld [vmem:[#allocation2 + $0xa3] ss:$4 sm:$0xff]  ;;  %v2475_v61 = vrot.slane %v8503_v55, 2  ;;  %v8540_v9 = vpop.f32.mrf.mxu0 }
 0x240   :  { %v1852_v38 = vpop.permute.xlu0 %1851  ;;  %v1858_v30 = vpop.permute.xlu1 %1857  ;;  %v4876_v21 = vmax.f32 %v4738_v19, %v4810_v54  ;;  %v7454_v28 = vld [vmem:[#allocation5 + $0x1d0] sm:$0xff]   ;;  %v2470_v19 = vsel %vm2379_vm0, %v2467_v48, %v2469_v3  ;;  %v1617_v54 = vrot.slane %v8540_v9, 1 }
 0x241   :  { %v4284_v58 = vmax.f32 %v4140_v24, 0.0  ;;  %v4283_v50 = vmax.f32 %v4139_v22, 0.0  ;;  %v2259_v60 = vadd.f32 %v1852_v38, %v8036_v27  ;;  %v2262_v43 = vadd.f32 %v8058_v62, %v1858_v30  ;;  %v7455_v62 = vld [vmem:[#allocation5 + $0x1d8] sm:$0xff]   ;;  %7214 = vmatprep.mubr.bf16.mxu0 %v7454_v28  ;;  %v8559_v29 = vpop.f32.mrf.mxu0 }
 0x242   :  { %3623 = vrot.lane.b32.xlu0 %v3338_v18, %s7653_s9  ;;  %v4912_v14 = vmax.f32 %v4696_v0, %v4876_v21  ;;  %v1612_v27 = vsel %vm1515_vm1, %v1609_v12, %v1611_v51  ;;  %7215 = vmatmul.mubr.bf16.gmra.mxu0 %v7455_v62  ;;  %v3339_v12 = vrot.slane %v8503_v55, 3  ;;  %v2476_v57 = vsel %vm2379_vm0, %v2473_v33, %v2475_v61 }
 0x243   :  { %4429 = vst.msk [vmem:[#allocation2 + $0xd0] sm:$0xff] %vm4402_vm3, %v4284_v58  ;;  %4428 = vst.msk [vmem:[#allocation2 + $0xc8] sm:$0xff] %vm4402_vm3, %v4283_v50  ;;  %3621 = vrot.lane.b32.xlu1 %v3336_v34, %s7653_s9  ;;  %v1615_v0 = vrot.slane %v8490_v31, 1  ;;  %v3334_v33 = vsel %vm3243_vm2, %v3331_v44, %v3333_v32  ;;  %v1613_v21 = vrot.slane %v8559_v29, 1  ;;  %v2479_v50 = vrot.slane %v8490_v31, 2 }
 0x244   :  { %v2716_v10 = vpop.permute.xlu0 %2715  ;;  %v2722_v63 = vpop.permute.xlu1 %2721  ;;  %v4945_v46 = vpack.c.bf16 %v4912_v14, %v4911_v53  ;;  %v3340_v58 = vsel %vm3243_vm2, %v3337_v15, %v3339_v12  ;;  %v2481_v32 = vrot.slane %v8540_v9, 2  ;;  %v2477_v15 = vrot.slane %v8559_v29, 2 }
 0x245   :  { %v3123_v52 = vadd.f32 %v2716_v10, %v2259_v60  ;;  %v3126_v36 = vadd.f32 %v2722_v63, %v2262_v43  ;;  %v1618_v14 = vsel %vm1515_vm1, %v1615_v0, %v1617_v54  ;;  %v1616_v10 = vsel %vm1515_vm1, %v1613_v21, %v1615_v0  ;;  %v8584_v63 = vpop.f32.mrf.mxu0 }
 0x246   :  { %7250 = vmatprep.mubr.msk.bf16.mxu1 %vm4402_vm3, %v4945_v46  ;;  %1891 = vrot.lane.b32.xlu0 %v1606_v16, %s7652_s7  ;;  %v3343_v43 = vrot.slane %v8490_v31, 3  ;;  %v2482_v62 = vsel %vm2379_vm0, %v2479_v50, %v2481_v32 }
 0x247   :  { %1897 = vrot.lane.b32.xlu1 %v1612_v27, %s7652_s7 }
 0x248   :  { %v3580_v4 = vpop.permute.xlu0 %3579  ;;  %v3586_v59 = vpop.permute.xlu1 %3585 }
 0x249   :  { %v3987_v8 = vadd.f32 %v3580_v4, %v3123_v52  ;;  %v3990_v23 = vadd.f32 %v3586_v59, %v3126_v36  ;;  %v3341_v52 = vrot.slane %v8559_v29, 3  ;;  %v2480_v36 = vsel %vm2379_vm0, %v2477_v15, %v2479_v50  ;;  %v8593_v4 = vpop.f32.mrf.mxu0 }
 0x24a   :  { %2755 = vrot.lane.b32.xlu0 %v2470_v19, %s7644_s22  ;;  %v1619_v0 = vrot.slane %v8593_v4, 1 }
 0x24b   :  { %v4138_v24 = vadd.f32 %v8508_v2, %v3987_v8  ;;  %v4141_v22 = vadd.f32 %v8508_v2, %v3990_v23  ;;  %2761 = vrot.lane.b32.xlu1 %v2476_v57, %s7644_s22 }
 0x24c   :  { %v1864_v48 = vpop.permute.xlu0 %1863  ;;  %v1862_v3 = vpop.permute.xlu1 %1861 }
 0x24d   :  { %v4282_v38 = vmax.f32 %v4138_v24, 0.0  ;;  %v4285_v30 = vmax.f32 %v4141_v22, 0.0  ;;  %v2265_v34 = vadd.f32 %v8095_v49, %v1864_v48  ;;  %v2264_v53 = vadd.f32 %v1862_v3, %v8139_v47 }
 0x24e   :  { %3619 = vrot.lane.b32.xlu0 %v3334_v33, %s7653_s9  ;;  %v3345_v47 = vrot.slane %v8540_v9, 3  ;;  %v3344_v48 = vsel %vm3243_vm2, %v3341_v52, %v3343_v43  ;;  %v1614_v33 = vsel %vm1515_vm1, %v1611_v51, %v1613_v21  ;;  %v2478_v51 = vsel %vm2379_vm0, %v2475_v61, %v2477_v15 }
 0x24f   :  { %4427 = vst.msk [vmem:[#allocation2 + $0xc0] sm:$0xff] %vm4402_vm3, %v4282_v38  ;;  %4430 = vst.msk [vmem:[#allocation2 + $0xd8] sm:$0xff] %vm4402_vm3, %v4285_v30  ;;  %3625 = vrot.lane.b32.xlu1 %v3340_v58, %s7653_s9  ;;  %v2483_v58 = vrot.slane %v8593_v4, 2 }
 0x250   :  { %v2728_v18 = vpop.permute.xlu0 %2727  ;;  %v2726_v44 = vpop.permute.xlu1 %2725  ;;  %v3346_v22 = vsel %vm3243_vm2, %v3343_v43, %v3345_v47 }
 0x251   :  { %v3129_v46 = vadd.f32 %v2728_v18, %v2265_v34  ;;  %v3128_v60 = vadd.f32 %v2726_v44, %v2264_v53  ;;  %v1620_v18 = vsel %vm1515_vm1, %v1617_v54, %v1619_v0  ;;  %v8616_v53 = vpop.f32.mrf.mxu0  ;;  %v2484_v54 = vsel %vm2379_vm0, %v2481_v32, %v2483_v58 }
 0x252   :  { %1903 = vrot.lane.b32.xlu0 %v1618_v14, %s7652_s7  ;;  %v1625_v61 = vrot.slane %v8616_v53, 1 }
 0x253   :  { %1901 = vrot.lane.b32.xlu1 %v1616_v10, %s7652_s7  ;;  %v8631_v15 = vpop.f32.mrf.mxu0 }
 0x254   :  { %v3592_v16 = vpop.permute.xlu0 %3591  ;;  %v3590_v49 = vpop.permute.xlu1 %3589  ;;  %v1621_v32 = vrot.slane %v8631_v15, 1 }
 0x255   :  { %v3993_v28 = vadd.f32 %v3592_v16, %v3129_v46  ;;  %v3992_v27 = vadd.f32 %v3590_v49, %v3128_v60  ;;  %v1623_v16 = vrot.slane %v8584_v63, 1 }
 0x256   :  { %2767 = vrot.lane.b32.xlu0 %v2482_v62, %s7644_s22 }
 0x257   :  { %v4144_v59 = vadd.f32 %v8508_v2, %v3993_v28  ;;  %v4143_v8 = vadd.f32 %v8508_v2, %v3992_v27  ;;  %2765 = vrot.lane.b32.xlu1 %v2480_v36, %s7644_s22  ;;  %v3342_v27 = vsel %vm3243_vm2, %v3339_v12, %v3341_v52  ;;  %v2489_v12 = vrot.slane %v8616_v53, 2 }
 0x258   :  { %v1860_v23 = vpop.permute.xlu0 %1859 }
 0x259   :  { %v4288_v19 = vmax.f32 %v4144_v59, 0.0  ;;  %v4287_v57 = vmax.f32 %v4143_v8, 0.0  ;;  %v1866_v24 = vpop.permute.xlu1 %1865  ;;  %v2263_v38 = vadd.f32 %v1860_v23, %v8104_v5  ;;  %v2487_v8 = vrot.slane %v8584_v63, 2 }
 0x25a   :  { %3631 = vrot.lane.b32.xlu0 %v3346_v22, %s7653_s9  ;;  %v2266_v50 = vadd.f32 %v8128_v37, %v1866_v24  ;;  %v3347_v37 = vrot.slane %v8593_v4, 3  ;;  %v1624_v24 = vsel %vm1515_vm1, %v1621_v32, %v1623_v16  ;;  %v8656_v22 = vpop.f32.mrf.mxu0 }
 0x25b   :  { %4433 = vst.msk [vmem:[#allocation2 + $0xf0] sm:$0xff] %vm4402_vm3, %v4288_v19  ;;  %4432 = vst.msk [vmem:[#allocation2 + $0xe8] sm:$0xff] %vm4402_vm3, %v4287_v57  ;;  %3629 = vrot.lane.b32.xlu1 %v3344_v48, %s7653_s9  ;;  %v1626_v19 = vsel %vm1515_vm1, %v1623_v16, %v1625_v61 }
 0x25c   :  { %v2724_v3 = vpop.permute.xlu0 %2723  ;;  %v3348_v36 = vsel %vm3243_vm2, %v3345_v47, %v3347_v37  ;;  %v2485_v47 = vrot.slane %v8631_v15, 2 }
 0x25d   :  { %v2730_v30 = vpop.permute.xlu1 %2729  ;;  %v3127_v44 = vadd.f32 %v2724_v3, %v2263_v38 }
 0x25e   :  { %1899 = vrot.lane.b32.xlu0 %v1614_v33, %s7652_s7  ;;  %v3130_v34 = vadd.f32 %v2730_v30, %v2266_v50  ;;  %v4632_v30 = vld [vmem:[#allocation2 + $0xc1] ss:$4 sm:$0xff]  ;;  %v4740_v33 = vld [vmem:[#allocation2 + $0xc2] ss:$4 sm:$0xff]  ;;  %v4812_v50 = vld [vmem:[#allocation2 + $0xc3] ss:$4 sm:$0xff] }
 0x25f   :  { %1905 = vrot.lane.b32.xlu1 %v1620_v18, %s7652_s7  ;;  %v3351_v18 = vrot.slane %v8584_v63, 3 }
 0x260   :  { %v3588_v5 = vpop.permute.xlu0 %3587 }
 0x261   :  { %v3991_v14 = vadd.f32 %v3588_v5, %v3127_v44  ;;  %v3594_v10 = vpop.permute.xlu1 %3593  ;;  %v2490_v5 = vsel %vm2379_vm0, %v2487_v8, %v2489_v12 }
 0x262   :  { %v3994_v21 = vadd.f32 %v3594_v10, %v3130_v34  ;;  %2763 = vrot.lane.b32.xlu0 %v2478_v51, %s7644_s22  ;;  %v2488_v51 = vsel %vm2379_vm0, %v2485_v47, %v2487_v8 }
 0x263   :  { %v4142_v46 = vadd.f32 %v8508_v2, %v3991_v14  ;;  %2769 = vrot.lane.b32.xlu1 %v2484_v54, %s7644_s22  ;;  %v3349_v14 = vrot.slane %v8631_v15, 3 }
 0x264   :  { %v4145_v60 = vadd.f32 %v8508_v2, %v3994_v21  ;;  %v1872_v43 = vpop.permute.xlu0 %1871  ;;  %v8669_v21 = vpop.f32.mrf.mxu0 }
 0x265   :  { %v4286_v49 = vmax.f32 %v4142_v46, 0.0  ;;  %v1870_v28 = vpop.permute.xlu1 %1869  ;;  %v2269_v52 = vadd.f32 %v8169_v26, %v1872_v43  ;;  %v4560_v26 = vld [vmem:[#allocation2 + $0xc0] ss:$4 sm:$0xff] }
 0x266   :  { %v4289_v62 = vmax.f32 %v4145_v60, 0.0  ;;  %3627 = vrot.lane.b32.xlu0 %v3342_v27, %s7653_s9  ;;  %v2268_v57 = vadd.f32 %v1870_v28, %v8232_v1  ;;  %v3353_v1 = vrot.slane %v8616_v53, 3  ;;  %v4697_v43 = vmax.f32 %v4560_v26, %v4632_v30 }
 0x267   :  { %4431 = vst.msk [vmem:[#allocation2 + $0xe0] sm:$0xff] %vm4402_vm3, %v4286_v49  ;;  %3633 = vrot.lane.b32.xlu1 %v3348_v36, %s7653_s9  ;;  %v4877_v49 = vmax.f32 %v4740_v33, %v4812_v50 }
 0x268   :  { %4434 = vst.msk [vmem:[#allocation2 + $0xf8] sm:$0xff] %vm4402_vm3, %v4289_v62  ;;  %v2736_v59 = vpop.permute.xlu0 %2735 }
 0x269   :  { %v2734_v23 = vpop.permute.xlu1 %2733  ;;  %v3133_v48 = vadd.f32 %v2736_v59, %v2269_v52  ;;  %v8674_v59 = vpop.f32.mrf.mxu0  ;;  %v4913_v26 = vmax.f32 %v4697_v43, %v4877_v49 }
 0x26a   :  { %1911 = vrot.lane.b32.xlu0 %v1626_v19, %s7652_s7  ;;  %v3132_v3 = vadd.f32 %v2734_v23, %v2268_v57  ;;  %v3354_v23 = vsel %vm3243_vm2, %v3351_v18, %v3353_v1  ;;  %v1627_v57 = vrot.slane %v8669_v21, 1 }
 0x26b   :  { %1909 = vrot.lane.b32.xlu1 %v1624_v24, %s7652_s7  ;;  %v8687_v30 = vpop.f32.mrf.mxu0 }
 0x26c   :  { %v3600_v38 = vpop.permute.xlu0 %3599 }
 0x26d   :  { %v3997_v44 = vadd.f32 %v3600_v38, %v3133_v48  ;;  %v3598_v34 = vpop.permute.xlu1 %3597  ;;  %v3352_v48 = vsel %vm3243_vm2, %v3349_v14, %v3351_v18  ;;  %v1622_v18 = vsel %vm1515_vm1, %v1619_v0, %v1621_v32  ;;  %v8705_v0 = vpop.f32.mrf.mxu0 }
 0x26e   :  { %v3996_v10 = vadd.f32 %v3598_v34, %v3132_v3  ;;  %2775 = vrot.lane.b32.xlu0 %v2490_v5, %s7644_s22  ;;  %v2491_v34 = vrot.slane %v8669_v21, 2 }
 0x26f   :  { %v4148_v54 = vadd.f32 %v8508_v2, %v3997_v44  ;;  %2773 = vrot.lane.b32.xlu1 %v2488_v51, %s7644_s22  ;;  %v4562_v46 = vld [vmem:[#allocation2 + $0xe0] ss:$4 sm:$0xff]  ;;  %v4634_v60 = vld [vmem:[#allocation2 + $0xe1] ss:$4 sm:$0xff]  ;;  %v4742_v16 = vld [vmem:[#allocation2 + $0xe2] ss:$4 sm:$0xff] }
 0x270   :  { %v4147_v28 = vadd.f32 %v8508_v2, %v3996_v10  ;;  %v1868_v27 = vpop.permute.xlu0 %1867  ;;  %v4698_v62 = vmax.f32 %v4562_v46, %v4634_v60  ;;  %v4814_v36 = vld [vmem:[#allocation2 + $0xe3] ss:$4 sm:$0xff]  ;;  %v3355_v60 = vrot.slane %v8669_v21, 3  ;;  %v2492_v43 = vsel %vm2379_vm0, %v2489_v12, %v2491_v34 }
 0x271   :  { %v4292_v52 = vmax.f32 %v4148_v54, 0.0  ;;  %v1874_v8 = vpop.permute.xlu1 %1873  ;;  %v4878_v19 = vmax.f32 %v4742_v16, %v4814_v36  ;;  %v2267_v33 = vadd.f32 %v1868_v27, %v8182_v42  ;;  %v1628_v42 = vsel %vm1515_vm1, %v1625_v61, %v1627_v57  ;;  %v8724_v27 = vpop.f32.mrf.mxu0 }
 0x272   :  { %v4291_v24 = vmax.f32 %v4147_v28, 0.0  ;;  %3639 = vrot.lane.b32.xlu0 %v3354_v23, %s7653_s9  ;;  %v2270_v5 = vadd.f32 %v8213_v39, %v1874_v8  ;;  %v2486_v39 = vsel %vm2379_vm0, %v2483_v58, %v2485_v47  ;;  %v1631_v58 = vrot.slane %v8656_v22, 1 }
 0x273   :  { %4437 = vst.msk [vmem:[#allocation2 + $0x110] sm:$0xff] %vm4402_vm3, %v4292_v52  ;;  %3637 = vrot.lane.b32.xlu1 %v3352_v48, %s7653_s9  ;;  %v4914_v3 = vmax.f32 %v4698_v62, %v4878_v19  ;;  %v1633_v47 = vrot.slane %v8674_v59, 1  ;;  %v3350_v12 = vsel %vm3243_vm2, %v3347_v37, %v3349_v14  ;;  %v1629_v52 = vrot.slane %v8687_v30, 1  ;;  %v8740_v19 = vpop.f32.mrf.mxu0 }
 0x274   :  { %4436 = vst.msk [vmem:[#allocation2 + $0x108] sm:$0xff] %vm4402_vm3, %v4291_v24  ;;  %v2732_v38 = vpop.permute.xlu0 %2731  ;;  %v3356_v23 = vsel %vm3243_vm2, %v3353_v1, %v3355_v60  ;;  %v2495_v14 = vrot.slane %v8656_v22, 2  ;;  %v2497_v24 = vrot.slane %v8674_v59, 2  ;;  %v2493_v1 = vrot.slane %v8687_v30, 2 }
 0x275   :  { %v2738_v50 = vpop.permute.xlu1 %2737  ;;  %v4946_v44 = vpack.c.bf16 %v4914_v3, %v4913_v26  ;;  %v3131_v10 = vadd.f32 %v2732_v38, %v2267_v33  ;;  %v1634_v3 = vsel %vm1515_vm1, %v1631_v58, %v1633_v47  ;;  %v1632_v33 = vsel %vm1515_vm1, %v1629_v52, %v1631_v58 }
 0x276   :  { %1907 = vrot.lane.b32.xlu0 %v1622_v18, %s7652_s7  ;;  %v3134_v51 = vadd.f32 %v2738_v50, %v2270_v5 }
 0x277   :  { %7251 = vmatmul.mubr.msk.bf16.gmra.mxu1 %vm4402_vm3, %v4946_v44  ;;  %1913 = vrot.lane.b32.xlu1 %v1628_v42, %s7652_s7  ;;  %v8751_v44 = vpop.f32.mrf.mxu0 }
 0x278   :  { %v3596_v54 = vpop.permute.xlu0 %3595 }
 0x279   :  { %v3995_v32 = vadd.f32 %v3596_v54, %v3131_v10  ;;  %v3602_v46 = vpop.permute.xlu1 %3601  ;;  %v2498_v10 = vsel %vm2379_vm0, %v2495_v14, %v2497_v24 }
 0x27a   :  { %v3998_v61 = vadd.f32 %v3602_v46, %v3134_v51  ;;  %2771 = vrot.lane.b32.xlu0 %v2486_v39, %s7644_s22  ;;  %v1635_v51 = vrot.slane %v8724_v27, 1 }
 0x27b   :  { %v4146_v16 = vadd.f32 %v8508_v2, %v3995_v32  ;;  %2777 = vrot.lane.b32.xlu1 %v2492_v43, %s7644_s22  ;;  %v8758_v32 = vpop.f32.mrf.mxu0 }
 0x27c   :  { %v4149_v49 = vadd.f32 %v8508_v2, %v3998_v61  ;;  %v1880_v28 = vpop.permute.xlu0 %1879 }
 0x27d   :  { %v4290_v62 = vmax.f32 %v4146_v16, 0.0  ;;  %v1878_v36 = vpop.permute.xlu1 %1877  ;;  %v2273_v48 = vadd.f32 %v8257_v25, %v1880_v28  ;;  %v2499_v28 = vrot.slane %v8724_v27, 2 }
 0x27e   :  { %v4293_v8 = vmax.f32 %v4149_v49, 0.0  ;;  %3635 = vrot.lane.b32.xlu0 %v3350_v12, %s7653_s9  ;;  %v2272_v38 = vadd.f32 %v1878_v36, %v8304_v17  ;;  %v2496_v17 = vsel %vm2379_vm0, %v2493_v1, %v2495_v14  ;;  %v1630_v49 = vsel %vm1515_vm1, %v1627_v57, %v1629_v52  ;;  %v8772_v36 = vpop.f32.mrf.mxu0 }
 0x27f   :  { %4435 = vst.msk [vmem:[#allocation2 + $0x100] sm:$0xff] %vm4402_vm3, %v4290_v62  ;;  %3641 = vrot.lane.b32.xlu1 %v3356_v23, %s7653_s9  ;;  %v1636_v62 = vsel %vm1515_vm1, %v1633_v47, %v1635_v51  ;;  %v1639_v57 = vrot.slane %v8705_v0, 1  ;;  %v1641_v52 = vrot.slane %v8740_v19, 1  ;;  %v2494_v47 = vsel %vm2379_vm0, %v2491_v34, %v2493_v1 }
 0x280   :  { %4438 = vst.msk [vmem:[#allocation2 + $0x118] sm:$0xff] %vm4402_vm3, %v4293_v8  ;;  %v2744_v37 = vpop.permute.xlu0 %2743  ;;  %v1637_v14 = vrot.slane %v8751_v44, 1  ;;  %v2505_v34 = vrot.slane %v8740_v19, 2 }
 0x281   :  { %v2742_v26 = vpop.permute.xlu1 %2741  ;;  %v3137_v50 = vadd.f32 %v2744_v37, %v2273_v48  ;;  %v8782_v37 = vpop.f32.mrf.mxu0 }
 0x282   :  { %1919 = vrot.lane.b32.xlu0 %v1634_v3, %s7652_s7  ;;  %v3136_v18 = vadd.f32 %v2742_v26, %v2272_v38  ;;  %v2500_v26 = vsel %vm2379_vm0, %v2497_v24, %v2499_v28  ;;  %v3357_v24 = vrot.slane %v8687_v30, 3 }
 0x283   :  { %1917 = vrot.lane.b32.xlu1 %v1632_v33, %s7652_s7  ;;  %v2503_v33 = vrot.slane %v8705_v0, 2 }
 0x284   :  { %v3608_v5 = vpop.permute.xlu0 %3607 }
 0x285   :  { %v4001_v42 = vadd.f32 %v3608_v5, %v3137_v50  ;;  %v3606_v25 = vpop.permute.xlu1 %3605  ;;  %v3359_v5 = vrot.slane %v8656_v22, 3 }
 0x286   :  { %v4000_v54 = vadd.f32 %v3606_v25, %v3136_v18  ;;  %2783 = vrot.lane.b32.xlu0 %v2498_v10, %s7644_s22  ;;  %v8796_v18 = vpop.f32.mrf.mxu0  ;;  %v1640_v25 = vsel %vm1515_vm1, %v1637_v14, %v1639_v57 }
 0x287   :  { %v4152_v46 = vadd.f32 %v8508_v2, %v4001_v42  ;;  %2781 = vrot.lane.b32.xlu1 %v2496_v17, %s7644_s22 }
 0x288   :  { %v4151_v39 = vadd.f32 %v8508_v2, %v4000_v54  ;;  %v1876_v61 = vpop.permute.xlu0 %1875 }
 0x289   :  { %v4296_v43 = vmax.f32 %v4152_v46, 0.0  ;;  %v1882_v16 = vpop.permute.xlu1 %1881  ;;  %v2271_v8 = vadd.f32 %v1876_v61, %v8266_v11  ;;  %v2506_v61 = vsel %vm2379_vm0, %v2503_v33, %v2505_v34 }
 0x28a   :  { %v4295_v58 = vmax.f32 %v4151_v39, 0.0  ;;  %1915 = vrot.lane.b32.xlu0 %v1630_v49, %s7652_s7  ;;  %v2274_v48 = vadd.f32 %v8289_v35, %v1882_v16  ;;  %v1642_v35 = vsel %vm1515_vm1, %v1639_v57, %v1641_v52  ;;  %v2501_v16 = vrot.slane %v8751_v44, 2 }
 0x28b   :  { %4441 = vst.msk [vmem:[#allocation2 + $0x130] sm:$0xff] %vm4402_vm3, %v4296_v43  ;;  %1921 = vrot.lane.b32.xlu1 %v1636_v62, %s7652_s7  ;;  %v8808_v43 = vpop.f32.mrf.mxu0 }
 0x28c   :  { %4440 = vst.msk [vmem:[#allocation2 + $0x128] sm:$0xff] %vm4402_vm3, %v4295_v58  ;;  %v2740_v12 = vpop.permute.xlu0 %2739  ;;  %v3360_v58 = vsel %vm3243_vm2, %v3357_v24, %v3359_v5 }
 0x28d   :  { %v2746_v23 = vpop.permute.xlu1 %2745  ;;  %v3135_v3 = vadd.f32 %v2740_v12, %v2271_v8  ;;  %v8819_v8 = vpop.f32.mrf.mxu0 }
 0x28e   :  { %2779 = vrot.lane.b32.xlu0 %v2494_v47, %s7644_s22  ;;  %v3138_v11 = vadd.f32 %v2746_v23, %v2274_v48  ;;  %v1638_v23 = vsel %vm1515_vm1, %v1635_v51, %v1637_v14  ;;  %v1643_v47 = vrot.slane %v8772_v36, 1 }
 0x28f   :  { %2785 = vrot.lane.b32.xlu1 %v2500_v26, %s7644_s22  ;;  %v2504_v26 = vsel %vm2379_vm0, %v2501_v16, %v2503_v33  ;;  %v2507_v33 = vrot.slane %v8772_v36, 2 }
 0x290   :  { %v3604_v38 = vpop.permute.xlu0 %3603 }
 0x291   :  { %v3999_v1 = vadd.f32 %v3604_v38, %v3135_v3  ;;  %v3610_v50 = vpop.permute.xlu1 %3609 }
 0x292   :  { %v4002_v42 = vadd.f32 %v3610_v50, %v3138_v11  ;;  %1927 = vrot.lane.b32.xlu0 %v1642_v35, %s7652_s7  ;;  %v4564_v11 = vld [vmem:[#allocation2 + $0x100] ss:$4 sm:$0xff]  ;;  %v4636_v50 = vld [vmem:[#allocation2 + $0x101] ss:$4 sm:$0xff]  ;;  %v4744_v35 = vld [vmem:[#allocation2 + $0x102] ss:$4 sm:$0xff] }
 0x293   :  { %v4150_v10 = vadd.f32 %v8508_v2, %v3999_v1  ;;  %1925 = vrot.lane.b32.xlu1 %v1640_v25, %s7652_s7 }
 0x294   :  { %v4153_v54 = vadd.f32 %v8508_v2, %v4002_v42  ;;  %v1888_v17 = vpop.permute.xlu0 %1887  ;;  %v4816_v42 = vld [vmem:[#allocation2 + $0x103] ss:$4 sm:$0xff] }
 0x295   :  { %v4294_v46 = vmax.f32 %v4150_v10, 0.0  ;;  %v1886_v39 = vpop.permute.xlu1 %1885  ;;  %v2277_v12 = vadd.f32 %v8329_v7, %v1888_v17  ;;  %v8829_v7 = vpop.f32.mrf.mxu0  ;;  %v1644_v10 = vsel %vm1515_vm1, %v1641_v52, %v1643_v47 }
 0x296   :  { %v4297_v49 = vmax.f32 %v4153_v54, 0.0  ;;  %2791 = vrot.lane.b32.xlu0 %v2506_v61, %s7644_s22  ;;  %v2276_v48 = vadd.f32 %v1886_v39, %v8393_v40  ;;  %v2502_v40 = vsel %vm2379_vm0, %v2499_v28, %v2501_v16  ;;  %v4699_v39 = vmax.f32 %v4564_v11, %v4636_v50 }
 0x297   :  { %4439 = vst.msk [vmem:[#allocation2 + $0x120] sm:$0xff] %vm4402_vm3, %v4294_v46  ;;  %3645 = vrot.lane.b32.xlu1 %v3360_v58, %s7653_s9  ;;  %v4879_v28 = vmax.f32 %v4744_v35, %v4816_v42  ;;  %v8843_v16 = vpop.f32.mrf.mxu0 }
 0x298   :  { %4442 = vst.msk [vmem:[#allocation2 + $0x138] sm:$0xff] %vm4402_vm3, %v4297_v49  ;;  %v2752_v62 = vpop.permute.xlu0 %2751 }
 0x299   :  { %v2750_v57 = vpop.permute.xlu1 %2749  ;;  %v3141_v3 = vadd.f32 %v2752_v62, %v2277_v12  ;;  %v8859_v35 = vpop.f32.mrf.mxu0 }
 0x29a   :  { %1923 = vrot.lane.b32.xlu0 %v1638_v23, %s7652_s7  ;;  %v3140_v38 = vadd.f32 %v2750_v57, %v2276_v48  ;;  %v3361_v57 = vrot.slane %v8674_v59, 3  ;;  %v3358_v48 = vsel %vm3243_vm2, %v3355_v60, %v3357_v24  ;;  %v3365_v24 = vrot.slane %v8751_v44, 3 }
 0x29b   :  { %2789 = vrot.lane.b32.xlu1 %v2504_v26, %s7644_s22 }
 0x29c   :  { %v3616_v1 = vpop.permute.xlu0 %3615 }
 0x29d   :  { %v4005_v51 = vadd.f32 %v3616_v1, %v3141_v3  ;;  %v3614_v14 = vpop.permute.xlu1 %3613  ;;  %v3363_v3 = vrot.slane %v8724_v27, 3  ;;  %v4915_v1 = vmax.f32 %v4699_v39, %v4879_v28  ;;  %v3369_v39 = vrot.slane %v8740_v19, 3 }
 0x29e   :  { %v4004_v25 = vadd.f32 %v3614_v14, %v3140_v38  ;;  %2787 = vrot.lane.b32.xlu0 %v2502_v40, %s7644_s22  ;;  %v2508_v38 = vsel %vm2379_vm0, %v2505_v34, %v2507_v33  ;;  %v3362_v34 = vsel %vm3243_vm2, %v3359_v5, %v3361_v57  ;;  %v3367_v40 = vrot.slane %v8705_v0, 3 }
 0x29f   :  { %v4156_v54 = vadd.f32 %v8508_v2, %v4005_v51  ;;  %1929 = vrot.lane.b32.xlu1 %v1644_v10, %s7652_s7  ;;  %v4566_v17 = vld [vmem:[#allocation2 + $0x120] ss:$4 sm:$0xff]  ;;  %v4638_v46 = vld [vmem:[#allocation2 + $0x121] ss:$4 sm:$0xff]  ;;  %v4746_v61 = vld [vmem:[#allocation2 + $0x122] ss:$4 sm:$0xff]  ;;  %v3364_v10 = vsel %vm3243_vm2, %v3361_v57, %v3363_v3  ;;  %v3366_v28 = vsel %vm3243_vm2, %v3363_v3, %v3365_v24 }
 0x2a0   :  { %v4155_v49 = vadd.f32 %v8508_v2, %v4004_v25  ;;  %v1884_v58 = vpop.permute.xlu0 %1883  ;;  %v4700_v62 = vmax.f32 %v4566_v17, %v4638_v46  ;;  %v4818_v12 = vld [vmem:[#allocation2 + $0x123] ss:$4 sm:$0xff]  ;;  %v3370_v3 = vsel %vm3243_vm2, %v3367_v40, %v3369_v39 }
 0x2a1   :  { %v4300_v23 = vmax.f32 %v4156_v54, 0.0  ;;  %v1890_v52 = vpop.permute.xlu1 %1889  ;;  %v4880_v26 = vmax.f32 %v4746_v61, %v4818_v12  ;;  %v2275_v42 = vadd.f32 %v1884_v58, %v8342_v56  ;;  %v8873_v56 = vpop.f32.mrf.mxu0  ;;  %v3368_v58 = vsel %vm3243_vm2, %v3365_v24, %v3367_v40 }
 0x2a2   :  { %v4299_v11 = vmax.f32 %v4155_v49, 0.0  ;;  %3643 = vrot.lane.b32.xlu0 %v3358_v48, %s7653_s9  ;;  %v2278_v25 = vadd.f32 %v8374_v20, %v1890_v52  ;;  %v3371_v20 = vrot.slane %v8772_v36, 3  ;;  %v1645_v52 = vrot.slane %v8796_v18, 1 }
 0x2a3   :  { %4445 = vst.msk [vmem:[#allocation2 + $0x150] sm:$0xff] %vm4402_vm3, %v4300_v23  ;;  %2793 = vrot.lane.b32.xlu1 %v2508_v38, %s7644_s22  ;;  %v4916_v50 = vmax.f32 %v4700_v62, %v4880_v26  ;;  %v8882_v12 = vpop.f32.mrf.mxu0  ;;  %v1649_v24 = vrot.slane %v8782_v37, 1 }
 0x2a4   :  { %4444 = vst.msk [vmem:[#allocation2 + $0x148] sm:$0xff] %vm4402_vm3, %v4299_v11  ;;  %v2748_v60 = vpop.permute.xlu0 %2747  ;;  %v1647_v11 = vrot.slane %v8758_v32, 1 }
 0x2a5   :  { %v2754_v51 = vpop.permute.xlu1 %2753  ;;  %v4947_v14 = vpack.c.bf16 %v4916_v50, %v4915_v1  ;;  %v3139_v54 = vadd.f32 %v2748_v60, %v2275_v42  ;;  %v3372_v1 = vsel %vm3243_vm2, %v3369_v39, %v3371_v20  ;;  %v8894_v50 = vpop.f32.mrf.mxu0 }
 0x2a6   :  { %3647 = vrot.lane.b32.xlu0 %v3362_v34, %s7653_s9  ;;  %v3142_v17 = vadd.f32 %v2754_v51, %v2278_v25  ;;  %v1651_v34 = vrot.slane %v8819_v8, 1  ;;  %v1648_v25 = vsel %vm1515_vm1, %v1645_v52, %v1647_v11 }
 0x2a7   :  { %7254 = vmatprep.mubr.msk.bf16.mxu1 %vm4402_vm3, %v4947_v14  ;;  %3649 = vrot.lane.b32.xlu1 %v3364_v10, %s7653_s9  ;;  %v1646_v14 = vsel %vm1515_vm1, %v1643_v47, %v1645_v52  ;;  %v1650_v47 = vsel %vm1515_vm1, %v1647_v11, %v1649_v24 }
 0x2a8   :  { %v3612_v46 = vpop.permute.xlu0 %3611 }
 0x2a9   :  { %v4003_v5 = vadd.f32 %v3612_v46, %v3139_v54  ;;  %v3618_v61 = vpop.permute.xlu1 %3617  ;;  %v8907_v54 = vpop.f32.mrf.mxu0  ;;  %v1653_v46 = vrot.slane %v8843_v16, 1 }
 0x2aa   :  { %v4006_v49 = vadd.f32 %v3618_v61, %v3142_v17  ;;  %3651 = vrot.lane.b32.xlu0 %v3366_v28, %s7653_s9  ;;  %11572 = vst [vmem:[#allocation22_spill] sm:$0xff] %v8907_v54  ;;  %v1655_v61 = vrot.slane %v8808_v43, 1  ;;  %v1652_v28 = vsel %vm1515_vm1, %v1649_v24, %v1651_v34  ;;  %v1661_v24 = vrot.slane %v8894_v50, 1 }
 0x2ab   :  { %v4154_v62 = vadd.f32 %v8508_v2, %v4003_v5  ;;  %3653 = vrot.lane.b32.xlu1 %v3368_v58, %s7653_s9  ;;  %v8916_v58 = vpop.f32.mrf.mxu0 }
 0x2ac   :  { %v4157_v57 = vadd.f32 %v8508_v2, %v4006_v49  ;;  %v1896_v23 = vpop.permute.xlu0 %1895 }
 0x2ad   :  { %v4298_v48 = vmax.f32 %v4154_v62, 0.0  ;;  %v1894_v26 = vpop.permute.xlu1 %1893  ;;  %v2281_v42 = vadd.f32 %v8418_v45, %v1896_v23  ;;  %v1657_v23 = vrot.slane %v8829_v7, 1 }
 0x2ae   :  { %v4301_v38 = vmax.f32 %v4157_v57, 0.0  ;;  %3655 = vrot.lane.b32.xlu0 %v3370_v3, %s7653_s9  ;;  %v2280_v40 = vadd.f32 %v1894_v26, %v8465_v41  ;;  %v1654_v26 = vsel %vm1515_vm1, %v1651_v34, %v1653_v46  ;;  %v1659_v3 = vrot.slane %v8873_v56, 1 }
 0x2af   :  { %4443 = vst.msk [vmem:[#allocation2 + $0x140] sm:$0xff] %vm4402_vm3, %v4298_v48  ;;  %3657 = vrot.lane.b32.xlu1 %v3372_v1, %s7653_s9  ;;  %v8926_v1 = vpop.f32.mrf.mxu0  ;;  %v1663_v34 = vrot.slane %v8859_v35, 1 }
 0x2b0   :  { %4446 = vst.msk [vmem:[#allocation2 + $0x158] sm:$0xff] %vm4402_vm3, %v4301_v38  ;;  %v2760_v60 = vpop.permute.xlu0 %2759  ;;  %v1656_v38 = vsel %vm1515_vm1, %v1653_v46, %v1655_v61  ;;  %11573 = vst [vmem:[#allocation23_spill] sm:$0xff] %v8926_v1 }
 0x2b1   :  { %v2758_v51 = vpop.permute.xlu1 %2757  ;;  %v3145_v10 = vadd.f32 %v2760_v60, %v2281_v42 }
 0x2b2   :  { %1931 = vrot.lane.b32.xlu0 %v1646_v14, %s7652_s7  ;;  %v3144_v17 = vadd.f32 %v2758_v51, %v2280_v40  ;;  %v1658_v14 = vsel %vm1515_vm1, %v1655_v61, %v1657_v23  ;;  %v1667_v61 = vrot.slane %v8916_v58, 1 }
 0x2b3   :  { %1933 = vrot.lane.b32.xlu1 %v1648_v25, %s7652_s7  ;;  %v1660_v25 = vsel %vm1515_vm1, %v1657_v23, %v1659_v3 }
 0x2b4   :  { %v3624_v45 = vpop.permute.xlu0 %3623 }
 0x2b5   :  { %v4009_v39 = vadd.f32 %v3624_v45, %v3145_v10  ;;  %v3622_v5 = vpop.permute.xlu1 %3621 }
 0x2b6   :  { %v4008_v41 = vadd.f32 %v3622_v5, %v3144_v17  ;;  %1935 = vrot.lane.b32.xlu0 %v1650_v47, %s7652_s7  ;;  %v8936_v17 = vpop.f32.mrf.mxu0  ;;  %v1662_v47 = vsel %vm1515_vm1, %v1659_v3, %v1661_v24  ;;  %v1671_v3 = vrot.slane %v8907_v54, 1 }
 0x2b7   :  { %v4160_v49 = vadd.f32 %v8508_v2, %v4009_v39  ;;  %1937 = vrot.lane.b32.xlu1 %v1652_v28, %s7652_s7  ;;  %11574 = vst [vmem:[#allocation24_spill] sm:$0xff] %v8936_v17  ;;  %v1669_v23 = vrot.slane %v8936_v17, 1 }
 0x2b8   :  { %v4159_v62 = vadd.f32 %v8508_v2, %v4008_v41  ;;  %v1892_v57 = vpop.permute.xlu0 %1891  ;;  %v1664_v41 = vsel %vm1515_vm1, %v1661_v24, %v1663_v34  ;;  %v8944_v28 = vpop.f32.mrf.mxu0 }
 0x2b9   :  { %v4304_v52 = vmax.f32 %v4160_v49, 0.0  ;;  %v1898_v48 = vpop.permute.xlu1 %1897  ;;  %v2279_v42 = vadd.f32 %v1892_v57, %v8427_v13  ;;  %v1665_v13 = vrot.slane %v8882_v12, 1  ;;  %11575 = vst [vmem:[#allocation25_spill] sm:$0xff] %v8944_v28 }
 0x2ba   :  { %v4303_v11 = vmax.f32 %v4159_v62, 0.0  ;;  %1939 = vrot.lane.b32.xlu0 %v1654_v26, %s7652_s7  ;;  %v2282_v40 = vadd.f32 %v8450_v6, %v1898_v48 }
 0x2bb   :  { %4449 = vst.msk [vmem:[#allocation2 + $0x170] sm:$0xff] %vm4402_vm3, %v4304_v52  ;;  %1941 = vrot.lane.b32.xlu1 %v1656_v38, %s7652_s7  ;;  %v1666_v26 = vsel %vm1515_vm1, %v1663_v34, %v1665_v13  ;;  %v1668_v38 = vsel %vm1515_vm1, %v1665_v13, %v1667_v61  ;;  %v1670_v34 = vsel %vm1515_vm1, %v1667_v61, %v1669_v23 }
 0x2bc   :  { %4448 = vst.msk [vmem:[#allocation2 + $0x168] sm:$0xff] %vm4402_vm3, %v4303_v11  ;;  %v2756_v60 = vpop.permute.xlu0 %2755 }
 0x2bd   :  { %v2762_v51 = vpop.permute.xlu1 %2761  ;;  %v3143_v10 = vadd.f32 %v2756_v60, %v2279_v42  ;;  %v8955_v60 = vpop.f32.mrf.mxu0  ;;  %v1673_v42 = vrot.slane %v8926_v1, 1 }
 0x2be   :  { %1943 = vrot.lane.b32.xlu0 %v1658_v14, %s7652_s7  ;;  %v3146_v45 = vadd.f32 %v2762_v51, %v2282_v40  ;;  %11576 = vst [vmem:[#allocation26_spill] sm:$0xff] %v8955_v60  ;;  %v1675_v40 = vrot.slane %v8955_v60, 1 }
 0x2bf   :  { %1945 = vrot.lane.b32.xlu1 %v1660_v25, %s7652_s7 }
 0x2c0   :  { %v3620_v46 = vpop.permute.xlu0 %3619 }
 0x2c1   :  { %v4007_v39 = vadd.f32 %v3620_v46, %v3143_v10  ;;  %v3626_v5 = vpop.permute.xlu1 %3625  ;;  %v1672_v10 = vsel %vm1515_vm1, %v1669_v23, %v1671_v3  ;;  %v4568_v46 = vld [vmem:[#allocation2 + $0x140] ss:$4 sm:$0xff] }
 0x2c2   :  { %v4010_v6 = vadd.f32 %v3626_v5, %v3146_v45  ;;  %1947 = vrot.lane.b32.xlu0 %v1662_v47, %s7652_s7  ;;  %v4640_v5 = vld [vmem:[#allocation2 + $0x141] ss:$4 sm:$0xff]  ;;  %v4748_v47 = vld [vmem:[#allocation2 + $0x142] ss:$4 sm:$0xff] }
 0x2c3   :  { %v4158_v49 = vadd.f32 %v8508_v2, %v4007_v39  ;;  %1949 = vrot.lane.b32.xlu1 %v1664_v41, %s7652_s7 }
 0x2c4   :  { %v4161_v62 = vadd.f32 %v8508_v2, %v4010_v6  ;;  %v1904_v57 = vpop.permute.xlu0 %1903  ;;  %v2509_v6 = vrot.slane %v8796_v18, 2 }
 0x2c5   :  { %v4302_v52 = vmax.f32 %v4158_v49, 0.0  ;;  %v1902_v48 = vpop.permute.xlu1 %1901  ;;  %v2285_v51 = vadd.f32 %v8490_v31, %v1904_v57  ;;  %v4820_v31 = vld [vmem:[#allocation2 + $0x143] ss:$4 sm:$0xff]  ;;  %v1674_v49 = vsel %vm1515_vm1, %v1671_v3, %v1673_v42  ;;  %v1676_v57 = vsel %vm1515_vm1, %v1673_v42, %v1675_v40  ;;  %v8979_v3 = vld [vmem:[%s11500_s2] ss:$0 sm:$0xff] }
 0x2c6   :  { %v4305_v11 = vmax.f32 %v4161_v62, 0.0  ;;  %1951 = vrot.lane.b32.xlu0 %v1666_v26, %s7652_s7  ;;  %v2284_v25 = vadd.f32 %v1902_v48, %v8559_v29  ;;  %v2511_v29 = vrot.slane %v8758_v32, 2  ;;  %v4701_v26 = vmax.f32 %v4568_v46, %v4640_v5 }
 0x2c7   :  { %4447 = vst.msk [vmem:[#allocation2 + $0x160] sm:$0xff] %vm4402_vm3, %v4302_v52  ;;  %1953 = vrot.lane.b32.xlu1 %v1668_v38, %s7652_s7  ;;  %v4881_v38 = vmax.f32 %v4748_v47, %v4820_v31  ;;  %v2513_v42 = vrot.slane %v8782_v37, 2  ;;  %v2515_v46 = vrot.slane %v8819_v8, 2 }
 0x2c8   :  { %4450 = vst.msk [vmem:[#allocation2 + $0x178] sm:$0xff] %vm4402_vm3, %v4305_v11  ;;  %v2768_v24 = vpop.permute.xlu0 %2767 }
 0x2c9   :  { %v2766_v14 = vpop.permute.xlu1 %2765  ;;  %v3149_v45 = vadd.f32 %v2768_v24, %v2285_v51  ;;  %v4917_v5 = vmax.f32 %v4701_v26, %v4881_v38 }
 0x2ca   :  { %1955 = vrot.lane.b32.xlu0 %v1670_v34, %s7652_s7  ;;  %v3148_v13 = vadd.f32 %v2766_v14, %v2284_v25 }
 0x2cb   :  { %1957 = vrot.lane.b32.xlu1 %v1672_v10, %s7652_s7  ;;  %v2510_v10 = vsel %vm2379_vm0, %v2507_v33, %v2509_v6 }
 0x2cc   :  { %v3632_v39 = vpop.permute.xlu0 %3631 }
 0x2cd   :  { %v4013_v61 = vadd.f32 %v3632_v39, %v3149_v45  ;;  %v3630_v41 = vpop.permute.xlu1 %3629  ;;  %v2512_v39 = vsel %vm2379_vm0, %v2509_v6, %v2511_v29 }
 0x2ce   :  { %v4012_v62 = vadd.f32 %v3630_v41, %v3148_v13  ;;  %1959 = vrot.lane.b32.xlu0 %v1674_v49, %s7652_s7 }
 0x2cf   :  { %v4164_v23 = vadd.f32 %v8508_v2, %v4013_v61  ;;  %1961 = vrot.lane.b32.xlu1 %v1676_v57, %s7652_s7  ;;  %v4570_v52 = vld [vmem:[#allocation2 + $0x160] ss:$4 sm:$0xff]  ;;  %v4642_v48 = vld [vmem:[#allocation2 + $0x161] ss:$4 sm:$0xff]  ;;  %v4750_v11 = vld [vmem:[#allocation2 + $0x162] ss:$4 sm:$0xff] }
 0x2d0   :  { %v4163_v24 = vadd.f32 %v8979_v3, %v4012_v62  ;;  %v1900_v51 = vpop.permute.xlu0 %1899  ;;  %v4702_v14 = vmax.f32 %v4570_v52, %v4642_v48  ;;  %v4822_v34 = vld [vmem:[#allocation2 + $0x163] ss:$4 sm:$0xff]  ;;  %v2517_v61 = vrot.slane %v8843_v16, 2  ;;  %v2514_v62 = vsel %vm2379_vm0, %v2511_v29, %v2513_v42 }
 0x2d1   :  { %v4308_v2 = vmax.f32 %v4164_v23, 0.0  ;;  %v1906_v25 = vpop.permute.xlu1 %1905  ;;  %v4882_v45 = vmax.f32 %v4750_v11, %v4822_v34  ;;  %v2283_v33 = vadd.f32 %v1900_v51, %v8503_v55  ;;  %v2519_v57 = vrot.slane %v8808_v43, 2 }
 0x2d2   :  { %v4307_v13 = vmax.f32 %v4163_v24, 0.0  ;;  %2795 = vrot.lane.b32.xlu0 %v2510_v10, %s7644_s22  ;;  %v2286_v6 = vadd.f32 %v8540_v9, %v1906_v25  ;;  %v2516_v23 = vsel %vm2379_vm0, %v2513_v42, %v2515_v46  ;;  %v2521_v55 = vrot.slane %v8829_v7, 2 }
 0x2d3   :  { %4453 = vst.msk [vmem:[#allocation2 + $0x190] sm:$0xff] %vm4402_vm3, %v4308_v2  ;;  %2797 = vrot.lane.b32.xlu1 %v2512_v39, %s7644_s22  ;;  %v4918_v47 = vmax.f32 %v4702_v14, %v4882_v45  ;;  %v2518_v29 = vsel %vm2379_vm0, %v2515_v46, %v2517_v61  ;;  %v2523_v24 = vrot.slane %v8873_v56, 2  ;;  %v2520_v51 = vsel %vm2379_vm0, %v2517_v61, %v2519_v57 }
 0x2d4   :  { %4452 = vst.msk [vmem:[#allocation2 + $0x188] sm:$0xff] %vm4402_vm3, %v4307_v13  ;;  %v2764_v31 = vpop.permute.xlu0 %2763  ;;  %v2525_v2 = vrot.slane %v8894_v50, 2  ;;  %v2522_v45 = vsel %vm2379_vm0, %v2519_v57, %v2521_v55  ;;  %v2527_v46 = vrot.slane %v8859_v35, 2 }
 0x2d5   :  { %v2770_v41 = vpop.permute.xlu1 %2769  ;;  %v4948_v49 = vpack.c.bf16 %v4918_v47, %v4917_v5  ;;  %v3147_v52 = vadd.f32 %v2764_v31, %v2283_v33  ;;  %v2524_v39 = vsel %vm2379_vm0, %v2521_v55, %v2523_v24  ;;  %v2529_v47 = vrot.slane %v8882_v12, 2 }
 0x2d6   :  { %2799 = vrot.lane.b32.xlu0 %v2514_v62, %s7644_s22  ;;  %v3150_v48 = vadd.f32 %v2770_v41, %v2286_v6  ;;  %v2526_v33 = vsel %vm2379_vm0, %v2523_v24, %v2525_v2  ;;  %v2531_v41 = vrot.slane %v8916_v58, 2  ;;  %v2528_v62 = vsel %vm2379_vm0, %v2525_v2, %v2527_v46 }
 0x2d7   :  { %7255 = vmatmul.mubr.msk.bf16.gmra.mxu1 %vm4402_vm3, %v4948_v49  ;;  %2801 = vrot.lane.b32.xlu1 %v2516_v23, %s7644_s22  ;;  %v2535_v55 = vrot.slane %v8907_v54, 2 }
 0x2d8   :  { %v3628_v26 = vpop.permute.xlu0 %3627 }
 0x2d9   :  { %v4011_v11 = vadd.f32 %v3628_v26, %v3147_v52  ;;  %v3634_v38 = vpop.permute.xlu1 %3633  ;;  %v2533_v52 = vrot.slane %v8936_v17, 2  ;;  %v2530_v26 = vsel %vm2379_vm0, %v2527_v46, %v2529_v47  ;;  %v9042_v46 = vpop.f32.mrf.mxu0 }
 0x2da   :  { %v4014_v9 = vadd.f32 %v3634_v38, %v3150_v48  ;;  %2803 = vrot.lane.b32.xlu0 %v2518_v29, %s7644_s22  ;;  %11577 = vst [vmem:[#allocation27_spill] sm:$0xff] %v9042_v46 }
 0x2db   :  { %v4162_v14 = vadd.f32 %v8979_v3, %v4011_v11  ;;  %2805 = vrot.lane.b32.xlu1 %v2520_v51, %s7644_s22 }
 0x2dc   :  { %v4165_v34 = vadd.f32 %v8979_v3, %v4014_v9  ;;  %v1912_v42 = vpop.permute.xlu0 %1911  ;;  %v2537_v9 = vrot.slane %v8926_v1, 2 }
 0x2dd   :  { %v4306_v25 = vmax.f32 %v4162_v14, 0.0  ;;  %v1910_v10 = vpop.permute.xlu1 %1909  ;;  %v2289_v31 = vadd.f32 %v8584_v63, %v1912_v42  ;;  %v2539_v42 = vrot.slane %v8955_v60, 2 }
 0x2de   :  { %v4309_v13 = vmax.f32 %v4165_v34, 0.0  ;;  %2807 = vrot.lane.b32.xlu0 %v2522_v45, %s7644_s22  ;;  %v2288_v49 = vadd.f32 %v1910_v10, %v8631_v15  ;;  %v2532_v15 = vsel %vm2379_vm0, %v2529_v47, %v2531_v41  ;;  %v2534_v34 = vsel %vm2379_vm0, %v2531_v41, %v2533_v52 }
 0x2df   :  { %4451 = vst.msk [vmem:[#allocation2 + $0x180] sm:$0xff] %vm4402_vm3, %v4306_v25  ;;  %2809 = vrot.lane.b32.xlu1 %v2524_v39, %s7644_s22  ;;  %v2536_v25 = vsel %vm2379_vm0, %v2533_v52, %v2535_v55  ;;  %v3373_v45 = vrot.slane %v8796_v18, 3  ;;  %v3375_v47 = vrot.slane %v8758_v32, 3 }
 0x2e0   :  { %4454 = vst.msk [vmem:[#allocation2 + $0x198] sm:$0xff] %vm4402_vm3, %v4309_v13  ;;  %v2776_v5 = vpop.permute.xlu0 %2775 }
 0x2e1   :  { %v2774_v61 = vpop.permute.xlu1 %2773  ;;  %v3153_v57 = vadd.f32 %v2776_v5, %v2289_v31  ;;  %v2538_v5 = vsel %vm2379_vm0, %v2535_v55, %v2537_v9 }
 0x2e2   :  { %2811 = vrot.lane.b32.xlu0 %v2526_v33, %s7644_s22  ;;  %v3152_v6 = vadd.f32 %v2774_v61, %v2288_v49  ;;  %v2540_v61 = vsel %vm2379_vm0, %v2537_v9, %v2539_v42 }
 0x2e3   :  { %2813 = vrot.lane.b32.xlu1 %v2528_v62, %s7644_s22  ;;  %v9054_v62 = vpop.f32.mrf.mxu0 }
 0x2e4   :  { %v3640_v23 = vpop.permute.xlu0 %3639  ;;  %11578 = vst [vmem:[#allocation28_spill] sm:$0xff] %v9054_v62 }
 0x2e5   :  { %v4017_v48 = vadd.f32 %v3640_v23, %v3153_v57  ;;  %v3638_v63 = vpop.permute.xlu1 %3637  ;;  %v3379_v23 = vrot.slane %v8819_v8, 3 }
 0x2e6   :  { %v4016_v11 = vadd.f32 %v3638_v63, %v3152_v6  ;;  %2815 = vrot.lane.b32.xlu0 %v2530_v26, %s7644_s22 }
 0x2e7   :  { %v4168_v38 = vadd.f32 %v8979_v3, %v4017_v48  ;;  %2817 = vrot.lane.b32.xlu1 %v2532_v15, %s7644_s22  ;;  %v3376_v48 = vsel %vm3243_vm2, %v3373_v45, %v3375_v47  ;;  %v9068_v15 = vpop.f32.mrf.mxu0 }
 0x2e8   :  { %v4167_v29 = vadd.f32 %v8979_v3, %v4016_v11  ;;  %v1908_v24 = vpop.permute.xlu0 %1907  ;;  %v3381_v11 = vrot.slane %v8843_v16, 3  ;;  %11579 = vst [vmem:[#allocation29_spill] sm:$0xff] %v9068_v15 }
 0x2e9   :  { %v4312_v51 = vmax.f32 %v4168_v38, 0.0  ;;  %v1914_v14 = vpop.permute.xlu1 %1913  ;;  %v2287_v13 = vadd.f32 %v1908_v24, %v8593_v4  ;;  %v3377_v4 = vrot.slane %v8782_v37, 3  ;;  %v3383_v24 = vrot.slane %v8808_v43, 3 }
 0x2ea   :  { %v4311_v2 = vmax.f32 %v4167_v29, 0.0  ;;  %2819 = vrot.lane.b32.xlu0 %v2534_v34, %s7644_s22  ;;  %v2290_v31 = vadd.f32 %v8616_v53, %v1914_v14  ;;  %v3374_v53 = vsel %vm3243_vm2, %v3371_v20, %v3373_v45  ;;  %v3385_v34 = vrot.slane %v8829_v7, 3 }
 0x2eb   :  { %4457 = vst.msk [vmem:[#allocation2 + $0x1b0] sm:$0xff] %vm4402_vm3, %v4312_v51  ;;  %2821 = vrot.lane.b32.xlu1 %v2536_v25, %s7644_s22  ;;  %v3378_v29 = vsel %vm3243_vm2, %v3375_v47, %v3377_v4  ;;  %v3380_v51 = vsel %vm3243_vm2, %v3377_v4, %v3379_v23  ;;  %v3387_v45 = vrot.slane %v8873_v56, 3 }
 0x2ec   :  { %4456 = vst.msk [vmem:[#allocation2 + $0x1a8] sm:$0xff] %vm4402_vm3, %v4311_v2  ;;  %v2772_v10 = vpop.permute.xlu0 %2771  ;;  %v9080_v2 = vpop.f32.mrf.mxu0  ;;  %v3386_v4 = vsel %vm3243_vm2, %v3383_v24, %v3385_v34 }
 0x2ed   :  { %v2778_v39 = vpop.permute.xlu1 %2777  ;;  %v3151_v33 = vadd.f32 %v2772_v10, %v2287_v13  ;;  %11580 = vst [vmem:[#allocation30_spill] sm:$0xff] %v9080_v2  ;;  %v3382_v10 = vsel %vm3243_vm2, %v3379_v23, %v3381_v11  ;;  %v3384_v13 = vsel %vm3243_vm2, %v3381_v11, %v3383_v24  ;;  %v3393_v24 = vrot.slane %v8882_v12, 3 }
 0x2ee   :  { %2823 = vrot.lane.b32.xlu0 %v2538_v5, %s7644_s22  ;;  %v3154_v41 = vadd.f32 %v2778_v39, %v2290_v31  ;;  %v4572_v39 = vld [vmem:[#allocation2 + $0x180] ss:$4 sm:$0xff]  ;;  %v9087_v5 = vpop.f32.mrf.mxu0  ;;  %v4644_v31 = vld [vmem:[#allocation2 + $0x181] ss:$4 sm:$0xff] }
 0x2ef   :  { %2825 = vrot.lane.b32.xlu1 %v2540_v61, %s7644_s22  ;;  %11581 = vst [vmem:[#allocation31_spill] sm:$0xff] %v9087_v5  ;;  %v4752_v61 = vld [vmem:[#allocation2 + $0x182] ss:$4 sm:$0xff] }
 0x2f0   :  { %v3636_v49 = vpop.permute.xlu0 %3635 }
 0x2f1   :  { %v4015_v57 = vadd.f32 %v3636_v49, %v3151_v33  ;;  %v3642_v6 = vpop.permute.xlu1 %3641  ;;  %v4824_v33 = vld [vmem:[#allocation2 + $0x183] ss:$4 sm:$0xff] }
 0x2f2   :  { %v4018_v52 = vadd.f32 %v3642_v6, %v3154_v41  ;;  %3659 = vrot.lane.b32.xlu0 %v3374_v53, %s7653_s9  ;;  %v3389_v41 = vrot.slane %v8894_v50, 3  ;;  %v3388_v6 = vsel %vm3243_vm2, %v3385_v34, %v3387_v45  ;;  %v3395_v34 = vrot.slane %v8916_v58, 3 }
 0x2f3   :  { %v4166_v63 = vadd.f32 %v8979_v3, %v4015_v57  ;;  %3661 = vrot.lane.b32.xlu1 %v3376_v48, %s7653_s9  ;;  %v3391_v57 = vrot.slane %v8859_v35, 3 }
 0x2f4   :  { %v4169_v26 = vadd.f32 %v8979_v3, %v4018_v52  ;;  %v9065_v55 = vpop.permute.xlu0 %1919  ;;  %v4703_v52 = vmax.f32 %v4572_v39, %v4644_v31 }
 0x2f5   :  { %v4310_v20 = vmax.f32 %v4166_v63, 0.0  ;;  %v1918_v38 = vpop.permute.xlu1 %1917  ;;  %v4883_v63 = vmax.f32 %v4752_v61, %v4824_v33 }
 0x2f6   :  { %v4313_v9 = vmax.f32 %v4169_v26, 0.0  ;;  %3663 = vrot.lane.b32.xlu0 %v3378_v29, %s7653_s9  ;;  %v9099_v26 = vpop.f32.mrf.mxu0 }
 0x2f7   :  { %4455 = vst.msk [vmem:[#allocation2 + $0x1a0] sm:$0xff] %vm4402_vm3, %v4310_v20  ;;  %3665 = vrot.lane.b32.xlu1 %v3380_v51, %s7653_s9  ;;  %11582 = vst [vmem:[#allocation32_spill] sm:$0xff] %v9099_v26  ;;  %v3390_v51 = vsel %vm3243_vm2, %v3387_v45, %v3389_v41  ;;  %v4919_v39 = vmax.f32 %v4703_v52, %v4883_v63 }
 0x2f8   :  { %4458 = vst.msk [vmem:[#allocation2 + $0x1b8] sm:$0xff] %vm4402_vm3, %v4313_v9  ;;  %v9077_v14 = vpop.permute.xlu0 %2783  ;;  %v9109_v61 = vpop.f32.mrf.mxu0 }
 0x2f9   :  { %v2782_v25 = vpop.permute.xlu1 %2781  ;;  %11583 = vst [vmem:[#allocation33_spill] sm:$0xff] %v9109_v61 }
 0x2fa   :  { %3667 = vrot.lane.b32.xlu0 %v3382_v10, %s7653_s9  ;;  %v9123_v52 = vpop.f32.mrf.mxu0 }
 0x2fb   :  { %3669 = vrot.lane.b32.xlu1 %v3384_v13, %s7653_s9  ;;  %v3392_v13 = vsel %vm3243_vm2, %v3389_v41, %v3391_v57  ;;  %v3396_v41 = vsel %vm3243_vm2, %v3393_v24, %v3395_v34  ;;  %11584 = vst [vmem:[#allocation34_spill] sm:$0xff] %v9123_v52 }
 0x2fc   :  { %v9089_v47 = vpop.permute.xlu0 %1915 }
 0x2fd   :  { %v9092_v49 = vpop.permute.xlu1 %1921 }
 0x2fe   :  { %3671 = vrot.lane.b32.xlu0 %v3386_v4, %s7653_s9  ;;  %v3397_v4 = vrot.slane %v8936_v17, 3 }
 0x2ff   :  { %3673 = vrot.lane.b32.xlu1 %v3388_v6, %s7653_s9  ;;  %v4574_v53 = vld [vmem:[#allocation2 + $0x1a0] ss:$4 sm:$0xff]  ;;  %v4646_v23 = vld [vmem:[#allocation2 + $0x1a1] ss:$4 sm:$0xff]  ;;  %v4754_v48 = vld [vmem:[#allocation2 + $0x1a2] ss:$4 sm:$0xff] }
 0x300   :  { %v2780_v11 = vpop.permute.xlu0 %2779  ;;  %v4704_v20 = vmax.f32 %v4574_v53, %v4646_v23  ;;  %v4826_v29 = vld [vmem:[#allocation2 + $0x1a3] ss:$4 sm:$0xff]  ;;  %v3394_v53 = vsel %vm3243_vm2, %v3391_v57, %v3393_v24  ;;  %v3399_v23 = vrot.slane %v8907_v54, 3 }
 0x301   :  { %v9102_v9 = vpop.permute.xlu1 %2785  ;;  %v4884_v10 = vmax.f32 %v4754_v48, %v4826_v29  ;;  %v2292_v48 = vadd.f32 %v1918_v38, %v8687_v30  ;;  %v3401_v29 = vrot.slane %v8926_v1, 3  ;;  %v11510_v30 = vrot.slane %v8955_v60, 3 }
 0x302   :  { %3675 = vrot.lane.b32.xlu0 %v3390_v51, %s7653_s9  ;;  %v3398_v51 = vsel %vm3243_vm2, %v3395_v34, %v3397_v4  ;;  %v3400_v24 = vsel %vm3243_vm2, %v3397_v4, %v3399_v23  ;;  %v1679_v34 = vrot.slane %v8944_v28, 1 }
 0x303   :  { %3677 = vrot.lane.b32.xlu1 %v3392_v13, %s7653_s9  ;;  %v4920_v31 = vmax.f32 %v4704_v20, %v4884_v10  ;;  %v3156_v63 = vadd.f32 %v2782_v25, %v2292_v48  ;;  %v9133_v10 = vpop.f32.mrf.mxu0  ;;  %v3404_v4 = vsel %vm3243_vm2, %v3401_v29, %v11510_v30  ;;  %v1687_v30 = vrot.slane %v9068_v15, 1 }
 0x304   :  { %v9111_v33 = vpop.permute.xlu0 %1927  ;;  %11585 = vst [vmem:[#allocation35_spill] sm:$0xff] %v9133_v10 }
 0x305   :  { %v9114_v6 = vpop.permute.xlu1 %1925  ;;  %v4949_v45 = vpack.c.bf16 %v4920_v31, %v4919_v39  ;;  %v1677_v39 = vrot.slane %v9054_v62, 1  ;;  %v9144_v48 = vpop.f32.mrf.mxu0 }
 0x306   :  { %3679 = vrot.lane.b32.xlu0 %v3394_v53, %s7653_s9  ;;  %11586 = vst [vmem:[#allocation36_spill] sm:$0xff] %v9144_v48 }
 0x307   :  { %7258 = vmatprep.mubr.msk.bf16.mxu1 %vm4402_vm3, %v4949_v45  ;;  %3681 = vrot.lane.b32.xlu1 %v3396_v41, %s7653_s9  ;;  %v3402_v45 = vsel %vm3243_vm2, %v3399_v23, %v3401_v29  ;;  %v2291_v23 = vadd.f32 %v9089_v47, %v8669_v21  ;;  %v1680_v29 = vsel %vm1515_vm1, %v1677_v39, %v1679_v34  ;;  %v1685_v47 = vrot.slane %v9099_v26, 1 }
 0x308   :  { %v9125_v20 = vpop.permute.xlu0 %2791  ;;  %v2293_v21 = vadd.f32 %v8656_v22, %v9065_v55 }
 0x309   :  { %v3646_v57 = vpop.permute.xlu1 %3645 }
 0x30a   :  { %v4020_v38 = vadd.f32 %v3646_v57, %v3156_v63  ;;  %3683 = vrot.lane.b32.xlu0 %v3398_v51, %s7653_s9  ;;  %v1681_v63 = vrot.slane %v9042_v46, 1  ;;  %v1678_v51 = vsel %vm1515_vm1, %v1675_v40, %v1677_v39  ;;  %v2294_v39 = vadd.f32 %v8674_v59, %v9092_v49 }
 0x30b   :  { %3685 = vrot.lane.b32.xlu1 %v3400_v24, %s7653_s9  ;;  %v3155_v24 = vadd.f32 %v2780_v11, %v2291_v23  ;;  %v3157_v23 = vadd.f32 %v9077_v14, %v2293_v21  ;;  %v2296_v14 = vadd.f32 %v9114_v6, %v8751_v44  ;;  %v1691_v21 = vrot.slane %v9123_v52, 1 }
 0x30c   :  { %v4171_v25 = vadd.f32 %v8979_v3, %v4020_v38  ;;  %v1924_v13 = vpop.permute.xlu0 %1923  ;;  %v1683_v38 = vrot.slane %v9080_v2, 1  ;;  %v1682_v40 = vsel %vm1515_vm1, %v1679_v34, %v1681_v63  ;;  %v3158_v55 = vadd.f32 %v9102_v9, %v2294_v39 }
 0x30d   :  { %v2790_v31 = vpop.permute.xlu1 %2789  ;;  %v1689_v34 = vrot.slane %v9087_v5, 1  ;;  %v1695_v39 = vrot.slane %v9109_v61, 1 }
 0x30e   :  { %v4315_v53 = vmax.f32 %v4171_v25, 0.0  ;;  %3687 = vrot.lane.b32.xlu0 %v3402_v45, %s7653_s9  ;;  %v9157_v25 = vpop.f32.mrf.mxu0  ;;  %v1684_v11 = vsel %vm1515_vm1, %v1681_v63, %v1683_v38  ;;  %v1686_v63 = vsel %vm1515_vm1, %v1683_v38, %v1685_v47  ;;  %v3160_v38 = vadd.f32 %v2790_v31, %v2296_v14 }
 0x30f   :  { %3689 = vrot.lane.b32.xlu1 %v3404_v4, %s7653_s9  ;;  %v1692_v31 = vsel %vm1515_vm1, %v1689_v34, %v1691_v21 }
 0x310   :  { %4460 = vst.msk [vmem:[#allocation2 + $0x1c8] sm:$0xff] %vm4402_vm3, %v4315_v53  ;;  %v2788_v41 = vpop.permute.xlu0 %2787  ;;  %v9171_v22 = vpop.f32.mrf.mxu0 }
 0x311   :  { %v1930_v57 = vpop.permute.xlu1 %1929  ;;  %11587 = vst [vmem:[#allocation37_spill] sm:$0xff] %v9171_v22 }
 0x312   :  { %1963 = vrot.lane.b32.xlu0 %v1678_v51, %s7652_s7 }
 0x313   :  { %1965 = vrot.lane.b32.xlu1 %v1680_v29, %s7652_s7 }
 0x314   :  { %v3644_v45 = vpop.permute.xlu0 %3643 }
 0x315   :  { %v4019_v53 = vadd.f32 %v3644_v45, %v3155_v24  ;;  %v2794_v4 = vpop.permute.xlu1 %2793  ;;  %v2295_v24 = vadd.f32 %v1924_v13, %v8724_v27  ;;  %v9185_v13 = vpop.f32.mrf.mxu0 }
 0x316   :  { %1967 = vrot.lane.b32.xlu0 %v1682_v40, %s7652_s7  ;;  %v1688_v40 = vsel %vm1515_vm1, %v1685_v47, %v1687_v30  ;;  %v2297_v47 = vadd.f32 %v8705_v0, %v9111_v33 }
 0x317   :  { %v4170_v51 = vadd.f32 %v8979_v3, %v4019_v53  ;;  %1969 = vrot.lane.b32.xlu1 %v1684_v11, %s7652_s7  ;;  %v3159_v9 = vadd.f32 %v2788_v41, %v2295_v24  ;;  %v1690_v11 = vsel %vm1515_vm1, %v1687_v30, %v1689_v34  ;;  %v1693_v41 = vrot.slane %v9144_v48, 1  ;;  %v9199_v0 = vpop.f32.mrf.mxu0 }
 0x318   :  { %v3648_v29 = vpop.permute.xlu0 %3647 }
 0x319   :  { %v4314_v59 = vmax.f32 %v4170_v51, 0.0  ;;  %v4021_v49 = vadd.f32 %v3648_v29, %v3157_v23  ;;  %v3650_v45 = vpop.permute.xlu1 %3649  ;;  %v2298_v29 = vadd.f32 %v8740_v19, %v1930_v57 }
 0x31a   :  { %v4022_v53 = vadd.f32 %v3650_v45, %v3158_v55  ;;  %1971 = vrot.lane.b32.xlu0 %v1686_v63, %s7652_s7  ;;  %v1697_v45 = vrot.slane %v9133_v10, 1 }
 0x31b   :  { %4459 = vst.msk [vmem:[#allocation2 + $0x1c0] sm:$0xff] %vm4402_vm3, %v4314_v59  ;;  %v4172_v27 = vadd.f32 %v8979_v3, %v4021_v49  ;;  %1973 = vrot.lane.b32.xlu1 %v1688_v40, %s7652_s7  ;;  %v3161_v49 = vadd.f32 %v9125_v20, %v2297_v47  ;;  %v3162_v33 = vadd.f32 %v2794_v4, %v2298_v29  ;;  %v9210_v4 = vpop.f32.mrf.mxu0 }
 0x31c   :  { %v4173_v44 = vadd.f32 %v8979_v3, %v4022_v53  ;;  %v3652_v6 = vpop.permute.xlu0 %3651  ;;  %v1694_v20 = vsel %vm1515_vm1, %v1691_v21, %v1693_v41  ;;  %v1699_v53 = vrot.slane %v9171_v22, 1 }
 0x31d   :  { %v4316_v23 = vmax.f32 %v4172_v27, 0.0  ;;  %v4023_v51 = vadd.f32 %v3652_v6, %v3159_v9  ;;  %v3654_v55 = vpop.permute.xlu1 %3653  ;;  %v1696_v27 = vsel %vm1515_vm1, %v1693_v41, %v1695_v39  ;;  %v1701_v6 = vrot.slane %v9199_v0, 1  ;;  %v9226_v29 = vpop.f32.mrf.mxu0 }
 0x31e   :  { %v4317_v24 = vmax.f32 %v4173_v44, 0.0  ;;  %v4024_v59 = vadd.f32 %v3654_v55, %v3160_v38  ;;  %1975 = vrot.lane.b32.xlu0 %v1690_v11, %s7652_s7  ;;  %v1698_v41 = vsel %vm1515_vm1, %v1695_v39, %v1697_v45  ;;  %v1700_v55 = vsel %vm1515_vm1, %v1697_v45, %v1699_v53 }
 0x31f   :  { %4461 = vst.msk [vmem:[#allocation2 + $0x1d0] sm:$0xff] %vm4402_vm3, %v4316_v23  ;;  %v4174_v30 = vadd.f32 %v8979_v3, %v4023_v51  ;;  %1977 = vrot.lane.b32.xlu1 %v1692_v31, %s7652_s7  ;;  %v1703_v23 = vrot.slane %v9157_v25, 1  ;;  %v1702_v31 = vsel %vm1515_vm1, %v1699_v53, %v1701_v6  ;;  %v2543_v53 = vrot.slane %v8944_v28, 2 }
 0x320   :  { %4462 = vst.msk [vmem:[#allocation2 + $0x1d8] sm:$0xff] %vm4402_vm3, %v4317_v24  ;;  %v4175_v19 = vadd.f32 %v8979_v3, %v4024_v59  ;;  %v3656_v57 = vpop.permute.xlu0 %3655  ;;  %v1705_v59 = vrot.slane %v9185_v13, 1  ;;  %v11516_v1 = vrot.slane %v9226_v29, 2 }
 0x321   :  { %v4318_v63 = vmax.f32 %v4174_v30, 0.0  ;;  %v4025_v34 = vadd.f32 %v3656_v57, %v3161_v49  ;;  %v3658_v14 = vpop.permute.xlu1 %3657  ;;  %v11511_v49 = vrot.slane %v9226_v29, 1  ;;  %v1704_v30 = vsel %vm1515_vm1, %v1701_v6, %v1703_v23 }
 0x322   :  { %v4319_v40 = vmax.f32 %v4175_v19, 0.0  ;;  %v4026_v9 = vadd.f32 %v3658_v14, %v3162_v33  ;;  %1979 = vrot.lane.b32.xlu0 %v1694_v20, %s7652_s7  ;;  %v1706_v20 = vsel %vm1515_vm1, %v1703_v23, %v1705_v59  ;;  %v2545_v23 = vrot.slane %v9042_v46, 2 }
 0x323   :  { %4463 = vst.msk [vmem:[#allocation2 + $0x1e0] sm:$0xff] %vm4402_vm3, %v4318_v63  ;;  %v4176_v38 = vadd.f32 %v8979_v3, %v4025_v34  ;;  %1981 = vrot.lane.b32.xlu1 %v1696_v27, %s7652_s7  ;;  %v2541_v34 = vrot.slane %v9054_v62, 2 }
 0x324   :  { %4464 = vst.msk [vmem:[#allocation2 + $0x1e8] sm:$0xff] %vm4402_vm3, %v4319_v40  ;;  %v4177_v21 = vadd.f32 %v8979_v3, %v4026_v9  ;;  %v9216_v44 = vpop.permute.xlu0 %1931  ;;  %v1708_v40 = vsel %vm1515_vm1, %v1705_v59, %v11511_v49 }
 0x325   :  { %v4320_v11 = vmax.f32 %v4176_v38, 0.0  ;;  %v9219_v47 = vpop.permute.xlu1 %1933 }
 0x326   :  { %v4321_v51 = vmax.f32 %v4177_v21, 0.0  ;;  %1983 = vrot.lane.b32.xlu0 %v1698_v41, %s7652_s7 }
 0x327   :  { %4465 = vst.msk [vmem:[#allocation2 + $0x1f0] sm:$0xff] %vm4402_vm3, %v4320_v11  ;;  %1985 = vrot.lane.b32.xlu1 %v1700_v55, %s7652_s7  ;;  %v4576_v33 = vld [vmem:[#allocation2 + $0x1c0] ss:$4 sm:$0xff]  ;;  %v4648_v57 = vld [vmem:[#allocation2 + $0x1c1] ss:$4 sm:$0xff] }
 0x328   :  { %4466 = vst.msk [vmem:[#allocation2 + $0x1f8] sm:$0xff] %vm4402_vm3, %v4321_v51  ;;  %v9230_v24 = vpop.permute.xlu0 %1935  ;;  %v4756_v45 = vld [vmem:[#allocation2 + $0x1c2] ss:$4 sm:$0xff]  ;;  %v4828_v63 = vld [vmem:[#allocation2 + $0x1c3] ss:$4 sm:$0xff]  ;;  %v4705_v38 = vmax.f32 %v4576_v33, %v4648_v57  ;;  %v2544_v33 = vsel %vm2379_vm0, %v2541_v34, %v2543_v53 }
 0x329   :  { %v9233_v39 = vpop.permute.xlu1 %1937  ;;  %v4885_v6 = vmax.f32 %v4756_v45, %v4828_v63 }
 0x32a   :  { %1987 = vrot.lane.b32.xlu0 %v1702_v31, %s7652_s7  ;;  %v2542_v31 = vsel %vm2379_vm0, %v2539_v42, %v2541_v34  ;;  %v2546_v42 = vsel %vm2379_vm0, %v2543_v53, %v2545_v23  ;;  %v2555_v53 = vrot.slane %v9123_v52, 2 }
 0x32b   :  { %1989 = vrot.lane.b32.xlu1 %v1704_v30, %s7652_s7  ;;  %v2547_v30 = vrot.slane %v9080_v2, 2  ;;  %v4921_v57 = vmax.f32 %v4705_v38, %v4885_v6  ;;  %v2553_v38 = vrot.slane %v9087_v5, 2 }
 0x32c   :  { %v9240_v19 = vpop.permute.xlu0 %1939 }
 0x32d   :  { %v9243_v14 = vpop.permute.xlu1 %1941 }
 0x32e   :  { %1991 = vrot.lane.b32.xlu0 %v1706_v20, %s7652_s7  ;;  %v2549_v20 = vrot.slane %v9099_v26, 2 }
 0x32f   :  { %1993 = vrot.lane.b32.xlu1 %v1708_v40, %s7652_s7  ;;  %v4578_v9 = vld [vmem:[#allocation2 + $0x1e0] ss:$4 sm:$0xff]  ;;  %v4650_v27 = vld [vmem:[#allocation2 + $0x1e1] ss:$4 sm:$0xff]  ;;  %v4758_v21 = vld [vmem:[#allocation2 + $0x1e2] ss:$4 sm:$0xff] }
 0x330   :  { %v9252_v11 = vpop.permute.xlu0 %1943  ;;  %v4706_v41 = vmax.f32 %v4578_v9, %v4650_v27  ;;  %v4830_v51 = vld [vmem:[#allocation2 + $0x1e3] ss:$4 sm:$0xff]  ;;  %v2551_v27 = vrot.slane %v9068_v15, 2 }
 0x331   :  { %v9255_v55 = vpop.permute.xlu1 %1945  ;;  %v4886_v59 = vmax.f32 %v4758_v21, %v4830_v51  ;;  %v2548_v21 = vsel %vm2379_vm0, %v2545_v23, %v2547_v30 }
 0x332   :  { %2827 = vrot.lane.b32.xlu0 %v2542_v31, %s7644_s22  ;;  %v2552_v51 = vsel %vm2379_vm0, %v2549_v20, %v2551_v27  ;;  %v2557_v31 = vrot.slane %v9144_v48, 2 }
 0x333   :  { %2829 = vrot.lane.b32.xlu1 %v2544_v33, %s7644_s22  ;;  %v4922_v45 = vmax.f32 %v4706_v41, %v4886_v59  ;;  %v2550_v41 = vsel %vm2379_vm0, %v2547_v30, %v2549_v20  ;;  %v2554_v33 = vsel %vm2379_vm0, %v2551_v27, %v2553_v38  ;;  %v2556_v30 = vsel %vm2379_vm0, %v2553_v38, %v2555_v53 }
 0x334   :  { %v9264_v63 = vpop.permute.xlu0 %1947  ;;  %v2561_v20 = vrot.slane %v9133_v10, 2  ;;  %v2565_v38 = vrot.slane %v9199_v0, 2 }
 0x335   :  { %v9267_v40 = vpop.permute.xlu1 %1949  ;;  %v4950_v9 = vpack.c.bf16 %v4922_v45, %v4921_v57  ;;  %v2559_v57 = vrot.slane %v9109_v61, 2 }
 0x336   :  { %2831 = vrot.lane.b32.xlu0 %v2546_v42, %s7644_s22  ;;  %v2558_v42 = vsel %vm2379_vm0, %v2555_v53, %v2557_v31 }
 0x337   :  { %7259 = vmatmul.mubr.msk.bf16.gmra.mxu1 %vm4402_vm3, %v4950_v9  ;;  %2833 = vrot.lane.b32.xlu1 %v2548_v21, %s7644_s22  ;;  %v2563_v21 = vrot.slane %v9171_v22, 2  ;;  %v2560_v27 = vsel %vm2379_vm0, %v2557_v31, %v2559_v57  ;;  %v2569_v31 = vrot.slane %v9185_v13, 2 }
 0x338   :  { %v9275_v34 = vpop.permute.xlu0 %1951 }
 0x339   :  { %v9278_v6 = vpop.permute.xlu1 %1953  ;;  %v2564_v53 = vsel %vm2379_vm0, %v2561_v20, %v2563_v21  ;;  %v2566_v49 = vsel %vm2379_vm0, %v2563_v21, %v2565_v38  ;;  %v3407_v21 = vrot.slane %v8944_v28, 3 }
 0x33a   :  { %2835 = vrot.lane.b32.xlu0 %v2550_v41, %s7644_s22 }
 0x33b   :  { %2837 = vrot.lane.b32.xlu1 %v2552_v51, %s7644_s22 }
 0x33c   :  { %v9285_v23 = vpop.permute.xlu0 %1955 }
 0x33d   :  { %11588 = vst [vmem:[#allocation38_spill] sm:$0xff] %v9285_v23  ;;  %v9288_v59 = vpop.permute.xlu1 %1957 }
 0x33e   :  { %11589 = vst [vmem:[#allocation39_spill] sm:$0xff] %v9288_v59  ;;  %2839 = vrot.lane.b32.xlu0 %v2554_v33, %s7644_s22  ;;  %v2562_v33 = vsel %vm2379_vm0, %v2559_v57, %v2561_v20  ;;  %v3405_v20 = vrot.slane %v9054_v62, 3 }
 0x33f   :  { %2841 = vrot.lane.b32.xlu1 %v2556_v30, %s7644_s22  ;;  %v2567_v30 = vrot.slane %v9157_v25, 2 }
 0x340   :  { %v9295_v45 = vpop.permute.xlu0 %1959 }
 0x341   :  { %11590 = vst [vmem:[#allocation40_spill] sm:$0xff] %v9295_v45  ;;  %v9298_v9 = vpop.permute.xlu1 %1961  ;;  %v2568_v57 = vsel %vm2379_vm0, %v2565_v38, %v2567_v30  ;;  %v2570_v54 = vsel %vm2379_vm0, %v2567_v30, %v2569_v31  ;;  %v11592_v30 = vrot.slane %v8955_v60, 3 }
 0x342   :  { %11591 = vst [vmem:[#allocation41_spill] sm:$0xff] %v9298_v9  ;;  %2843 = vrot.lane.b32.xlu0 %v2558_v42, %s7644_s22 }
 0x343   :  { %2845 = vrot.lane.b32.xlu1 %v2560_v27, %s7644_s22  ;;  %v3406_v28 = vsel %vm3243_vm2, %v11592_v30, %v3405_v20  ;;  %v3415_v30 = vrot.slane %v9068_v15, 3 }
 0x344   :  { %v9305_v41 = vpop.permute.xlu0 %2795 }
 0x345   :  { %v9308_v51 = vpop.permute.xlu1 %2797 }
 0x346   :  { %2847 = vrot.lane.b32.xlu0 %v2562_v33, %s7644_s22 }
 0x347   :  { %2849 = vrot.lane.b32.xlu1 %v2564_v53, %s7644_s22  ;;  %v9328_v53 = vpop.f32.mrf.mxu0 }
 0x348   :  { %v9315_v42 = vpop.permute.xlu0 %2799 }
 0x349   :  { %v9318_v27 = vpop.permute.xlu1 %2801  ;;  %v9342_v62 = vpop.f32.mrf.mxu0 }
 0x34a   :  { %2851 = vrot.lane.b32.xlu0 %v2566_v49, %s7644_s22  ;;  %v2572_v49 = vsel %vm2379_vm0, %v2569_v31, %v11516_v1  ;;  %v3408_v31 = vsel %vm3243_vm2, %v3405_v20, %v3407_v21  ;;  %v3413_v1 = vrot.slane %v9099_v26, 3 }
 0x34b   :  { %2853 = vrot.lane.b32.xlu1 %v2568_v57, %s7644_s22  ;;  %v3409_v57 = vrot.slane %v9042_v46, 3  ;;  %v9356_v46 = vpop.f32.mrf.mxu0 }
 0x34c   :  { %v9325_v33 = vpop.permute.xlu0 %2803  ;;  %11593 = vst [vmem:[#allocation42_spill] sm:$0xff] %v9356_v46 }
 0x34d   :  { %v9330_v9 = vpop.permute.xlu1 %2805  ;;  %v3410_v60 = vsel %vm3243_vm2, %v3407_v21, %v3409_v57  ;;  %v3419_v21 = vrot.slane %v9123_v52, 3  ;;  %v3425_v52 = vrot.slane %v9133_v10, 3 }
 0x34e   :  { %2855 = vrot.lane.b32.xlu0 %v2570_v54, %s7644_s22  ;;  %v3411_v54 = vrot.slane %v9080_v2, 3  ;;  %v9368_v2 = vpop.f32.mrf.mxu0 }
 0x34f   :  { %2857 = vrot.lane.b32.xlu1 %v2572_v49, %s7644_s22 }
 0x350   :  { %v9339_v38 = vpop.permute.xlu0 %2807  ;;  %v3414_v17 = vsel %vm3243_vm2, %v3411_v54, %v3413_v1 }
 0x351   :  { %v9344_v45 = vpop.permute.xlu1 %2809 }
 0x352   :  { %3691 = vrot.lane.b32.xlu0 %v3406_v28, %s7653_s9  ;;  %v3412_v28 = vsel %vm3243_vm2, %v3409_v57, %v3411_v54  ;;  %v9377_v57 = vpop.f32.mrf.mxu0  ;;  %v3423_v54 = vrot.slane %v9109_v61, 3  ;;  %v3427_v61 = vrot.slane %v9171_v22, 3  ;;  %v2301_v22 = vadd.f32 %v8758_v32, %v9230_v24 }
 0x353   :  { %3693 = vrot.lane.b32.xlu1 %v3408_v31, %s7653_s9  ;;  %v3417_v31 = vrot.slane %v9087_v5, 3  ;;  %11594 = vst [vmem:[#allocation43_spill] sm:$0xff] %v9377_v57  ;;  %v3421_v5 = vrot.slane %v9144_v48, 3  ;;  %v2299_v48 = vadd.f32 %v9216_v44, %v8772_v36  ;;  %v3433_v24 = vrot.slane %v9185_v13, 3 }
 0x354   :  { %v9353_v49 = vpop.permute.xlu0 %2811 }
 0x355   :  { %v9358_v59 = vpop.permute.xlu1 %2813  ;;  %v3418_v23 = vsel %vm3243_vm2, %v3415_v30, %v3417_v31 }
 0x356   :  { %3695 = vrot.lane.b32.xlu0 %v3410_v60, %s7653_s9  ;;  %v3416_v60 = vsel %vm3243_vm2, %v3413_v1, %v3415_v30  ;;  %v9389_v1 = vpop.f32.mrf.mxu0  ;;  %v3422_v30 = vsel %vm3243_vm2, %v3419_v21, %v3421_v5 }
 0x357   :  { %3697 = vrot.lane.b32.xlu1 %v3412_v28, %s7653_s9 }
 0x358   :  { %v9365_v20 = vpop.permute.xlu0 %2815  ;;  %v9406_v10 = vpop.f32.mrf.mxu0 }
 0x359   :  { %v9370_v26 = vpop.permute.xlu1 %2817  ;;  %11597 = vst [vmem:[#allocation46_spill] sm:$0xff] %v9406_v10 }
 0x35a   :  { %3699 = vrot.lane.b32.xlu0 %v3414_v17, %s7653_s9  ;;  %v3420_v17 = vsel %vm3243_vm2, %v3417_v31, %v3419_v21  ;;  %v3424_v31 = vsel %vm3243_vm2, %v3421_v5, %v3423_v54  ;;  %v3429_v21 = vrot.slane %v9199_v0, 3  ;;  %v3431_v5 = vrot.slane %v9157_v25, 3  ;;  %v9421_v32 = vpop.f32.mrf.mxu0 }
 0x35b   :  { %3701 = vrot.lane.b32.xlu1 %v3416_v60, %s7653_s9  ;;  %11598 = vst [vmem:[#allocation47_spill] sm:$0xff] %v9421_v32 }
 0x35c   :  { %v9379_v28 = vpop.permute.xlu0 %2819 }
 0x35d   :  { %v9382_v15 = vpop.permute.xlu1 %2821 }
 0x35e   :  { %11595 = vst [vmem:[#allocation44_spill] sm:$0xff] %v9382_v15  ;;  %3703 = vrot.lane.b32.xlu0 %v3418_v23, %s7653_s9  ;;  %v2300_v23 = vadd.f32 %v9219_v47, %v8796_v18  ;;  %v3426_v47 = vsel %vm3243_vm2, %v3423_v54, %v3425_v52  ;;  %v3435_v54 = vrot.slane %v9226_v29, 3 }
 0x35f   :  { %3705 = vrot.lane.b32.xlu1 %v3420_v17, %s7653_s9  ;;  %v3163_v17 = vadd.f32 %v9305_v41, %v2299_v48  ;;  %v2302_v48 = vadd.f32 %v8782_v37, %v9233_v39 }
 0x360   :  { %v9391_v60 = vpop.permute.xlu0 %2823  ;;  %v3164_v36 = vadd.f32 %v9308_v51, %v2300_v23  ;;  %v3428_v51 = vsel %vm3243_vm2, %v3425_v52, %v3427_v61  ;;  %v2303_v52 = vadd.f32 %v9240_v19, %v8819_v8  ;;  %v9438_v19 = vpop.f32.mrf.mxu0 }
 0x361   :  { %v9396_v15 = vpop.permute.xlu1 %2825  ;;  %11599 = vst [vmem:[#allocation48_spill] sm:$0xff] %v9438_v19 }
 0x362   :  { %11596 = vst [vmem:[#allocation45_spill] sm:$0xff] %v9396_v15  ;;  %3707 = vrot.lane.b32.xlu0 %v3422_v30, %s7653_s9  ;;  %v3165_v30 = vadd.f32 %v9315_v42, %v2301_v22 }
 0x363   :  { %3709 = vrot.lane.b32.xlu1 %v3424_v31, %s7653_s9  ;;  %v3166_v31 = vadd.f32 %v9318_v27, %v2302_v48  ;;  %v3432_v27 = vsel %vm3243_vm2, %v3429_v21, %v3431_v5 }
 0x364   :  { %v3660_v44 = vpop.permute.xlu0 %3659 }
 0x365   :  { %v4027_v15 = vadd.f32 %v3660_v44, %v3163_v17  ;;  %v3662_v18 = vpop.permute.xlu1 %3661 }
 0x366   :  { %v4028_v41 = vadd.f32 %v3662_v18, %v3164_v36  ;;  %3711 = vrot.lane.b32.xlu0 %v3426_v47, %s7653_s9  ;;  %v2304_v36 = vadd.f32 %v9243_v14, %v8843_v16  ;;  %v3167_v47 = vadd.f32 %v9325_v33, %v2303_v52  ;;  %v1709_v16 = vrot.slane %v9342_v62, 1 }
 0x367   :  { %v4178_v23 = vadd.f32 %v8979_v3, %v4027_v15  ;;  %3713 = vrot.lane.b32.xlu1 %v3428_v51, %s7653_s9  ;;  %v3430_v15 = vsel %vm3243_vm2, %v3427_v61, %v3429_v21  ;;  %v1711_v61 = vrot.slane %v9210_v4, 1  ;;  %v2305_v33 = vadd.f32 %v8808_v43, %v9252_v11  ;;  %v9458_v11 = vpop.f32.mrf.mxu0 }
 0x368   :  { %v4179_v37 = vadd.f32 %v8979_v3, %v4028_v41  ;;  %v3664_v39 = vpop.permute.xlu0 %3663  ;;  %v3168_v14 = vadd.f32 %v9330_v9, %v2304_v36  ;;  %v3436_v9 = vsel %vm3243_vm2, %v3433_v24, %v3435_v54  ;;  %11600 = vst [vmem:[#allocation49_spill] sm:$0xff] %v9458_v11  ;;  %v11601_v36 = vrot.slane %v9226_v29, 1 }
 0x369   :  { %v4322_v17 = vmax.f32 %v4178_v23, 0.0  ;;  %v4029_v22 = vadd.f32 %v3664_v39, %v3165_v30  ;;  %v3666_v42 = vpop.permute.xlu1 %3665  ;;  %v3434_v23 = vsel %vm3243_vm2, %v3431_v5, %v3433_v24  ;;  %v3169_v52 = vadd.f32 %v9339_v38, %v2305_v33 }
 0x36a   :  { %v4323_v44 = vmax.f32 %v4179_v37, 0.0  ;;  %v4030_v18 = vadd.f32 %v3666_v42, %v3166_v31  ;;  %3715 = vrot.lane.b32.xlu0 %v3430_v15, %s7653_s9  ;;  %v2306_v31 = vadd.f32 %v8829_v7, %v9255_v55  ;;  %v1713_v7 = vrot.slane %v9328_v53, 1 }
 0x36b   :  { %4467 = vst.msk [vmem:[#allocation2 + $0x200] sm:$0xff] %vm4402_vm3, %v4322_v17  ;;  %v4180_v8 = vadd.f32 %v8979_v3, %v4029_v22  ;;  %3717 = vrot.lane.b32.xlu1 %v3432_v27, %s7653_s9  ;;  %v1715_v55 = vrot.slane %v9368_v2, 1  ;;  %v2307_v38 = vadd.f32 %v9264_v63, %v8873_v56  ;;  %v9479_v56 = vld [vmem:[%s11500_s2] ss:$0 sm:$0xff] }
 0x36c   :  { %4468 = vst.msk [vmem:[#allocation2 + $0x208] sm:$0xff] %vm4402_vm3, %v4323_v44  ;;  %v4181_v21 = vadd.f32 %v8979_v3, %v4030_v18  ;;  %v3668_v48 = vpop.permute.xlu0 %3667  ;;  %v3170_v5 = vadd.f32 %v9344_v45, %v2306_v31  ;;  %v1710_v44 = vsel %vm1515_vm1, %v11601_v36, %v1709_v16  ;;  %v2308_v18 = vadd.f32 %v9267_v40, %v8894_v50  ;;  %v9483_v50 = vpop.f32.mrf.mxu0 }
 0x36d   :  { %v4324_v41 = vmax.f32 %v4180_v8, 0.0  ;;  %v4031_v51 = vadd.f32 %v3668_v48, %v3167_v47  ;;  %v3670_v30 = vpop.permute.xlu1 %3669  ;;  %v1712_v47 = vsel %vm1515_vm1, %v1709_v16, %v1711_v61  ;;  %v1719_v40 = vrot.slane %v9356_v46, 1 }
 0x36e   :  { %v4325_v37 = vmax.f32 %v4181_v21, 0.0  ;;  %v4032_v39 = vadd.f32 %v3670_v30, %v3168_v14  ;;  %3719 = vrot.lane.b32.xlu0 %v3434_v23, %s7653_s9  ;;  %v3172_v8 = vadd.f32 %v9358_v59, %v2308_v18  ;;  %v1714_v14 = vsel %vm1515_vm1, %v1711_v61, %v1713_v7 }
 0x36f   :  { %4469 = vst.msk [vmem:[#allocation2 + $0x210] sm:$0xff] %vm4402_vm3, %v4324_v41  ;;  %v4182_v43 = vadd.f32 %v8979_v3, %v4031_v51  ;;  %3721 = vrot.lane.b32.xlu1 %v3436_v9, %s7653_s9  ;;  %v2309_v21 = vadd.f32 %v8859_v35, %v9275_v34  ;;  %v1717_v48 = vrot.slane %v9389_v1, 1  ;;  %v2310_v30 = vadd.f32 %v8882_v12, %v9278_v6  ;;  %v9501_v34 = vpop.f32.mrf.mxu0 }
 0x370   :  { %4470 = vst.msk [vmem:[#allocation2 + $0x218] sm:$0xff] %vm4402_vm3, %v4325_v37  ;;  %v4183_v24 = vadd.f32 %v8979_v3, %v4032_v39  ;;  %v3672_v17 = vpop.permute.xlu0 %3671  ;;  %v3171_v3 = vadd.f32 %v9353_v49, %v2307_v38  ;;  %v1716_v31 = vsel %vm1515_vm1, %v1713_v7, %v1715_v55  ;;  %11602 = vst [vmem:[#allocation50_spill] sm:$0xff] %v9501_v34  ;;  %v1721_v12 = vrot.slane %v9377_v57, 1  ;;  %v11605_v38 = vld [vmem:[#allocation39_spill] sm:$0xff] }
 0x371   :  { %v4326_v22 = vmax.f32 %v4182_v43, 0.0  ;;  %v4033_v42 = vadd.f32 %v3672_v17, %v3169_v52  ;;  %v3674_v15 = vpop.permute.xlu1 %3673  ;;  %v3173_v37 = vadd.f32 %v9365_v20, %v2309_v21  ;;  %v3174_v61 = vadd.f32 %v9370_v26, %v2310_v30  ;;  %v11603_v20 = vld [vmem:[#allocation38_spill] sm:$0xff]  ;;  %v11604_v17 = vld [vmem:[#allocation24_spill] sm:$0xff]  ;;  %v11610_v30 = vld [vmem:[#allocation41_spill] sm:$0xff] }
 0x372   :  { %v4327_v27 = vmax.f32 %v4183_v24, 0.0  ;;  %v4034_v45 = vadd.f32 %v3674_v15, %v3170_v5  ;;  %1995 = vrot.lane.b32.xlu0 %v1710_v44, %s7652_s7  ;;  %v1723_v6 = vrot.slane %v9421_v32, 1  ;;  %v2311_v52 = vadd.f32 %v11603_v20, %v8916_v58 }
 0x373   :  { %4471 = vst.msk [vmem:[#allocation2 + $0x220] sm:$0xff] %vm4402_vm3, %v4326_v22  ;;  %v4184_v63 = vadd.f32 %v9479_v56, %v4033_v42  ;;  %1997 = vrot.lane.b32.xlu1 %v1712_v47, %s7652_s7  ;;  %v1718_v24 = vsel %vm1515_vm1, %v1715_v55, %v1717_v48  ;;  %v2312_v26 = vadd.f32 %v11605_v38, %v11604_v17  ;;  %v1727_v44 = vrot.slane %v9406_v10, 1  ;;  %v9520_v55 = vpop.f32.mrf.mxu0 }
 0x374   :  { %4472 = vst.msk [vmem:[#allocation2 + $0x228] sm:$0xff] %vm4402_vm3, %v4327_v27  ;;  %v4185_v49 = vadd.f32 %v9479_v56, %v4034_v45  ;;  %v3676_v16 = vpop.permute.xlu0 %3675  ;;  %v1720_v15 = vsel %vm1515_vm1, %v1717_v48, %v1719_v40  ;;  %v3175_v36 = vadd.f32 %v9379_v28, %v2311_v52  ;;  %11606 = vst [vmem:[#allocation38_spill] sm:$0xff] %v9520_v55  ;;  %v11607_v27 = vld [vmem:[#allocation44_spill] sm:$0xff]  ;;  %v1725_v48 = vrot.slane %v9458_v11, 1 }
 0x375   :  { %v4328_v33 = vmax.f32 %v4184_v63, 0.0  ;;  %v4035_v41 = vadd.f32 %v3676_v16, %v3171_v3  ;;  %v3678_v51 = vpop.permute.xlu1 %3677  ;;  %v3176_v45 = vadd.f32 %v11607_v27, %v2312_v26  ;;  %v1722_v28 = vsel %vm1515_vm1, %v1719_v40, %v1721_v12  ;;  %v11608_v16 = vld [vmem:[#allocation40_spill] sm:$0xff] }
 0x376   :  { %v4329_v23 = vmax.f32 %v4185_v49, 0.0  ;;  %v4036_v59 = vadd.f32 %v3678_v51, %v3172_v8  ;;  %1999 = vrot.lane.b32.xlu0 %v1714_v14, %s7652_s7  ;;  %v11609_v14 = vld [vmem:[#allocation22_spill] sm:$0xff]  ;;  %v1724_v40 = vsel %vm1515_vm1, %v1721_v12, %v1723_v6  ;;  %v1729_v17 = vrot.slane %v9438_v19, 1 }
 0x377   :  { %4473 = vst.msk [vmem:[#allocation2 + $0x230] sm:$0xff] %vm4402_vm3, %v4328_v33  ;;  %v4186_v35 = vadd.f32 %v9479_v56, %v4035_v41  ;;  %2001 = vrot.lane.b32.xlu1 %v1716_v31, %s7652_s7  ;;  %v4580_v18 = vld [vmem:[#allocation2 + $0x200] ss:$4 sm:$0xff]  ;;  %v4652_v63 = vld [vmem:[#allocation2 + $0x201] ss:$4 sm:$0xff]  ;;  %v2313_v21 = vadd.f32 %v11609_v14, %v11608_v16 }
 0x378   :  { %4474 = vst.msk [vmem:[#allocation2 + $0x238] sm:$0xff] %vm4402_vm3, %v4329_v23  ;;  %v4187_v39 = vadd.f32 %v9479_v56, %v4036_v59  ;;  %v3680_v9 = vpop.permute.xlu0 %3679  ;;  %v4760_v8 = vld [vmem:[#allocation2 + $0x202] ss:$4 sm:$0xff]  ;;  %v4832_v49 = vld [vmem:[#allocation2 + $0x203] ss:$4 sm:$0xff]  ;;  %v4707_v52 = vmax.f32 %v4580_v18, %v4652_v63  ;;  %v1731_v18 = vrot.slane %v9501_v34, 1 }
 0x379   :  { %v4330_v43 = vmax.f32 %v4186_v35, 0.0  ;;  %v4037_v7 = vadd.f32 %v3680_v9, %v3173_v37  ;;  %v3682_v5 = vpop.permute.xlu1 %3681  ;;  %v11611_v23 = vld [vmem:[#allocation23_spill] sm:$0xff]  ;;  %v3177_v35 = vadd.f32 %v9391_v60, %v2313_v21 }
 0x37a   :  { %v4331_v22 = vmax.f32 %v4187_v39, 0.0  ;;  %v4038_v42 = vadd.f32 %v3682_v5, %v3174_v61  ;;  %2003 = vrot.lane.b32.xlu0 %v1718_v24, %s7652_s7  ;;  %v2314_v59 = vadd.f32 %v11611_v23, %v11610_v30  ;;  %v9536_v39 = vpop.f32.mrf.mxu0  ;;  %v11613_v5 = vld [vmem:[#allocation45_spill] sm:$0xff]  ;;  %v1732_v30 = vsel %vm1515_vm1, %v1729_v17, %v1731_v18 }
 0x37b   :  { %4475 = vst.msk [vmem:[#allocation2 + $0x240] sm:$0xff] %vm4402_vm3, %v4330_v43  ;;  %v4188_v58 = vadd.f32 %v9479_v56, %v4037_v7  ;;  %2005 = vrot.lane.b32.xlu1 %v1720_v15, %s7652_s7  ;;  %11612 = vst [vmem:[#allocation24_spill] sm:$0xff] %v9536_v39  ;;  %v4887_v7 = vmax.f32 %v4760_v8, %v4832_v49  ;;  %v1733_v16 = vrot.slane %v9536_v39, 1 }
 0x37c   :  { %4476 = vst.msk [vmem:[#allocation2 + $0x248] sm:$0xff] %vm4402_vm3, %v4331_v22  ;;  %v4189_v47 = vadd.f32 %v9479_v56, %v4038_v42  ;;  %v3684_v3 = vpop.permute.xlu0 %3683  ;;  %v3178_v24 = vadd.f32 %v11613_v5, %v2314_v59 }
 0x37d   :  { %v4332_v33 = vmax.f32 %v4188_v58, 0.0  ;;  %v4039_v41 = vadd.f32 %v3684_v3, %v3175_v36  ;;  %v3686_v51 = vpop.permute.xlu1 %3685  ;;  %v1726_v36 = vsel %vm1515_vm1, %v1723_v6, %v1725_v48  ;;  %v9550_v3 = vpop.f32.mrf.mxu0  ;;  %v4923_v6 = vmax.f32 %v4707_v52, %v4887_v7 }
 0x37e   :  { %v4333_v31 = vmax.f32 %v4189_v47, 0.0  ;;  %v4040_v37 = vadd.f32 %v3686_v51, %v3176_v45  ;;  %2007 = vrot.lane.b32.xlu0 %v1722_v28, %s7652_s7  ;;  %v1728_v47 = vsel %vm1515_vm1, %v1725_v48, %v1727_v44  ;;  %11614 = vst [vmem:[#allocation39_spill] sm:$0xff] %v9550_v3  ;;  %v2573_v7 = vrot.slane %v9342_v62, 2 }
 0x37f   :  { %4477 = vst.msk [vmem:[#allocation2 + $0x250] sm:$0xff] %vm4402_vm3, %v4332_v33  ;;  %v4190_v61 = vadd.f32 %v9479_v56, %v4039_v41  ;;  %2009 = vrot.lane.b32.xlu1 %v1724_v40, %s7652_s7  ;;  %v4582_v9 = vld [vmem:[#allocation2 + $0x220] ss:$4 sm:$0xff]  ;;  %v4654_v20 = vld [vmem:[#allocation2 + $0x221] ss:$4 sm:$0xff]  ;;  %v1730_v33 = vsel %vm1515_vm1, %v1727_v44, %v1729_v17  ;;  %v1735_v41 = vrot.slane %v9483_v50, 1  ;;  %v9568_v23 = vpop.f32.mrf.mxu0 }
 0x380   :  { %v4762_v43 = vld [vmem:[#allocation2 + $0x222] ss:$4 sm:$0xff]  ;;  %4478 = vst.msk [vmem:[#allocation2 + $0x258] sm:$0xff] %vm4402_vm3, %v4333_v31  ;;  %v4191_v60 = vadd.f32 %v9479_v56, %v4040_v37  ;;  %v3688_v12 = vpop.permute.xlu0 %3687  ;;  %v4708_v38 = vmax.f32 %v4582_v9, %v4654_v20  ;;  %v4834_v26 = vld [vmem:[#allocation2 + $0x223] ss:$4 sm:$0xff]  ;;  %v1737_v44 = vrot.slane %v9520_v55, 1  ;;  %v1734_v37 = vsel %vm1515_vm1, %v1731_v18, %v1733_v16 }
 0x381   :  { %v4334_v22 = vmax.f32 %v4190_v61, 0.0  ;;  %v4041_v42 = vadd.f32 %v3688_v12, %v3177_v35  ;;  %v3690_v15 = vpop.permute.xlu1 %3689  ;;  %v4888_v58 = vmax.f32 %v4762_v43, %v4834_v26  ;;  %v11530_v40 = vrot.slane %v9568_v23, 1 }
 0x382   :  { %v4335_v27 = vmax.f32 %v4191_v60, 0.0  ;;  %v4042_v45 = vadd.f32 %v3690_v15, %v3178_v24  ;;  %2011 = vrot.lane.b32.xlu0 %v1726_v36, %s7652_s7  ;;  %v1736_v35 = vsel %vm1515_vm1, %v1733_v16, %v1735_v41  ;;  %v1738_v24 = vsel %vm1515_vm1, %v1735_v41, %v1737_v44 }
 0x383   :  { %4479 = vst.msk [vmem:[#allocation2 + $0x260] sm:$0xff] %vm4402_vm3, %v4334_v22  ;;  %v4192_v28 = vadd.f32 %v9479_v56, %v4041_v42  ;;  %2013 = vrot.lane.b32.xlu1 %v1728_v47, %s7652_s7  ;;  %v4924_v63 = vmax.f32 %v4708_v38, %v4888_v58  ;;  %v2575_v17 = vrot.slane %v9210_v4, 2  ;;  %v1740_v60 = vsel %vm1515_vm1, %v1737_v44, %v11530_v40 }
 0x384   :  { %4480 = vst.msk [vmem:[#allocation2 + $0x268] sm:$0xff] %vm4402_vm3, %v4335_v27  ;;  %v4193_v8 = vadd.f32 %v9479_v56, %v4042_v45  ;;  %v9556_v49 = vpop.permute.xlu0 %1963  ;;  %v2577_v18 = vrot.slane %v9328_v53, 2  ;;  %v11615_v45 = vrot.slane %v9226_v29, 2 }
 0x385   :  { %v4336_v14 = vmax.f32 %v4192_v28, 0.0  ;;  %v9559_v21 = vpop.permute.xlu1 %1965  ;;  %v4951_v48 = vpack.c.bf16 %v4924_v63, %v4923_v6  ;;  %v2579_v6 = vrot.slane %v9368_v2, 2  ;;  %v2576_v63 = vsel %vm2379_vm0, %v2573_v7, %v2575_v17 }
 0x386   :  { %v4337_v51 = vmax.f32 %v4193_v8, 0.0  ;;  %2015 = vrot.lane.b32.xlu0 %v1730_v33, %s7652_s7  ;;  %v2574_v47 = vsel %vm2379_vm0, %v11615_v45, %v2573_v7 }
 0x387   :  { %4481 = vst.msk [vmem:[#allocation2 + $0x270] sm:$0xff] %vm4402_vm3, %v4336_v14  ;;  %7262 = vmatprep.mubr.msk.bf16.mxu1 %vm4402_vm3, %v4951_v48  ;;  %2017 = vrot.lane.b32.xlu1 %v1732_v30, %s7652_s7  ;;  %v4584_v61 = vld [vmem:[#allocation2 + $0x240] ss:$4 sm:$0xff]  ;;  %v4656_v20 = vld [vmem:[#allocation2 + $0x241] ss:$4 sm:$0xff]  ;;  %v2581_v48 = vrot.slane %v9389_v1, 2  ;;  %v2580_v44 = vsel %vm2379_vm0, %v2577_v18, %v2579_v6 }
 0x388   :  { %4482 = vst.msk [vmem:[#allocation2 + $0x278] sm:$0xff] %vm4402_vm3, %v4337_v51  ;;  %v9573_v59 = vpop.permute.xlu0 %1967  ;;  %v4764_v52 = vld [vmem:[#allocation2 + $0x242] ss:$4 sm:$0xff]  ;;  %v4836_v43 = vld [vmem:[#allocation2 + $0x243] ss:$4 sm:$0xff]  ;;  %v4709_v26 = vmax.f32 %v4584_v61, %v4656_v20  ;;  %v2578_v51 = vsel %vm2379_vm0, %v2575_v17, %v2577_v18  ;;  %v2583_v30 = vrot.slane %v9356_v46, 2 }
 0x389   :  { %v9576_v31 = vpop.permute.xlu1 %1969  ;;  %v4889_v42 = vmax.f32 %v4764_v52, %v4836_v43  ;;  %v2582_v20 = vsel %vm2379_vm0, %v2579_v6, %v2581_v48  ;;  %v2587_v52 = vrot.slane %v9421_v32, 2 }
 0x38a   :  { %2019 = vrot.lane.b32.xlu0 %v1734_v37, %s7652_s7  ;;  %v2584_v43 = vsel %vm2379_vm0, %v2581_v48, %v2583_v30  ;;  %v2601_v48 = vrot.slane %v9520_v55, 2 }
 0x38b   :  { %2021 = vrot.lane.b32.xlu1 %v1736_v35, %s7652_s7  ;;  %v4925_v8 = vmax.f32 %v4709_v26, %v4889_v42  ;;  %v2585_v35 = vrot.slane %v9377_v57, 2 }
 0x38c   :  { %v9583_v9 = vpop.permute.xlu0 %1971 }
 0x38d   :  { %v9586_v5 = vpop.permute.xlu1 %1973 }
 0x38e   :  { %2023 = vrot.lane.b32.xlu0 %v1738_v24, %s7652_s7  ;;  %v2589_v24 = vrot.slane %v9458_v11, 2 }
 0x38f   :  { %2025 = vrot.lane.b32.xlu1 %v1740_v60, %s7652_s7  ;;  %v4586_v12 = vld [vmem:[#allocation2 + $0x260] ss:$4 sm:$0xff]  ;;  %v4658_v38 = vld [vmem:[#allocation2 + $0x261] ss:$4 sm:$0xff]  ;;  %v4766_v22 = vld [vmem:[#allocation2 + $0x262] ss:$4 sm:$0xff]  ;;  %v2586_v60 = vsel %vm2379_vm0, %v2583_v30, %v2585_v35 }
 0x390   :  { %v9595_v15 = vpop.permute.xlu0 %1975  ;;  %v4710_v36 = vmax.f32 %v4586_v12, %v4658_v38  ;;  %v4838_v58 = vld [vmem:[#allocation2 + $0x263] ss:$4 sm:$0xff]  ;;  %v2591_v12 = vrot.slane %v9406_v10, 2  ;;  %v2588_v38 = vsel %vm2379_vm0, %v2585_v35, %v2587_v52  ;;  %v11529_v30 = vrot.slane %v9568_v23, 2 }
 0x391   :  { %v9598_v27 = vpop.permute.xlu1 %1977  ;;  %v4890_v28 = vmax.f32 %v4766_v22, %v4838_v58  ;;  %v2593_v22 = vrot.slane %v9438_v19, 2  ;;  %v2595_v58 = vrot.slane %v9501_v34, 2 }
 0x392   :  { %2859 = vrot.lane.b32.xlu0 %v2574_v47, %s7644_s22  ;;  %v2592_v18 = vsel %vm2379_vm0, %v2589_v24, %v2591_v12  ;;  %v2597_v47 = vrot.slane %v9536_v39, 2 }
 0x393   :  { %2861 = vrot.lane.b32.xlu1 %v2576_v63, %s7644_s22  ;;  %v4926_v16 = vmax.f32 %v4710_v36, %v4890_v28  ;;  %v2590_v36 = vsel %vm2379_vm0, %v2587_v52, %v2589_v24  ;;  %v2594_v6 = vsel %vm2379_vm0, %v2591_v12, %v2593_v22  ;;  %v2599_v63 = vrot.slane %v9483_v50, 2 }
 0x394   :  { %v9607_v14 = vpop.permute.xlu0 %1979  ;;  %v3439_v24 = vrot.slane %v9210_v4, 3 }
 0x395   :  { %v9610_v33 = vpop.permute.xlu1 %1981  ;;  %v4952_v41 = vpack.c.bf16 %v4926_v16, %v4925_v8  ;;  %v2596_v8 = vsel %vm2379_vm0, %v2593_v22, %v2595_v58 }
 0x396   :  { %2863 = vrot.lane.b32.xlu0 %v2578_v51, %s7644_s22  ;;  %v2598_v51 = vsel %vm2379_vm0, %v2595_v58, %v2597_v47  ;;  %v3443_v58 = vrot.slane %v9368_v2, 3 }
 0x397   :  { %7263 = vmatmul.mubr.msk.bf16.gmra.mxu1 %vm4402_vm3, %v4952_v41  ;;  %2865 = vrot.lane.b32.xlu1 %v2580_v44, %s7644_s22  ;;  %v2600_v44 = vsel %vm2379_vm0, %v2597_v47, %v2599_v63 }
 0x398   :  { %v9618_v37 = vpop.permute.xlu0 %1983 }
 0x399   :  { %v9621_v61 = vpop.permute.xlu1 %1985 }
 0x39a   :  { %2867 = vrot.lane.b32.xlu0 %v2582_v20, %s7644_s22  ;;  %v3437_v20 = vrot.slane %v9342_v62, 3 }
 0x39b   :  { %2869 = vrot.lane.b32.xlu1 %v2584_v43, %s7644_s22  ;;  %v2602_v43 = vsel %vm2379_vm0, %v2599_v63, %v2601_v48 }
 0x39c   :  { %v9628_v7 = vpop.permute.xlu0 %1987 }
 0x39d   :  { %v9631_v17 = vpop.permute.xlu1 %1989 }
 0x39e   :  { %2871 = vrot.lane.b32.xlu0 %v2586_v60, %s7644_s22  ;;  %v2604_v60 = vsel %vm2379_vm0, %v2601_v48, %v11529_v30  ;;  %v3447_v48 = vrot.slane %v9356_v46, 3  ;;  %v11617_v30 = vld [vmem:[#allocation26_spill] sm:$0xff] }
 0x39f   :  { %2873 = vrot.lane.b32.xlu1 %v2588_v38, %s7644_s22  ;;  %v3441_v38 = vrot.slane %v9328_v53, 3  ;;  %v2315_v40 = vadd.f32 %v9556_v49, %v11617_v30 }
 0x3a0   :  { %v9638_v26 = vpop.permute.xlu0 %1991 }
 0x3a1   :  { %v9641_v42 = vpop.permute.xlu1 %1993 }
 0x3a2   :  { %2875 = vrot.lane.b32.xlu0 %v2590_v36, %s7644_s22  ;;  %v3438_v36 = vsel %vm3243_vm2, %v3435_v54, %v3437_v20  ;;  %v3444_v54 = vsel %vm3243_vm2, %v3441_v38, %v3443_v58 }
 0x3a3   :  { %2877 = vrot.lane.b32.xlu1 %v2592_v18, %s7644_s22  ;;  %v3440_v18 = vsel %vm3243_vm2, %v3437_v20, %v3439_v24 }
 0x3a4   :  { %v9648_v45 = vpop.permute.xlu0 %2827 }
 0x3a5   :  { %v9651_v28 = vpop.permute.xlu1 %2829 }
 0x3a6   :  { %2879 = vrot.lane.b32.xlu0 %v2594_v6, %s7644_s22  ;;  %v3445_v6 = vrot.slane %v9389_v1, 3 }
 0x3a7   :  { %2881 = vrot.lane.b32.xlu1 %v2596_v8, %s7644_s22  ;;  %v3442_v8 = vsel %vm3243_vm2, %v3439_v24, %v3441_v38  ;;  %v3453_v38 = vrot.slane %v9458_v11, 3 }
 0x3a8   :  { %v9658_v16 = vpop.permute.xlu0 %2831  ;;  %v3448_v24 = vsel %vm3243_vm2, %v3445_v6, %v3447_v48 }
 0x3a9   :  { %v9661_v41 = vpop.permute.xlu1 %2833 }
 0x3aa   :  { %2883 = vrot.lane.b32.xlu0 %v2598_v51, %s7644_s22 }
 0x3ab   :  { %2885 = vrot.lane.b32.xlu1 %v2600_v44, %s7644_s22  ;;  %v3449_v44 = vrot.slane %v9377_v57, 3  ;;  %v9742_v57 = vpop.f32.mrf.mxu1 }
 0x3ac   :  { %v9668_v35 = vpop.permute.xlu0 %2835  ;;  %11619 = vst [vmem:[#allocation40_spill] sm:$0xff] %v9742_v57 }
 0x3ad   :  { %v9671_v52 = vpop.permute.xlu1 %2837 }
 0x3ae   :  { %2887 = vrot.lane.b32.xlu0 %v2602_v43, %s7644_s22  ;;  %v3446_v43 = vsel %vm3243_vm2, %v3443_v58, %v3445_v6 }
 0x3af   :  { %2889 = vrot.lane.b32.xlu1 %v2604_v60, %s7644_s22  ;;  %v3451_v60 = vrot.slane %v9421_v32, 3  ;;  %v3179_v32 = vadd.f32 %v9648_v45, %v2315_v40  ;;  %v3463_v40 = vrot.slane %v9483_v50, 3  ;;  %v11621_v45 = vld [vmem:[#allocation27_spill] sm:$0xff] }
 0x3b0   :  { %v9680_v12 = vpop.permute.xlu0 %2839 }
 0x3b1   :  { %v9683_v22 = vpop.permute.xlu1 %2841  ;;  %v3452_v58 = vsel %vm3243_vm2, %v3449_v44, %v3451_v60 }
 0x3b2   :  { %3723 = vrot.lane.b32.xlu0 %v3438_v36, %s7653_s9 }
 0x3b3   :  { %3725 = vrot.lane.b32.xlu1 %v3440_v18, %s7653_s9 }
 0x3b4   :  { %v9692_v47 = vpop.permute.xlu0 %2843 }
 0x3b5   :  { %v9695_v63 = vpop.permute.xlu1 %2845 }
 0x3b6   :  { %3727 = vrot.lane.b32.xlu0 %v3442_v8, %s7653_s9  ;;  %v3450_v8 = vsel %vm3243_vm2, %v3447_v48, %v3449_v44  ;;  %v3454_v48 = vsel %vm3243_vm2, %v3451_v60, %v3453_v38  ;;  %v3461_v60 = vrot.slane %v9536_v39, 3 }
 0x3b7   :  { %3729 = vrot.lane.b32.xlu1 %v3444_v54, %s7653_s9  ;;  %v3455_v54 = vrot.slane %v9406_v10, 3  ;;  %v3459_v10 = vrot.slane %v9501_v34, 3  ;;  %v11620_v34 = vld [vmem:[#allocation25_spill] sm:$0xff] }
 0x3b8   :  { %v9702_v51 = vpop.permute.xlu0 %2847 }
 0x3b9   :  { %v9705_v20 = vpop.permute.xlu1 %2849 }
 0x3ba   :  { %3731 = vrot.lane.b32.xlu0 %v3446_v43, %s7653_s9  ;;  %v9722_v43 = vpop.f32.mrf.mxu0 }
 0x3bb   :  { %3733 = vrot.lane.b32.xlu1 %v3448_v24, %s7653_s9  ;;  %11616 = vst [vmem:[#allocation44_spill] sm:$0xff] %v9722_v43  ;;  %v3457_v24 = vrot.slane %v9438_v19, 3 }
 0x3bc   :  { %v9712_v36 = vpop.permute.xlu0 %2851  ;;  %v9739_v19 = vpop.f32.mrf.mxu0 }
 0x3bd   :  { %v9715_v18 = vpop.permute.xlu1 %2853 }
 0x3be   :  { %3735 = vrot.lane.b32.xlu0 %v3450_v8, %s7653_s9  ;;  %v11618_v8 = vld [vmem:[#allocation28_spill] sm:$0xff] }
 0x3bf   :  { %3737 = vrot.lane.b32.xlu1 %v3452_v58, %s7653_s9  ;;  %v2316_v44 = vadd.f32 %v9559_v21, %v11618_v8  ;;  %v3456_v58 = vsel %vm3243_vm2, %v3453_v38, %v3455_v54  ;;  %v2317_v21 = vadd.f32 %v11620_v34, %v9573_v59  ;;  %v3458_v38 = vsel %vm3243_vm2, %v3455_v54, %v3457_v24  ;;  %v9758_v59 = vpop.f32.mrf.mxu0 }
 0x3c0   :  { %v9724_v6 = vpop.permute.xlu0 %2855  ;;  %11622 = vst [vmem:[#allocation22_spill] sm:$0xff] %v9758_v59 }
 0x3c1   :  { %v9729_v11 = vpop.permute.xlu1 %2857  ;;  %v3180_v49 = vadd.f32 %v9651_v28, %v2316_v44  ;;  %v3460_v28 = vsel %vm3243_vm2, %v3457_v24, %v3459_v10  ;;  %v3181_v44 = vadd.f32 %v9658_v16, %v2317_v21  ;;  %v11624_v24 = vld [vmem:[#allocation30_spill] sm:$0xff] }
 0x3c2   :  { %3739 = vrot.lane.b32.xlu0 %v3454_v48, %s7653_s9  ;;  %v2319_v16 = vadd.f32 %v9583_v9, %v11624_v24 }
 0x3c3   :  { %3741 = vrot.lane.b32.xlu1 %v3456_v58, %s7653_s9  ;;  %v2318_v58 = vadd.f32 %v11621_v45, %v9576_v31  ;;  %v11625_v45 = vld [vmem:[#allocation32_spill] sm:$0xff] }
 0x3c4   :  { %v3692_v30 = vpop.permute.xlu0 %3691 }
 0x3c5   :  { %v4043_v8 = vadd.f32 %v3692_v30, %v3179_v32  ;;  %v3694_v48 = vpop.permute.xlu1 %3693  ;;  %v3465_v32 = vrot.slane %v9520_v55, 3  ;;  %v3182_v54 = vadd.f32 %v9661_v41, %v2318_v58  ;;  %v9762_v30 = vpop.f32.mrf.mxu1  ;;  %v3183_v41 = vadd.f32 %v9668_v35, %v2319_v16 }
 0x3c6   :  { %v4044_v46 = vadd.f32 %v3694_v48, %v3180_v49  ;;  %3743 = vrot.lane.b32.xlu0 %v3458_v38, %s7653_s9  ;;  %11623 = vst [vmem:[#allocation41_spill] sm:$0xff] %v9762_v30  ;;  %v3462_v38 = vsel %vm3243_vm2, %v3459_v10, %v3461_v60  ;;  %v1741_v10 = vrot.slane %v9739_v19, 1  ;;  %v9777_v58 = vpop.f32.mrf.mxu0 }
 0x3c7   :  { %v4194_v39 = vadd.f32 %v9479_v56, %v4043_v8  ;;  %3745 = vrot.lane.b32.xlu1 %v3460_v28, %s7653_s9  ;;  %v2320_v28 = vadd.f32 %v9586_v5, %v11625_v45  ;;  %11626 = vst [vmem:[#allocation23_spill] sm:$0xff] %v9777_v58  ;;  %v9782_v35 = vpop.f32.mrf.mxu1 }
 0x3c8   :  { %v4195_v31 = vadd.f32 %v9479_v56, %v4044_v46  ;;  %v3696_v49 = vpop.permute.xlu0 %3695  ;;  %v3464_v46 = vsel %vm3243_vm2, %v3461_v60, %v3463_v40  ;;  %11627 = vst [vmem:[#allocation45_spill] sm:$0xff] %v9782_v35  ;;  %v9793_v45 = vpop.f32.mrf.mxu0 }
 0x3c9   :  { %v4338_v21 = vmax.f32 %v4194_v39, 0.0  ;;  %v4045_v8 = vadd.f32 %v3696_v49, %v3181_v44  ;;  %v3698_v48 = vpop.permute.xlu1 %3697  ;;  %v1743_v39 = vrot.slane %v9550_v3, 1  ;;  %v3184_v5 = vadd.f32 %v9671_v52, %v2320_v28  ;;  %11631 = vst [vmem:[#allocation26_spill] sm:$0xff] %v9793_v45 }
 0x3ca   :  { %v4339_v34 = vmax.f32 %v4195_v31, 0.0  ;;  %v4046_v55 = vadd.f32 %v3698_v48, %v3182_v54  ;;  %3747 = vrot.lane.b32.xlu0 %v3462_v38, %s7653_s9  ;;  %v11628_v54 = vld [vmem:[#allocation29_spill] sm:$0xff] }
 0x3cb   :  { %4483 = vst.msk [vmem:[#allocation2 + $0x280] sm:$0xff] %vm4402_vm3, %v4338_v21  ;;  %v4196_v9 = vadd.f32 %v9479_v56, %v4045_v8  ;;  %3749 = vrot.lane.b32.xlu1 %v3464_v46, %s7653_s9  ;;  %v2321_v31 = vadd.f32 %v11628_v54, %v9595_v15  ;;  %v3466_v21 = vsel %vm3243_vm2, %v3463_v40, %v3465_v32  ;;  %v11629_v8 = vld [vmem:[#allocation31_spill] sm:$0xff]  ;;  %v1747_v40 = vrot.slane %v9777_v58, 1 }
 0x3cc   :  { %4484 = vst.msk [vmem:[#allocation2 + $0x288] sm:$0xff] %vm4402_vm3, %v4339_v34  ;;  %v4197_v60 = vadd.f32 %v9479_v56, %v4046_v55  ;;  %v3700_v44 = vpop.permute.xlu0 %3699  ;;  %v2322_v48 = vadd.f32 %v11629_v8, %v9598_v27  ;;  %v11630_v55 = vrot.slane %v9568_v23, 3  ;;  %v1745_v27 = vrot.slane %v9722_v43, 1  ;;  %v9813_v8 = vpop.f32.mrf.mxu0 }
 0x3cd   :  { %v4340_v49 = vmax.f32 %v4196_v9, 0.0  ;;  %v4047_v24 = vadd.f32 %v3700_v44, %v3183_v41  ;;  %v3702_v16 = vpop.permute.xlu1 %3701  ;;  %v3185_v15 = vadd.f32 %v9680_v12, %v2321_v31  ;;  %v9804_v9 = vpop.f32.mrf.mxu1  ;;  %v11633_v12 = vld [vmem:[#allocation34_spill] sm:$0xff]  ;;  %v11634_v31 = vrot.slane %v9568_v23, 1  ;;  %11636 = vst [vmem:[#allocation25_spill] sm:$0xff] %v9813_v8 }
 0x3ce   :  { %v4341_v38 = vmax.f32 %v4197_v60, 0.0  ;;  %v4048_v52 = vadd.f32 %v3702_v16, %v3184_v5  ;;  %3751 = vrot.lane.b32.xlu0 %v3466_v21, %s7653_s9  ;;  %v3468_v34 = vsel %vm3243_vm2, %v3465_v32, %v11630_v55  ;;  %v3186_v46 = vadd.f32 %v9683_v22, %v2322_v48  ;;  %11632 = vst [vmem:[#allocation28_spill] sm:$0xff] %v9804_v9 }
 0x3cf   :  { %4485 = vst.msk [vmem:[#allocation2 + $0x290] sm:$0xff] %vm4402_vm3, %v4340_v49  ;;  %v4198_v28 = vadd.f32 %v9479_v56, %v4047_v24  ;;  %3753 = vrot.lane.b32.xlu1 %v3468_v34, %s7653_s9  ;;  %v2323_v5 = vadd.f32 %v9607_v14, %v11633_v12  ;;  %v1742_v49 = vsel %vm1515_vm1, %v11634_v31, %v1741_v10  ;;  %v11635_v24 = vld [vmem:[#allocation36_spill] sm:$0xff]  ;;  %v1755_v31 = vrot.slane %v9762_v30, 1 }
 0x3d0   :  { %4486 = vst.msk [vmem:[#allocation2 + $0x298] sm:$0xff] %vm4402_vm3, %v4341_v38  ;;  %v4199_v32 = vadd.f32 %v9479_v56, %v4048_v52  ;;  %v3704_v41 = vpop.permute.xlu0 %3703  ;;  %v2324_v22 = vadd.f32 %v9610_v33, %v11635_v24  ;;  %v1744_v48 = vsel %vm1515_vm1, %v1741_v10, %v1743_v39  ;;  %v1751_v52 = vrot.slane %v9758_v59, 1 }
 0x3d1   :  { %v4342_v60 = vmax.f32 %v4198_v28, 0.0  ;;  %v4049_v44 = vadd.f32 %v3704_v41, %v3185_v15  ;;  %v3706_v54 = vpop.permute.xlu1 %3705  ;;  %v3187_v14 = vadd.f32 %v9692_v47, %v2323_v5  ;;  %v1746_v10 = vsel %vm1515_vm1, %v1743_v39, %v1745_v27  ;;  %v9826_v15 = vpop.f32.mrf.mxu1  ;;  %v11637_v47 = vld [vmem:[#allocation33_spill] sm:$0xff]  ;;  %v11638_v5 = vld [vmem:[#allocation35_spill] sm:$0xff] }
 0x3d2   :  { %v4343_v16 = vmax.f32 %v4199_v32, 0.0  ;;  %v4050_v21 = vadd.f32 %v3706_v54, %v3186_v46  ;;  %2027 = vrot.lane.b32.xlu0 %v1742_v49, %s7652_s7  ;;  %v3188_v33 = vadd.f32 %v9695_v63, %v2324_v22  ;;  %v2325_v28 = vadd.f32 %v11637_v47, %v9618_v37 }
 0x3d3   :  { %4487 = vst.msk [vmem:[#allocation2 + $0x2a0] sm:$0xff] %vm4402_vm3, %v4342_v60  ;;  %v4200_v38 = vadd.f32 %v9479_v56, %v4049_v44  ;;  %2029 = vrot.lane.b32.xlu1 %v1744_v48, %s7652_s7  ;;  %v1749_v32 = vrot.slane %v9813_v8, 1  ;;  %v2326_v63 = vadd.f32 %v11638_v5, %v9621_v61  ;;  %v1748_v54 = vsel %vm1515_vm1, %v1745_v27, %v1747_v40  ;;  %v9844_v27 = vpop.f32.mrf.mxu1 }
 0x3d4   :  { %4488 = vst.msk [vmem:[#allocation2 + $0x2a8] sm:$0xff] %vm4402_vm3, %v4343_v16  ;;  %v4201_v55 = vadd.f32 %v9479_v56, %v4050_v21  ;;  %v3708_v34 = vpop.permute.xlu0 %3707  ;;  %v3189_v39 = vadd.f32 %v9702_v51, %v2325_v28  ;;  %v1753_v61 = vrot.slane %v9793_v45, 1  ;;  %11639 = vst [vmem:[#allocation27_spill] sm:$0xff] %v9844_v27  ;;  %v11640_v51 = vld [vmem:[#allocation37_spill] sm:$0xff]  ;;  %v1757_v47 = vrot.slane %v9804_v9, 1 }
 0x3d5   :  { %v4344_v46 = vmax.f32 %v4200_v38, 0.0  ;;  %v4051_v41 = vadd.f32 %v3708_v34, %v3187_v14  ;;  %v3710_v12 = vpop.permute.xlu1 %3709  ;;  %v3190_v49 = vadd.f32 %v9705_v20, %v2326_v63  ;;  %v2327_v16 = vadd.f32 %v9628_v7, %v11640_v51  ;;  %v9862_v5 = vpop.f32.mrf.mxu1 }
 0x3d6   :  { %v4345_v60 = vmax.f32 %v4201_v55, 0.0  ;;  %v4052_v44 = vadd.f32 %v3710_v12, %v3188_v33  ;;  %2031 = vrot.lane.b32.xlu0 %v1746_v10, %s7652_s7  ;;  %v1750_v38 = vsel %vm1515_vm1, %v1747_v40, %v1749_v32  ;;  %v2328_v20 = vadd.f32 %v9631_v17, %v9199_v0 }
 0x3d7   :  { %4489 = vst.msk [vmem:[#allocation2 + $0x2b0] sm:$0xff] %vm4402_vm3, %v4344_v46  ;;  %v4202_v37 = vadd.f32 %v9479_v56, %v4051_v41  ;;  %2033 = vrot.lane.b32.xlu1 %v1748_v54, %s7652_s7  ;;  %v1752_v34 = vsel %vm1515_vm1, %v1749_v32, %v1751_v52  ;;  %v1759_v10 = vrot.slane %v9742_v57, 1  ;;  %v3191_v7 = vadd.f32 %v9712_v36, %v2327_v16  ;;  %v4588_v40 = vld [vmem:[#allocation2 + $0x280] ss:$4 sm:$0xff]  ;;  %v4660_v32 = vld [vmem:[#allocation2 + $0x281] ss:$4 sm:$0xff] }
 0x3d8   :  { %4490 = vst.msk [vmem:[#allocation2 + $0x2b8] sm:$0xff] %vm4402_vm3, %v4345_v60  ;;  %v4203_v24 = vadd.f32 %v9479_v56, %v4052_v44  ;;  %v3712_v22 = vpop.permute.xlu0 %3711  ;;  %v3192_v0 = vadd.f32 %v9715_v18, %v2328_v20  ;;  %v4768_v41 = vld [vmem:[#allocation2 + $0x282] ss:$4 sm:$0xff]  ;;  %v4840_v12 = vld [vmem:[#allocation2 + $0x283] ss:$4 sm:$0xff]  ;;  %v2329_v36 = vadd.f32 %v9157_v25, %v9638_v26  ;;  %v1754_v54 = vsel %vm1515_vm1, %v1751_v52, %v1753_v61 }
 0x3d9   :  { %v4346_v21 = vmax.f32 %v4202_v37, 0.0  ;;  %v4053_v48 = vadd.f32 %v3712_v22, %v3189_v39  ;;  %v3714_v14 = vpop.permute.xlu1 %3713  ;;  %v2330_v18 = vadd.f32 %v9185_v13, %v9641_v42  ;;  %v4711_v22 = vmax.f32 %v4588_v40, %v4660_v32 }
 0x3da   :  { %v4347_v33 = vmax.f32 %v4203_v24, 0.0  ;;  %v4054_v55 = vadd.f32 %v3714_v14, %v3190_v49  ;;  %2035 = vrot.lane.b32.xlu0 %v1750_v38, %s7652_s7  ;;  %v1756_v49 = vsel %vm1515_vm1, %v1753_v61, %v1755_v31  ;;  %v3193_v24 = vadd.f32 %v9724_v6, %v2329_v36  ;;  %v9881_v14 = vpop.f32.mrf.mxu1 }
 0x3db   :  { %4491 = vst.msk [vmem:[#allocation2 + $0x2c0] sm:$0xff] %vm4402_vm3, %v4346_v21  ;;  %v4204_v28 = vadd.f32 %v9479_v56, %v4053_v48  ;;  %2037 = vrot.lane.b32.xlu1 %v1752_v34, %s7652_s7  ;;  %v4891_v42 = vmax.f32 %v4768_v41, %v4840_v12  ;;  %v1761_v51 = vrot.slane %v9782_v35, 1  ;;  %v3194_v16 = vadd.f32 %v9729_v11, %v2330_v18 }
 0x3dc   :  { %4492 = vst.msk [vmem:[#allocation2 + $0x2c8] sm:$0xff] %vm4402_vm3, %v4347_v33  ;;  %v4205_v17 = vadd.f32 %v9479_v56, %v4054_v55  ;;  %v3716_v46 = vpop.permute.xlu0 %3715  ;;  %v1758_v55 = vsel %vm1515_vm1, %v1755_v31, %v1757_v47  ;;  %v1760_v40 = vsel %vm1515_vm1, %v1757_v47, %v1759_v10  ;;  %v1765_v41 = vrot.slane %v9881_v14, 1  ;;  %v9899_v12 = vpop.f32.mrf.mxu1 }
 0x3dd   :  { %v4348_v63 = vmax.f32 %v4204_v28, 0.0  ;;  %v4055_v60 = vadd.f32 %v3716_v46, %v3191_v7  ;;  %v3718_v44 = vpop.permute.xlu1 %3717  ;;  %v1763_v7 = vrot.slane %v9844_v27, 1 }
 0x3de   :  { %v4349_v39 = vmax.f32 %v4205_v17, 0.0  ;;  %v4056_v37 = vadd.f32 %v3718_v44, %v3192_v0  ;;  %2039 = vrot.lane.b32.xlu0 %v1754_v54, %s7652_s7  ;;  %v4927_v17 = vmax.f32 %v4711_v22, %v4891_v42  ;;  %v1767_v44 = vrot.slane %v9826_v15, 1 }
 0x3df   :  { %4493 = vst.msk [vmem:[#allocation2 + $0x2d0] sm:$0xff] %vm4402_vm3, %v4348_v63  ;;  %v4206_v25 = vadd.f32 %v9479_v56, %v4055_v60  ;;  %2041 = vrot.lane.b32.xlu1 %v1756_v49, %s7652_s7  ;;  %v4590_v26 = vld [vmem:[#allocation2 + $0x2a0] ss:$4 sm:$0xff]  ;;  %v4662_v52 = vld [vmem:[#allocation2 + $0x2a1] ss:$4 sm:$0xff]  ;;  %v1762_v60 = vsel %vm1515_vm1, %v1759_v10, %v1761_v51  ;;  %v1764_v18 = vsel %vm1515_vm1, %v1761_v51, %v1763_v7  ;;  %v9916_v10 = vpop.f32.mrf.mxu1  ;;  %v2605_v51 = vrot.slane %v9739_v19, 2 }
 0x3e0   :  { %v4770_v13 = vld [vmem:[#allocation2 + $0x2a2] ss:$4 sm:$0xff]  ;;  %4494 = vst.msk [vmem:[#allocation2 + $0x2d8] sm:$0xff] %vm4402_vm3, %v4349_v39  ;;  %v4207_v61 = vadd.f32 %v9479_v56, %v4056_v37  ;;  %v3720_v6 = vpop.permute.xlu0 %3719  ;;  %v4712_v21 = vmax.f32 %v4590_v26, %v4662_v52  ;;  %v4842_v48 = vld [vmem:[#allocation2 + $0x2a3] ss:$4 sm:$0xff]  ;;  %v1769_v39 = vrot.slane %v9862_v5, 1  ;;  %v1766_v49 = vsel %vm1515_vm1, %v1763_v7, %v1765_v41 }
 0x3e1   :  { %v4350_v38 = vmax.f32 %v4206_v25, 0.0  ;;  %v4057_v20 = vadd.f32 %v3720_v6, %v3193_v24  ;;  %v3722_v33 = vpop.permute.xlu1 %3721  ;;  %v4892_v34 = vmax.f32 %v4770_v13, %v4842_v48  ;;  %v11541_v24 = vrot.slane %v9916_v10, 1 }
 0x3e2   :  { %v4351_v11 = vmax.f32 %v4207_v61, 0.0  ;;  %v4058_v28 = vadd.f32 %v3722_v33, %v3194_v16  ;;  %2043 = vrot.lane.b32.xlu0 %v1758_v55, %s7652_s7  ;;  %v1768_v25 = vsel %vm1515_vm1, %v1765_v41, %v1767_v44  ;;  %v1770_v61 = vsel %vm1515_vm1, %v1767_v44, %v1769_v39 }
 0x3e3   :  { %4495 = vst.msk [vmem:[#allocation2 + $0x2e0] sm:$0xff] %vm4402_vm3, %v4350_v38  ;;  %v4208_v0 = vadd.f32 %v9479_v56, %v4057_v20  ;;  %2045 = vrot.lane.b32.xlu1 %v1760_v40, %s7652_s7  ;;  %v4928_v46 = vmax.f32 %v4712_v21, %v4892_v34  ;;  %v2607_v6 = vrot.slane %v9550_v3, 2  ;;  %v1772_v21 = vsel %vm1515_vm1, %v1769_v39, %v11541_v24 }
 0x3e4   :  { %4496 = vst.msk [vmem:[#allocation2 + $0x2e8] sm:$0xff] %vm4402_vm3, %v4351_v11  ;;  %v4209_v31 = vadd.f32 %v9479_v56, %v4058_v28  ;;  %v9896_v32 = vpop.permute.xlu0 %1995  ;;  %v2609_v28 = vrot.slane %v9722_v43, 2  ;;  %v2613_v44 = vrot.slane %v9813_v8, 2 }
 0x3e5   :  { %v4352_v47 = vmax.f32 %v4208_v0, 0.0  ;;  %v9901_v36 = vpop.permute.xlu1 %1997  ;;  %v4953_v63 = vpack.c.bf16 %v4928_v46, %v4927_v17  ;;  %v11641_v0 = vrot.slane %v9568_v23, 2  ;;  %v2608_v41 = vsel %vm2379_vm0, %v2605_v51, %v2607_v6 }
 0x3e6   :  { %v4353_v54 = vmax.f32 %v4209_v31, 0.0  ;;  %2047 = vrot.lane.b32.xlu0 %v1762_v60, %s7652_s7  ;;  %v2611_v31 = vrot.slane %v9777_v58, 2  ;;  %v2610_v39 = vsel %vm2379_vm0, %v2607_v6, %v2609_v28 }
 0x3e7   :  { %4497 = vst.msk [vmem:[#allocation2 + $0x2f0] sm:$0xff] %vm4402_vm3, %v4352_v47  ;;  %7266 = vmatprep.mubr.msk.bf16.mxu1 %vm4402_vm3, %v4953_v63  ;;  %2049 = vrot.lane.b32.xlu1 %v1764_v18, %s7652_s7  ;;  %v4592_v26 = vld [vmem:[#allocation2 + $0x2c0] ss:$4 sm:$0xff]  ;;  %v4664_v22 = vld [vmem:[#allocation2 + $0x2c1] ss:$4 sm:$0xff]  ;;  %v2606_v17 = vsel %vm2379_vm0, %v11641_v0, %v2605_v51  ;;  %v2619_v51 = vrot.slane %v9762_v30, 2 }
 0x3e8   :  { %4498 = vst.msk [vmem:[#allocation2 + $0x2f8] sm:$0xff] %vm4402_vm3, %v4353_v54  ;;  %v9913_v56 = vpop.permute.xlu0 %1999  ;;  %v4772_v13 = vld [vmem:[#allocation2 + $0x2c2] ss:$4 sm:$0xff]  ;;  %v4844_v42 = vld [vmem:[#allocation2 + $0x2c3] ss:$4 sm:$0xff]  ;;  %v4713_v20 = vmax.f32 %v4592_v26, %v4664_v22  ;;  %v2617_v22 = vrot.slane %v9793_v45, 2 }
 0x3e9   :  { %v9918_v37 = vpop.permute.xlu1 %2001  ;;  %v4893_v55 = vmax.f32 %v4772_v13, %v4844_v42  ;;  %v2614_v42 = vsel %vm2379_vm0, %v2611_v31, %v2613_v44  ;;  %v2627_v0 = vrot.slane %v9844_v27, 2 }
 0x3ea   :  { %2051 = vrot.lane.b32.xlu0 %v1766_v49, %s7652_s7  ;;  %v2615_v49 = vrot.slane %v9758_v59, 2 }
 0x3eb   :  { %2053 = vrot.lane.b32.xlu1 %v1768_v25, %s7652_s7  ;;  %v4929_v47 = vmax.f32 %v4713_v20, %v4893_v55  ;;  %v2612_v25 = vsel %vm2379_vm0, %v2609_v28, %v2611_v31  ;;  %v2623_v20 = vrot.slane %v9742_v57, 2  ;;  %v2629_v31 = vrot.slane %v9881_v14, 2 }
 0x3ec   :  { %v9925_v52 = vpop.permute.xlu0 %2003 }
 0x3ed   :  { %v9928_v16 = vpop.permute.xlu1 %2005 }
 0x3ee   :  { %2055 = vrot.lane.b32.xlu0 %v1770_v61, %s7652_s7  ;;  %v2616_v61 = vsel %vm2379_vm0, %v2613_v44, %v2615_v49 }
 0x3ef   :  { %2057 = vrot.lane.b32.xlu1 %v1772_v21, %s7652_s7  ;;  %v4594_v48 = vld [vmem:[#allocation2 + $0x2e0] ss:$4 sm:$0xff]  ;;  %v4666_v38 = vld [vmem:[#allocation2 + $0x2e1] ss:$4 sm:$0xff]  ;;  %v4774_v33 = vld [vmem:[#allocation2 + $0x2e2] ss:$4 sm:$0xff] }
 0x3f0   :  { %v9937_v34 = vpop.permute.xlu0 %2007  ;;  %v4714_v7 = vmax.f32 %v4594_v48, %v4666_v38  ;;  %v4846_v11 = vld [vmem:[#allocation2 + $0x2e3] ss:$4 sm:$0xff]  ;;  %v2621_v21 = vrot.slane %v9804_v9, 2  ;;  %v2618_v38 = vsel %vm2379_vm0, %v2615_v49, %v2617_v22 }
 0x3f1   :  { %v9940_v40 = vpop.permute.xlu1 %2009  ;;  %v4894_v46 = vmax.f32 %v4774_v33, %v4846_v11  ;;  %v2620_v33 = vsel %vm2379_vm0, %v2617_v22, %v2619_v51  ;;  %v11540_v22 = vrot.slane %v9916_v10, 2 }
 0x3f2   :  { %2891 = vrot.lane.b32.xlu0 %v2606_v17, %s7644_s22  ;;  %v2622_v28 = vsel %vm2379_vm0, %v2619_v51, %v2621_v21  ;;  %v2624_v17 = vsel %vm2379_vm0, %v2621_v21, %v2623_v20 }
 0x3f3   :  { %2893 = vrot.lane.b32.xlu1 %v2608_v41, %s7644_s22  ;;  %v4930_v63 = vmax.f32 %v4714_v7, %v4894_v46  ;;  %v2625_v7 = vrot.slane %v9782_v35, 2 }
 0x3f4   :  { %v9949_v60 = vpop.permute.xlu0 %2011 }
 0x3f5   :  { %v9952_v54 = vpop.permute.xlu1 %2013  ;;  %v4954_v18 = vpack.c.bf16 %v4930_v63, %v4929_v47  ;;  %v2626_v47 = vsel %vm2379_vm0, %v2623_v20, %v2625_v7  ;;  %v2631_v63 = vrot.slane %v9826_v15, 2  ;;  %v2628_v44 = vsel %vm2379_vm0, %v2625_v7, %v2627_v0  ;;  %v10022_v7 = vpop.f32.mrf.mxu1 }
 0x3f6   :  { %2895 = vrot.lane.b32.xlu0 %v2610_v39, %s7644_s22  ;;  %v2633_v39 = vrot.slane %v9862_v5, 2  ;;  %v3471_v20 = vrot.slane %v9550_v3, 3 }
 0x3f7   :  { %7267 = vmatmul.mubr.msk.bf16.gmra.mxu1 %vm4402_vm3, %v4954_v18  ;;  %2897 = vrot.lane.b32.xlu1 %v2612_v25, %s7644_s22  ;;  %v2630_v25 = vsel %vm2379_vm0, %v2627_v0, %v2629_v31  ;;  %v3473_v0 = vrot.slane %v9722_v43, 3 }
 0x3f8   :  { %v9960_v26 = vpop.permute.xlu0 %2015 }
 0x3f9   :  { %v9963_v13 = vpop.permute.xlu1 %2017 }
 0x3fa   :  { %2899 = vrot.lane.b32.xlu0 %v2614_v42, %s7644_s22  ;;  %v2632_v42 = vsel %vm2379_vm0, %v2629_v31, %v2631_v63  ;;  %v11642_v31 = vrot.slane %v9568_v23, 3 }
 0x3fb   :  { %2901 = vrot.lane.b32.xlu1 %v2616_v61, %s7644_s22  ;;  %v3469_v61 = vrot.slane %v9739_v19, 3 }
 0x3fc   :  { %v9970_v6 = vpop.permute.xlu0 %2019 }
 0x3fd   :  { %v9973_v48 = vpop.permute.xlu1 %2021 }
 0x3fe   :  { %2903 = vrot.lane.b32.xlu0 %v2618_v38, %s7644_s22  ;;  %v2634_v38 = vsel %vm2379_vm0, %v2631_v63, %v2633_v39  ;;  %v3475_v63 = vrot.slane %v9777_v58, 3 }
 0x3ff   :  { %2905 = vrot.lane.b32.xlu1 %v2620_v33, %s7644_s22  ;;  %v2636_v33 = vsel %vm2379_vm0, %v2633_v39, %v11540_v22  ;;  %v10036_v39 = vpop.f32.mrf.mxu1 }
 0x400   :  { %v9980_v55 = vpop.permute.xlu0 %2023  ;;  %v3476_v22 = vsel %vm3243_vm2, %v3473_v0, %v3475_v63 }
 0x401   :  { %v9983_v11 = vpop.permute.xlu1 %2025 }
 0x402   :  { %2907 = vrot.lane.b32.xlu0 %v2622_v28, %s7644_s22 }
 0x403   :  { %2909 = vrot.lane.b32.xlu1 %v2624_v17, %s7644_s22 }
 0x404   :  { %v9990_v46 = vpop.permute.xlu0 %2859 }
 0x405   :  { %v9993_v41 = vpop.permute.xlu1 %2861 }
 0x406   :  { %2911 = vrot.lane.b32.xlu0 %v2626_v47, %s7644_s22  ;;  %v3470_v47 = vsel %vm3243_vm2, %v11642_v31, %v3469_v61  ;;  %v3479_v31 = vrot.slane %v9758_v59, 3 }
 0x407   :  { %2913 = vrot.lane.b32.xlu1 %v2628_v44, %s7644_s22  ;;  %v3472_v44 = vsel %vm3243_vm2, %v3469_v61, %v3471_v20  ;;  %v10048_v61 = vpop.f32.mrf.mxu1 }
 0x408   :  { %v10000_v18 = vpop.permute.xlu0 %2863  ;;  %11643 = vst [vmem:[#allocation30_spill] sm:$0xff] %v10048_v61 }
 0x409   :  { %v10003_v49 = vpop.permute.xlu1 %2865 }
 0x40a   :  { %2915 = vrot.lane.b32.xlu0 %v2630_v25, %s7644_s22 }
 0x40b   :  { %2917 = vrot.lane.b32.xlu1 %v2632_v42, %s7644_s22  ;;  %v3477_v42 = vrot.slane %v9813_v8, 3 }
 0x40c   :  { %v10010_v51 = vpop.permute.xlu0 %2867 }
 0x40d   :  { %v10013_v21 = vpop.permute.xlu1 %2869  ;;  %v3478_v8 = vsel %vm3243_vm2, %v3475_v63, %v3477_v42  ;;  %v3480_v59 = vsel %vm3243_vm2, %v3477_v42, %v3479_v31  ;;  %v3487_v63 = vrot.slane %v9742_v57, 3  ;;  %v3489_v42 = vrot.slane %v9782_v35, 3 }
 0x40e   :  { %2919 = vrot.lane.b32.xlu0 %v2634_v38, %s7644_s22  ;;  %v3491_v57 = vrot.slane %v9844_v27, 3  ;;  %v2333_v27 = vadd.f32 %v9210_v4, %v9913_v56  ;;  %v10105_v4 = vld [vmem:[%s11500_s2] ss:$0 sm:$0xff] }
 0x40f   :  { %2921 = vrot.lane.b32.xlu1 %v2636_v33, %s7644_s22  ;;  %v3474_v33 = vsel %vm3243_vm2, %v3471_v20, %v3473_v0  ;;  %v3483_v20 = vrot.slane %v9762_v30, 3  ;;  %v10060_v0 = vpop.f32.mrf.mxu1 }
 0x410   :  { %v10024_v28 = vpop.permute.xlu0 %2871 }
 0x411   :  { %v10027_v17 = vpop.permute.xlu1 %2873 }
 0x412   :  { %3755 = vrot.lane.b32.xlu0 %v3470_v47, %s7653_s9 }
 0x413   :  { %3757 = vrot.lane.b32.xlu1 %v3472_v44, %s7653_s9  ;;  %v3481_v44 = vrot.slane %v9793_v45, 3 }
 0x414   :  { %v10038_v25 = vpop.permute.xlu0 %2875 }
 0x415   :  { %v10041_v38 = vpop.permute.xlu1 %2877  ;;  %v3482_v45 = vsel %vm3243_vm2, %v3479_v31, %v3481_v44  ;;  %v3484_v30 = vsel %vm3243_vm2, %v3481_v44, %v3483_v20 }
 0x416   :  { %3759 = vrot.lane.b32.xlu0 %v3474_v33, %s7653_s9  ;;  %v3485_v33 = vrot.slane %v9804_v9, 3  ;;  %v2331_v9 = vadd.f32 %v9896_v32, %v9226_v29 }
 0x417   :  { %3761 = vrot.lane.b32.xlu1 %v3476_v22, %s7653_s9 }
 0x418   :  { %v10050_v47 = vpop.permute.xlu0 %2879  ;;  %v3486_v31 = vsel %vm3243_vm2, %v3483_v20, %v3485_v33  ;;  %v3195_v44 = vadd.f32 %v9990_v46, %v2331_v9  ;;  %v3493_v20 = vrot.slane %v9881_v14, 3  ;;  %v2334_v9 = vadd.f32 %v9328_v53, %v9918_v37 }
 0x419   :  { %v10053_v24 = vpop.permute.xlu1 %2881  ;;  %v3499_v53 = vrot.slane %v9916_v10, 3 }
 0x41a   :  { %3763 = vrot.lane.b32.xlu0 %v3478_v8, %s7653_s9  ;;  %v10072_v8 = vpop.f32.mrf.mxu1 }
 0x41b   :  { %3765 = vrot.lane.b32.xlu1 %v3480_v59, %s7653_s9  ;;  %11644 = vst [vmem:[#allocation32_spill] sm:$0xff] %v10072_v8 }
 0x41c   :  { %v10062_v22 = vpop.permute.xlu0 %2883  ;;  %v10089_v35 = vpop.f32.mrf.mxu1 }
 0x41d   :  { %v10065_v58 = vpop.permute.xlu1 %2885 }
 0x41e   :  { %3767 = vrot.lane.b32.xlu0 %v3482_v45, %s7653_s9  ;;  %v2332_v45 = vadd.f32 %v9901_v36, %v9342_v62  ;;  %v3490_v36 = vsel %vm3243_vm2, %v3487_v63, %v3489_v42  ;;  %v10111_v37 = vpop.f32.mrf.mxu1 }
 0x41f   :  { %3769 = vrot.lane.b32.xlu1 %v3484_v30, %s7653_s9  ;;  %v3488_v30 = vsel %vm3243_vm2, %v3485_v33, %v3487_v63  ;;  %v3495_v33 = vrot.slane %v9826_v15, 3  ;;  %v3497_v63 = vrot.slane %v9862_v5, 3  ;;  %11645 = vst [vmem:[#allocation29_spill] sm:$0xff] %v10111_v37 }
 0x420   :  { %v10074_v59 = vpop.permute.xlu0 %2887  ;;  %v3196_v29 = vadd.f32 %v9993_v41, %v2332_v45  ;;  %v3197_v41 = vadd.f32 %v10000_v18, %v2333_v27  ;;  %v2335_v18 = vadd.f32 %v9925_v52, %v9368_v2  ;;  %v1775_v52 = vrot.slane %v9899_v12, 1 }
 0x421   :  { %v10079_v43 = vpop.permute.xlu1 %2889 }
 0x422   :  { %3771 = vrot.lane.b32.xlu0 %v3486_v31, %s7653_s9  ;;  %v3492_v31 = vsel %vm3243_vm2, %v3489_v42, %v3491_v57  ;;  %v3198_v42 = vadd.f32 %v10003_v49, %v2334_v9  ;;  %v3199_v49 = vadd.f32 %v10010_v51, %v2335_v18  ;;  %v10128_v9 = vpop.f32.mrf.mxu1  ;;  %v11647_v51 = vld [vmem:[#allocation42_spill] sm:$0xff] }
 0x423   :  { %3773 = vrot.lane.b32.xlu1 %v3488_v30, %s7653_s9  ;;  %11646 = vst [vmem:[#allocation31_spill] sm:$0xff] %v10128_v9 }
 0x424   :  { %v3724_v32 = vpop.permute.xlu0 %3723 }
 0x425   :  { %v4059_v3 = vadd.f32 %v3724_v32, %v3195_v44  ;;  %v3726_v62 = vpop.permute.xlu1 %3725  ;;  %v2336_v32 = vadd.f32 %v9928_v16, %v9389_v1 }
 0x426   :  { %v4060_v46 = vadd.f32 %v3726_v62, %v3196_v29  ;;  %3775 = vrot.lane.b32.xlu0 %v3490_v36, %s7653_s9 }
 0x427   :  { %v4210_v56 = vadd.f32 %v10105_v4, %v4059_v3  ;;  %3777 = vrot.lane.b32.xlu1 %v3492_v31, %s7653_s9  ;;  %v3494_v3 = vsel %vm3243_vm2, %v3491_v57, %v3493_v20  ;;  %v3496_v31 = vsel %vm3243_vm2, %v3493_v20, %v3495_v33  ;;  %v1773_v57 = vrot.slane %v10036_v39, 1 }
 0x428   :  { %v4211_v45 = vadd.f32 %v10105_v4, %v4060_v46  ;;  %v3728_v27 = vpop.permute.xlu0 %3727  ;;  %v3200_v1 = vadd.f32 %v10013_v21, %v2336_v32  ;;  %v2337_v46 = vadd.f32 %v11647_v51, %v9937_v34  ;;  %v3500_v21 = vsel %vm3243_vm2, %v3497_v63, %v3499_v53 }
 0x429   :  { %v4354_v30 = vmax.f32 %v4210_v56, 0.0  ;;  %v4061_v44 = vadd.f32 %v3728_v27, %v3197_v41  ;;  %v3730_v29 = vpop.permute.xlu1 %3729  ;;  %v11648_v27 = vld [vmem:[#allocation43_spill] sm:$0xff] }
 0x42a   :  { %v4355_v62 = vmax.f32 %v4211_v45, 0.0  ;;  %v4062_v36 = vadd.f32 %v3730_v29, %v3198_v42  ;;  %3779 = vrot.lane.b32.xlu0 %v3494_v3, %s7653_s9  ;;  %v3498_v45 = vsel %vm3243_vm2, %v3495_v33, %v3497_v63  ;;  %v2338_v18 = vadd.f32 %v11648_v27, %v9940_v40  ;;  %v10148_v3 = vpop.f32.mrf.mxu1 }
 0x42b   :  { %4499 = vst.msk [vmem:[#allocation2 + $0x300] sm:$0xff] %vm4402_vm3, %v4354_v30  ;;  %v4212_v2 = vadd.f32 %v10105_v4, %v4061_v44  ;;  %3781 = vrot.lane.b32.xlu1 %v3496_v31, %s7653_s9  ;;  %v3201_v29 = vadd.f32 %v10024_v28, %v2337_v46  ;;  %v1777_v33 = vrot.slane %v10022_v7, 1  ;;  %v1779_v40 = vrot.slane %v10060_v0, 1  ;;  %11649 = vst [vmem:[#allocation34_spill] sm:$0xff] %v10148_v3  ;;  %v11650_v28 = vld [vmem:[#allocation47_spill] sm:$0xff] }
 0x42c   :  { %4500 = vst.msk [vmem:[#allocation2 + $0x308] sm:$0xff] %vm4402_vm3, %v4355_v62  ;;  %v4213_v16 = vadd.f32 %v10105_v4, %v4062_v36  ;;  %v3732_v20 = vpop.permute.xlu0 %3731  ;;  %v3202_v32 = vadd.f32 %v10027_v17, %v2338_v18  ;;  %v2339_v36 = vadd.f32 %v9949_v60, %v11650_v28  ;;  %v10168_v27 = vpop.f32.mrf.mxu1 }
 0x42d   :  { %v4356_v41 = vmax.f32 %v4212_v2, 0.0  ;;  %v4063_v56 = vadd.f32 %v3732_v20, %v3199_v49  ;;  %v3734_v42 = vpop.permute.xlu1 %3733  ;;  %v11652_v20 = vld [vmem:[#allocation49_spill] sm:$0xff]  ;;  %11653 = vst [vmem:[#allocation36_spill] sm:$0xff] %v10168_v27 }
 0x42e   :  { %v4357_v30 = vmax.f32 %v4213_v16, 0.0  ;;  %v4064_v44 = vadd.f32 %v3734_v42, %v3200_v1  ;;  %3783 = vrot.lane.b32.xlu0 %v3498_v45, %s7653_s9  ;;  %v11651_v1 = vrot.slane %v9916_v10, 1  ;;  %v2340_v51 = vadd.f32 %v9952_v54, %v11652_v20 }
 0x42f   :  { %4501 = vst.msk [vmem:[#allocation2 + $0x310] sm:$0xff] %vm4402_vm3, %v4356_v41  ;;  %v4214_v34 = vadd.f32 %v10105_v4, %v4063_v56  ;;  %3785 = vrot.lane.b32.xlu1 %v3500_v21, %s7653_s9  ;;  %v1776_v41 = vsel %vm1515_vm1, %v1773_v57, %v1775_v52  ;;  %v3203_v56 = vadd.f32 %v10038_v25, %v2339_v36  ;;  %v1783_v42 = vrot.slane %v10048_v61, 1  ;;  %v11654_v25 = vld [vmem:[#allocation46_spill] sm:$0xff] }
 0x430   :  { %4502 = vst.msk [vmem:[#allocation2 + $0x318] sm:$0xff] %vm4402_vm3, %v4357_v30  ;;  %v4215_v63 = vadd.f32 %v10105_v4, %v4064_v44  ;;  %v3736_v62 = vpop.permute.xlu0 %3735  ;;  %v1774_v16 = vsel %vm1515_vm1, %v11651_v1, %v1773_v57  ;;  %v1781_v45 = vrot.slane %v10089_v35, 1  ;;  %v3204_v54 = vadd.f32 %v10041_v38, %v2340_v51 }
 0x431   :  { %v4358_v31 = vmax.f32 %v4214_v34, 0.0  ;;  %v4065_v49 = vadd.f32 %v3736_v62, %v3201_v29  ;;  %v3738_v2 = vpop.permute.xlu1 %3737  ;;  %v2341_v30 = vadd.f32 %v11654_v25, %v9960_v26  ;;  %v1778_v34 = vsel %vm1515_vm1, %v1775_v52, %v1777_v33 }
 0x432   :  { %v4359_v46 = vmax.f32 %v4215_v63, 0.0  ;;  %v4066_v17 = vadd.f32 %v3738_v2, %v3202_v32  ;;  %2059 = vrot.lane.b32.xlu0 %v1774_v16, %s7652_s7  ;;  %v11655_v32 = vld [vmem:[#allocation48_spill] sm:$0xff]  ;;  %v1780_v38 = vsel %vm1515_vm1, %v1777_v33, %v1779_v40  ;;  %v1787_v52 = vrot.slane %v10128_v9, 1 }
 0x433   :  { %4503 = vst.msk [vmem:[#allocation2 + $0x320] sm:$0xff] %vm4402_vm3, %v4358_v31  ;;  %v4216_v60 = vadd.f32 %v10105_v4, %v4065_v49  ;;  %2061 = vrot.lane.b32.xlu1 %v1776_v41, %s7652_s7  ;;  %v2342_v63 = vadd.f32 %v11655_v32, %v9963_v13  ;;  %v3205_v36 = vadd.f32 %v10050_v47, %v2341_v30  ;;  %v1785_v31 = vrot.slane %v10072_v8, 1  ;;  %v10186_v49 = vpop.f32.mrf.mxu1  ;;  %v11656_v47 = vld [vmem:[#allocation50_spill] sm:$0xff] }
 0x434   :  { %4504 = vst.msk [vmem:[#allocation2 + $0x328] sm:$0xff] %vm4402_vm3, %v4359_v46  ;;  %v4217_v57 = vadd.f32 %v10105_v4, %v4066_v17  ;;  %v3740_v18 = vpop.permute.xlu0 %3739  ;;  %v2343_v1 = vadd.f32 %v9970_v6, %v11656_v47  ;;  %v1782_v46 = vsel %vm1515_vm1, %v1779_v40, %v1781_v45  ;;  %v11657_v17 = vld [vmem:[#allocation24_spill] sm:$0xff] }
 0x435   :  { %v4360_v44 = vmax.f32 %v4216_v60, 0.0  ;;  %v4067_v21 = vadd.f32 %v3740_v18, %v3203_v56  ;;  %v3742_v29 = vpop.permute.xlu1 %3741  ;;  %v3206_v13 = vadd.f32 %v10053_v24, %v2342_v63  ;;  %v2344_v41 = vadd.f32 %v9973_v48, %v11657_v17  ;;  %v10204_v48 = vpop.f32.mrf.mxu1 }
 0x436   :  { %v4361_v62 = vmax.f32 %v4217_v57, 0.0  ;;  %v4068_v28 = vadd.f32 %v3742_v29, %v3204_v54  ;;  %2063 = vrot.lane.b32.xlu0 %v1778_v34, %s7652_s7  ;;  %v1784_v24 = vsel %vm1515_vm1, %v1781_v45, %v1783_v42  ;;  %v1791_v54 = vrot.slane %v10111_v37, 1  ;;  %11658 = vst [vmem:[#allocation33_spill] sm:$0xff] %v10204_v48 }
 0x437   :  { %4505 = vst.msk [vmem:[#allocation2 + $0x330] sm:$0xff] %vm4402_vm3, %v4360_v44  ;;  %v4218_v26 = vadd.f32 %v10105_v4, %v4067_v21  ;;  %2065 = vrot.lane.b32.xlu1 %v1780_v38, %s7652_s7  ;;  %v1789_v57 = vrot.slane %v10168_v27, 1  ;;  %v3207_v6 = vadd.f32 %v10062_v22, %v2343_v1  ;;  %v4596_v40 = vld [vmem:[#allocation2 + $0x300] ss:$4 sm:$0xff]  ;;  %v3208_v25 = vadd.f32 %v10065_v58, %v2344_v41  ;;  %v4668_v44 = vld [vmem:[#allocation2 + $0x301] ss:$4 sm:$0xff]  ;;  %v10221_v1 = vpop.f32.mrf.mxu1 }
 0x438   :  { %4506 = vst.msk [vmem:[#allocation2 + $0x338] sm:$0xff] %vm4402_vm3, %v4361_v62  ;;  %v4219_v33 = vadd.f32 %v10105_v4, %v4068_v28  ;;  %v3744_v2 = vpop.permute.xlu0 %3743  ;;  %v4776_v21 = vld [vmem:[#allocation2 + $0x302] ss:$4 sm:$0xff]  ;;  %v4848_v29 = vld [vmem:[#allocation2 + $0x303] ss:$4 sm:$0xff]  ;;  %v2345_v22 = vadd.f32 %v9483_v50, %v9980_v55  ;;  %v1786_v62 = vsel %vm1515_vm1, %v1783_v42, %v1785_v31  ;;  %v4715_v42 = vmax.f32 %v4596_v40, %v4668_v44 }
 0x439   :  { %v4362_v16 = vmax.f32 %v4218_v26, 0.0  ;;  %v4069_v20 = vadd.f32 %v3744_v2, %v3205_v36  ;;  %v3746_v51 = vpop.permute.xlu1 %3745  ;;  %v11659_v28 = vld [vmem:[#allocation38_spill] sm:$0xff]  ;;  %v1788_v26 = vsel %vm1515_vm1, %v1785_v31, %v1787_v52  ;;  %v4895_v47 = vmax.f32 %v4776_v21, %v4848_v29 }
 0x43a   :  { %v4363_v56 = vmax.f32 %v4219_v33, 0.0  ;;  %v4070_v60 = vadd.f32 %v3746_v51, %v3206_v13  ;;  %2067 = vrot.lane.b32.xlu0 %v1782_v46, %s7652_s7  ;;  %v2346_v38 = vadd.f32 %v11659_v28, %v9983_v11  ;;  %v3209_v13 = vadd.f32 %v10074_v59, %v2345_v22 }
 0x43b   :  { %4507 = vst.msk [vmem:[#allocation2 + $0x340] sm:$0xff] %vm4402_vm3, %v4362_v16  ;;  %v4220_v18 = vadd.f32 %v10105_v4, %v4069_v20  ;;  %2069 = vrot.lane.b32.xlu1 %v1784_v24, %s7652_s7  ;;  %v1793_v11 = vrot.slane %v10148_v3, 1  ;;  %v1795_v24 = vrot.slane %v10204_v48, 1 }
 0x43c   :  { %4508 = vst.msk [vmem:[#allocation2 + $0x348] sm:$0xff] %vm4402_vm3, %v4363_v56  ;;  %v4221_v45 = vadd.f32 %v10105_v4, %v4070_v60  ;;  %v3748_v30 = vpop.permute.xlu0 %3747  ;;  %v3210_v31 = vadd.f32 %v10079_v43, %v2346_v38  ;;  %v1790_v56 = vsel %vm1515_vm1, %v1787_v52, %v1789_v57  ;;  %v1792_v43 = vsel %vm1515_vm1, %v1789_v57, %v1791_v54  ;;  %v10235_v52 = vpop.f32.mrf.mxu1 }
 0x43d   :  { %v4364_v34 = vmax.f32 %v4220_v18, 0.0  ;;  %v4071_v32 = vadd.f32 %v3748_v30, %v3207_v6  ;;  %v3750_v63 = vpop.permute.xlu1 %3749  ;;  %11660 = vst [vmem:[#allocation35_spill] sm:$0xff] %v10235_v52  ;;  %v1797_v57 = vrot.slane %v10235_v52, 1  ;;  %v1801_v38 = vrot.slane %v10221_v1, 1 }
 0x43e   :  { %v4365_v58 = vmax.f32 %v4221_v45, 0.0  ;;  %v4072_v36 = vadd.f32 %v3750_v63, %v3208_v25  ;;  %2071 = vrot.lane.b32.xlu0 %v1786_v62, %s7652_s7  ;;  %v4931_v25 = vmax.f32 %v4715_v42, %v4895_v47  ;;  %v1796_v62 = vsel %vm1515_vm1, %v1793_v11, %v1795_v24 }
 0x43f   :  { %4509 = vst.msk [vmem:[#allocation2 + $0x350] sm:$0xff] %vm4402_vm3, %v4364_v34  ;;  %v4222_v50 = vadd.f32 %v10105_v4, %v4071_v32  ;;  %2073 = vrot.lane.b32.xlu1 %v1788_v26, %s7652_s7  ;;  %v4598_v55 = vld [vmem:[#allocation2 + $0x320] ss:$4 sm:$0xff]  ;;  %v4670_v33 = vld [vmem:[#allocation2 + $0x321] ss:$4 sm:$0xff]  ;;  %v1794_v34 = vsel %vm1515_vm1, %v1791_v54, %v1793_v11  ;;  %v1799_v32 = vrot.slane %v10186_v49, 1 }
 0x440   :  { %v4778_v2 = vld [vmem:[#allocation2 + $0x322] ss:$4 sm:$0xff]  ;;  %4510 = vst.msk [vmem:[#allocation2 + $0x358] sm:$0xff] %vm4402_vm3, %v4365_v58  ;;  %v4223_v59 = vadd.f32 %v10105_v4, %v4072_v36  ;;  %v3752_v16 = vpop.permute.xlu0 %3751  ;;  %v4716_v20 = vmax.f32 %v4598_v55, %v4670_v33  ;;  %v4850_v51 = vld [vmem:[#allocation2 + $0x323] ss:$4 sm:$0xff]  ;;  %v1798_v58 = vsel %vm1515_vm1, %v1795_v24, %v1797_v57  ;;  %v2637_v42 = vrot.slane %v10036_v39, 2 }
 0x441   :  { %v4366_v46 = vmax.f32 %v4222_v50, 0.0  ;;  %v4073_v17 = vadd.f32 %v3752_v16, %v3209_v13  ;;  %v3754_v41 = vpop.permute.xlu1 %3753  ;;  %v4896_v60 = vmax.f32 %v4778_v2, %v4850_v51  ;;  %v1800_v36 = vsel %vm1515_vm1, %v1797_v57, %v1799_v32 }
 0x442   :  { %v4367_v6 = vmax.f32 %v4223_v59, 0.0  ;;  %v4074_v18 = vadd.f32 %v3754_v41, %v3210_v31  ;;  %2075 = vrot.lane.b32.xlu0 %v1790_v56, %s7652_s7  ;;  %v1802_v47 = vsel %vm1515_vm1, %v1799_v32, %v1801_v38  ;;  %v2639_v11 = vrot.slane %v9899_v12, 2 }
 0x443   :  { %4511 = vst.msk [vmem:[#allocation2 + $0x360] sm:$0xff] %vm4402_vm3, %v4366_v46  ;;  %v4224_v40 = vadd.f32 %v10105_v4, %v4073_v17  ;;  %2077 = vrot.lane.b32.xlu1 %v1792_v43, %s7652_s7  ;;  %v4932_v45 = vmax.f32 %v4716_v20, %v4896_v60  ;;  %v2641_v56 = vrot.slane %v10022_v7, 2  ;;  %v11661_v24 = vrot.slane %v9916_v10, 2 }
 0x444   :  { %4512 = vst.msk [vmem:[#allocation2 + $0x368] sm:$0xff] %vm4402_vm3, %v4367_v6  ;;  %v4225_v30 = vadd.f32 %v10105_v4, %v4074_v18  ;;  %v10239_v44 = vpop.permute.xlu0 %2027  ;;  %v2643_v43 = vrot.slane %v10060_v0, 2  ;;  %v2645_v57 = vrot.slane %v10089_v35, 2  ;;  %v2647_v32 = vrot.slane %v10048_v61, 2 }
 0x445   :  { %v4368_v21 = vmax.f32 %v4224_v40, 0.0  ;;  %v10242_v29 = vpop.permute.xlu1 %2029  ;;  %v4955_v22 = vpack.c.bf16 %v4932_v45, %v4931_v25  ;;  %v2638_v6 = vsel %vm2379_vm0, %v11661_v24, %v2637_v42  ;;  %v2640_v40 = vsel %vm2379_vm0, %v2637_v42, %v2639_v11 }
 0x446   :  { %v4369_v63 = vmax.f32 %v4225_v30, 0.0  ;;  %2079 = vrot.lane.b32.xlu0 %v1794_v34, %s7652_s7  ;;  %v2642_v34 = vsel %vm2379_vm0, %v2639_v11, %v2641_v56  ;;  %v2655_v11 = vrot.slane %v10111_v37, 2  ;;  %v2661_v24 = vrot.slane %v10235_v52, 2 }
 0x447   :  { %4513 = vst.msk [vmem:[#allocation2 + $0x370] sm:$0xff] %vm4402_vm3, %v4368_v21  ;;  %7270 = vmatprep.mubr.msk.bf16.mxu1 %vm4402_vm3, %v4955_v22  ;;  %2081 = vrot.lane.b32.xlu1 %v1796_v62, %s7652_s7  ;;  %v4600_v26 = vld [vmem:[#allocation2 + $0x340] ss:$4 sm:$0xff]  ;;  %v4672_v50 = vld [vmem:[#allocation2 + $0x341] ss:$4 sm:$0xff] }
 0x448   :  { %4514 = vst.msk [vmem:[#allocation2 + $0x378] sm:$0xff] %vm4402_vm3, %v4369_v63  ;;  %v10254_v28 = vpop.permute.xlu0 %2031  ;;  %v4780_v55 = vld [vmem:[#allocation2 + $0x342] ss:$4 sm:$0xff]  ;;  %v4852_v33 = vld [vmem:[#allocation2 + $0x343] ss:$4 sm:$0xff]  ;;  %v4717_v16 = vmax.f32 %v4600_v26, %v4672_v50  ;;  %v2644_v63 = vsel %vm2379_vm0, %v2641_v56, %v2643_v43  ;;  %v2651_v26 = vrot.slane %v10128_v9, 2  ;;  %v2648_v50 = vsel %vm2379_vm0, %v2645_v57, %v2647_v32 }
 0x449   :  { %v10257_v54 = vpop.permute.xlu1 %2033  ;;  %v4897_v51 = vmax.f32 %v4780_v55, %v4852_v33  ;;  %v2653_v33 = vrot.slane %v10168_v27, 2 }
 0x44a   :  { %2083 = vrot.lane.b32.xlu0 %v1798_v58, %s7652_s7 }
 0x44b   :  { %2085 = vrot.lane.b32.xlu1 %v1800_v36, %s7652_s7  ;;  %v4933_v25 = vmax.f32 %v4717_v16, %v4897_v51  ;;  %v2646_v36 = vsel %vm2379_vm0, %v2643_v43, %v2645_v57  ;;  %v2657_v16 = vrot.slane %v10148_v3, 2  ;;  %v2654_v51 = vsel %vm2379_vm0, %v2651_v26, %v2653_v33 }
 0x44c   :  { %v10263_v13 = vpop.permute.xlu0 %2035  ;;  %v2663_v43 = vrot.slane %v10186_v49, 2 }
 0x44d   :  { %v10266_v2 = vpop.permute.xlu1 %2037 }
 0x44e   :  { %2087 = vrot.lane.b32.xlu0 %v1802_v47, %s7652_s7 }
 0x44f   :  { %2089 = vrot.lane.b32.xlu1 %v1801_v38, %s7652_s7  ;;  %v4602_v31 = vld [vmem:[#allocation2 + $0x360] ss:$4 sm:$0xff]  ;;  %v4674_v59 = vld [vmem:[#allocation2 + $0x361] ss:$4 sm:$0xff]  ;;  %v4782_v20 = vld [vmem:[#allocation2 + $0x362] ss:$4 sm:$0xff] }
 0x450   :  { %v10272_v46 = vpop.permute.xlu0 %2039  ;;  %v4718_v17 = vmax.f32 %v4602_v31, %v4674_v59  ;;  %v4854_v41 = vld [vmem:[#allocation2 + $0x363] ss:$4 sm:$0xff]  ;;  %v2649_v38 = vrot.slane %v10072_v8, 2 }
 0x451   :  { %v10275_v60 = vpop.permute.xlu1 %2041  ;;  %v4898_v18 = vmax.f32 %v4782_v20, %v4854_v41  ;;  %v2656_v41 = vsel %vm2379_vm0, %v2653_v33, %v2655_v11  ;;  %v3505_v33 = vrot.slane %v10022_v7, 3 }
 0x452   :  { %2923 = vrot.lane.b32.xlu0 %v2638_v6, %s7644_s22  ;;  %v2650_v47 = vsel %vm2379_vm0, %v2647_v32, %v2649_v38  ;;  %v2652_v31 = vsel %vm2379_vm0, %v2649_v38, %v2651_v26  ;;  %v3503_v26 = vrot.slane %v9899_v12, 3 }
 0x453   :  { %2925 = vrot.lane.b32.xlu1 %v2640_v40, %s7644_s22  ;;  %v4934_v45 = vmax.f32 %v4718_v17, %v4898_v18  ;;  %v2659_v17 = vrot.slane %v10204_v48, 2  ;;  %v2658_v18 = vsel %vm2379_vm0, %v2655_v11, %v2657_v16 }
 0x454   :  { %v10284_v30 = vpop.permute.xlu0 %2043 }
 0x455   :  { %v10287_v21 = vpop.permute.xlu1 %2045  ;;  %v4956_v22 = vpack.c.bf16 %v4934_v45, %v4933_v25  ;;  %v2660_v40 = vsel %vm2379_vm0, %v2657_v16, %v2659_v17  ;;  %v2662_v57 = vsel %vm2379_vm0, %v2659_v17, %v2661_v24  ;;  %v3509_v17 = vrot.slane %v10089_v35, 3 }
 0x456   :  { %2927 = vrot.lane.b32.xlu0 %v2642_v34, %s7644_s22  ;;  %v2664_v34 = vsel %vm2379_vm0, %v2661_v24, %v2663_v43  ;;  %v3506_v24 = vsel %vm3243_vm2, %v3503_v26, %v3505_v33 }
 0x457   :  { %7271 = vmatmul.mubr.msk.bf16.gmra.mxu1 %vm4402_vm3, %v4956_v22  ;;  %2929 = vrot.lane.b32.xlu1 %v2644_v63, %s7644_s22  ;;  %v2665_v22 = vrot.slane %v10221_v1, 2  ;;  %v3501_v63 = vrot.slane %v10036_v39, 3 }
 0x458   :  { %v10295_v62 = vpop.permute.xlu0 %2047 }
 0x459   :  { %v10298_v58 = vpop.permute.xlu1 %2049  ;;  %v3502_v11 = vsel %vm3243_vm2, %v3499_v53, %v3501_v63  ;;  %v3504_v16 = vsel %vm3243_vm2, %v3501_v63, %v3503_v26  ;;  %v3515_v63 = vrot.slane %v10128_v9, 3 }
 0x45a   :  { %2931 = vrot.lane.b32.xlu0 %v2646_v36, %s7644_s22  ;;  %v2666_v36 = vsel %vm2379_vm0, %v2663_v43, %v2665_v22  ;;  %v10374_v43 = vpop.f32.mrf.mxu1 }
 0x45b   :  { %2933 = vrot.lane.b32.xlu1 %v2648_v50, %s7644_s22 }
 0x45c   :  { %v10305_v55 = vpop.permute.xlu0 %2051  ;;  %v10386_v26 = vpop.f32.mrf.mxu1 }
 0x45d   :  { %v10308_v42 = vpop.permute.xlu1 %2053 }
 0x45e   :  { %2935 = vrot.lane.b32.xlu0 %v2650_v47, %s7644_s22 }
 0x45f   :  { %2937 = vrot.lane.b32.xlu1 %v2652_v31, %s7644_s22  ;;  %v3507_v31 = vrot.slane %v10060_v0, 3 }
 0x460   :  { %v10315_v59 = vpop.permute.xlu0 %2055 }
 0x461   :  { %v10318_v20 = vpop.permute.xlu1 %2057  ;;  %v3508_v53 = vsel %vm3243_vm2, %v3505_v33, %v3507_v31 }
 0x462   :  { %2939 = vrot.lane.b32.xlu0 %v2654_v51, %s7644_s22 }
 0x463   :  { %2941 = vrot.lane.b32.xlu1 %v2656_v41, %s7644_s22 }
 0x464   :  { %v10325_v56 = vpop.permute.xlu0 %2891 }
 0x465   :  { %v10328_v6 = vpop.permute.xlu1 %2893 }
 0x466   :  { %2943 = vrot.lane.b32.xlu0 %v2658_v18, %s7644_s22  ;;  %v3511_v18 = vrot.slane %v10048_v61, 3  ;;  %v3527_v61 = vrot.slane %v10186_v49, 3 }
 0x467   :  { %2945 = vrot.lane.b32.xlu1 %v2660_v40, %s7644_s22 }
 0x468   :  { %v10335_v25 = vpop.permute.xlu0 %2895 }
 0x469   :  { %v10337_v45 = vpop.permute.xlu1 %2897 }
 0x46a   :  { %2947 = vrot.lane.b32.xlu0 %v2662_v57, %s7644_s22  ;;  %v3513_v57 = vrot.slane %v10072_v8, 3 }
 0x46b   :  { %2949 = vrot.lane.b32.xlu1 %v2664_v34, %s7644_s22  ;;  %v3510_v34 = vsel %vm3243_vm2, %v3507_v31, %v3509_v17  ;;  %v3519_v31 = vrot.slane %v10111_v37, 3  ;;  %v3523_v37 = vrot.slane %v10204_v48, 3  ;;  %v11663_v48 = vld [vmem:[#allocation39_spill] sm:$0xff] }
 0x46c   :  { %v10344_v32 = vpop.permute.xlu0 %2899 }
 0x46d   :  { %v10347_v38 = vpop.permute.xlu1 %2901 }
 0x46e   :  { %2951 = vrot.lane.b32.xlu0 %v2666_v36, %s7644_s22  ;;  %v3512_v36 = vsel %vm3243_vm2, %v3509_v17, %v3511_v18  ;;  %v10398_v17 = vpop.f32.mrf.mxu1 }
 0x46f   :  { %2953 = vrot.lane.b32.xlu1 %v2665_v22, %s7644_s22 }
 0x470   :  { %v10353_v50 = vpop.permute.xlu0 %2903 }
 0x471   :  { %v10356_v47 = vpop.permute.xlu1 %2905 }
 0x472   :  { %3787 = vrot.lane.b32.xlu0 %v3502_v11, %s7653_s9  ;;  %v3517_v11 = vrot.slane %v10168_v27, 3  ;;  %v2347_v27 = vadd.f32 %v10239_v44, %v9568_v23 }
 0x473   :  { %3789 = vrot.lane.b32.xlu1 %v3504_v16, %s7653_s9 }
 0x474   :  { %v10365_v51 = vpop.permute.xlu0 %2907 }
 0x475   :  { %v10368_v41 = vpop.permute.xlu1 %2909 }
 0x476   :  { %3791 = vrot.lane.b32.xlu0 %v3506_v24, %s7653_s9  ;;  %v3514_v24 = vsel %vm3243_vm2, %v3511_v18, %v3513_v57  ;;  %v3518_v18 = vsel %vm3243_vm2, %v3515_v63, %v3517_v11 }
 0x477   :  { %3793 = vrot.lane.b32.xlu1 %v3508_v53, %s7653_s9  ;;  %v3516_v53 = vsel %vm3243_vm2, %v3513_v57, %v3515_v63  ;;  %v2348_v57 = vadd.f32 %v10242_v29, %v9739_v19  ;;  %v3525_v63 = vrot.slane %v10235_v52, 3  ;;  %v2349_v19 = vadd.f32 %v11663_v48, %v10254_v28 }
 0x478   :  { %v10377_v40 = vpop.permute.xlu0 %2911 }
 0x479   :  { %v10380_v22 = vpop.permute.xlu1 %2913  ;;  %v3212_v23 = vadd.f32 %v10328_v6, %v2348_v57  ;;  %v3213_v57 = vadd.f32 %v10335_v25, %v2349_v19  ;;  %v3526_v25 = vsel %vm3243_vm2, %v3523_v37, %v3525_v63  ;;  %v11666_v19 = vld [vmem:[#allocation25_spill] sm:$0xff] }
 0x47a   :  { %3795 = vrot.lane.b32.xlu0 %v3510_v34, %s7653_s9 }
 0x47b   :  { %3797 = vrot.lane.b32.xlu1 %v3512_v36, %s7653_s9  ;;  %v3521_v36 = vrot.slane %v10148_v3, 3  ;;  %v3211_v3 = vadd.f32 %v10325_v56, %v2347_v27  ;;  %v11664_v27 = vld [vmem:[#allocation44_spill] sm:$0xff] }
 0x47c   :  { %v10389_v33 = vpop.permute.xlu0 %2915  ;;  %v2350_v56 = vadd.f32 %v11664_v27, %v10257_v54  ;;  %v11665_v54 = vld [vmem:[#allocation23_spill] sm:$0xff] }
 0x47d   :  { %v10392_v16 = vpop.permute.xlu1 %2917  ;;  %v3524_v6 = vsel %vm3243_vm2, %v3521_v36, %v3523_v37 }
 0x47e   :  { %3799 = vrot.lane.b32.xlu0 %v3514_v24, %s7653_s9  ;;  %v3520_v24 = vsel %vm3243_vm2, %v3517_v11, %v3519_v31  ;;  %v3214_v48 = vadd.f32 %v10337_v45, %v2350_v56  ;;  %v3528_v45 = vsel %vm3243_vm2, %v3525_v63, %v3527_v61 }
 0x47f   :  { %3801 = vrot.lane.b32.xlu1 %v3516_v53, %s7653_s9  ;;  %v10414_v53 = vpop.f32.mrf.mxu1 }
 0x480   :  { %v10401_v34 = vpop.permute.xlu0 %2919 }
 0x481   :  { %v10406_v9 = vpop.permute.xlu1 %2921  ;;  %v10420_v8 = vpop.f32.mrf.mxu1 }
 0x482   :  { %3803 = vrot.lane.b32.xlu0 %v3518_v18, %s7653_s9  ;;  %11662 = vst [vmem:[#allocation37_spill] sm:$0xff] %v10420_v8  ;;  %v3522_v18 = vsel %vm3243_vm2, %v3519_v31, %v3521_v36  ;;  %v2351_v36 = vadd.f32 %v10263_v13, %v11665_v54 }
 0x483   :  { %3805 = vrot.lane.b32.xlu1 %v3520_v24, %s7653_s9 }
 0x484   :  { %v3756_v44 = vpop.permute.xlu0 %3755  ;;  %v3215_v56 = vadd.f32 %v10344_v32, %v2351_v36  ;;  %v5247_v36 = vrot.slane %v10374_v43, 1 }
 0x485   :  { %v3758_v29 = vpop.permute.xlu1 %3757  ;;  %v4075_v11 = vadd.f32 %v3756_v44, %v3211_v3  ;;  %v3529_v3 = vrot.slane %v10221_v1, 3  ;;  %v10436_v44 = vpop.f32.mrf.mxu1 }
 0x486   :  { %v4076_v24 = vadd.f32 %v3758_v29, %v3212_v23  ;;  %3807 = vrot.lane.b32.xlu0 %v3522_v18, %s7653_s9 }
 0x487   :  { %v4226_v52 = vadd.f32 %v10105_v4, %v4075_v11  ;;  %3809 = vrot.lane.b32.xlu1 %v3524_v6, %s7653_s9  ;;  %v2352_v11 = vadd.f32 %v10266_v2, %v11666_v19  ;;  %v10453_v63 = vpop.f32.mrf.mxu1  ;;  %v3530_v54 = vsel %vm3243_vm2, %v3527_v61, %v3529_v3  ;;  %v5249_v61 = vrot.slane %v10398_v17, 1 }
 0x488   :  { %v4227_v28 = vadd.f32 %v10105_v4, %v4076_v24  ;;  %v3760_v31 = vpop.permute.xlu0 %3759  ;;  %11667 = vst [vmem:[#allocation42_spill] sm:$0xff] %v10453_v63 }
 0x489   :  { %v4370_v23 = vmax.f32 %v4226_v52, 0.0  ;;  %v3762_v29 = vpop.permute.xlu1 %3761  ;;  %v4077_v18 = vadd.f32 %v3760_v31, %v3213_v57  ;;  %v5245_v52 = vrot.slane %v10414_v53, 1  ;;  %v3216_v37 = vadd.f32 %v10347_v38, %v2352_v11  ;;  %v11668_v57 = vld [vmem:[#allocation22_spill] sm:$0xff] }
 0x48a   :  { %v4371_v27 = vmax.f32 %v4227_v28, 0.0  ;;  %v4078_v6 = vadd.f32 %v3762_v29, %v3214_v48  ;;  %3811 = vrot.lane.b32.xlu0 %v3526_v25, %s7653_s9  ;;  %v2353_v32 = vadd.f32 %v11668_v57, %v10272_v46  ;;  %v5244_v25 = vrot.slane %v10386_v26, 1 }
 0x48b   :  { %4515 = vst.msk [vmem:[#allocation2 + $0x380] sm:$0xff] %vm4402_vm3, %v4370_v23  ;;  %v4228_v13 = vadd.f32 %v10105_v4, %v4077_v18  ;;  %3813 = vrot.lane.b32.xlu1 %v3528_v45, %s7653_s9  ;;  %v11669_v23 = vld [vmem:[#allocation26_spill] sm:$0xff]  ;;  %v10472_v45 = vpop.f32.mrf.mxu1 }
 0x48c   :  { %4516 = vst.msk [vmem:[#allocation2 + $0x388] sm:$0xff] %vm4402_vm3, %v4371_v27  ;;  %v4229_v2 = vadd.f32 %v10105_v4, %v4078_v6  ;;  %v3764_v24 = vpop.permute.xlu0 %3763  ;;  %v2354_v38 = vadd.f32 %v11669_v23, %v10275_v60  ;;  %v3217_v19 = vadd.f32 %v10353_v50, %v2353_v32  ;;  %v5248_v6 = vsel %vm1515_vm1, %v5245_v52, %v5247_v36  ;;  %v11671_v50 = vld [vmem:[#allocation41_spill] sm:$0xff] }
 0x48d   :  { %v4372_v48 = vmax.f32 %v4228_v13, 0.0  ;;  %v3766_v28 = vpop.permute.xlu1 %3765  ;;  %v4079_v31 = vadd.f32 %v3764_v24, %v3215_v56  ;;  %11670 = vst [vmem:[#allocation43_spill] sm:$0xff] %v10472_v45  ;;  %v2355_v56 = vadd.f32 %v10284_v30, %v11671_v50  ;;  %v5251_v24 = vrot.slane %v10436_v44, 1 }
 0x48e   :  { %v4373_v29 = vmax.f32 %v4229_v2, 0.0  ;;  %v4080_v18 = vadd.f32 %v3766_v28, %v3216_v37  ;;  %3815 = vrot.lane.b32.xlu0 %v3530_v54, %s7653_s9  ;;  %v3218_v11 = vadd.f32 %v10356_v47, %v2354_v38  ;;  %v11672_v47 = vld [vmem:[#allocation28_spill] sm:$0xff]  ;;  %v10481_v28 = vpop.f32.mrf.mxu1  ;;  %v5250_v38 = vsel %vm1515_vm1, %v5247_v36, %v5249_v61 }
 0x48f   :  { %4517 = vst.msk [vmem:[#allocation2 + $0x390] sm:$0xff] %vm4402_vm3, %v4372_v48  ;;  %v4230_v46 = vadd.f32 %v10105_v4, %v4079_v31  ;;  %3817 = vrot.lane.b32.xlu1 %v3529_v3, %s7653_s9  ;;  %v5246_v3 = vsel %vm1515_vm1, %v5244_v25, %v5245_v52  ;;  %v2356_v57 = vadd.f32 %v10287_v21, %v11672_v47  ;;  %11673 = vst [vmem:[#allocation47_spill] sm:$0xff] %v10481_v28 }
 0x490   :  { %4518 = vst.msk [vmem:[#allocation2 + $0x398] sm:$0xff] %vm4402_vm3, %v4373_v29  ;;  %v4231_v60 = vadd.f32 %v10105_v4, %v4080_v18  ;;  %v3768_v27 = vpop.permute.xlu0 %3767  ;;  %v3219_v31 = vadd.f32 %v10365_v51, %v2355_v56  ;;  %v5253_v52 = vrot.slane %v10472_v45, 1  ;;  %v5255_v29 = vrot.slane %v10420_v8, 1  ;;  %v11674_v51 = vld [vmem:[#allocation40_spill] sm:$0xff]  ;;  %v10500_v36 = vpop.f32.mrf.mxu1 }
 0x491   :  { %v4374_v13 = vmax.f32 %v4230_v46, 0.0  ;;  %v3770_v37 = vpop.permute.xlu1 %3769  ;;  %v4081_v2 = vadd.f32 %v3768_v27, %v3217_v19  ;;  %v3220_v54 = vadd.f32 %v10368_v41, %v2356_v57  ;;  %v2357_v18 = vadd.f32 %v11674_v51, %v10295_v62  ;;  %11676 = vst [vmem:[#allocation49_spill] sm:$0xff] %v10500_v36 }
 0x492   :  { %v4375_v32 = vmax.f32 %v4231_v60, 0.0  ;;  %v4082_v48 = vadd.f32 %v3770_v37, %v3218_v11  ;;  %5315 = vrot.lane.b32.xlu0 %v5246_v3, %s7652_s7  ;;  %v11675_v11 = vld [vmem:[#allocation45_spill] sm:$0xff]  ;;  %v5462_v50 = vrot.slane %v10374_v43, 2  ;;  %v11677_v3 = vld [vmem:[#allocation27_spill] sm:$0xff] }
 0x493   :  { %4519 = vst.msk [vmem:[#allocation2 + $0x3a0] sm:$0xff] %vm4402_vm3, %v4374_v13  ;;  %v4232_v30 = vadd.f32 %v10105_v4, %v4081_v2  ;;  %5317 = vrot.lane.b32.xlu1 %v5248_v6, %s7652_s7  ;;  %v2358_v60 = vadd.f32 %v11675_v11, %v10298_v58  ;;  %v5252_v6 = vsel %vm1515_vm1, %v5249_v61, %v5251_v24  ;;  %v5257_v58 = vrot.slane %v10453_v63, 1 }
 0x494   :  { %4520 = vst.msk [vmem:[#allocation2 + $0x3a8] sm:$0xff] %vm4402_vm3, %v4375_v32  ;;  %v4233_v21 = vadd.f32 %v10105_v4, %v4082_v48  ;;  %v3772_v23 = vpop.permute.xlu0 %3771  ;;  %v3221_v56 = vadd.f32 %v10377_v40, %v2357_v18  ;;  %v5256_v2 = vsel %vm1515_vm1, %v5253_v52, %v5255_v29  ;;  %v2359_v40 = vadd.f32 %v10305_v55, %v11677_v3 }
 0x495   :  { %v4376_v25 = vmax.f32 %v4232_v30, 0.0  ;;  %v3774_v19 = vpop.permute.xlu1 %3773  ;;  %v4083_v46 = vadd.f32 %v3772_v23, %v3219_v31  ;;  %v3222_v13 = vadd.f32 %v10380_v22, %v2358_v60  ;;  %v5254_v48 = vsel %vm1515_vm1, %v5251_v24, %v5253_v52 }
 0x496   :  { %v4377_v27 = vmax.f32 %v4233_v21, 0.0  ;;  %v4084_v41 = vadd.f32 %v3774_v19, %v3220_v54  ;;  %5319 = vrot.lane.b32.xlu0 %v5250_v38, %s7652_s7  ;;  %v5259_v31 = vrot.slane %v10500_v36, 1  ;;  %v2360_v22 = vadd.f32 %v10308_v42, %v9881_v14 }
 0x497   :  { %4521 = vst.msk [vmem:[#allocation2 + $0x3b0] sm:$0xff] %vm4402_vm3, %v4376_v25  ;;  %v4234_v62 = vadd.f32 %v10105_v4, %v4083_v46  ;;  %5321 = vrot.lane.b32.xlu1 %v5252_v6, %s7652_s7  ;;  %v5459_v21 = vrot.slane %v10386_v26, 2  ;;  %v5460_v23 = vrot.slane %v10414_v53, 2  ;;  %v3223_v55 = vadd.f32 %v10389_v33, %v2359_v40  ;;  %v4604_v24 = vld [vmem:[#allocation2 + $0x380] ss:$4 sm:$0xff] }
 0x498   :  { %4522 = vst.msk [vmem:[#allocation2 + $0x3b8] sm:$0xff] %vm4402_vm3, %v4377_v27  ;;  %v4235_v61 = vadd.f32 %v10105_v4, %v4084_v41  ;;  %v3776_v37 = vpop.permute.xlu0 %3775  ;;  %v3224_v52 = vadd.f32 %v10392_v16, %v2360_v22  ;;  %v4676_v51 = vld [vmem:[#allocation2 + $0x381] ss:$4 sm:$0xff]  ;;  %v4784_v18 = vld [vmem:[#allocation2 + $0x382] ss:$4 sm:$0xff]  ;;  %v2361_v33 = vadd.f32 %v9826_v15, %v10315_v59  ;;  %v5258_v60 = vsel %vm1515_vm1, %v5255_v29, %v5257_v58 }
 0x499   :  { %v4378_v47 = vmax.f32 %v4234_v62, 0.0  ;;  %v3778_v57 = vpop.permute.xlu1 %3777  ;;  %v4085_v32 = vadd.f32 %v3776_v37, %v3221_v56  ;;  %v4856_v25 = vld [vmem:[#allocation2 + $0x383] ss:$4 sm:$0xff]  ;;  %v2362_v27 = vadd.f32 %v9862_v5, %v10318_v20  ;;  %v5260_v6 = vsel %vm1515_vm1, %v5257_v58, %v5259_v31 }
 0x49a   :  { %v4379_v30 = vmax.f32 %v4235_v61, 0.0  ;;  %v4086_v54 = vadd.f32 %v3778_v57, %v3222_v13  ;;  %5323 = vrot.lane.b32.xlu0 %v5254_v48, %s7652_s7  ;;  %v3225_v56 = vadd.f32 %v10401_v34, %v2361_v33  ;;  %v4719_v62 = vmax.f32 %v4604_v24, %v4676_v51 }
 0x49b   :  { %4523 = vst.msk [vmem:[#allocation2 + $0x3c0] sm:$0xff] %vm4402_vm3, %v4378_v47  ;;  %v4236_v38 = vadd.f32 %v10105_v4, %v4085_v32  ;;  %5325 = vrot.lane.b32.xlu1 %v5256_v2, %s7652_s7  ;;  %v4899_v20 = vmax.f32 %v4784_v18, %v4856_v25  ;;  %v5464_v13 = vrot.slane %v10398_v17, 2  ;;  %v3226_v61 = vadd.f32 %v10406_v9, %v2362_v27 }
 0x49c   :  { %4524 = vst.msk [vmem:[#allocation2 + $0x3c8] sm:$0xff] %vm4402_vm3, %v4379_v30  ;;  %v4237_v14 = vadd.f32 %v10105_v4, %v4086_v54  ;;  %v3780_v42 = vpop.permute.xlu0 %3779  ;;  %v5461_v57 = vsel %vm2379_vm0, %v5459_v21, %v5460_v23  ;;  %v5466_v48 = vrot.slane %v10436_v44, 2  ;;  %v5463_v9 = vsel %vm2379_vm0, %v5460_v23, %v5462_v50 }
 0x49d   :  { %v4380_v19 = vmax.f32 %v4236_v38, 0.0  ;;  %v3782_v46 = vpop.permute.xlu1 %3781  ;;  %v4087_v11 = vadd.f32 %v3780_v42, %v3223_v55  ;;  %v4935_v55 = vmax.f32 %v4719_v62, %v4899_v20  ;;  %v5465_v51 = vsel %vm2379_vm0, %v5462_v50, %v5464_v13  ;;  %v10591_v20 = vpop.f32.mrf.mxu1 }
 0x49e   :  { %v4381_v16 = vmax.f32 %v4237_v14, 0.0  ;;  %v4088_v41 = vadd.f32 %v3782_v46, %v3224_v52  ;;  %5327 = vrot.lane.b32.xlu0 %v5258_v60, %s7652_s7  ;;  %v5468_v52 = vrot.slane %v10472_v45, 2  ;;  %v5467_v25 = vsel %vm2379_vm0, %v5464_v13, %v5466_v48  ;;  %11678 = vst [vmem:[#allocation46_spill] sm:$0xff] %v10591_v20 }
 0x49f   :  { %4525 = vst.msk [vmem:[#allocation2 + $0x3d0] sm:$0xff] %vm4402_vm3, %v4380_v19  ;;  %v4238_v15 = vadd.f32 %v10105_v4, %v4087_v11  ;;  %5329 = vrot.lane.b32.xlu1 %v5260_v6, %s7652_s7  ;;  %v4606_v59 = vld [vmem:[#allocation2 + $0x3a0] ss:$4 sm:$0xff]  ;;  %v4678_v29 = vld [vmem:[#allocation2 + $0x3a1] ss:$4 sm:$0xff]  ;;  %v5472_v19 = vrot.slane %v10453_v63, 2 }
 0x4a0   :  { %v4786_v5 = vld [vmem:[#allocation2 + $0x3a2] ss:$4 sm:$0xff]  ;;  %4526 = vst.msk [vmem:[#allocation2 + $0x3d8] sm:$0xff] %vm4402_vm3, %v4381_v16  ;;  %v4239_v58 = vadd.f32 %v10105_v4, %v4088_v41  ;;  %v3784_v34 = vpop.permute.xlu0 %3783  ;;  %v4720_v37 = vmax.f32 %v4606_v59, %v4678_v29  ;;  %v4858_v2 = vld [vmem:[#allocation2 + $0x3a3] ss:$4 sm:$0xff]  ;;  %v5469_v46 = vsel %vm2379_vm0, %v5466_v48, %v5468_v52  ;;  %v5474_v11 = vrot.slane %v10500_v36, 2 }
 0x4a1   :  { %v4382_v3 = vmax.f32 %v4238_v15, 0.0  ;;  %v3786_v40 = vpop.permute.xlu1 %3785  ;;  %v4089_v47 = vadd.f32 %v3784_v34, %v3225_v56  ;;  %v4900_v32 = vmax.f32 %v4786_v5, %v4858_v2  ;;  %v5675_v15 = vrot.slane %v10414_v53, 3 }
 0x4a2   :  { %v4383_v22 = vmax.f32 %v4239_v58, 0.0  ;;  %v4090_v30 = vadd.f32 %v3786_v40, %v3226_v61  ;;  %5530 = vrot.lane.b32.xlu0 %v5461_v57, %s7644_s22  ;;  %v5674_v62 = vrot.slane %v10386_v26, 3  ;;  %v5475_v5 = vsel %vm2379_vm0, %v5472_v19, %v5474_v11 }
 0x4a3   :  { %4527 = vst.msk [vmem:[#allocation2 + $0x3e0] sm:$0xff] %vm4402_vm3, %v4382_v3  ;;  %v4240_v54 = vadd.f32 %v10105_v4, %v4089_v47  ;;  %5532 = vrot.lane.b32.xlu1 %v5463_v9, %s7644_s22  ;;  %v4936_v38 = vmax.f32 %v4720_v37, %v4900_v32  ;;  %v5677_v2 = vrot.slane %v10374_v43, 3  ;;  %v5679_v57 = vrot.slane %v10398_v17, 3 }
 0x4a4   :  { %4528 = vst.msk [vmem:[#allocation2 + $0x3e8] sm:$0xff] %vm4402_vm3, %v4383_v22  ;;  %v4241_v21 = vadd.f32 %v10105_v4, %v4090_v30  ;;  %v10555_v24 = vpop.permute.xlu0 %2059  ;;  %v5470_v4 = vrot.slane %v10420_v8, 2  ;;  %v5676_v48 = vsel %vm3243_vm2, %v5674_v62, %v5675_v15  ;;  %v5681_v30 = vrot.slane %v10436_v44, 3 }
 0x4a5   :  { %v4384_v14 = vmax.f32 %v4240_v54, 0.0  ;;  %v10558_v23 = vpop.permute.xlu1 %2061  ;;  %v4957_v42 = vpack.c.bf16 %v4936_v38, %v4935_v55  ;;  %v5678_v9 = vsel %vm3243_vm2, %v5675_v15, %v5677_v2  ;;  %v10604_v54 = vpop.f32.mrf.mxu1 }
 0x4a6   :  { %v4385_v18 = vmax.f32 %v4241_v21, 0.0  ;;  %5534 = vrot.lane.b32.xlu0 %v5465_v51, %s7644_s22  ;;  %v5471_v60 = vsel %vm2379_vm0, %v5468_v52, %v5470_v4  ;;  %v5473_v29 = vsel %vm2379_vm0, %v5470_v4, %v5472_v19  ;;  %11679 = vst [vmem:[#allocation48_spill] sm:$0xff] %v10604_v54  ;;  %v5683_v52 = vrot.slane %v10472_v45, 3 }
 0x4a7   :  { %4529 = vst.msk [vmem:[#allocation2 + $0x3f0] sm:$0xff] %vm4402_vm3, %v4384_v14  ;;  %7274 = vmatprep.mubr.msk.bf16.mxu1 %vm4402_vm3, %v4957_v42  ;;  %5536 = vrot.lane.b32.xlu1 %v5467_v25, %s7644_s22  ;;  %v4608_v27 = vld [vmem:[#allocation2 + $0x3c0] ss:$4 sm:$0xff]  ;;  %v4680_v41 = vld [vmem:[#allocation2 + $0x3c1] ss:$4 sm:$0xff]  ;;  %v10610_v14 = vpop.f32.mrf.mxu1  ;;  %v5682_v25 = vsel %vm3243_vm2, %v5679_v57, %v5681_v30  ;;  %v5685_v4 = vrot.slane %v10420_v8, 3  ;;  %v2363_v8 = vadd.f32 %v10555_v24, %v9916_v10 }
 0x4a8   :  { %4530 = vst.msk [vmem:[#allocation2 + $0x3f8] sm:$0xff] %vm4402_vm3, %v4385_v18  ;;  %v10570_v33 = vpop.permute.xlu0 %2063  ;;  %v4788_v6 = vld [vmem:[#allocation2 + $0x3c2] ss:$4 sm:$0xff]  ;;  %v4860_v56 = vld [vmem:[#allocation2 + $0x3c3] ss:$4 sm:$0xff]  ;;  %v4721_v58 = vmax.f32 %v4608_v27, %v4680_v41  ;;  %v5680_v18 = vsel %vm3243_vm2, %v5677_v2, %v5679_v57  ;;  %v5684_v41 = vsel %vm3243_vm2, %v5681_v30, %v5683_v52  ;;  %v11681_v45 = vrot.slane %v10500_v36, 3 }
 0x4a9   :  { %v10573_v50 = vpop.permute.xlu1 %2065  ;;  %v4901_v37 = vmax.f32 %v4788_v6, %v4860_v56  ;;  %v11562_v6 = vrot.slane %v10500_v36, 3  ;;  %v5686_v56 = vsel %vm3243_vm2, %v5683_v52, %v5685_v4 }
 0x4aa   :  { %5538 = vrot.lane.b32.xlu0 %v5469_v46, %s7644_s22  ;;  %v5687_v46 = vrot.slane %v10453_v63, 3 }
 0x4ab   :  { %5540 = vrot.lane.b32.xlu1 %v5471_v60, %s7644_s22  ;;  %v4937_v55 = vmax.f32 %v4721_v58, %v4901_v37  ;;  %v10623_v60 = vpop.f32.mrf.mxu1  ;;  %v7456_v58 = vld [vmem:[#allocation11 + $0x10] ss:$8 sps:$4 sm:$0xff]   ;;  %v5263_v37 = vrot.slane %v10481_v28, 1 }
 0x4ac   :  { %v10580_v16 = vpop.permute.xlu0 %2067  ;;  %11680 = vst [vmem:[#allocation50_spill] sm:$0xff] %v10623_v60 }
 0x4ad   :  { %v10583_v59 = vpop.permute.xlu1 %2069  ;;  %v10635_v62 = vpop.f32.mrf.mxu1 }
 0x4ae   :  { %5542 = vrot.lane.b32.xlu0 %v5473_v29, %s7644_s22  ;;  %v5261_v29 = vrot.slane %v10604_v54, 1 }
 0x4af   :  { %5544 = vrot.lane.b32.xlu1 %v5475_v5, %s7644_s22  ;;  %v4610_v13 = vld [vmem:[#allocation2 + $0x3e0] ss:$4 sm:$0xff]  ;;  %v4682_v61 = vld [vmem:[#allocation2 + $0x3e1] ss:$4 sm:$0xff]  ;;  %v4790_v34 = vld [vmem:[#allocation2 + $0x3e2] ss:$4 sm:$0xff] }
 0x4b0   :  { %v10595_v3 = vpop.permute.xlu0 %2071  ;;  %v4722_v40 = vmax.f32 %v4610_v13, %v4682_v61  ;;  %v4862_v47 = vld [vmem:[#allocation2 + $0x3e3] ss:$4 sm:$0xff]  ;;  %v5688_v13 = vsel %vm3243_vm2, %v5685_v4, %v5687_v46  ;;  %v5690_v61 = vsel %vm3243_vm2, %v5687_v46, %v11562_v6  ;;  %v5264_v30 = vsel %vm1515_vm1, %v5261_v29, %v5263_v37 }
 0x4b1   :  { %v10598_v32 = vpop.permute.xlu1 %2073  ;;  %v4902_v22 = vmax.f32 %v4790_v34, %v4862_v47  ;;  %v7458_v34 = vld [vmem:[#allocation11 + $0x14] ss:$8 sps:$4 sm:$0xff]   ;;  %v10649_v47 = vpop.f32.mrf.mxu1  ;;  %v5271_v46 = vrot.slane %v10610_v14, 1 }
 0x4b2   :  { %5745 = vrot.lane.b32.xlu0 %v5676_v48, %s7653_s9  ;;  %v5262_v48 = vsel %vm1515_vm1, %v5259_v31, %v5261_v29  ;;  %6159 = vmatprep.subr.bf16.mxu1 %v7458_v34  ;;  %v5699_v10 = vrot.slane %v10649_v47, 3 }
 0x4b3   :  { %5747 = vrot.lane.b32.xlu1 %v5678_v9, %s7653_s9  ;;  %v4938_v38 = vmax.f32 %v4722_v40, %v4902_v22  ;;  %v5265_v40 = vrot.slane %v10591_v20, 1  ;;  %v5267_v22 = vrot.slane %v10623_v60, 1  ;;  %6160 = vmatpush1.bf16.msra.mxu1 %v7456_v58  ;;  %v7459_v9 = vld [vmem:[#allocation11] ss:$8 sps:$4 sm:$0xff]  }
 0x4b4   :  { %v10607_v21 = vpop.permute.xlu0 %2075 }
 0x4b5   :  { %v10612_v42 = vpop.permute.xlu1 %2077  ;;  %v4958_v51 = vpack.c.bf16 %v4938_v38, %v4937_v55  ;;  %v7461_v55 = vld [vmem:[#allocation11 + $0x4] ss:$8 sps:$4 sm:$0xff]   ;;  %v10659_v38 = vpop.f32.mrf.mxu1 }
 0x4b6   :  { %5749 = vrot.lane.b32.xlu0 %v5680_v18, %s7653_s9  ;;  %6161 = vmatprep.subr.bf16.mxu1 %v7461_v55  ;;  %v5266_v18 = vsel %vm1515_vm1, %v5263_v37, %v5265_v40  ;;  %v5476_v37 = vrot.slane %v10604_v54, 2  ;;  %v5480_v55 = vrot.slane %v10591_v20, 2 }
 0x4b7   :  { %7275 = vmatmul.mubr.msk.bf16.gmra.mxu1 %vm4402_vm3, %v4958_v51  ;;  %5751 = vrot.lane.b32.xlu1 %v5682_v25, %s7653_s9  ;;  %v5269_v51 = vrot.slane %v10649_v47, 1  ;;  %v5268_v25 = vsel %vm1515_vm1, %v5265_v40, %v5267_v22  ;;  %v10670_v4 = vpop.f32.mrf.mxu1 }
 0x4b8   :  { %v10620_v19 = vpop.permute.xlu0 %2079  ;;  %6162 = vmatpush1.bf16.msra.mxu1 %v7459_v9  ;;  %v11567_v6 = vrot.slane %v10670_v4, 2 }
 0x4b9   :  { %v10625_v27 = vpop.permute.xlu1 %2081  ;;  %v5272_v58 = vsel %vm1515_vm1, %v5269_v51, %v5271_v46 }
 0x4ba   :  { %5753 = vrot.lane.b32.xlu0 %v5684_v41, %s7653_s9 }
 0x4bb   :  { %5755 = vrot.lane.b32.xlu1 %v5686_v56, %s7653_s9  ;;  %v5273_v56 = vrot.slane %v10635_v62, 1 }
 0x4bc   :  { %v10632_v15 = vpop.permute.xlu0 %2083 }
 0x4bd   :  { %v10637_v5 = vpop.permute.xlu1 %2085 }
 0x4be   :  { %5757 = vrot.lane.b32.xlu0 %v5688_v13, %s7653_s9  ;;  %v5270_v13 = vsel %vm1515_vm1, %v5267_v22, %v5269_v51 }
 0x4bf   :  { %5759 = vrot.lane.b32.xlu1 %v5690_v61, %s7653_s9  ;;  %v11561_v61 = vrot.slane %v10670_v4, 1 }
 0x4c0   :  { %v10646_v2 = vpop.permute.xlu0 %2087 }
 0x4c1   :  { %v10651_v57 = vpop.permute.xlu1 %2089  ;;  %v5276_v22 = vsel %vm1515_vm1, %v5273_v56, %v11561_v61 }
 0x4c2   :  { %5331 = vrot.lane.b32.xlu0 %v5262_v48, %s7652_s7  ;;  %v5274_v48 = vsel %vm1515_vm1, %v5271_v46, %v5273_v56 }
 0x4c3   :  { %5333 = vrot.lane.b32.xlu1 %v5264_v30, %s7652_s7  ;;  %v5478_v30 = vrot.slane %v10481_v28, 2 }
 0x4c4   :  { %v10662_v52 = vpop.permute.xlu0 %2923 }
 0x4c5   :  { %v10665_v31 = vpop.permute.xlu1 %2925  ;;  %v5479_v46 = vsel %vm2379_vm0, %v5476_v37, %v5478_v30 }
 0x4c6   :  { %5335 = vrot.lane.b32.xlu0 %v5266_v18, %s7652_s7  ;;  %v5477_v18 = vsel %vm2379_vm0, %v5474_v11, %v5476_v37  ;;  %v5486_v11 = vrot.slane %v10610_v14, 2 }
 0x4c7   :  { %5337 = vrot.lane.b32.xlu1 %v5268_v25, %s7652_s7  ;;  %v5482_v25 = vrot.slane %v10623_v60, 2 }
 0x4c8   :  { %v10674_v41 = vpop.permute.xlu0 %2927 }
 0x4c9   :  { %v10677_v29 = vpop.permute.xlu1 %2929 }
 0x4ca   :  { %5339 = vrot.lane.b32.xlu0 %v5270_v13, %s7652_s7  ;;  %v5484_v13 = vrot.slane %v10649_v47, 2 }
 0x4cb   :  { %5341 = vrot.lane.b32.xlu1 %v5272_v58, %s7652_s7 }
 0x4cc   :  { %v10684_v34 = vpop.permute.xlu0 %2931  ;;  %v5485_v61 = vsel %vm2379_vm0, %v5482_v25, %v5484_v13 }
 0x4cd   :  { %v10687_v40 = vpop.permute.xlu1 %2933 }
 0x4ce   :  { %5343 = vrot.lane.b32.xlu0 %v5274_v48, %s7652_s7  ;;  %v5481_v48 = vsel %vm2379_vm0, %v5478_v30, %v5480_v55  ;;  %v5487_v30 = vsel %vm2379_vm0, %v5484_v13, %v5486_v11  ;;  %v10740_v13 = vpop.f32.mrf.mxu1 }
 0x4cf   :  { %5345 = vrot.lane.b32.xlu1 %v5276_v22, %s7652_s7  ;;  %v5483_v22 = vsel %vm2379_vm0, %v5480_v55, %v5482_v25 }
 0x4d0   :  { %v10696_v9 = vpop.permute.xlu0 %2935  ;;  %v10760_v24 = vpop.f32.mrf.mxu1 }
 0x4d1   :  { %v10699_v51 = vpop.permute.xlu1 %2937 }
 0x4d2   :  { %5546 = vrot.lane.b32.xlu0 %v5477_v18, %s7644_s22  ;;  %v5488_v18 = vrot.slane %v10635_v62, 2 }
 0x4d3   :  { %5548 = vrot.lane.b32.xlu1 %v5479_v46, %s7644_s22 }
 0x4d4   :  { %v10708_v56 = vpop.permute.xlu0 %2939  ;;  %v5489_v63 = vsel %vm2379_vm0, %v5486_v11, %v5488_v18  ;;  %v5491_v25 = vsel %vm2379_vm0, %v5488_v18, %v11567_v6 }
 0x4d5   :  { %v10711_v58 = vpop.permute.xlu1 %2941 }
 0x4d6   :  { %5550 = vrot.lane.b32.xlu0 %v5481_v48, %s7644_s22  ;;  %v5691_v48 = vrot.slane %v10604_v54, 3  ;;  %v5695_v54 = vrot.slane %v10591_v20, 3  ;;  %v3227_v20 = vadd.f32 %v10662_v52, %v2363_v8  ;;  %v2366_v8 = vadd.f32 %v10022_v7, %v10573_v50 }
 0x4d7   :  { %5552 = vrot.lane.b32.xlu1 %v5483_v22, %s7644_s22  ;;  %v5703_v7 = vrot.slane %v10635_v62, 3 }
 0x4d8   :  { %v10718_v37 = vpop.permute.xlu0 %2943  ;;  %v5692_v18 = vsel %vm3243_vm2, %v11681_v45, %v5691_v48  ;;  %v3230_v50 = vadd.f32 %v10677_v29, %v2366_v8 }
 0x4d9   :  { %v10721_v46 = vpop.permute.xlu1 %2945 }
 0x4da   :  { %5554 = vrot.lane.b32.xlu0 %v5485_v61, %s7644_s22  ;;  %v5693_v61 = vrot.slane %v10481_v28, 3 }
 0x4db   :  { %5556 = vrot.lane.b32.xlu1 %v5487_v30, %s7644_s22 }
 0x4dc   :  { %v10728_v55 = vpop.permute.xlu0 %2947  ;;  %v5694_v6 = vsel %vm3243_vm2, %v5691_v48, %v5693_v61  ;;  %v5701_v48 = vrot.slane %v10610_v14, 3 }
 0x4dd   :  { %v10731_v22 = vpop.permute.xlu1 %2949 }
 0x4de   :  { %5558 = vrot.lane.b32.xlu0 %v5489_v63, %s7644_s22  ;;  %v5697_v63 = vrot.slane %v10623_v60, 3  ;;  %v2365_v60 = vadd.f32 %v9899_v12, %v10570_v33  ;;  %v10777_v12 = vld [vmem:[%s11500_s2] ss:$0 sm:$0xff] }
 0x4df   :  { %5560 = vrot.lane.b32.xlu1 %v5491_v25, %s7644_s22  ;;  %v2364_v25 = vadd.f32 %v10558_v23, %v10036_v39  ;;  %v5696_v23 = vsel %vm3243_vm2, %v5693_v61, %v5695_v54 }
 0x4e0   :  { %v10742_v30 = vpop.permute.xlu0 %2951 }
 0x4e1   :  { %v10747_v11 = vpop.permute.xlu1 %2953  ;;  %v3228_v28 = vadd.f32 %v10665_v31, %v2364_v25  ;;  %v3229_v31 = vadd.f32 %v10674_v41, %v2365_v60  ;;  %v5700_v25 = vsel %vm3243_vm2, %v5697_v63, %v5699_v10 }
 0x4e2   :  { %5761 = vrot.lane.b32.xlu0 %v5692_v18, %s7653_s9  ;;  %v5698_v18 = vsel %vm3243_vm2, %v5695_v54, %v5697_v63  ;;  %v2367_v54 = vadd.f32 %v10580_v16, %v10060_v0  ;;  %v5277_v16 = vrot.slane %v10760_v24, 1 }
 0x4e3   :  { %5763 = vrot.lane.b32.xlu1 %v5694_v6, %s7653_s9  ;;  %v10769_v6 = vpop.f32.mrf.mxu1 }
 0x4e4   :  { %v3788_v45 = vpop.permute.xlu0 %3787 }
 0x4e5   :  { %v3790_v36 = vpop.permute.xlu1 %3789  ;;  %v4091_v39 = vadd.f32 %v3788_v45, %v3227_v20  ;;  %v5702_v20 = vsel %vm3243_vm2, %v5699_v10, %v5701_v48  ;;  %v5705_v45 = vrot.slane %v10670_v4, 3  ;;  %v5704_v10 = vsel %vm3243_vm2, %v5701_v48, %v5703_v7 }
 0x4e6   :  { %v4092_v52 = vadd.f32 %v3790_v36, %v3228_v28  ;;  %5765 = vrot.lane.b32.xlu0 %v5696_v23, %s7653_s9  ;;  %v10791_v23 = vpop.f32.mrf.mxu1 }
 0x4e7   :  { %v4242_v33 = vadd.f32 %v10777_v12, %v4091_v39  ;;  %5767 = vrot.lane.b32.xlu1 %v5698_v18, %s7653_s9  ;;  %v2368_v39 = vadd.f32 %v10583_v59, %v10089_v35  ;;  %v5279_v18 = vrot.slane %v10659_v38, 1 }
 0x4e8   :  { %v4243_v28 = vadd.f32 %v10777_v12, %v4092_v52  ;;  %v3792_v36 = vpop.permute.xlu0 %3791  ;;  %v3231_v52 = vadd.f32 %v10684_v34, %v2367_v54  ;;  %v11682_v34 = vld [vmem:[#allocation30_spill] sm:$0xff]  ;;  %v10808_v54 = vpop.f32.mrf.mxu1 }
 0x4e9   :  { %v4386_v60 = vmax.f32 %v4242_v33, 0.0  ;;  %v3794_v41 = vpop.permute.xlu1 %3793  ;;  %v4093_v61 = vadd.f32 %v3792_v36, %v3229_v31  ;;  %v3232_v63 = vadd.f32 %v10687_v40, %v2368_v39  ;;  %v2369_v31 = vadd.f32 %v11682_v34, %v10595_v3  ;;  %v11683_v36 = vld [vmem:[#allocation32_spill] sm:$0xff] }
 0x4ea   :  { %v4387_v29 = vmax.f32 %v4243_v28, 0.0  ;;  %v4094_v8 = vadd.f32 %v3794_v41, %v3230_v50  ;;  %5769 = vrot.lane.b32.xlu0 %v5700_v25, %s7653_s9  ;;  %v5706_v41 = vsel %vm3243_vm2, %v5703_v7, %v5705_v45  ;;  %v5280_v7 = vsel %vm1515_vm1, %v5277_v16, %v5279_v18  ;;  %v10831_v34 = vpop.f32.mrf.mxu1 }
 0x4eb   :  { %4531 = vst.msk [vmem:[#allocation2 + $0x400] sm:$0xff] %vm4402_vm3, %v4386_v60  ;;  %v4244_v0 = vadd.f32 %v10777_v12, %v4093_v61  ;;  %5771 = vrot.lane.b32.xlu1 %v5702_v20, %s7653_s9  ;;  %v2370_v20 = vadd.f32 %v11683_v36, %v10598_v32  ;;  %v3233_v48 = vadd.f32 %v10696_v9, %v2369_v31  ;;  %v5281_v32 = vrot.slane %v10740_v13, 1 }
 0x4ec   :  { %4532 = vst.msk [vmem:[#allocation2 + $0x408] sm:$0xff] %vm4402_vm3, %v4387_v29  ;;  %v4245_v35 = vadd.f32 %v10777_v12, %v4094_v8  ;;  %v3796_v59 = vpop.permute.xlu0 %3795  ;;  %v11684_v29 = vld [vmem:[#allocation31_spill] sm:$0xff] }
 0x4ed   :  { %v4388_v33 = vmax.f32 %v4244_v0, 0.0  ;;  %v3798_v50 = vpop.permute.xlu1 %3797  ;;  %v4095_v28 = vadd.f32 %v3796_v59, %v3231_v52  ;;  %v3234_v61 = vadd.f32 %v10699_v51, %v2370_v20  ;;  %v2371_v9 = vadd.f32 %v10607_v21, %v11684_v29  ;;  %v11686_v59 = vld [vmem:[#allocation36_spill] sm:$0xff]  ;;  %v11687_v20 = vld [vmem:[#allocation29_spill] sm:$0xff] }
 0x4ee   :  { %v4389_v40 = vmax.f32 %v4245_v35, 0.0  ;;  %v4096_v60 = vadd.f32 %v3798_v50, %v3232_v63  ;;  %5773 = vrot.lane.b32.xlu0 %v5704_v10, %s7653_s9  ;;  %v11685_v63 = vrot.slane %v10670_v4, 1  ;;  %v2372_v51 = vadd.f32 %v10612_v42, %v11686_v59  ;;  %v11690_v59 = vld [vmem:[#allocation35_spill] sm:$0xff] }
 0x4ef   :  { %4533 = vst.msk [vmem:[#allocation2 + $0x410] sm:$0xff] %vm4402_vm3, %v4388_v33  ;;  %v4246_v3 = vadd.f32 %v10777_v12, %v4095_v28  ;;  %5775 = vrot.lane.b32.xlu1 %v5706_v41, %s7653_s9  ;;  %v5283_v10 = vrot.slane %v10791_v23, 1  ;;  %v3235_v21 = vadd.f32 %v10708_v56, %v2371_v9  ;;  %v5282_v36 = vsel %vm1515_vm1, %v5279_v18, %v5281_v32 }
 0x4f0   :  { %4534 = vst.msk [vmem:[#allocation2 + $0x418] sm:$0xff] %vm4402_vm3, %v4389_v40  ;;  %v4247_v25 = vadd.f32 %v10777_v12, %v4096_v60  ;;  %v3800_v39 = vpop.permute.xlu0 %3799  ;;  %v5278_v35 = vsel %vm1515_vm1, %v11685_v63, %v5277_v16  ;;  %v3236_v16 = vadd.f32 %v10711_v58, %v2372_v51  ;;  %v2373_v40 = vadd.f32 %v11687_v20, %v10620_v19 }
 0x4f1   :  { %v4390_v8 = vmax.f32 %v4246_v3, 0.0  ;;  %v3802_v52 = vpop.permute.xlu1 %3801  ;;  %v4097_v0 = vadd.f32 %v3800_v39, %v3233_v48  ;;  %v5285_v56 = vrot.slane %v10831_v34, 1  ;;  %v11688_v3 = vld [vmem:[#allocation34_spill] sm:$0xff]  ;;  %v5284_v39 = vsel %vm1515_vm1, %v5281_v32, %v5283_v10 }
 0x4f2   :  { %v4391_v31 = vmax.f32 %v4247_v25, 0.0  ;;  %v4098_v33 = vadd.f32 %v3802_v52, %v3234_v61  ;;  %5347 = vrot.lane.b32.xlu0 %v5278_v35, %s7652_s7  ;;  %v2374_v61 = vadd.f32 %v11688_v3, %v10625_v27  ;;  %v5287_v18 = vrot.slane %v10769_v6, 1 }
 0x4f3   :  { %4535 = vst.msk [vmem:[#allocation2 + $0x420] sm:$0xff] %vm4402_vm3, %v4390_v8  ;;  %v4248_v50 = vadd.f32 %v10777_v12, %v4097_v0  ;;  %5349 = vrot.lane.b32.xlu1 %v5280_v7, %s7652_s7  ;;  %v3237_v7 = vadd.f32 %v10718_v37, %v2373_v40  ;;  %v5289_v29 = vrot.slane %v10808_v54, 1  ;;  %v11689_v8 = vld [vmem:[#allocation33_spill] sm:$0xff]  ;;  %v5286_v35 = vsel %vm1515_vm1, %v5283_v10, %v5285_v56 }
 0x4f4   :  { %4536 = vst.msk [vmem:[#allocation2 + $0x428] sm:$0xff] %vm4402_vm3, %v4391_v31  ;;  %v4249_v42 = vadd.f32 %v10777_v12, %v4098_v33  ;;  %v3804_v28 = vpop.permute.xlu0 %3803  ;;  %v3238_v27 = vadd.f32 %v10721_v46, %v2374_v61  ;;  %v2375_v37 = vadd.f32 %v10632_v15, %v11689_v8  ;;  %v2376_v51 = vadd.f32 %v10637_v5, %v11690_v59 }
 0x4f5   :  { %v4392_v60 = vmax.f32 %v4248_v50, 0.0  ;;  %v3806_v41 = vpop.permute.xlu1 %3805  ;;  %v4099_v48 = vadd.f32 %v3804_v28, %v3235_v21  ;;  %v5288_v46 = vsel %vm1515_vm1, %v5285_v56, %v5287_v18  ;;  %v5492_v21 = vrot.slane %v10760_v24, 2 }
 0x4f6   :  { %v4393_v25 = vmax.f32 %v4249_v42, 0.0  ;;  %v4100_v58 = vadd.f32 %v3806_v41, %v3236_v16  ;;  %5351 = vrot.lane.b32.xlu0 %v5282_v36, %s7652_s7  ;;  %v3239_v50 = vadd.f32 %v10728_v55, %v2375_v37  ;;  %v3240_v16 = vadd.f32 %v10731_v22, %v2376_v51 }
 0x4f7   :  { %4537 = vst.msk [vmem:[#allocation2 + $0x430] sm:$0xff] %vm4402_vm3, %v4392_v60  ;;  %v4250_v19 = vadd.f32 %v10777_v12, %v4099_v48  ;;  %5353 = vrot.lane.b32.xlu1 %v5284_v39, %s7652_s7  ;;  %v4612_v10 = vld [vmem:[#allocation2 + $0x400] ss:$4 sm:$0xff]  ;;  %v4684_v28 = vld [vmem:[#allocation2 + $0x401] ss:$4 sm:$0xff]  ;;  %v2377_v55 = vadd.f32 %v10186_v49, %v10646_v2  ;;  %v5290_v41 = vsel %vm1515_vm1, %v5287_v18, %v5289_v29  ;;  %v11691_v37 = vrot.slane %v10670_v4, 2 }
 0x4f8   :  { %4538 = vst.msk [vmem:[#allocation2 + $0x438] sm:$0xff] %vm4402_vm3, %v4393_v25  ;;  %v4251_v32 = vadd.f32 %v10777_v12, %v4100_v58  ;;  %v3808_v9 = vpop.permute.xlu0 %3807  ;;  %v4792_v36 = vld [vmem:[#allocation2 + $0x402] ss:$4 sm:$0xff]  ;;  %v4864_v20 = vld [vmem:[#allocation2 + $0x403] ss:$4 sm:$0xff]  ;;  %v2378_v22 = vadd.f32 %v10221_v1, %v10651_v57  ;;  %v4723_v58 = vmax.f32 %v4612_v10, %v4684_v28 }
 0x4f9   :  { %v4394_v52 = vmax.f32 %v4250_v19, 0.0  ;;  %v3810_v0 = vpop.permute.xlu1 %3809  ;;  %v4101_v63 = vadd.f32 %v3808_v9, %v3237_v7  ;;  %v3241_v61 = vadd.f32 %v10742_v30, %v2377_v55  ;;  %v4903_v7 = vmax.f32 %v4792_v36, %v4864_v20 }
 0x4fa   :  { %v4395_v31 = vmax.f32 %v4251_v32, 0.0  ;;  %v4102_v33 = vadd.f32 %v3810_v0, %v3238_v27  ;;  %5355 = vrot.lane.b32.xlu0 %v5286_v35, %s7652_s7  ;;  %v5496_v19 = vrot.slane %v10740_v13, 2  ;;  %v3242_v18 = vadd.f32 %v10747_v11, %v2378_v22 }
 0x4fb   :  { %4539 = vst.msk [vmem:[#allocation2 + $0x440] sm:$0xff] %vm4402_vm3, %v4394_v52  ;;  %v4252_v15 = vadd.f32 %v10777_v12, %v4101_v63  ;;  %5357 = vrot.lane.b32.xlu1 %v5288_v46, %s7652_s7  ;;  %v5493_v52 = vsel %vm2379_vm0, %v11691_v37, %v5492_v21  ;;  %v5494_v63 = vrot.slane %v10659_v38, 2  ;;  %v4939_v51 = vmax.f32 %v4723_v58, %v4903_v7 }
 0x4fc   :  { %4540 = vst.msk [vmem:[#allocation2 + $0x448] sm:$0xff] %vm4402_vm3, %v4395_v31  ;;  %v4253_v5 = vadd.f32 %v10777_v12, %v4102_v33  ;;  %v3812_v42 = vpop.permute.xlu0 %3811  ;;  %v5504_v36 = vrot.slane %v10808_v54, 2 }
 0x4fd   :  { %v4396_v40 = vmax.f32 %v4252_v15, 0.0  ;;  %v3814_v56 = vpop.permute.xlu1 %3813  ;;  %v4103_v60 = vadd.f32 %v3812_v42, %v3239_v50  ;;  %v5497_v50 = vsel %vm2379_vm0, %v5494_v63, %v5496_v19  ;;  %v5500_v15 = vrot.slane %v10831_v34, 2 }
 0x4fe   :  { %v4397_v48 = vmax.f32 %v4253_v5, 0.0  ;;  %v4104_v3 = vadd.f32 %v3814_v56, %v3240_v16  ;;  %5359 = vrot.lane.b32.xlu0 %v5290_v41, %s7652_s7 }
 0x4ff   :  { %4541 = vst.msk [vmem:[#allocation2 + $0x450] sm:$0xff] %vm4402_vm3, %v4396_v40  ;;  %v4254_v49 = vadd.f32 %v10777_v12, %v4103_v60  ;;  %v4614_v2 = vld [vmem:[#allocation2 + $0x420] ss:$4 sm:$0xff]  ;;  %v4686_v25 = vld [vmem:[#allocation2 + $0x421] ss:$4 sm:$0xff]  ;;  %v5502_v40 = vrot.slane %v10769_v6, 2 }
 0x500   :  { %v4794_v39 = vld [vmem:[#allocation2 + $0x422] ss:$4 sm:$0xff]  ;;  %4542 = vst.msk [vmem:[#allocation2 + $0x458] sm:$0xff] %vm4402_vm3, %v4397_v48  ;;  %v4255_v1 = vadd.f32 %v10777_v12, %v4104_v3  ;;  %v3816_v57 = vpop.permute.xlu0 %3815  ;;  %v4724_v27 = vmax.f32 %v4614_v2, %v4686_v25  ;;  %v4866_v30 = vld [vmem:[#allocation2 + $0x423] ss:$4 sm:$0xff]  ;;  %v5707_v3 = vrot.slane %v10760_v24, 3 }
 0x501   :  { %v4398_v32 = vmax.f32 %v4254_v49, 0.0  ;;  %v3818_v9 = vpop.permute.xlu1 %3817  ;;  %v4105_v8 = vadd.f32 %v3816_v57, %v3241_v61  ;;  %v4904_v0 = vmax.f32 %v4794_v39, %v4866_v30  ;;  %v5505_v49 = vsel %vm2379_vm0, %v5502_v40, %v5504_v36 }
 0x502   :  { %v4399_v11 = vmax.f32 %v4255_v1, 0.0  ;;  %v4106_v35 = vadd.f32 %v3818_v9, %v3242_v18  ;;  %5562 = vrot.lane.b32.xlu0 %v5493_v52, %s7644_s22 }
 0x503   :  { %4543 = vst.msk [vmem:[#allocation2 + $0x460] sm:$0xff] %vm4402_vm3, %v4398_v32  ;;  %v4256_v59 = vadd.f32 %v10777_v12, %v4105_v8  ;;  %v4940_v31 = vmax.f32 %v4724_v27, %v4904_v0  ;;  %v5711_v27 = vrot.slane %v10740_v13, 3  ;;  %v5708_v32 = vsel %vm3243_vm2, %v5705_v45, %v5707_v3 }
 0x504   :  { %4544 = vst.msk [vmem:[#allocation2 + $0x468] sm:$0xff] %vm4402_vm3, %v4399_v11  ;;  %v4257_v33 = vadd.f32 %v10777_v12, %v4106_v35  ;;  %v10899_v46 = vpop.permute.xlu0 %5315  ;;  %v5498_v12 = vrot.slane %v10791_v23, 2  ;;  %v5709_v8 = vrot.slane %v10659_v38, 3  ;;  %v5715_v11 = vrot.slane %v10831_v34, 3 }
 0x505   :  { %v4400_v10 = vmax.f32 %v4256_v59, 0.0  ;;  %v10907_v16 = vpop.permute.xlu1 %5317  ;;  %v4959_v5 = vpack.c.bf16 %v4940_v31, %v4939_v51  ;;  %v5713_v45 = vrot.slane %v10791_v23, 3 }
 0x506   :  { %v4401_v42 = vmax.f32 %v4257_v33, 0.0  ;;  %5566 = vrot.lane.b32.xlu0 %v5497_v50, %s7644_s22  ;;  %v5501_v55 = vsel %vm2379_vm0, %v5498_v12, %v5500_v15  ;;  %v5712_v51 = vsel %vm3243_vm2, %v5709_v8, %v5711_v27  ;;  %v7654_v50 = vmov 0  }
 0x507   :  { %4545 = vst.msk [vmem:[#allocation2 + $0x470] sm:$0xff] %vm4402_vm3, %v4400_v10  ;;  %7278 = vmatprep.mubr.msk.bf16.mxu1 %vm4402_vm3, %v4959_v5  ;;  %v4616_v56 = vld [vmem:[#allocation2 + $0x440] ss:$4 sm:$0xff]  ;;  %v4688_v41 = vld [vmem:[#allocation2 + $0x441] ss:$4 sm:$0xff]  ;;  %v5719_v10 = vrot.slane %v10808_v54, 3 }
 0x508   :  { %4547 = vst.msk [vmem:[#allocation2 + $0x478] sm:$0x1f] %vm4546_vm4, %v4401_v42  ;;  %v10913_v28 = vpop.permute.xlu0 %5319  ;;  %v4796_v22 = vld [vmem:[#allocation2 + $0x442] ss:$4 sm:$0xff]  ;;  %v4868_v48 = vld [vmem:[#allocation2 + $0x443] ss:$4 sm:$0xff]  ;;  %v4725_v58 = vmax.f32 %v4616_v56, %v4688_v41 }
 0x509   :  { %v10916_v20 = vpop.permute.xlu1 %5321  ;;  %v4905_v39 = vmax.f32 %v4796_v22, %v4868_v48  ;;  %v5717_v41 = vrot.slane %v10769_v6, 3 }
 0x50a   :  { %5570 = vrot.lane.b32.xlu0 %v5501_v55, %s7644_s22  ;;  %v5716_v55 = vsel %vm3243_vm2, %v5713_v45, %v5715_v11 }
 0x50b   :  { %v4941_v37 = vmax.f32 %v4725_v58, %v4905_v39  ;;  %v5720_v58 = vsel %vm3243_vm2, %v5717_v41, %v5719_v10 }
 0x50c   :  { %v10925_v60 = vpop.permute.xlu0 %5323 }
 0x50d   :  { %v10928_v61 = vpop.permute.xlu1 %5325 }
 0x50e   :  { %5574 = vrot.lane.b32.xlu0 %v5505_v49, %s7644_s22 }
 0x50f   :  { %v4618_v2 = vld [vmem:[#allocation2 + $0x460] ss:$4 sm:$0x7f]  ;;  %v4690_v25 = vld [vmem:[#allocation2 + $0x461] ss:$4 sm:$0x7f] }
 0x510   :  { %v10936_v7 = vpop.permute.xlu0 %5327  ;;  %v4726_v18 = vmax.f32 %v4618_v2, %v4690_v25  ;;  %v4798_v1 = vld [vmem:[#allocation2 + $0x462] ss:$4 sm:$0x7f]  ;;  %v4870_v57 = vld [vmem:[#allocation2 + $0x463] ss:$4 sm:$0x7f] }
 0x511   :  { %v10939_v30 = vpop.permute.xlu1 %5329  ;;  %v4906_v9 = vmax.f32 %v4798_v1, %v4870_v57 }
 0x512   :  { %5777 = vrot.lane.b32.xlu0 %v5708_v32, %s7653_s9  ;;  %v5423_v32 = vadd.f32 %v10899_v46, %v10386_v26 }
 0x513   :  { %v4942_v52 = vmax.f32 %v4726_v18, %v4906_v9  ;;  %v5495_v9 = vsel %vm2379_vm0, %v5492_v21, %v5494_v63  ;;  %v5424_v63 = vadd.f32 %v10907_v16, %v10414_v53  ;;  %v5425_v53 = vadd.f32 %v10374_v43, %v10913_v28 }
 0x514   :  { %v5531_v0 = vpop.permute.xlu0 %5530 }
 0x515   :  { %v5533_v35 = vpop.permute.xlu1 %5532  ;;  %v4960_v59 = vpack.c.bf16 %v4942_v52, %v4941_v37  ;;  %v5638_v46 = vadd.f32 %v5531_v0, %v5423_v32 }
 0x516   :  { %5781 = vrot.lane.b32.xlu0 %v5712_v51, %s7653_s9 }
 0x517   :  { %v10956_v31 = vpop.f32.mrf.mxu1  ;;  %7279 = vmatmul.mubr.msk.bf16.gmra.mxu1 %vm4402_vm3, %v4960_v59 }
 0x518   :  { %v5535_v33 = vpop.permute.xlu0 %5534  ;;  %6179 = vmatprep.mubr.bf16.mxu1 %v7654_v50  ;;  %v5725_v57 = vrot.slane %v10956_v31, 3 }
 0x519   :  { %v10961_v5 = vpop.f32.mrf.mxu1  ;;  %v5537_v42 = vpop.permute.xlu1 %5536  ;;  %v5640_v32 = vadd.f32 %v5535_v33, %v5425_v53 }
 0x51a   :  { %v5291_v56 = vrot.slane %v10961_v5, 1  ;;  %5785 = vrot.lane.b32.xlu0 %v5716_v55, %s7653_s9  ;;  %v5295_v55 = vrot.slane %v10956_v31, 1  ;;  %v5506_v43 = vrot.slane %v10961_v5, 2 }
 0x51b   :  { %v10971_v22 = vpop.f32.mrf.mxu1 }
 0x51c   :  { %v5292_v48 = vsel %vm1515_vm1, %v5289_v29, %v5291_v56  ;;  %v5539_v49 = vpop.permute.xlu0 %5538  ;;  %v5510_v29 = vrot.slane %v10956_v31, 2  ;;  %v5297_v52 = vrot.slane %v10971_v22, 1 }
 0x51d   :  { %v10976_v2 = vpop.f32.mrf.mxu1  ;;  %5361 = vrot.lane.b32.xlu1 %v5292_v48, %s7652_s7  ;;  %v5541_v25 = vpop.permute.xlu1 %5540  ;;  %v5499_v48 = vsel %vm2379_vm0, %v5496_v19, %v5498_v12  ;;  %v5426_v19 = vadd.f32 %v10398_v17, %v10916_v20  ;;  %v5427_v17 = vadd.f32 %v10925_v60, %v10436_v44 }
 0x51e   :  { %v5293_v39 = vrot.slane %v10976_v2, 1  ;;  %v5508_v18 = vrot.slane %v10976_v2, 2  ;;  %v5723_v1 = vrot.slane %v10976_v2, 3  ;;  %5789 = vrot.lane.b32.xlu0 %v5720_v58, %s7653_s9  ;;  %v11028_v58 = vld [vmem:[%s11502_s4] ss:$0 sm:$0xff] }
 0x51f   :  { %v5641_v28 = vadd.f32 %v5537_v42, %v5426_v19 }
 0x520   :  { %v5543_v37 = vpop.permute.xlu0 %5542  ;;  %v5294_v51 = vsel %vm1515_vm1, %v5291_v56, %v5293_v39  ;;  %v11007_v26 = vsel %vm2379_vm0, %v5508_v18, %v5510_v29  ;;  %v11014_v21 = vsel %vm3243_vm2, %v5723_v1, %v5725_v57  ;;  %v5639_v56 = vadd.f32 %v5533_v35, %v5424_v63 }
 0x521   :  { %5564 = vrot.lane.b32.xlu1 %v5495_v9, %s7644_s22  ;;  %v5545_v59 = vpop.permute.xlu1 %5544  ;;  %v5298_v35 = vsel %vm1515_vm1, %v5295_v55, %v5297_v52 }
 0x522   :  { %5363 = vrot.lane.b32.xlu0 %v5294_v51, %s7652_s7 }
 0x524   :  { %v5746_v9 = vpop.permute.xlu0 %5745 }
 0x525   :  { %5568 = vrot.lane.b32.xlu1 %v5499_v48, %s7644_s22  ;;  %v5748_v16 = vpop.permute.xlu1 %5747  ;;  %v5853_v0 = vadd.f32 %v5746_v9, %v5638_v46  ;;  %v5503_v46 = vsel %vm2379_vm0, %v5500_v15, %v5502_v40  ;;  %v11692_v9 = vld [vmem:[#allocation43_spill] sm:$0xff]  ;;  %v5507_v40 = vsel %vm2379_vm0, %v5504_v36, %v5506_v43 }
 0x526   :  { %v5854_v12 = vadd.f32 %v5748_v16, %v5639_v56  ;;  %5367 = vrot.lane.b32.xlu0 %v5298_v35, %s7652_s7  ;;  %v5428_v42 = vadd.f32 %v10928_v61, %v11692_v9  ;;  %v11693_v61 = vld [vmem:[#allocation37_spill] sm:$0xff] }
 0x527   :  { %v5896_v51 = vadd.f32 %v11028_v58, %v5853_v0  ;;  %v5642_v0 = vadd.f32 %v5539_v49, %v5427_v17  ;;  %v5429_v19 = vadd.f32 %v11693_v61, %v10936_v7  ;;  %v5710_v17 = vsel %vm3243_vm2, %v5707_v3, %v5709_v8 }
 0x528   :  { %v5897_v63 = vadd.f32 %v11028_v58, %v5854_v12  ;;  %v5750_v48 = vpop.permute.xlu0 %5749  ;;  %v5643_v15 = vadd.f32 %v5541_v25, %v5428_v42  ;;  %v11694_v25 = vld [vmem:[#allocation42_spill] sm:$0xff]  ;;  %v5714_v3 = vsel %vm3243_vm2, %v5711_v27, %v5713_v45 }
 0x529   :  { %v5932_v20 = vmax.f32 %v5896_v51, 0.0  ;;  %5572 = vrot.lane.b32.xlu1 %v5503_v46, %s7644_s22  ;;  %v5752_v33 = vpop.permute.xlu1 %5751  ;;  %v5855_v56 = vadd.f32 %v5750_v48, %v5640_v32  ;;  %v5430_v51 = vadd.f32 %v11694_v25, %v10939_v30  ;;  %v5644_v46 = vadd.f32 %v5543_v37, %v5429_v19 }
 0x52a   :  { %v5933_v53 = vmax.f32 %v5897_v63, 0.0  ;;  %v5856_v16 = vadd.f32 %v5752_v33, %v5641_v28 }
 0x52b   :  { %5968 = vst.msk [vmem:[#allocation3] sm:$0xff] %vm4402_vm3, %v5932_v20  ;;  %v5898_v35 = vadd.f32 %v11028_v58, %v5855_v56  ;;  %v5645_v36 = vadd.f32 %v5545_v59, %v5430_v51 }
 0x52c   :  { %5969 = vst.msk [vmem:[#allocation3 + $0x8] sm:$0xff] %vm4402_vm3, %v5933_v53  ;;  %v5899_v44 = vadd.f32 %v11028_v58, %v5856_v16  ;;  %v5754_v60 = vpop.permute.xlu0 %5753 }
 0x52d   :  { %v5934_v49 = vmax.f32 %v5898_v35, 0.0  ;;  %5576 = vrot.lane.b32.xlu1 %v5507_v40, %s7644_s22  ;;  %v5756_v12 = vpop.permute.xlu1 %5755  ;;  %v5857_v32 = vadd.f32 %v5754_v60, %v5642_v0  ;;  %v5721_v35 = vrot.slane %v10961_v5, 3 }
 0x52e   :  { %v5935_v28 = vmax.f32 %v5899_v44, 0.0  ;;  %v5858_v63 = vadd.f32 %v5756_v12, %v5643_v15  ;;  %v5718_v15 = vsel %vm3243_vm2, %v5715_v11, %v5717_v41 }
 0x52f   :  { %5970 = vst.msk [vmem:[#allocation3 + $0x10] sm:$0xff] %vm4402_vm3, %v5934_v49  ;;  %v5900_v48 = vadd.f32 %v11028_v58, %v5857_v32  ;;  %v5722_v40 = vsel %vm3243_vm2, %v5719_v10, %v5721_v35 }
 0x530   :  { %5971 = vst.msk [vmem:[#allocation3 + $0x18] sm:$0xff] %vm4402_vm3, %v5935_v28  ;;  %v5901_v7 = vadd.f32 %v11028_v58, %v5858_v63  ;;  %v5758_v20 = vpop.permute.xlu0 %5757  ;;  %v5296_v28 = vsel %vm1515_vm1, %v5293_v39, %v5295_v55 }
 0x531   :  { %v5936_v30 = vmax.f32 %v5900_v48, 0.0  ;;  %5779 = vrot.lane.b32.xlu1 %v5710_v17, %s7653_s9  ;;  %v5760_v37 = vpop.permute.xlu1 %5759  ;;  %v5859_v33 = vadd.f32 %v5758_v20, %v5644_v46 }
 0x532   :  { %v5937_v56 = vmax.f32 %v5901_v7, 0.0  ;;  %v5860_v9 = vadd.f32 %v5760_v37, %v5645_v36 }
 0x533   :  { %5972 = vst.msk [vmem:[#allocation3 + $0x20] sm:$0xff] %vm4402_vm3, %v5936_v30  ;;  %v5902_v59 = vadd.f32 %v11028_v58, %v5859_v33 }
 0x534   :  { %5973 = vst.msk [vmem:[#allocation3 + $0x28] sm:$0xff] %vm4402_vm3, %v5937_v56  ;;  %v5903_v42 = vadd.f32 %v11028_v58, %v5860_v9  ;;  %v5332_v8 = vpop.permute.xlu0 %5331 }
 0x535   :  { %v5938_v53 = vmax.f32 %v5902_v59, 0.0  ;;  %5783 = vrot.lane.b32.xlu1 %v5714_v3, %s7653_s9  ;;  %v5334_v16 = vpop.permute.xlu1 %5333  ;;  %v11695_v59 = vld [vmem:[#allocation49_spill] sm:$0xff] }
 0x536   :  { %v5939_v0 = vmax.f32 %v5903_v42, 0.0  ;;  %v5431_v42 = vadd.f32 %v5332_v8, %v11695_v59 }
 0x537   :  { %5974 = vst.msk [vmem:[#allocation3 + $0x30] sm:$0xff] %vm4402_vm3, %v5938_v53  ;;  %v6005_v45 = vld [vmem:[#allocation3] ss:$4 sm:$0xff]  ;;  %v6023_v61 = vld [vmem:[#allocation3 + $0x1] ss:$4 sm:$0xff] }
 0x538   :  { %5975 = vst.msk [vmem:[#allocation3 + $0x38] sm:$0xff] %vm4402_vm3, %v5939_v0  ;;  %v5336_v44 = vpop.permute.xlu0 %5335  ;;  %v6050_v19 = vld [vmem:[#allocation3 + $0x2] ss:$4 sm:$0xff]  ;;  %v6068_v49 = vld [vmem:[#allocation3 + $0x3] ss:$4 sm:$0xff]  ;;  %v6040_v41 = vmax.f32 %v6005_v45, %v6023_v61 }
 0x539   :  { %5787 = vrot.lane.b32.xlu1 %v5718_v15, %s7653_s9  ;;  %v5338_v27 = vpop.permute.xlu1 %5337  ;;  %v6085_v51 = vmax.f32 %v6050_v19, %v6068_v49  ;;  %v11696_v53 = vld [vmem:[#allocation48_spill] sm:$0xff]  ;;  %v11697_v61 = vld [vmem:[#allocation47_spill] sm:$0xff] }
 0x53a   :  { %v5432_v0 = vadd.f32 %v5334_v16, %v11696_v53  ;;  %v5433_v19 = vadd.f32 %v11697_v61, %v5336_v44 }
 0x53b   :  { %v6094_v7 = vmax.f32 %v6040_v41, %v6085_v51 }
 0x53c   :  { %v5340_v60 = vpop.permute.xlu0 %5339 }
 0x53d   :  { %5791 = vrot.lane.b32.xlu1 %v5722_v40, %s7653_s9  ;;  %v5342_v12 = vpop.permute.xlu1 %5341 }
 0x53f   :  { %v6007_v32 = vld [vmem:[#allocation3 + $0x20] ss:$4 sm:$0xff]  ;;  %v6025_v11 = vld [vmem:[#allocation3 + $0x21] ss:$4 sm:$0xff]  ;;  %v6052_v25 = vld [vmem:[#allocation3 + $0x22] ss:$4 sm:$0xff] }
 0x540   :  { %v5344_v63 = vpop.permute.xlu0 %5343  ;;  %v6041_v10 = vmax.f32 %v6007_v32, %v6025_v11  ;;  %v6070_v46 = vld [vmem:[#allocation3 + $0x23] ss:$4 sm:$0xff] }
 0x541   :  { %5365 = vrot.lane.b32.xlu1 %v5296_v28, %s7652_s7  ;;  %v5346_v48 = vpop.permute.xlu1 %5345  ;;  %v6086_v36 = vmax.f32 %v6052_v25, %v6070_v46  ;;  %v11698_v11 = vld [vmem:[#allocation46_spill] sm:$0xff] }
 0x542   :  { %v5434_v41 = vadd.f32 %v11698_v11, %v5338_v27 }
 0x543   :  { %v6095_v17 = vmax.f32 %v6041_v10, %v6086_v36  ;;  %v11699_v36 = vld [vmem:[#allocation50_spill] sm:$0xff] }
 0x544   :  { %v5547_v20 = vpop.permute.xlu0 %5546 }
 0x545   :  { %v5549_v30 = vpop.permute.xlu1 %5548  ;;  %v6103_v37 = vpack.c.bf16 %v6095_v17, %v6094_v7  ;;  %v5646_v15 = vadd.f32 %v5547_v20, %v5431_v42  ;;  %v5435_v7 = vadd.f32 %v5340_v60, %v11699_v36  ;;  %v5437_v60 = vadd.f32 %v10610_v14, %v5344_v63 }
 0x546   :  { %v5647_v45 = vadd.f32 %v5549_v30, %v5432_v0  ;;  %v5436_v30 = vadd.f32 %v5342_v12, %v10649_v47  ;;  %v5438_v47 = vadd.f32 %v10635_v62, %v5346_v48 }
 0x547   :  { %6924 = vmatmul.mubr.msk.bf16.vlgmr.msra.gmra.mxu1 %vm4402_vm3, %v6103_v37 }
 0x548   :  { %v5551_v33 = vpop.permute.xlu0 %5550  ;;  %6189 = vmatprep.mubr.bf16.mxu1 %v7654_v50 }
 0x549   :  { %v5553_v56 = vpop.permute.xlu1 %5552  ;;  %v5648_v51 = vadd.f32 %v5551_v33, %v5433_v19 }
 0x54a   :  { %v5649_v10 = vadd.f32 %v5553_v56, %v5434_v41 }
 0x54c   :  { %v5555_v9 = vpop.permute.xlu0 %5554 }
 0x54d   :  { %v5557_v39 = vpop.permute.xlu1 %5556  ;;  %v5650_v59 = vadd.f32 %v5555_v9, %v5435_v7 }
 0x54e   :  { %v5651_v33 = vadd.f32 %v5557_v39, %v5436_v30 }
 0x550   :  { %v5559_v55 = vpop.permute.xlu0 %5558 }
 0x551   :  { %v5561_v3 = vpop.permute.xlu1 %5560  ;;  %v5652_v9 = vadd.f32 %v5559_v55, %v5437_v60 }
 0x552   :  { %v5653_v39 = vadd.f32 %v5561_v3, %v5438_v47 }
 0x554   :  { %v5762_v40 = vpop.permute.xlu0 %5761 }
 0x555   :  { %v5764_v49 = vpop.permute.xlu1 %5763  ;;  %v5861_v32 = vadd.f32 %v5762_v40, %v5646_v15 }
 0x556   :  { %v5862_v25 = vadd.f32 %v5764_v49, %v5647_v45 }
 0x557   :  { %v5904_v28 = vadd.f32 %v11028_v58, %v5861_v32 }
 0x558   :  { %v5905_v46 = vadd.f32 %v11028_v58, %v5862_v25  ;;  %v5766_v8 = vpop.permute.xlu0 %5765 }
 0x559   :  { %v5940_v16 = vmax.f32 %v5904_v28, 0.0  ;;  %v5768_v17 = vpop.permute.xlu1 %5767  ;;  %v5863_v20 = vadd.f32 %v5766_v8, %v5648_v51 }
 0x55a   :  { %v5941_v44 = vmax.f32 %v5905_v46, 0.0  ;;  %v5864_v37 = vadd.f32 %v5768_v17, %v5649_v10 }
 0x55b   :  { %5976 = vst.msk [vmem:[#allocation3 + $0x40] sm:$0xff] %vm4402_vm3, %v5940_v16  ;;  %v5906_v27 = vadd.f32 %v11028_v58, %v5863_v20 }
 0x55c   :  { %5977 = vst.msk [vmem:[#allocation3 + $0x48] sm:$0xff] %vm4402_vm3, %v5941_v44  ;;  %v5907_v56 = vadd.f32 %v11028_v58, %v5864_v37  ;;  %v5770_v42 = vpop.permute.xlu0 %5769 }
 0x55d   :  { %v5942_v53 = vmax.f32 %v5906_v27, 0.0  ;;  %v5772_v0 = vpop.permute.xlu1 %5771  ;;  %v5865_v15 = vadd.f32 %v5770_v42, %v5650_v59 }
 0x55e   :  { %v5943_v12 = vmax.f32 %v5907_v56, 0.0  ;;  %v5866_v45 = vadd.f32 %v5772_v0, %v5651_v33 }
 0x55f   :  { %5978 = vst.msk [vmem:[#allocation3 + $0x50] sm:$0xff] %vm4402_vm3, %v5942_v53  ;;  %v5908_v40 = vadd.f32 %v11028_v58, %v5865_v15 }
 0x560   :  { %5979 = vst.msk [vmem:[#allocation3 + $0x58] sm:$0xff] %vm4402_vm3, %v5943_v12  ;;  %v5909_v61 = vadd.f32 %v11028_v58, %v5866_v45  ;;  %v5774_v19 = vpop.permute.xlu0 %5773 }
 0x561   :  { %v5944_v49 = vmax.f32 %v5908_v40, 0.0  ;;  %v5776_v14 = vpop.permute.xlu1 %5775  ;;  %v5867_v63 = vadd.f32 %v5774_v19, %v5652_v9 }
 0x562   :  { %v5945_v32 = vmax.f32 %v5909_v61, 0.0  ;;  %v5868_v11 = vadd.f32 %v5776_v14, %v5653_v39 }
 0x563   :  { %5980 = vst.msk [vmem:[#allocation3 + $0x60] sm:$0xff] %vm4402_vm3, %v5944_v49  ;;  %v5910_v62 = vadd.f32 %v11028_v58, %v5867_v63 }
 0x564   :  { %5981 = vst.msk [vmem:[#allocation3 + $0x68] sm:$0xff] %vm4402_vm3, %v5945_v32  ;;  %v5911_v48 = vadd.f32 %v11028_v58, %v5868_v11  ;;  %v5348_v55 = vpop.permute.xlu0 %5347 }
 0x565   :  { %v5946_v3 = vmax.f32 %v5910_v62, 0.0  ;;  %v11154_v49 = vpop.permute.xlu1 %5349 }
 0x566   :  { %v5947_v41 = vmax.f32 %v5911_v48, 0.0  ;;  %v5439_v48 = vadd.f32 %v5348_v55, %v10670_v4 }
 0x567   :  { %5982 = vst.msk [vmem:[#allocation3 + $0x70] sm:$0xff] %vm4402_vm3, %v5946_v3  ;;  %v6009_v51 = vld [vmem:[#allocation3 + $0x40] ss:$4 sm:$0xff]  ;;  %v6027_v10 = vld [vmem:[#allocation3 + $0x41] ss:$4 sm:$0xff] }
 0x568   :  { %5983 = vst.msk [vmem:[#allocation3 + $0x78] sm:$0xff] %vm4402_vm3, %v5947_v41  ;;  %v5352_v25 = vpop.permute.xlu0 %5351  ;;  %v6054_v46 = vld [vmem:[#allocation3 + $0x42] ss:$4 sm:$0xff]  ;;  %v6072_v8 = vld [vmem:[#allocation3 + $0x43] ss:$4 sm:$0xff]  ;;  %v6042_v16 = vmax.f32 %v6009_v51, %v6027_v10 }
 0x569   :  { %v6087_v20 = vmax.f32 %v6054_v46, %v6072_v8  ;;  %v5354_v55 = vpop.permute.xlu1 %5353  ;;  %v5441_v46 = vadd.f32 %v10659_v38, %v5352_v25 }
 0x56b   :  { %v6096_v27 = vmax.f32 %v6042_v16, %v6087_v20  ;;  %v5512_v16 = vrot.slane %v10971_v22, 2 }
 0x56c   :  { %v5356_v28 = vpop.permute.xlu0 %5355 }
 0x56d   :  { %v5358_v25 = vpop.permute.xlu1 %5357 }
 0x56f   :  { %v6011_v36 = vld [vmem:[#allocation3 + $0x60] ss:$4 sm:$0xff]  ;;  %v6029_v7 = vld [vmem:[#allocation3 + $0x61] ss:$4 sm:$0xff]  ;;  %v6056_v17 = vld [vmem:[#allocation3 + $0x62] ss:$4 sm:$0xff] }
 0x570   :  { %v5360_v30 = vpop.permute.xlu0 %5359  ;;  %v6043_v44 = vmax.f32 %v6011_v36, %v6029_v7  ;;  %v6074_v37 = vld [vmem:[#allocation3 + $0x63] ss:$4 sm:$0xff] }
 0x571   :  { %v6088_v59 = vmax.f32 %v6056_v17, %v6074_v37  ;;  %v5509_v17 = vsel %vm2379_vm0, %v5506_v43, %v5508_v18  ;;  %v5445_v43 = vadd.f32 %v10769_v6, %v5360_v30 }
 0x573   :  { %v6097_v33 = vmax.f32 %v6043_v44, %v6088_v59  ;;  %v5443_v44 = vadd.f32 %v5356_v28, %v10791_v23 }
 0x574   :  { %v5563_v56 = vpop.permute.xlu0 %5562 }
 0x575   :  { %v6104_v42 = vpack.c.bf16 %v6097_v33, %v6096_v27  ;;  %v5654_v51 = vadd.f32 %v5563_v56, %v5439_v48  ;;  %v5513_v33 = vsel %vm2379_vm0, %v5510_v29, %v5512_v16  ;;  %v5724_v48 = vsel %vm3243_vm2, %v5721_v35, %v5723_v1 }
 0x577   :  { %v11135_v60 = vpop.f32.mrf.mxu1  ;;  %6925 = vmatmul.mubr.msk.bf16.gmra.mxu1 %vm4402_vm3, %v6104_v42 }
 0x578   :  { %v5567_v53 = vpop.permute.xlu0 %5566  ;;  %6199 = vmatprep.mubr.bf16.mxu1 %v7654_v50  ;;  %v5303_v40 = vrot.slane %v11135_v60, 1  ;;  %v5518_v14 = vrot.slane %v11135_v60, 2  ;;  %v5733_v63 = vrot.slane %v11135_v60, 3 }
 0x579   :  { %v11139_v0 = vpop.f32.mrf.mxu1  ;;  %v5656_v36 = vadd.f32 %v5567_v53, %v5441_v46  ;;  %v5440_v46 = vadd.f32 %v11154_v49, %v10760_v24 }
 0x57a   :  { %v5299_v15 = vrot.slane %v11139_v0, 1  ;;  %v5514_v56 = vrot.slane %v11139_v0, 2 }
 0x57b   :  { %v11142_v47 = vpop.f32.mrf.mxu1 }
 0x57c   :  { %v5300_v12 = vsel %vm1515_vm1, %v5297_v52, %v5299_v15  ;;  %v5571_v45 = vpop.permute.xlu0 %5570  ;;  %v5305_v52 = vrot.slane %v11142_v47, 1 }
 0x57d   :  { %5369 = vrot.lane.b32.xlu1 %v5300_v12, %s7652_s7  ;;  %v11148_v9 = vpop.f32.mrf.mxu1  ;;  %v5658_v59 = vadd.f32 %v5571_v45, %v5443_v44  ;;  %v5520_v12 = vrot.slane %v11142_v47, 2 }
 0x57e   :  { %v5301_v39 = vrot.slane %v11148_v9, 1  ;;  %v5516_v61 = vrot.slane %v11148_v9, 2  ;;  %v5731_v19 = vrot.slane %v11148_v9, 3  ;;  %v5306_v10 = vsel %vm1515_vm1, %v5303_v40, %v5305_v52 }
 0x580   :  { %v5304_v32 = vsel %vm1515_vm1, %v5301_v39, %v5303_v40  ;;  %v5302_v11 = vsel %vm1515_vm1, %v5299_v15, %v5301_v39  ;;  %v5575_v62 = vpop.permute.xlu0 %5574  ;;  %v11165_v3 = vsel %vm2379_vm0, %v5516_v61, %v5518_v14  ;;  %v11172_v41 = vsel %vm3243_vm2, %v5731_v19, %v5733_v63 }
 0x581   :  { %5373 = vrot.lane.b32.xlu1 %v5304_v32, %s7652_s7  ;;  %5371 = vrot.lane.b32.xlu0 %v5302_v11, %s7652_s7  ;;  %v5660_v42 = vadd.f32 %v5575_v62, %v5445_v43  ;;  %v5517_v29 = vsel %vm2379_vm0, %v5514_v56, %v5516_v61  ;;  %v5521_v32 = vsel %vm2379_vm0, %v5518_v14, %v5520_v12  ;;  %v5727_v62 = vrot.slane %v10971_v22, 3 }
 0x583   :  { %v5728_v14 = vsel %vm3243_vm2, %v5725_v57, %v5727_v62 }
 0x584   :  { %v5778_v4 = vpop.permute.xlu0 %5777 }
 0x585   :  { %5375 = vrot.lane.b32.xlu0 %v5306_v10, %s7652_s7  ;;  %v5869_v8 = vadd.f32 %v5778_v4, %v5654_v51  ;;  %v5729_v10 = vrot.slane %v11139_v0, 3 }
 0x587   :  { %v5912_v7 = vadd.f32 %v11028_v58, %v5869_v8  ;;  %v5735_v8 = vrot.slane %v11142_v47, 3  ;;  %v5732_v1 = vsel %vm3243_vm2, %v5729_v10, %v5731_v19  ;;  %v5444_v19 = vadd.f32 %v5358_v25, %v10831_v34 }
 0x588   :  { %v5782_v20 = vpop.permute.xlu0 %5781 }
 0x589   :  { %v5948_v37 = vmax.f32 %v5912_v7, 0.0  ;;  %5578 = vrot.lane.b32.xlu0 %v5509_v17, %s7644_s22  ;;  %v5871_v38 = vadd.f32 %v5782_v20, %v5656_v36  ;;  %v5442_v36 = vadd.f32 %v10740_v13, %v5354_v55  ;;  %v5736_v24 = vsel %vm3243_vm2, %v5733_v63, %v5735_v8 }
 0x58b   :  { %5984 = vst.msk [vmem:[#allocation3 + $0x80] sm:$0xff] %vm4402_vm3, %v5948_v37  ;;  %v5914_v27 = vadd.f32 %v11028_v58, %v5871_v38 }
 0x58c   :  { %v5786_v18 = vpop.permute.xlu0 %5785 }
 0x58d   :  { %v5950_v23 = vmax.f32 %v5914_v27, 0.0  ;;  %5582 = vrot.lane.b32.xlu0 %v5513_v33, %s7644_s22  ;;  %v5873_v28 = vadd.f32 %v5786_v18, %v5658_v59 }
 0x58f   :  { %5986 = vst.msk [vmem:[#allocation3 + $0x90] sm:$0xff] %vm4402_vm3, %v5950_v23  ;;  %v5916_v53 = vadd.f32 %v11028_v58, %v5873_v28  ;;  %v5362_v15 = vpop.permute.xlu1 %5361 }
 0x590   :  { %v5790_v45 = vpop.permute.xlu0 %5789  ;;  %v5446_v59 = vadd.f32 %v10808_v54, %v5362_v15 }
 0x591   :  { %v5952_v6 = vmax.f32 %v5916_v53, 0.0  ;;  %5586 = vrot.lane.b32.xlu0 %v5517_v29, %s7644_s22  ;;  %v5875_v30 = vadd.f32 %v5790_v45, %v5660_v42 }
 0x593   :  { %5988 = vst.msk [vmem:[#allocation3 + $0xa0] sm:$0xff] %vm4402_vm3, %v5952_v6  ;;  %v5918_v40 = vadd.f32 %v11028_v58, %v5875_v30  ;;  %v5565_v39 = vpop.permute.xlu1 %5564 }
 0x594   :  { %v5655_v35 = vadd.f32 %v5565_v39, %v5440_v46 }
 0x595   :  { %v5954_v11 = vmax.f32 %v5918_v40, 0.0  ;;  %5590 = vrot.lane.b32.xlu0 %v5521_v32, %s7644_s22 }
 0x597   :  { %5990 = vst.msk [vmem:[#allocation3 + $0xb0] sm:$0xff] %vm4402_vm3, %v5954_v11  ;;  %v5569_v61 = vpop.permute.xlu1 %5568 }
 0x598   :  { %v5657_v49 = vadd.f32 %v5569_v61, %v5442_v36 }
 0x599   :  { %5793 = vrot.lane.b32.xlu0 %v5724_v48, %s7653_s9 }
 0x59b   :  { %v5573_v51 = vpop.permute.xlu1 %5572 }
 0x59c   :  { %v5659_v38 = vadd.f32 %v5573_v51, %v5444_v19 }
 0x59d   :  { %5797 = vrot.lane.b32.xlu0 %v5728_v14, %s7653_s9 }
 0x59f   :  { %v5577_v4 = vpop.permute.xlu1 %5576 }
 0x5a0   :  { %v5661_v33 = vadd.f32 %v5577_v4, %v5446_v59 }
 0x5a1   :  { %5801 = vrot.lane.b32.xlu0 %v5732_v1, %s7653_s9 }
 0x5a3   :  { %v5780_v57 = vpop.permute.xlu1 %5779 }
 0x5a4   :  { %v5870_v7 = vadd.f32 %v5780_v57, %v5655_v35 }
 0x5a5   :  { %5805 = vrot.lane.b32.xlu0 %v5736_v24, %s7653_s9 }
 0x5a6   :  { %v5913_v17 = vadd.f32 %v11028_v58, %v5870_v7 }
 0x5a7   :  { %v5784_v20 = vpop.permute.xlu1 %5783 }
 0x5a8   :  { %v5949_v44 = vmax.f32 %v5913_v17, 0.0  ;;  %v5872_v37 = vadd.f32 %v5784_v20, %v5657_v49 }
 0x5aa   :  { %5985 = vst.msk [vmem:[#allocation3 + $0x88] sm:$0xff] %vm4402_vm3, %v5949_v44  ;;  %v5915_v13 = vadd.f32 %v11028_v58, %v5872_v37  ;;  %v5364_v37 = vpop.permute.xlu0 %5363 }
 0x5ab   :  { %v5788_v55 = vpop.permute.xlu1 %5787 }
 0x5ac   :  { %v5951_v27 = vmax.f32 %v5915_v13, 0.0  ;;  %v5874_v63 = vadd.f32 %v5788_v55, %v5659_v38 }
 0x5ae   :  { %5987 = vst.msk [vmem:[#allocation3 + $0x98] sm:$0xff] %vm4402_vm3, %v5951_v27  ;;  %v5917_v18 = vadd.f32 %v11028_v58, %v5874_v63  ;;  %v5368_v59 = vpop.permute.xlu0 %5367 }
 0x5af   :  { %v5792_v43 = vpop.permute.xlu1 %5791 }
 0x5b0   :  { %v5953_v23 = vmax.f32 %v5917_v18, 0.0  ;;  %v5876_v34 = vadd.f32 %v5792_v43, %v5661_v33  ;;  %v5730_v33 = vsel %vm3243_vm2, %v5727_v62, %v5729_v10 }
 0x5b2   :  { %5989 = vst.msk [vmem:[#allocation3 + $0xa8] sm:$0xff] %vm4402_vm3, %v5953_v23  ;;  %v5919_v25 = vadd.f32 %v11028_v58, %v5876_v34 }
 0x5b4   :  { %v5955_v28 = vmax.f32 %v5919_v25, 0.0 }
 0x5b5   :  { %v6013_v42 = vld [vmem:[#allocation3 + $0x80] ss:$4 sm:$0xff]  ;;  %v6031_v53 = vld [vmem:[#allocation3 + $0x81] ss:$4 sm:$0xff]  ;;  %v6058_v54 = vld [vmem:[#allocation3 + $0x82] ss:$4 sm:$0xff] }
 0x5b6   :  { %5991 = vst.msk [vmem:[#allocation3 + $0xb8] sm:$0xff] %vm4402_vm3, %v5955_v28  ;;  %v6076_v15 = vld [vmem:[#allocation3 + $0x83] ss:$4 sm:$0xff]  ;;  %v6044_v6 = vmax.f32 %v6013_v42, %v6031_v53 }
 0x5b7   :  { %v6089_v40 = vmax.f32 %v6058_v54, %v6076_v15  ;;  %v5449_v54 = vadd.f32 %v10956_v31, %v5368_v59 }
 0x5b9   :  { %v6098_v61 = vmax.f32 %v6044_v6, %v6089_v40 }
 0x5bd   :  { %v6015_v29 = vld [vmem:[#allocation3 + $0xa0] ss:$4 sm:$0xff]  ;;  %v6033_v45 = vld [vmem:[#allocation3 + $0xa1] ss:$4 sm:$0xff]  ;;  %v6060_v30 = vld [vmem:[#allocation3 + $0xa2] ss:$4 sm:$0xff] }
 0x5be   :  { %v6045_v39 = vmax.f32 %v6015_v29, %v6033_v45  ;;  %v6078_v32 = vld [vmem:[#allocation3 + $0xa3] ss:$4 sm:$0xff] }
 0x5bf   :  { %v6090_v11 = vmax.f32 %v6060_v30, %v6078_v32 }
 0x5c1   :  { %v6099_v48 = vmax.f32 %v6045_v39, %v6090_v11 }
 0x5c3   :  { %v6105_v51 = vpack.c.bf16 %v6099_v48, %v6098_v61 }
 0x5c5   :  { %6926 = vmatmul.mubr.msk.bf16.gmra.mxu1 %vm4402_vm3, %v6105_v51 }
 0x5c6   :  { %6209 = vmatprep.mubr.bf16.mxu1 %v7654_v50 }
 0x5d7   :  { %v11254_v14 = vpop.f32.mrf.mxu1 }
 0x5d8   :  { %v5311_v49 = vrot.slane %v11254_v14, 1 }
 0x5d9   :  { %v11256_v4 = vpop.f32.mrf.mxu1 }
 0x5da   :  { %v5307_v46 = vrot.slane %v11256_v4, 1  ;;  %v5737_v55 = vrot.slane %v11256_v4, 3 }
 0x5db   :  { %v11259_v1 = vpop.f32.mrf.mxu1 }
 0x5dc   :  { %v5308_v35 = vsel %vm1515_vm1, %v5305_v52, %v5307_v46  ;;  %v5313_v7 = vrot.slane %v11259_v1, 1  ;;  %v5515_v52 = vsel %vm2379_vm0, %v5512_v16, %v5514_v56  ;;  %v5528_v19 = vrot.slane %v11259_v1, 2 }
 0x5dd   :  { %5377 = vrot.lane.b32.xlu1 %v5308_v35, %s7652_s7  ;;  %v11265_v57 = vpop.f32.mrf.mxu1  ;;  %v5526_v16 = vrot.slane %v11254_v14, 2  ;;  %v5738_v23 = vsel %vm3243_vm2, %v5735_v8, %v5737_v55 }
 0x5de   :  { %v5309_v36 = vrot.slane %v11265_v57, 1  ;;  %v5524_v17 = vrot.slane %v11265_v57, 2  ;;  %v5314_v20 = vsel %vm1515_vm1, %v5311_v49, %v5313_v7  ;;  %v5739_v56 = vrot.slane %v11265_v57, 3 }
 0x5df   :  { %v5529_v13 = vsel %vm2379_vm0, %v5526_v16, %v5528_v19 }
 0x5e0   :  { %v5310_v24 = vsel %vm1515_vm1, %v5307_v46, %v5309_v36  ;;  %v5740_v27 = vsel %vm3243_vm2, %v5737_v55, %v5739_v56  ;;  %v5312_v62 = vsel %vm1515_vm1, %v5309_v36, %v5311_v49  ;;  %v5527_v42 = vsel %vm2379_vm0, %v5524_v17, %v5526_v16 }
 0x5e1   :  { %5580 = vrot.lane.b32.xlu1 %v11007_v26, %s7644_s22  ;;  %5379 = vrot.lane.b32.xlu0 %v5310_v24, %s7652_s7  ;;  %v5522_v26 = vrot.slane %v11256_v4, 2 }
 0x5e3   :  { %v5525_v44 = vsel %vm2379_vm0, %v5522_v26, %v5524_v17  ;;  %v5523_v38 = vsel %vm2379_vm0, %v5520_v12, %v5522_v26  ;;  %v5741_v12 = vrot.slane %v11254_v14, 3 }
 0x5e5   :  { %5584 = vrot.lane.b32.xlu1 %v5515_v52, %s7644_s22  ;;  %5383 = vrot.lane.b32.xlu0 %v5314_v20, %s7652_s7  ;;  %v5742_v48 = vsel %vm3243_vm2, %v5739_v56, %v5741_v12 }
 0x5e9   :  { %5588 = vrot.lane.b32.xlu1 %v11165_v3, %s7644_s22  ;;  %5594 = vrot.lane.b32.xlu0 %v5525_v44, %s7644_s22  ;;  %v5743_v3 = vrot.slane %v11259_v1, 3 }
 0x5eb   :  { %v5744_v18 = vsel %vm3243_vm2, %v5741_v12, %v5743_v3 }
 0x5ed   :  { %5592 = vrot.lane.b32.xlu1 %v5523_v38, %s7644_s22  ;;  %5598 = vrot.lane.b32.xlu0 %v5529_v13, %s7644_s22 }
 0x5f1   :  { %5795 = vrot.lane.b32.xlu1 %v11014_v21, %s7653_s9  ;;  %5809 = vrot.lane.b32.xlu0 %v5740_v27, %s7653_s9 }
 0x5f3   :  { %v5372_v63 = vpop.permute.xlu0 %5371 }
 0x5f4   :  { %v5451_v51 = vadd.f32 %v5372_v63, %v11139_v0 }
 0x5f5   :  { %5799 = vrot.lane.b32.xlu1 %v5730_v33, %s7653_s9  ;;  %5813 = vrot.lane.b32.xlu0 %v5744_v18, %s7653_s9  ;;  %v5366_v33 = vpop.permute.xlu1 %5365 }
 0x5f7   :  { %v5376_v43 = vpop.permute.xlu0 %5375 }
 0x5f8   :  { %v5453_v17 = vadd.f32 %v11135_v60, %v5376_v43 }
 0x5f9   :  { %5803 = vrot.lane.b32.xlu1 %v11172_v41, %s7653_s9  ;;  %v5447_v41 = vadd.f32 %v5364_v37, %v10961_v5  ;;  %v5370_v18 = vpop.permute.xlu1 %5369 }
 0x5fb   :  { %v5579_v21 = vpop.permute.xlu0 %5578 }
 0x5fc   :  { %v5662_v53 = vadd.f32 %v5579_v21, %v5447_v41 }
 0x5fd   :  { %5807 = vrot.lane.b32.xlu1 %v5738_v23, %s7653_s9  ;;  %v5374_v43 = vpop.permute.xlu1 %5373 }
 0x5ff   :  { %v5583_v34 = vpop.permute.xlu0 %5582 }
 0x600   :  { %v5664_v40 = vadd.f32 %v5583_v34, %v5449_v54 }
 0x601   :  { %5381 = vrot.lane.b32.xlu1 %v5312_v62, %s7652_s7 }
 0x603   :  { %v5587_v10 = vpop.permute.xlu0 %5586 }
 0x605   :  { %5385 = vrot.lane.b32.xlu1 %v5313_v7, %s7652_s7  ;;  %v5666_v7 = vadd.f32 %v5587_v10, %v5451_v51 }
 0x607   :  { %v11321_v25 = vpop.f32.mrf.mxu1  ;;  %v5591_v28 = vpop.permute.xlu0 %5590 }
 0x608   :  { %v6237_v45 = vrot.slane %v11321_v25, 1  ;;  %v5668_v0 = vadd.f32 %v5591_v28, %v5453_v17 }
 0x609   :  { %5596 = vrot.lane.b32.xlu1 %v5527_v42, %s7644_s22  ;;  %v6183_v8 = vpop.f32.mrf.mxu1 }
 0x60a   :  { %v6299_v39 = vrot.slane %v6183_v8, 2 }
 0x60b   :  { %v11327_v15 = vpop.f32.mrf.mxu1  ;;  %v5794_v29 = vpop.permute.xlu0 %5793 }
 0x60c   :  { %v6238_v6 = vrot.slane %v11327_v15, 1  ;;  %v5877_v30 = vadd.f32 %v5794_v29, %v5662_v53  ;;  %v5448_v53 = vadd.f32 %v5366_v33, %v10976_v2  ;;  %v5452_v2 = vadd.f32 %v5374_v43, %v11148_v9 }
 0x60d   :  { %5600 = vrot.lane.b32.xlu1 %v5528_v19, %s7644_s22  ;;  %v6187_v5 = vpop.f32.mrf.mxu1 }
 0x60e   :  { %v5920_v32 = vadd.f32 %v11028_v58, %v5877_v30  ;;  %v6300_v11 = vrot.slane %v6187_v5, 2  ;;  %v6239_v61 = vsel %vm1515_vm1, %v6237_v45, %v6238_v6 }
 0x60f   :  { %6254 = vrot.lane.b32.xlu0 %v6239_v61, %s7644_s22  ;;  %v5798_v31 = vpop.permute.xlu0 %5797 }
 0x610   :  { %v5956_v46 = vmax.f32 %v5920_v32, 0.0  ;;  %v5879_v35 = vadd.f32 %v5798_v31, %v5664_v40  ;;  %v11338_v36 = vsel %vm2379_vm0, %v6299_v39, %v6300_v11  ;;  %v5450_v40 = vadd.f32 %v10971_v22, %v5370_v18 }
 0x611   :  { %5811 = vrot.lane.b32.xlu1 %v5742_v48, %s7653_s9 }
 0x612   :  { %5992 = vst.msk [vmem:[#allocation3 + $0xc0] sm:$0xff] %vm4402_vm3, %v5956_v46  ;;  %v5922_v24 = vadd.f32 %v11028_v58, %v5879_v35 }
 0x613   :  { %v5802_v49 = vpop.permute.xlu0 %5801 }
 0x614   :  { %v5958_v52 = vmax.f32 %v5922_v24, 0.0  ;;  %v5881_v20 = vadd.f32 %v5802_v49, %v5666_v7 }
 0x615   :  { %5815 = vrot.lane.b32.xlu1 %v5743_v3, %s7653_s9 }
 0x616   :  { %5994 = vst.msk [vmem:[#allocation3 + $0xd0] sm:$0xff] %vm4402_vm3, %v5958_v52  ;;  %v5924_v26 = vadd.f32 %v11028_v58, %v5881_v20 }
 0x617   :  { %v5806_v19 = vpop.permute.xlu0 %5805 }
 0x618   :  { %v5960_v44 = vmax.f32 %v5924_v26, 0.0  ;;  %v5883_v37 = vadd.f32 %v5806_v19, %v5668_v0 }
 0x61a   :  { %5996 = vst.msk [vmem:[#allocation3 + $0xe0] sm:$0xff] %vm4402_vm3, %v5960_v44  ;;  %v5926_v16 = vadd.f32 %v11028_v58, %v5883_v37 }
 0x61c   :  { %v5962_v56 = vmax.f32 %v5926_v16, 0.0 }
 0x61e   :  { %5998 = vst.msk [vmem:[#allocation3 + $0xf0] sm:$0xff] %vm4402_vm3, %v5962_v56 }
 0x637   :  { %v11350_v60 = vpop.f32.mrf.mxu1 }
 0x638   :  { %v6240_v38 = vrot.slane %v11350_v60, 1 }
 0x639   :  { %v11353_v13 = vpop.f32.mrf.mxu1 }
 0x63a   :  { %v6302_v55 = vrot.slane %v11353_v13, 2  ;;  %v6241_v59 = vsel %vm1515_vm1, %v6238_v6, %v6240_v38 }
 0x63b   :  { %6256 = vrot.lane.b32.xlu1 %v6241_v59, %s7644_s22  ;;  %v11358_v3 = vpop.f32.mrf.mxu1 }
 0x63c   :  { %v6242_v27 = vrot.slane %v11358_v3, 1  ;;  %v11364_v12 = vsel %vm2379_vm0, %v6300_v11, %v6302_v55 }
 0x63e   :  { %v6243_v63 = vsel %vm1515_vm1, %v6240_v38, %v6242_v27 }
 0x63f   :  { %6258 = vrot.lane.b32.xlu0 %v6243_v63, %s7644_s22 }
 0x64f   :  { %v5378_v21 = vpop.permute.xlu1 %5377 }
 0x650   :  { %v5454_v52 = vadd.f32 %v11142_v47, %v5378_v21 }
 0x653   :  { %v5581_v23 = vpop.permute.xlu1 %5580  ;;  %v5380_v34 = vpop.permute.xlu0 %5379 }
 0x654   :  { %v5455_v54 = vadd.f32 %v5380_v34, %v11256_v4  ;;  %v5663_v29 = vadd.f32 %v5581_v23, %v5448_v53 }
 0x657   :  { %v5585_v62 = vpop.permute.xlu1 %5584  ;;  %v5384_v10 = vpop.permute.xlu0 %5383 }
 0x658   :  { %v5457_v5 = vadd.f32 %v11254_v14, %v5384_v10  ;;  %v5665_v11 = vadd.f32 %v5585_v62, %v5450_v40 }
 0x65b   :  { %v5589_v28 = vpop.permute.xlu1 %5588  ;;  %v5595_v41 = vpop.permute.xlu0 %5594 }
 0x65c   :  { %v5670_v45 = vadd.f32 %v5595_v41, %v5455_v54  ;;  %v5667_v49 = vadd.f32 %v5589_v28, %v5452_v2 }
 0x65f   :  { %v5593_v42 = vpop.permute.xlu1 %5592  ;;  %v5599_v8 = vpop.permute.xlu0 %5598 }
 0x660   :  { %v5672_v61 = vadd.f32 %v5599_v8, %v5457_v5  ;;  %v5669_v26 = vadd.f32 %v5593_v42, %v5454_v52  ;;  %v11390_v5 = vpop.f32.mrf.mxu1 }
 0x663   :  { %v5796_v6 = vpop.permute.xlu1 %5795  ;;  %v5810_v30 = vpop.permute.xlu0 %5809 }
 0x664   :  { %v5878_v39 = vadd.f32 %v5796_v6, %v5663_v29  ;;  %v5885_v32 = vadd.f32 %v5810_v30, %v5670_v45 }
 0x666   :  { %v5921_v31 = vadd.f32 %v11028_v58, %v5878_v39  ;;  %v5928_v48 = vadd.f32 %v11028_v58, %v5885_v32  ;;  %v11395_v39 = vld [vmem:[%s11504_s6] ss:$0 sm:$0xff] }
 0x667   :  { %v5800_v51 = vpop.permute.xlu1 %5799  ;;  %v5814_v4 = vpop.permute.xlu0 %5813 }
 0x668   :  { %v5957_v46 = vmax.f32 %v5921_v31, 0.0  ;;  %v5964_v35 = vmax.f32 %v5928_v48, 0.0  ;;  %v5880_v7 = vadd.f32 %v5800_v51, %v5665_v11  ;;  %v5887_v24 = vadd.f32 %v5814_v4, %v5672_v61 }
 0x66a   :  { %5993 = vst.msk [vmem:[#allocation3 + $0xc8] sm:$0xff] %vm4402_vm3, %v5957_v46  ;;  %6000 = vst.msk [vmem:[#allocation3 + $0x100] sm:$0xff] %vm4402_vm3, %v5964_v35  ;;  %v5923_v22 = vadd.f32 %v11028_v58, %v5880_v7  ;;  %v5930_v14 = vadd.f32 %v11028_v58, %v5887_v24 }
 0x66b   :  { %v5804_v17 = vpop.permute.xlu1 %5803 }
 0x66c   :  { %v5959_v20 = vmax.f32 %v5923_v22, 0.0  ;;  %v5966_v9 = vmax.f32 %v5930_v14, 0.0  ;;  %v5882_v0 = vadd.f32 %v5804_v17, %v5667_v49 }
 0x66e   :  { %5995 = vst.msk [vmem:[#allocation3 + $0xd8] sm:$0xff] %vm4402_vm3, %v5959_v20  ;;  %6002 = vst.msk [vmem:[#allocation3 + $0x110] sm:$0xff] %vm4402_vm3, %v5966_v9  ;;  %v5925_v19 = vadd.f32 %v11028_v58, %v5882_v0 }
 0x66f   :  { %v5808_v44 = vpop.permute.xlu1 %5807 }
 0x670   :  { %v5961_v37 = vmax.f32 %v5925_v19, 0.0  ;;  %v5884_v16 = vadd.f32 %v5808_v44, %v5669_v26 }
 0x672   :  { %5997 = vst.msk [vmem:[#allocation3 + $0xe8] sm:$0xff] %vm4402_vm3, %v5961_v37  ;;  %v5927_v56 = vadd.f32 %v11028_v58, %v5884_v16 }
 0x673   :  { %v5382_v38 = vpop.permute.xlu1 %5381 }
 0x674   :  { %v5963_v59 = vmax.f32 %v5927_v56, 0.0  ;;  %v5456_v54 = vadd.f32 %v5382_v38, %v11265_v57  ;;  %v6304_v56 = vrot.slane %v11390_v5, 2 }
 0x675   :  { %v6017_v63 = vld [vmem:[#allocation3 + $0xc0] ss:$4 sm:$0xff]  ;;  %v6035_v33 = vld [vmem:[#allocation3 + $0xc1] ss:$4 sm:$0xff]  ;;  %v6062_v18 = vld [vmem:[#allocation3 + $0xc2] ss:$4 sm:$0xff] }
 0x676   :  { %5999 = vst.msk [vmem:[#allocation3 + $0xf8] sm:$0xff] %vm4402_vm3, %v5963_v59  ;;  %v6080_v43 = vld [vmem:[#allocation3 + $0xc3] ss:$4 sm:$0xff]  ;;  %v6046_v62 = vmax.f32 %v6017_v63, %v6035_v33  ;;  %v6305_v33 = vsel %vm2379_vm0, %v6302_v55, %v6304_v56 }
 0x677   :  { %v5386_v47 = vpop.permute.xlu1 %5385  ;;  %v6091_v28 = vmax.f32 %v6062_v18, %v6080_v43 }
 0x678   :  { %v5458_v61 = vadd.f32 %v11259_v1, %v5386_v47 }
 0x679   :  { %v6100_v45 = vmax.f32 %v6046_v62, %v6091_v28 }
 0x67b   :  { %v5597_v21 = vpop.permute.xlu1 %5596 }
 0x67c   :  { %v5671_v30 = vadd.f32 %v5597_v21, %v5456_v54 }
 0x67d   :  { %v6019_v23 = vld [vmem:[#allocation3 + $0xe0] ss:$4 sm:$0xff]  ;;  %v6037_v34 = vld [vmem:[#allocation3 + $0xe1] ss:$4 sm:$0xff]  ;;  %v6064_v10 = vld [vmem:[#allocation3 + $0xe2] ss:$4 sm:$0xff] }
 0x67e   :  { %v6047_v41 = vmax.f32 %v6019_v23, %v6037_v34  ;;  %v6082_v42 = vld [vmem:[#allocation3 + $0xe3] ss:$4 sm:$0xff] }
 0x67f   :  { %v5601_v8 = vpop.permute.xlu1 %5600  ;;  %v6092_v53 = vmax.f32 %v6064_v10, %v6082_v42 }
 0x680   :  { %v5673_v2 = vadd.f32 %v5601_v8, %v5458_v61  ;;  %v7463_v61 = vld [vmem:[#allocation13 + $0x30] sm:$0xff]  }
 0x681   :  { %v6255_v29 = vpop.permute.xlu0 %6254  ;;  %v6101_v6 = vmax.f32 %v6047_v41, %v6092_v53 }
 0x682   :  { %v6281_v40 = vadd.f32 %v6255_v29, %v11321_v25 }
 0x683   :  { %v5812_v32 = vpop.permute.xlu1 %5811  ;;  %v6106_v11 = vpack.c.bf16 %v6101_v6, %v6100_v45 }
 0x684   :  { %v6325_v31 = vadd.f32 %v11338_v36, %v6281_v40  ;;  %v5886_v57 = vadd.f32 %v5812_v32, %v5671_v30  ;;  %v7462_v40 = vld [vmem:[#allocation13 + $0x38] sm:$0xff]   ;;  %v7655_v32 = vmov 0.0  }
 0x685   :  { %v6201_v48 = vpop.f32.mrf.mxu1  ;;  %6927 = vmatmul.mubr.msk.bf16.gmra.mxu1 %vm4402_vm3, %v6106_v11  ;;  %7282 = vmatprep.subr.bf16.mxu1 %v7655_v32 }
 0x686   :  { %v6341_v25 = vadd.f32 %v11395_v39, %v6325_v31  ;;  %v5929_v51 = vadd.f32 %v11028_v58, %v5886_v57  ;;  %v6244_v4 = vrot.slane %v6201_v48, 1  ;;  %6219 = vmatprep.mubr.bf16.mxu1 %v7654_v50  ;;  %v7491_v50 = vld [vmem:[%s11502_s4] ss:$0 sm:$0xff]  ;;  %7283 = vmatpush3.bf16.msra.mxu1 %v7462_v40 }
 0x687   :  { %v6203_v46 = vpop.f32.mrf.mxu1  ;;  %v5816_v35 = vpop.permute.xlu1 %5815  ;;  %7284 = vmatprep.subr.bf16.mxu1 %v7655_v32 }
 0x688   :  { %v6350_v7 = vmax.f32 %v6341_v25, 0.0  ;;  %v5965_v24 = vmax.f32 %v5929_v51, 0.0  ;;  %v5888_v1 = vadd.f32 %v5816_v35, %v5673_v2  ;;  %v6245_v36 = vsel %vm1515_vm1, %v6242_v27, %v6244_v4  ;;  %v7464_v51 = vld [vmem:[#allocation13 + $0x28] sm:$0xff]   ;;  %v7465_v35 = vld [vmem:[#allocation13 + $0x20] sm:$0xff]  }
 0x689   :  { %v11406_v49 = vpop.f32.mrf.mxu1  ;;  %6260 = vrot.lane.b32.xlu1 %v6245_v36, %s7644_s22  ;;  %v6306_v23 = vrot.slane %v6203_v46, 2 }
 0x68a   :  { %6360 = vst.msk [vmem:[#allocation4] sm:$0xff] %vm6359_vm5, %v6350_v7  ;;  %v5931_v58 = vadd.f32 %v7491_v50, %v5888_v1  ;;  %v6246_v22 = vrot.slane %v11406_v49, 1  ;;  %7285 = vmatpush3.bf16.msra.mxu1 %v7463_v61 }
 0x68b   :  { %6001 = vst.msk [vmem:[#allocation3 + $0x108] sm:$0xff] %vm4402_vm3, %v5965_v24  ;;  %7286 = vmatprep.subr.bf16.mxu1 %v7655_v32 }
 0x68c   :  { %v5967_v14 = vmax.f32 %v5931_v58, 0.0  ;;  %v6247_v17 = vsel %vm1515_vm1, %v6244_v4, %v6246_v22 }
 0x68d   :  { %6262 = vrot.lane.b32.xlu0 %v6247_v17, %s7644_s22 }
 0x68e   :  { %6004 = vst.msk [vmem:[#allocation3 + $0x118] sm:$0xf] %vm6003_vm6, %v5967_v14  ;;  %7287 = vmatpush3.bf16.msra.mxu1 %v7464_v51  ;;  %v7480_v51 = vld [vmem:[#allocation14 + $0x8] sm:$0xff]  }
 0x68f   :  { %7288 = vmatprep.subr.bf16.mxu1 %v7655_v32 }
 0x692   :  { %7289 = vmatpush3.bf16.msra.mxu1 %v7465_v35 }
 0x693   :  { %7294 = vmatprep.subr.bf16.mxu1 %v7655_v32 }
 0x695   :  { %v6021_v27 = vld [vmem:[#allocation3 + $0x100] ss:$4 sm:$0x7f]  ;;  %v6039_v52 = vld [vmem:[#allocation3 + $0x101] ss:$4 sm:$0x7f] }
 0x696   :  { %v6048_v20 = vmax.f32 %v6021_v27, %v6039_v52  ;;  %v6066_v9 = vld [vmem:[#allocation3 + $0x102] ss:$4 sm:$0x7f]  ;;  %v6084_v0 = vld [vmem:[#allocation3 + $0x103] ss:$4 sm:$0x7f] }
 0x697   :  { %v6093_v26 = vmax.f32 %v6066_v9, %v6084_v0 }
 0x699   :  { %v6102_v19 = vmax.f32 %v6048_v20, %v6093_v26 }
 0x69b   :  { %v6107_v44 = vpack.c.bf16 %v6102_v19, %v6102_v19 }
 0x69d   :  { %6928 = vmatmul.mubr.msk.bf16.gmra.mxu1 %vm4402_vm3, %v6107_v44 }
 0x69e   :  { %7290 = vmatprep.mubr.msk.bf16.mxu1 %vm7656_vm7, %v7655_v32 }
 0x6ad   :  { %v6257_v37 = vpop.permute.xlu1 %6256 }
 0x6ae   :  { %v6282_v16 = vadd.f32 %v6257_v37, %v11327_v15 }
 0x6b0   :  { %v6326_v38 = vadd.f32 %v11364_v12, %v6282_v16  ;;  %v6207_v12 = vpop.f32.mrf.mxu1 }
 0x6b1   :  { %v6259_v59 = vpop.permute.xlu0 %6258  ;;  %v6308_v62 = vrot.slane %v6207_v12, 2 }
 0x6b2   :  { %v6342_v47 = vadd.f32 %v11395_v39, %v6326_v38  ;;  %v6283_v63 = vadd.f32 %v6259_v59, %v11350_v60  ;;  %v6307_v60 = vsel %vm2379_vm0, %v6304_v56, %v6306_v23 }
 0x6b3   :  { %v6309_v42 = vsel %vm2379_vm0, %v6306_v23, %v6308_v62 }
 0x6b4   :  { %v6351_v18 = vmax.f32 %v6342_v47, 0.0  ;;  %v6327_v43 = vadd.f32 %v6305_v33, %v6283_v63 }
 0x6b6   :  { %6361 = vst.msk [vmem:[#allocation4 + $0x8] sm:$0xff] %vm6359_vm5, %v6351_v18  ;;  %v6343_v21 = vadd.f32 %v11395_v39, %v6327_v43 }
 0x6b8   :  { %v6352_v15 = vmax.f32 %v6343_v21, 0.0 }
 0x6ba   :  { %6362 = vst.msk [vmem:[#allocation4 + $0x10] sm:$0xff] %vm6359_vm5, %v6352_v15 }
 0x6fb   :  { %v6261_v34 = vpop.permute.xlu1 %6260 }
 0x6fc   :  { %v6284_v10 = vadd.f32 %v6261_v34, %v11358_v3  ;;  %v7466_v34 = vld [vmem:[#allocation13 + $0x18] sm:$0xff]  }
 0x6fe   :  { %v6328_v13 = vadd.f32 %v6307_v60, %v6284_v10  ;;  %v7467_v10 = vld [vmem:[#allocation13 + $0x10] sm:$0xff]  }
 0x6ff   :  { %v6263_v28 = vpop.permute.xlu0 %6262 }
 0x700   :  { %v6285_v55 = vadd.f32 %v6263_v28, %v6201_v48  ;;  %v6344_v41 = vadd.f32 %v11395_v39, %v6328_v13  ;;  %v7468_v13 = vld [vmem:[#allocation13 + $0x8] sm:$0xff]  }
 0x702   :  { %v6329_v8 = vadd.f32 %v6309_v42, %v6285_v55  ;;  %v6353_v53 = vmax.f32 %v6344_v41, 0.0  ;;  %v7469_v55 = vld [vmem:[#allocation13] sm:$0xff]  }
 0x704   :  { %v6345_v54 = vadd.f32 %v11395_v39, %v6329_v8  ;;  %6363 = vst.msk [vmem:[#allocation4 + $0x18] sm:$0xff] %vm6359_vm5, %v6353_v53  ;;  %v7470_v8 = vld [vmem:[#allocation13 + $0x58] sm:$0xff]  }
 0x706   :  { %v6354_v29 = vmax.f32 %v6345_v54, 0.0  ;;  %v7471_v54 = vld [vmem:[#allocation13 + $0x50] sm:$0xff]  }
 0x708   :  { %6364 = vst.msk [vmem:[#allocation4 + $0x20] sm:$0xff] %vm6359_vm5, %v6354_v29  ;;  %v7472_v29 = vld [vmem:[#allocation13 + $0x48] sm:$0xff]  }
 0x745   :  { %v6211_v45 = vpop.f32.mrf.mxu1 }
 0x746   :  { %v6248_v3 = vrot.slane %v6211_v45, 1 }
 0x747   :  { %v6213_v6 = vpop.f32.mrf.mxu1 }
 0x748   :  { %v6249_v30 = vsel %vm1515_vm1, %v6246_v22, %v6248_v3  ;;  %v6310_v57 = vrot.slane %v6213_v6, 2 }
 0x749   :  { %6264 = vrot.lane.b32.xlu1 %v6249_v30, %s7644_s22  ;;  %v6215_v5 = vpop.f32.mrf.mxu1  ;;  %v7474_v30 = vld [vmem:[#allocation13 + $0x78] sm:$0xff]  }
 0x74a   :  { %v6250_v11 = vrot.slane %v6215_v5, 1  ;;  %v6311_v17 = vsel %vm2379_vm0, %v6308_v62, %v6310_v57 }
 0x74b   :  { %v6217_v31 = vpop.f32.mrf.mxu1 }
 0x74c   :  { %v6312_v48 = vrot.slane %v6217_v31, 2  ;;  %v6251_v2 = vsel %vm1515_vm1, %v6248_v3, %v6250_v11  ;;  %v7473_v3 = vld [vmem:[#allocation13 + $0x40] sm:$0xff]  }
 0x74d   :  { %6266 = vrot.lane.b32.xlu0 %v6251_v2, %s7644_s22  ;;  %v7477_v31 = vld [vmem:[#allocation13 + $0x60] sm:$0xff]   ;;  %v7478_v2 = vld [vmem:[#allocation14 + $0x18] sm:$0xff]  }
 0x74e   :  { %v6313_v25 = vsel %vm2379_vm0, %v6310_v57, %v6312_v48 }
 0x75d   :  { %v6221_v4 = vpop.f32.mrf.mxu1 }
 0x75e   :  { %v6252_v46 = vrot.slane %v6221_v4, 1 }
 0x75f   :  { %v6223_v7 = vpop.f32.mrf.mxu1 }
 0x760   :  { %v6314_v24 = vrot.slane %v6223_v7, 2  ;;  %6270 = vrot.lane.b32.xlu0 %v6252_v46, %s7644_s22  ;;  %v6253_v1 = vsel %vm1515_vm1, %v6250_v11, %v6252_v46  ;;  %v7476_v11 = vld [vmem:[#allocation13 + $0x68] sm:$0xff]  }
 0x761   :  { %6268 = vrot.lane.b32.xlu1 %v6253_v1, %s7644_s22  ;;  %v6225_v36 = vpop.f32.mrf.mxu1 }
 0x762   :  { %v6315_v50 = vsel %vm2379_vm0, %v6312_v48, %v6314_v24 }
 0x763   :  { %v6226_v58 = vpop.f32.mrf.mxu1 }
 0x7bb   :  { %v6265_v22 = vpop.permute.xlu1 %6264 }
 0x7bc   :  { %v6286_v14 = vadd.f32 %v6265_v22, %v11406_v49 }
 0x7be   :  { %v6330_v27 = vadd.f32 %v6311_v17, %v6286_v14 }
 0x7bf   :  { %v6267_v52 = vpop.permute.xlu0 %6266 }
 0x7c0   :  { %v6346_v20 = vadd.f32 %v11395_v39, %v6330_v27  ;;  %v6287_v9 = vadd.f32 %v6267_v52, %v6211_v45 }
 0x7c2   :  { %v6355_v0 = vmax.f32 %v6346_v20, 0.0  ;;  %v6331_v26 = vadd.f32 %v6313_v25, %v6287_v9  ;;  %v7479_v25 = vld [vmem:[#allocation14 + $0x10] sm:$0xff]  }
 0x7c4   :  { %6365 = vst.msk [vmem:[#allocation4 + $0x28] sm:$0xff] %vm6359_vm5, %v6355_v0  ;;  %v6347_v19 = vadd.f32 %v11395_v39, %v6331_v26 }
 0x7c6   :  { %v6356_v44 = vmax.f32 %v6347_v19, 0.0 }
 0x7c8   :  { %6366 = vst.msk [vmem:[#allocation4 + $0x30] sm:$0xff] %vm6359_vm5, %v6356_v44 }
 0x7d2   :  { %v6271_v37 = vpop.permute.xlu0 %6270 }
 0x7d3   :  { %v6289_v16 = vadd.f32 %v6271_v37, %v6221_v4  ;;  %v6269_v56 = vpop.permute.xlu1 %6268  ;;  %v7481_v4 = vld [vmem:[#allocation14] sm:$0xff]  }
 0x7d4   :  { %v6288_v49 = vadd.f32 %v6269_v56, %v6215_v5  ;;  %v7475_v5 = vld [vmem:[#allocation13 + $0x70] sm:$0xff]   ;;  %v6951_v56 = vld [vmem:[%s11508_s10] ss:$0 sm:$0xff] }
 0x7d5   :  { %v6333_v38 = vadd.f32 %v6314_v24, %v6289_v16 }
 0x7d6   :  { %v6332_v59 = vadd.f32 %v6315_v50, %v6288_v49 }
 0x7d7   :  { %v6349_v47 = vadd.f32 %v11395_v39, %v6333_v38 }
 0x7d8   :  { %v6348_v63 = vadd.f32 %v11395_v39, %v6332_v59 }
 0x7d9   :  { %v6358_v33 = vmax.f32 %v6349_v47, 0.0 }
 0x7da   :  { %v6357_v18 = vmax.f32 %v6348_v63, 0.0 }
 0x7db   :  { %6369 = vst.msk [vmem:[#allocation4 + $0x40] sm:$0x1f] %vm6368_vm8, %v6358_v33 }
 0x7dc   :  { %6367 = vst.msk [vmem:[#allocation4 + $0x38] sm:$0xff] %vm6359_vm5, %v6357_v18 }
 0x7e2   :  { %v6372_v60 = vld [vmem:[#allocation4 + $0x1] ss:$9 sm:$0xff] }
 0x7e3   :  { %v6376_v43 = vld [vmem:[#allocation4 + $0x3] ss:$9 sm:$0xff]  ;;  %v6380_v23 = vld [vmem:[#allocation4 + $0x5] ss:$9 sm:$0xff] }
 0x7e4   :  { %v6378_v21 = vld [vmem:[#allocation4 + $0x4] ss:$9 sm:$0xff]  ;;  %v6374_v41 = vld [vmem:[#allocation4 + $0x2] ss:$9 sm:$0xff] }
 0x7e5   :  { %v6384_v15 = vadd.f32 %v6378_v21, %v6376_v43  ;;  %v6370_v39 = vld [vmem:[#allocation4] ss:$9 sm:$0xff]  ;;  %v6390_v61 = vmax.f32 %v6376_v43, %v6378_v21 }
 0x7e6   :  { %v6381_v28 = vadd.f32 %v6372_v60, %v6370_v39  ;;  %v6387_v45 = vmax.f32 %v6370_v39, %v6372_v60 }
 0x7e7   :  { %v6385_v12 = vadd.f32 %v6384_v15, %v6380_v23  ;;  %v6391_v57 = vmax.f32 %v6390_v61, %v6380_v23 }
 0x7e8   :  { %v6382_v42 = vadd.f32 %v6381_v28, %v6374_v41  ;;  %v6388_v6 = vmax.f32 %v6387_v45, %v6374_v41 }
 0x7e9   :  { %v6386_v62 = vpack.c.bf16 %v6385_v12, %v6385_v12  ;;  %v6392_v48 = vpack.c.bf16 %v6391_v57, %v6391_v57 }
 0x7ea   :  { %v6383_v53 = vpack.c.bf16 %v6382_v42, %v6382_v42  ;;  %v6389_v40 = vpack.c.bf16 %v6388_v6, %v6388_v6 }
 0x7eb   :  { %7291 = vmatmul.mubr.msk.bf16.vlgmr.msra.gmra.mxu1 %vm6359_vm5, %v6386_v62 }
 0x7ec   :  { %7295 = vmatpush3.bf16.msra.mxu1 %v7466_v34  ;;  %7302 = vmatprep.mubr.msk.bf16.mxu1 %vm7656_vm7, %v7655_v32 }
 0x7ed   :  { %7296 = vmatprep.subr.bf16.mxu1 %v7655_v32 }
 0x7f0   :  { %7297 = vmatpush3.bf16.msra.mxu1 %v7467_v10 }
 0x7f1   :  { %7298 = vmatprep.subr.bf16.mxu1 %v7655_v32 }
 0x7f4   :  { %7299 = vmatpush3.bf16.msra.mxu1 %v7468_v13 }
 0x7f5   :  { %7300 = vmatprep.subr.bf16.mxu1 %v7655_v32 }
 0x7f8   :  { %7301 = vmatpush3.bf16.msra.mxu1 %v7469_v55 }
 0x7f9   :  { %7306 = vmatprep.subr.bf16.mxu1 %v7655_v32 }
 0x7fb   :  { %7303 = vmatmul.mubr.msk.bf16.vlgmr.msra.gmra.mxu1 %vm6359_vm5, %v6383_v53 }
 0x7fc   :  { %7307 = vmatpush3.bf16.msra.mxu1 %v7470_v8  ;;  %7314 = vmatprep.mubr.msk.bf16.mxu1 %vm7656_vm7, %v7655_v32 }
 0x7fd   :  { %7308 = vmatprep.subr.bf16.mxu1 %v7655_v32 }
 0x800   :  { %7309 = vmatpush3.bf16.msra.mxu1 %v7471_v54 }
 0x801   :  { %7310 = vmatprep.subr.bf16.mxu1 %v7655_v32 }
 0x804   :  { %7311 = vmatpush3.bf16.msra.mxu1 %v7472_v29 }
 0x805   :  { %7312 = vmatprep.subr.bf16.mxu1 %v7655_v32 }
 0x808   :  { %7313 = vmatpush3.bf16.msra.mxu1 %v7473_v3 }
 0x809   :  { %7318 = vmatprep.subr.bf16.mxu1 %v7655_v32 }
 0x80b   :  { %7315 = vmatmul.mubr.msk.bf16.vlgmr.msra.gmra.mxu1 %vm6359_vm5, %v6389_v40 }
 0x80c   :  { %7319 = vmatpush3.bf16.msra.mxu1 %v7474_v30  ;;  %7326 = vmatprep.mubr.msk.bf16.mxu1 %vm7656_vm7, %v7655_v32 }
 0x80d   :  { %7320 = vmatprep.subr.bf16.mxu1 %v7655_v32 }
 0x810   :  { %7321 = vmatpush3.bf16.msra.mxu1 %v7475_v5 }
 0x811   :  { %7322 = vmatprep.subr.bf16.mxu1 %v7655_v32 }
 0x814   :  { %7323 = vmatpush3.bf16.msra.mxu1 %v7476_v11 }
 0x815   :  { %7324 = vmatprep.subr.bf16.mxu1 %v7655_v32 }
 0x818   :  { %7325 = vmatpush3.bf16.msra.mxu1 %v7477_v31 }
 0x819   :  { %7330 = vmatprep.subr.bf16.mxu1 %v7655_v32 }
 0x81b   :  { %7327 = vmatmul.mubr.msk.bf16.vlgmr.msra.gmra.mxu1 %vm6359_vm5, %v6392_v48 }
 0x81c   :  { %7338 = vmatprep.mubr.msk.bf16.mxu1 %vm7656_vm7, %v7655_v32  ;;  %7331 = vmatpush3.bf16.msra.mxu1 %v7478_v2 }
 0x81d   :  { %7332 = vmatprep.subr.bf16.mxu1 %v7655_v32 }
 0x820   :  { %7333 = vmatpush3.bf16.msra.mxu1 %v7479_v25 }
 0x821   :  { %7334 = vmatprep.subr.bf16.mxu1 %v7655_v32 }
 0x824   :  { %7335 = vmatpush3.bf16.msra.mxu1 %v7480_v51 }
 0x825   :  { %7336 = vmatprep.subr.bf16.mxu1 %v7655_v32  ;;  %v6950_v32 = vld [vmem:[%s11506_s8] ss:$0 sm:$0xff]  ;;  %s7657_s8 = smov [#allocation16]  }
 0x826   :  { %s6806_s27 = sshll.u32 %s7657_s8, 4  ;;  %s6807_s27 = int_to_ptr.vmem [resolvable:$true] %s6806_s27 }
 0x827   :  { %s7612_s10 = scalar_lea.vmem %s6807_s27, 128  ;;  %p7617_p3 = scmp.lt.s32.totalorder %s6807_s27, %s6807_s27 }
 0x828   :  { %7337 = vmatpush3.bf16.msra.mxu1 %v7481_v4  ;;  %p7613_p2 = scmp.ne.s32.totalorder %s6807_s27, %s7612_s10  ;;  %p7618_p4 = scmp.lt.s32.totalorder %s7612_s10, %s7612_s10 }
 0x82a   :  { %p7619_p5 = por %p7618_p4, %p7617_p3 }
 0x82c   :  { %p7620_p6 = pnand %p7619_p5, %p7613_p2 }
 0x8ab   :  { %v6471_v46 = vpop.f32.mrf.mxu1 }
 0x8ad   :  { %v7292_v35 = vpop.f32.mrf.mxu1 }
 0x8af   :  { %v6474_v7 = vpop.f32.mrf.mxu1 }
 0x8b1   :  { %v7293_v24 = vpop.f32.mrf.mxu1 }
 0x8bb   :  { %v6538_v1 = vpop.f32.mrf.mxu1 }
 0x8bc   :  { %v6539_v52 = vadd.f32 %v6538_v1, %v6471_v46 }
 0x8bd   :  { %v7304_v36 = vpop.f32.mrf.mxu1 }
 0x8bf   :  { %v6541_v50 = vpop.f32.mrf.mxu1 }
 0x8c1   :  { %v7305_v58 = vpop.f32.mrf.mxu1 }
 0x8cb   :  { %v6614_v22 = vpop.f32.mrf.mxu1 }
 0x8cc   :  { %v6620_v20 = vadd.f32 %v6614_v22, %v6539_v52 }
 0x8cd   :  { %v7316_v14 = vpop.f32.mrf.mxu1 }
 0x8cf   :  { %v6617_v17 = vpop.f32.mrf.mxu1 }
 0x8d1   :  { %v7317_v27 = vpop.f32.mrf.mxu1 }
 0x8db   :  { %v6691_v9 = vpop.f32.mrf.mxu1 }
 0x8dc   :  { %v6697_v0 = vadd.f32 %v6691_v9, %v6620_v20 }
 0x8dd   :  { %v7328_v26 = vpop.f32.mrf.mxu1 }
 0x8de   :  { %v6705_v19 = vadd.f32 %v6950_v32, %v6697_v0 }
 0x8df   :  { %v6694_v44 = vpop.f32.mrf.mxu1 }
 0x8e0   :  { %v6706_v37 = vpack.c.bf16 %v6705_v19, %v6705_v19 }
 0x8e1   :  { %v7329_v16 = vpop.f32.mrf.mxu1 }
 0x8e2   :  { %7339 = vmatmul.mubr.msk.bf16.vlgmr.msra.gmra.mxu1 %vm6359_vm5, %v6706_v37 }
 0x9a2   :  { %v6783_v49 = vpop.f32.mrf.mxu1 }
 0x9a3   :  { %v6784_v38 = vadd.f32 %v6951_v56, %v6783_v49 }
 0x9a4   :  { %v7340_v59 = vpop.f32.mrf.mxu1 }
 0x9a5   :  { %6789 = vmax.xlane.f32.xlu1 %v6784_v38 }
 0x9a6   :  { %v6786_v47 = vpop.f32.mrf.mxu1 }
 0x9a8   :  { %v7341_v63 = vpop.f32.mrf.mxu1 }
 0xa2e   :  { %v6790_v33 = vpop.xlane.xlu1 %6789 }
 0xa2f   :  { %v6791_v18 = vsub.f32 %v6784_v38, %v6790_v33 }
 0xa31   :  { %v6792_v43 = vmul.f32 1.442695, %v6791_v18 }
 0xa33   :  { %7482 = vpow2.f32 %v6792_v43 }
 0xa40   :  { %v7483_v21 = vpop.eup %7482 }
 0xa41   :  { %6794 = vadd.xlane.f32.xlu0 %v7483_v21 }
 0xaca   :  { %v6795_v15 = vpop.xlane.xlu0 %6794 }
 0xacb   :  { %7484 = vlog2.f32 %v6795_v15 }
 0xad8   :  { %v7485_v23 = vpop.eup %7484 }
 0xad9   :  { %v6797_v12 = vmul.f32 0.6931472, %v7485_v23 }
 0xadb   :  { %v6798_v34 = vsub.f32 %v6791_v18, %v6797_v12 }
 0xadd   :  { %6799 = vst [vmem:[#allocation16] sm:$0xff] %v6798_v34 }
 0xade   :  { %7623 = shalt.err (!%p7620_p6)
}
 0xadf   :  { %6809 = dma.vmem_to_hbm [thread:$0]  %s6807_s27, 128, %s11509_s11, [#allocation7]  }
 0xae0   :  { %7640 = dma.done.wait [#allocation7], 128  }
 0xae1   :  { %7641 = vsyncadd [#allocation7], 4294967168 }
 0xae2   :  { %6813 = vsyncpa [#allocation6], 1 }
 0xae3   :  { %6814 = vsyncpa [#allocation9], 1 }
 0xae4   :  { %6815 = vsyncpa [#allocation12], 1 }
 0xae5   :  { %6816 = vsyncpa [#allocation15], 1 }
 0xae6   :  { %6817 = vsyncpa [#allocation7], 1 }

</bundles_post_ra>
